<compile_context>
chip_gen: v7x
topology: tpu7x:2x2x1
jax: 0.10.0
libtpu: 0.0.40
codegen_flags: <defaults>
</compile_context>

<pallas_src>
import functools

import jax
import jax.numpy as jnp
from jax.experimental import pallas as pl
from jax.experimental.pallas import tpu as pltpu


# ------------------------- in-kernel helpers -------------------------

def _conv3x3(x, taps, w_at, bias, H, W, relu):
    """3x3 conv (stride 1, padding 1) on a flattened (Cin, H*W) activation.

    Each of the 9 taps is a wrap-around lane roll of the activation (XLU),
    zeroed at the image borders with a precomputed 0/1 mask row (VPU), then
    contracted against its (Cout, Cin) weight matrix on the MXU.  The three
    unit pipelines overlap across taps.
    """
    Cin = x.shape[0]
    HW = H * W
    acc = None
    for k in range(9):
        dy, dx = divmod(k, 3)
        off = (dy - 1) * W + (dx - 1)
        xs = x if off == 0 else pltpu.roll(x, shift=(-off) % HW, axis=1)
        if k != 4:                                   # centre tap: mask is all-ones
            xs = xs * taps[k:k + 1, :]
        wk = w_at(k)                                 # (Cout, Cin)
        if Cin == 1:
            c = wk * xs                              # (Cout,1)*(1,HW) broadcast
        else:
            c = jnp.dot(wk, xs, preferred_element_type=jnp.float32)
        acc = c if acc is None else acc + c
    if bias is not None:
        acc = acc + bias                             # bias: (Cout, 1)
    if relu:
        acc = jnp.maximum(acc, 0.0)
    return acc


def _resblock_chain(x, taps, w1_ref, b1_ref, w2_ref, b2_ref, T, H, W):
    """T residual blocks of (Conv3x3 -> ReLU -> Conv3x3), VMEM resident."""
    for t in range(T):
        h = _conv3x3(x, taps, lambda k, t=t: w1_ref[t * 9 + k], b1_ref[t],
                     H, W, relu=True)
        h = _conv3x3(h, taps, lambda k, t=t: w2_ref[t * 9 + k], b2_ref[t],
                     H, W, relu=False)
        x = x + h
    return x


def _col_sum_broadcast(v, H, W):
    """Per-column sum of an (R, H*W) flattened image, replicated to all rows.

    Uses a roll-and-add butterfly on the lane axis; since all roll offsets are
    multiples of W, wrap-around stays within the same image column, so the
    result is simultaneously the reduction over H and its broadcast over H.
    """
    HW = H * W
    if H & (H - 1) == 0:                 # power-of-two H: log2(H) steps
        span = HW
        while span > W:
            span //= 2
            v = v + pltpu.roll(v, shift=span, axis=1)
        return v
    acc = v                              # generic fallback: H-1 rolls
    for h in range(1, H):
        acc = acc + pltpu.roll(v, shift=h * W, axis=1)
    return acc


# ------------------------- Pallas kernels -------------------------

def _x_init_kernel(img_ref, taps_ref, cx_ref, w1_ref, b1_ref, w2_ref, b2_ref,
                   out_ref, *, T, H, W):
    # one batch item per grid step; fuses CX conv + concat + T X-resblocks
    taps = taps_ref[...]
    img = img_ref[0]                                             # (2, HW)
    cov = _conv3x3(img, taps, lambda k: cx_ref[k], None, H, W, relu=False)
    x = jnp.concatenate([img, cov], axis=0)                      # (nc+2, HW)
    out_ref[0] = _resblock_chain(x, taps, w1_ref, b1_ref, w2_ref, b2_ref,
                                 T, H, W)


def _x_loop_kernel(pse_ref, xz_ref, taps_ref, w1_ref, b1_ref, w2_ref, b2_ref,
                   out_ref, *, T, H, W):
    # one batch item per grid step; fuses concat([pse, XZ]) + T X-resblocks
    taps = taps_ref[...]
    x = jnp.concatenate([pse_ref[0], xz_ref[0]], axis=0)         # (nc+2, HW)
    out_ref[0] = _resblock_chain(x, taps, w1_ref, b1_ref, w2_ref, b2_ref,
                                 T, H, W)


def _mask_stage_kernel(sig_ref, fai_ref, yr_ref, yi_ref, zr_ref, zi_ref,
                       taps_ref, cm_ref, w1_ref, b1_ref, w2_ref, b2_ref,
                       mask_ref, zr_out_ref, zi_out_ref, *, T, H, W):
    # full mask branch of one stage: statistics + column reduce/broadcast +
    # CM conv + concat + T M-resblocks + data-consistency update Z.
    taps = taps_ref[...]
    sig = sig_ref[0]
    fai = fai_ref[0]
    yr = yr_ref[0]                                               # (1, HW)
    yi = yi_ref[0]
    zr = zr_ref[0]
    zi = zi_ref[0]

    # n = sigma*|Y|^2 + 2*(Yr*Zr + Yi*Zi),  d = sigma*|Y|^2 + |Zi|^2
    y2 = yr * yr + yi * yi
    n = sig * y2 + 2.0 * (yr * zr + yi * zi)
    d = sig * y2 + (zr * zr + zi * zi)

    # column-wise sum over the H rows, already broadcast back over H
    nd = _col_sum_broadcast(jnp.concatenate([n, d], axis=0), H, W)
    im = nd[0:1, :] / nd[1:2, :]                                 # (1, HW)

    # CM conv (bias-free) + concat + T residual blocks (channels = nmc+1)
    cov = _conv3x3(im, taps, lambda k: cm_ref[k], None, H, W, relu=False)
    x = jnp.concatenate([im, cov], axis=0)                       # (nmc+1, HW)
    x = _resblock_chain(x, taps, w1_ref, b1_ref, w2_ref, b2_ref, T, H, W)

    m = x[0:1, :]                                                # (1, HW)
    mask_ref[0] = m

    # Z = (Zi + fai*mask*Y) / (1 + fai*mask), per real/imag component
    fm = fai * m
    inv = 1.0 / (1.0 + fm)
    zr_out_ref[0] = (zr + fm * yr) * inv
    zi_out_ref[0] = (zi + fm * yi) * inv


# ------------------------- pallas_call wrappers -------------------------

def _conv_taps(w):
    """(Cout, Cin, 3, 3) -> (9, Cout, Cin) tap matrices (tap = dy*3+dx)."""
    co, ci = w.shape[0], w.shape[1]
    return jnp.transpose(w, (2, 3, 0, 1)).reshape(9, co, ci).astype(jnp.float32)


def _stack_blocks(blocks):
    """Stack T residual blocks into (T*9,C,C)/(T,C,1) tensors for VMEM."""
    w1s = jnp.concatenate([_conv_taps(w1) for (w1, _, _, _) in blocks], axis=0)
    b1s = jnp.stack([b1.reshape(-1, 1).astype(jnp.float32)
                     for (_, b1, _, _) in blocks], axis=0)
    w2s = jnp.concatenate([_conv_taps(w2) for (_, _, w2, _) in blocks], axis=0)
    b2s = jnp.stack([b2.reshape(-1, 1).astype(jnp.float32)
                     for (_, _, _, b2) in blocks], axis=0)
    return w1s, b1s, w2s, b2s


def _tap_masks(H, W):
    """(9, H*W) 0/1 masks: tap k is valid where the rolled source pixel exists."""
    HW = H * W
    rows = jnp.arange(HW, dtype=jnp.int32) // W
    cols = jnp.arange(HW, dtype=jnp.int32) % W
    ms = []
    for dy in range(3):
        for dx in range(3):
            r = rows + (dy - 1)
            c = cols + (dx - 1)
            ok = (r >= 0) & (r < H) & (c >= 0) & (c < W)
            ms.append(ok.astype(jnp.float32))
    return jnp.stack(ms, axis=0)


def _full_spec(shape):
    return pl.BlockSpec(shape, lambda b: (0,) * len(shape))


def projnet_x_init(img_flat, cx_taps, xw, tapmask, H, W):
    B = img_flat.shape[0]
    HW = H * W
    nc = cx_taps.shape[1]
    C = nc + 2
    w1s, b1s, w2s, b2s = xw
    T = b1s.shape[0]
    kern = functools.partial(_x_init_kernel, T=T, H=H, W=W)
    return pl.pallas_call(
        kern,
        out_shape=jax.ShapeDtypeStruct((B, C, HW), jnp.float32),
        grid=(B,),
        in_specs=[
            pl.BlockSpec((1, 2, HW), lambda b: (b, 0, 0)),
            _full_spec(tapmask.shape),
            _full_spec(cx_taps.shape),
            _full_spec(w1s.shape), _full_spec(b1s.shape),
            _full_spec(w2s.shape), _full_spec(b2s.shape),
        ],
        out_specs=pl.BlockSpec((1, C, HW), lambda b: (b, 0, 0)),
        compiler_params=pltpu.CompilerParams(dimension_semantics=("parallel",)),
    )(img_flat, tapmask, cx_taps, w1s, b1s, w2s, b2s)


def projnet_x_loop(pse_flat, xz_flat, xw, tapmask, H, W):
    B = pse_flat.shape[0]
    HW = H * W
    nc = xz_flat.shape[1]
    C = nc + 2
    w1s, b1s, w2s, b2s = xw
    T = b1s.shape[0]
    kern = functools.partial(_x_loop_kernel, T=T, H=H, W=W)
    return pl.pallas_call(
        kern,
        out_shape=jax.ShapeDtypeStruct((B, C, HW), jnp.float32),
        grid=(B,),
        in_specs=[
            pl.BlockSpec((1, 2, HW), lambda b: (b, 0, 0)),
            pl.BlockSpec((1, nc, HW), lambda b: (b, 0, 0)),
            _full_spec(tapmask.shape),
            _full_spec(w1s.shape), _full_spec(b1s.shape),
            _full_spec(w2s.shape), _full_spec(b2s.shape),
        ],
        out_specs=pl.BlockSpec((1, C, HW), lambda b: (b, 0, 0)),
        compiler_params=pltpu.CompilerParams(dimension_semantics=("parallel",)),
    )(pse_flat, xz_flat, tapmask, w1s, b1s, w2s, b2s)


def mask_stage(sig, fai, yr, yi, zr, zi, cm_taps, mw, tapmask, H, W):
    B = yr.shape[0]
    HW = H * W
    w1s, b1s, w2s, b2s = mw
    T = b1s.shape[0]
    kern = functools.partial(_mask_stage_kernel, T=T, H=H, W=W)
    img_spec = pl.BlockSpec((1, 1, HW), lambda b: (b, 0, 0))
    smem = pl.BlockSpec(memory_space=pltpu.MemorySpace.SMEM)
    out_sds = jax.ShapeDtypeStruct((B, 1, HW), jnp.float32)
    return pl.pallas_call(
        kern,
        out_shape=(out_sds, out_sds, out_sds),
        grid=(B,),
        in_specs=[smem, smem,
                  img_spec, img_spec, img_spec, img_spec,
                  _full_spec(tapmask.shape),
                  _full_spec(cm_taps.shape),
                  _full_spec(w1s.shape), _full_spec(b1s.shape),
                  _full_spec(w2s.shape), _full_spec(b2s.shape)],
        out_specs=(img_spec, img_spec, img_spec),
        compiler_params=pltpu.CompilerParams(dimension_semantics=("parallel",)),
    )(sig, fai, yr, yi, zr, zi, tapmask, cm_taps, w1s, b1s, w2s, b2s)


# ------------------------- plain-JAX glue -------------------------

def fft2c(data):
    # fastmri.fft2c: centered orthonormal 2D FFT on (..., H, W, 2).
    x = data[..., 0] + 1j * data[..., 1]
    x = jnp.fft.ifftshift(x, axes=(-2, -1))
    x = jnp.fft.fft2(x, norm="ortho")
    x = jnp.fft.fftshift(x, axes=(-2, -1))
    return jnp.stack([jnp.real(x), jnp.imag(x)], axis=-1).astype(jnp.float32)


def ifft2c(data):
    x = data[..., 0] + 1j * data[..., 1]
    x = jnp.fft.ifftshift(x, axes=(-2, -1))
    x = jnp.fft.ifft2(x, norm="ortho")
    x = jnp.fft.fftshift(x, axes=(-2, -1))
    return jnp.stack([jnp.real(x), jnp.imag(x)], axis=-1).astype(jnp.float32)


def complex_to_chan_dim(x):
    b, c, h, w, two = x.shape
    return jnp.transpose(x, (0, 4, 1, 2, 3)).reshape(b, 2 * c, h, w)


def chan_complex_to_last_dim(x):
    b, c2, h, w = x.shape
    c = c2 // 2
    return jnp.transpose(x.reshape(b, 2, c, h, w), (0, 2, 3, 4, 1))


def init_params(key, S, T, num_channel, num_mask_channel, fai):
    # TODO(synk): the original `filter` tensor is undefined in the source file;
    # using a fixed deterministic 3x3 Gaussian as a stand-in.
    filt = jnp.array([[1., 2., 1.], [2., 4., 2.], [1., 2., 1.]], jnp.float32) / 16.0
    params = {
        "CX": jnp.broadcast_to(filt[None, None],
                               (num_channel, 2, 3, 3)).astype(jnp.float32),
        "CM": jnp.broadcast_to(filt[None, None],
                               (num_mask_channel, 1, 3, 3)).astype(jnp.float32),
        "sigma": jnp.ones((S,), jnp.float32) * 0.1,
        "fai2": jnp.ones((S,), jnp.float32) * fai,
    }

    def conv_wb(k, cin, cout):
        k1, k2 = jax.random.split(k)
        w = 0.05 * jax.random.normal(k1, (cout, cin, 3, 3), jnp.float32)
        b = 0.01 * jax.random.normal(k2, (cout,), jnp.float32)
        return w, b

    def resblocks(k, ch, n_blocks):
        blocks = []
        for _ in range(n_blocks):
            k, ka, kb = jax.random.split(k, 3)
            w1, b1 = conv_wb(ka, ch, ch)
            w2, b2 = conv_wb(kb, ch, ch)
            blocks.append((w1, b1, w2, b2))
        return blocks

    kx, km = jax.random.split(key)
    # only proxNet_Xall[0] / proxNet_Mall[0] are used in the reference forward
    params["Xall0"] = resblocks(kx, num_channel + 2, T)
    params["Mall0"] = resblocks(km, num_mask_channel + 1, T)
    return params


def mxnet_forward(Y, params, S):
    # Y: (B, 1, H, W, 2) complex k-space data
    B, _, H, W, _ = Y.shape
    HW = H * W

    tapmask = _tap_masks(H, W)                                     # (9, HW)
    cx_taps = _conv_taps(params["CX"])
    cm_taps = _conv_taps(params["CM"])
    xw = _stack_blocks(params["Xall0"])
    mw = _stack_blocks(params["Mall0"])

    sig = jnp.reshape(params["sigma"][-1], (1,)).astype(jnp.float32)
    fai = jnp.reshape(params["fai2"][-1], (1,)).astype(jnp.float32)

    yr = Y[..., 0].reshape(B, 1, HW).astype(jnp.float32)
    yi = Y[..., 1].reshape(B, 1, HW).astype(jnp.float32)

    ListX, ListZ = [], []

    image_data = ifft2c(Y)                                         # (B,1,H,W,2)
    img_flat = complex_to_chan_dim(image_data).reshape(B, 2, HW)
    ini = projnet_x_init(img_flat, cx_taps, xw, tapmask, H, W)     # (B, nc+2, HW)
    XZ = ini[:, 2:, :]                                             # stays flat
    X = chan_complex_to_last_dim(ini[:, :2, :].reshape(B, 2, H, W))

    mask = None
    for _ in range(S):
        Zi = fft2c(X)                                              # (B,1,H,W,2)
        zr = Zi[..., 0].reshape(B, 1, HW)
        zi = Zi[..., 1].reshape(B, 1, HW)
        mask_f, zr_o, zi_o = mask_stage(sig, fai, yr, yi, zr, zi,
                                        cm_taps, mw, tapmask, H, W)
        mask = mask_f.reshape(B, 1, H, W)
        Z = jnp.stack([zr_o.reshape(B, 1, H, W),
                       zi_o.reshape(B, 1, H, W)], axis=-1)         # (B,1,H,W,2)
        pse_flat = complex_to_chan_dim(ifft2c(Z)).reshape(B, 2, HW)
        out = projnet_x_loop(pse_flat, XZ, xw, tapmask, H, W)      # (B, nc+2, HW)
        X = chan_complex_to_last_dim(out[:, :2, :].reshape(B, 2, H, W))
        XZ = out[:, 2:, :]
        ListX.append(X)
        ListZ.append(Z)

    return ListX, ListZ, mask


if __name__ == "__main__":
    S, T = 2, 2
    num_channel, num_mask_channel = 4, 3
    B, H, W = 2, 16, 16
    fai = 0.5

    key = jax.random.PRNGKey(0)
    kp, ky = jax.random.split(key)
    params = init_params(kp, S, T, num_channel, num_mask_channel, fai)
    Y = jax.random.normal(ky, (B, 1, H, W, 2), jnp.float32)

    fwd = jax.jit(functools.partial(mxnet_forward, S=S))
    ListX, ListZ, mask = fwd(Y, params)
    jax.block_until_ready((ListX, ListZ, mask))

    assert len(ListX) == S and len(ListZ) == S
    assert ListX[0].shape == (B, 1, H, W, 2)
    assert ListZ[0].shape == (B, 1, H, W, 2)
    assert mask.shape == (B, 1, H, W)
    print("KERNEL_OK")
</pallas_src>

<mosaic_0001>
module attributes {stable_mosaic.version = 11 : i64} {
  func.func @_x_init_kernel(%arg0: i32, %arg1: memref<1x2x256xf32, #tpu.memory_space<vmem>>, %arg2: memref<9x256xf32, #tpu.memory_space<vmem>>, %arg3: memref<9x4x2xf32, #tpu.memory_space<vmem>>, %arg4: memref<18x6x6xf32, #tpu.memory_space<vmem>>, %arg5: memref<2x6x1xf32, #tpu.memory_space<vmem>>, %arg6: memref<18x6x6xf32, #tpu.memory_space<vmem>>, %arg7: memref<2x6x1xf32, #tpu.memory_space<vmem>>, %arg8: memref<1x6x256xf32, #tpu.memory_space<vmem>>) attributes {dimension_semantics = [#tpu.dimension_semantics<parallel>], iteration_bounds = array<i64: 2>, scalar_prefetch = 0 : i64, scratch_operands = 0 : i64, tpu.core_type = #tpu.core_type<tc>, window_params = [{transform_indices = @transform_0, window_bounds = array<i64: 1, 2, 256>}, {pipeline_mode = #tpu.pipeline_mode<synchronous>, transform_indices = @transform_1, window_bounds = array<i64: 9, 256>}, {pipeline_mode = #tpu.pipeline_mode<synchronous>, transform_indices = @transform_2, window_bounds = array<i64: 9, 4, 2>}, {pipeline_mode = #tpu.pipeline_mode<synchronous>, transform_indices = @transform_3, window_bounds = array<i64: 18, 6, 6>}, {pipeline_mode = #tpu.pipeline_mode<synchronous>, transform_indices = @transform_4, window_bounds = array<i64: 2, 6, 1>}, {pipeline_mode = #tpu.pipeline_mode<synchronous>, transform_indices = @transform_5, window_bounds = array<i64: 18, 6, 6>}, {pipeline_mode = #tpu.pipeline_mode<synchronous>, transform_indices = @transform_6, window_bounds = array<i64: 2, 6, 1>}, {transform_indices = @transform_7, window_bounds = array<i64: 1, 6, 256>}]} {
    %c0 = arith.constant 0 : index
    %c0_0 = arith.constant 0 : index
    %0 = vector.load %arg2[%c0, %c0_0] : memref<9x256xf32, #tpu.memory_space<vmem>>, vector<9x256xf32>
    %c0_1 = arith.constant 0 : index
    %c0_2 = arith.constant 0 : index
    %c0_3 = arith.constant 0 : index
    %1 = vector.load %arg1[%c0_1, %c0_2, %c0_3] : memref<1x2x256xf32, #tpu.memory_space<vmem>>, vector<1x2x256xf32>
    %2 = vector.shape_cast %1 : vector<1x2x256xf32> to vector<2x256xf32>
    %c17_i32 = arith.constant 17 : i32
    %3 = tpu.dynamic_rotate %2 by %c17_i32 dim 1 : vector<2x256xf32>, i32 -> vector<2x256xf32>
    %4 = vector.extract_strided_slice %0 {offsets = [0, 0], sizes = [1, 256], strides = [1, 1]} : vector<9x256xf32> to vector<1x256xf32>
    %5 = vector.broadcast %4 : vector<1x256xf32> to vector<2x256xf32>
    %6 = arith.mulf %3, %5 : vector<2x256xf32>
    %c0_4 = arith.constant 0 : index
    %c0_5 = arith.constant 0 : index
    %c0_6 = arith.constant 0 : index
    %7 = vector.load %arg3[%c0_4, %c0_5, %c0_6] : memref<9x4x2xf32, #tpu.memory_space<vmem>>, vector<1x4x2xf32>
    %8 = vector.shape_cast %7 : vector<1x4x2xf32> to vector<4x2xf32>
    %cst = arith.constant dense<0.000000e+00> : vector<4x256xf32>
    %9 = tpu.matmul %8, %6, %cst {dimension_numbers = #tpu.dot_dimension_numbers<[1], [0], [0], [1], [0, 0, 1, 1], [], []>} : vector<4x2xf32>, vector<2x256xf32>, vector<4x256xf32> -> vector<4x256xf32>
    %c16_i32 = arith.constant 16 : i32
    %10 = tpu.dynamic_rotate %2 by %c16_i32 dim 1 : vector<2x256xf32>, i32 -> vector<2x256xf32>
    %11 = vector.extract_strided_slice %0 {offsets = [1, 0], sizes = [1, 256], strides = [1, 1]} : vector<9x256xf32> to vector<1x256xf32>
    %12 = vector.broadcast %11 : vector<1x256xf32> to vector<2x256xf32>
    %13 = arith.mulf %10, %12 : vector<2x256xf32>
    %c1 = arith.constant 1 : index
    %c0_7 = arith.constant 0 : index
    %c0_8 = arith.constant 0 : index
    %14 = vector.load %arg3[%c1, %c0_7, %c0_8] : memref<9x4x2xf32, #tpu.memory_space<vmem>>, vector<1x4x2xf32>
    %15 = vector.shape_cast %14 : vector<1x4x2xf32> to vector<4x2xf32>
    %cst_9 = arith.constant dense<0.000000e+00> : vector<4x256xf32>
    %16 = tpu.matmul %15, %13, %cst_9 {dimension_numbers = #tpu.dot_dimension_numbers<[1], [0], [0], [1], [0, 0, 1, 1], [], []>} : vector<4x2xf32>, vector<2x256xf32>, vector<4x256xf32> -> vector<4x256xf32>
    %17 = arith.addf %9, %16 : vector<4x256xf32>
    %c15_i32 = arith.constant 15 : i32
    %18 = tpu.dynamic_rotate %2 by %c15_i32 dim 1 : vector<2x256xf32>, i32 -> vector<2x256xf32>
    %19 = vector.extract_strided_slice %0 {offsets = [2, 0], sizes = [1, 256], strides = [1, 1]} : vector<9x256xf32> to vector<1x256xf32>
    %20 = vector.broadcast %19 : vector<1x256xf32> to vector<2x256xf32>
    %21 = arith.mulf %18, %20 : vector<2x256xf32>
    %c2 = arith.constant 2 : index
    %c0_10 = arith.constant 0 : index
    %c0_11 = arith.constant 0 : index
    %22 = vector.load %arg3[%c2, %c0_10, %c0_11] : memref<9x4x2xf32, #tpu.memory_space<vmem>>, vector<1x4x2xf32>
    %23 = vector.shape_cast %22 : vector<1x4x2xf32> to vector<4x2xf32>
    %cst_12 = arith.constant dense<0.000000e+00> : vector<4x256xf32>
    %24 = tpu.matmul %23, %21, %cst_12 {dimension_numbers = #tpu.dot_dimension_numbers<[1], [0], [0], [1], [0, 0, 1, 1], [], []>} : vector<4x2xf32>, vector<2x256xf32>, vector<4x256xf32> -> vector<4x256xf32>
    %25 = arith.addf %17, %24 : vector<4x256xf32>
    %c1_i32 = arith.constant 1 : i32
    %26 = tpu.dynamic_rotate %2 by %c1_i32 dim 1 : vector<2x256xf32>, i32 -> vector<2x256xf32>
    %27 = vector.extract_strided_slice %0 {offsets = [3, 0], sizes = [1, 256], strides = [1, 1]} : vector<9x256xf32> to vector<1x256xf32>
    %28 = vector.broadcast %27 : vector<1x256xf32> to vector<2x256xf32>
    %29 = arith.mulf %26, %28 : vector<2x256xf32>
    %c3 = arith.constant 3 : index
    %c0_13 = arith.constant 0 : index
    %c0_14 = arith.constant 0 : index
    %30 = vector.load %arg3[%c3, %c0_13, %c0_14] : memref<9x4x2xf32, #tpu.memory_space<vmem>>, vector<1x4x2xf32>
    %31 = vector.shape_cast %30 : vector<1x4x2xf32> to vector<4x2xf32>
    %cst_15 = arith.constant dense<0.000000e+00> : vector<4x256xf32>
    %32 = tpu.matmul %31, %29, %cst_15 {dimension_numbers = #tpu.dot_dimension_numbers<[1], [0], [0], [1], [0, 0, 1, 1], [], []>} : vector<4x2xf32>, vector<2x256xf32>, vector<4x256xf32> -> vector<4x256xf32>
    %33 = arith.addf %25, %32 : vector<4x256xf32>
    %c4 = arith.constant 4 : index
    %c0_16 = arith.constant 0 : index
    %c0_17 = arith.constant 0 : index
    %34 = vector.load %arg3[%c4, %c0_16, %c0_17] : memref<9x4x2xf32, #tpu.memory_space<vmem>>, vector<1x4x2xf32>
    %35 = vector.shape_cast %34 : vector<1x4x2xf32> to vector<4x2xf32>
    %cst_18 = arith.constant dense<0.000000e+00> : vector<4x256xf32>
    %36 = tpu.matmul %35, %2, %cst_18 {dimension_numbers = #tpu.dot_dimension_numbers<[1], [0], [0], [1], [0, 0, 1, 1], [], []>} : vector<4x2xf32>, vector<2x256xf32>, vector<4x256xf32> -> vector<4x256xf32>
    %37 = arith.addf %33, %36 : vector<4x256xf32>
    %c255_i32 = arith.constant 255 : i32
    %38 = tpu.dynamic_rotate %2 by %c255_i32 dim 1 : vector<2x256xf32>, i32 -> vector<2x256xf32>
    %39 = vector.extract_strided_slice %0 {offsets = [5, 0], sizes = [1, 256], strides = [1, 1]} : vector<9x256xf32> to vector<1x256xf32>
    %40 = vector.broadcast %39 : vector<1x256xf32> to vector<2x256xf32>
    %41 = arith.mulf %38, %40 : vector<2x256xf32>
    %c5 = arith.constant 5 : index
    %c0_19 = arith.constant 0 : index
    %c0_20 = arith.constant 0 : index
    %42 = vector.load %arg3[%c5, %c0_19, %c0_20] : memref<9x4x2xf32, #tpu.memory_space<vmem>>, vector<1x4x2xf32>
    %43 = vector.shape_cast %42 : vector<1x4x2xf32> to vector<4x2xf32>
    %cst_21 = arith.constant dense<0.000000e+00> : vector<4x256xf32>
    %44 = tpu.matmul %43, %41, %cst_21 {dimension_numbers = #tpu.dot_dimension_numbers<[1], [0], [0], [1], [0, 0, 1, 1], [], []>} : vector<4x2xf32>, vector<2x256xf32>, vector<4x256xf32> -> vector<4x256xf32>
    %45 = arith.addf %37, %44 : vector<4x256xf32>
    %c241_i32 = arith.constant 241 : i32
    %46 = tpu.dynamic_rotate %2 by %c241_i32 dim 1 : vector<2x256xf32>, i32 -> vector<2x256xf32>
    %47 = vector.extract_strided_slice %0 {offsets = [6, 0], sizes = [1, 256], strides = [1, 1]} : vector<9x256xf32> to vector<1x256xf32>
    %48 = vector.broadcast %47 : vector<1x256xf32> to vector<2x256xf32>
    %49 = arith.mulf %46, %48 : vector<2x256xf32>
    %c6 = arith.constant 6 : index
    %c0_22 = arith.constant 0 : index
    %c0_23 = arith.constant 0 : index
    %50 = vector.load %arg3[%c6, %c0_22, %c0_23] : memref<9x4x2xf32, #tpu.memory_space<vmem>>, vector<1x4x2xf32>
    %51 = vector.shape_cast %50 : vector<1x4x2xf32> to vector<4x2xf32>
    %cst_24 = arith.constant dense<0.000000e+00> : vector<4x256xf32>
    %52 = tpu.matmul %51, %49, %cst_24 {dimension_numbers = #tpu.dot_dimension_numbers<[1], [0], [0], [1], [0, 0, 1, 1], [], []>} : vector<4x2xf32>, vector<2x256xf32>, vector<4x256xf32> -> vector<4x256xf32>
    %53 = arith.addf %45, %52 : vector<4x256xf32>
    %c240_i32 = arith.constant 240 : i32
    %54 = tpu.dynamic_rotate %2 by %c240_i32 dim 1 : vector<2x256xf32>, i32 -> vector<2x256xf32>
    %55 = vector.extract_strided_slice %0 {offsets = [7, 0], sizes = [1, 256], strides = [1, 1]} : vector<9x256xf32> to vector<1x256xf32>
    %56 = vector.broadcast %55 : vector<1x256xf32> to vector<2x256xf32>
    %57 = arith.mulf %54, %56 : vector<2x256xf32>
    %c7 = arith.constant 7 : index
    %c0_25 = arith.constant 0 : index
    %c0_26 = arith.constant 0 : index
    %58 = vector.load %arg3[%c7, %c0_25, %c0_26] : memref<9x4x2xf32, #tpu.memory_space<vmem>>, vector<1x4x2xf32>
    %59 = vector.shape_cast %58 : vector<1x4x2xf32> to vector<4x2xf32>
    %cst_27 = arith.constant dense<0.000000e+00> : vector<4x256xf32>
    %60 = tpu.matmul %59, %57, %cst_27 {dimension_numbers = #tpu.dot_dimension_numbers<[1], [0], [0], [1], [0, 0, 1, 1], [], []>} : vector<4x2xf32>, vector<2x256xf32>, vector<4x256xf32> -> vector<4x256xf32>
    %61 = arith.addf %53, %60 : vector<4x256xf32>
    %c239_i32 = arith.constant 239 : i32
    %62 = tpu.dynamic_rotate %2 by %c239_i32 dim 1 : vector<2x256xf32>, i32 -> vector<2x256xf32>
    %63 = vector.extract_strided_slice %0 {offsets = [8, 0], sizes = [1, 256], strides = [1, 1]} : vector<9x256xf32> to vector<1x256xf32>
    %64 = vector.broadcast %63 : vector<1x256xf32> to vector<2x256xf32>
    %65 = arith.mulf %62, %64 : vector<2x256xf32>
    %c8 = arith.constant 8 : index
    %c0_28 = arith.constant 0 : index
    %c0_29 = arith.constant 0 : index
    %66 = vector.load %arg3[%c8, %c0_28, %c0_29] : memref<9x4x2xf32, #tpu.memory_space<vmem>>, vector<1x4x2xf32>
    %67 = vector.shape_cast %66 : vector<1x4x2xf32> to vector<4x2xf32>
    %cst_30 = arith.constant dense<0.000000e+00> : vector<4x256xf32>
    %68 = tpu.matmul %67, %65, %cst_30 {dimension_numbers = #tpu.dot_dimension_numbers<[1], [0], [0], [1], [0, 0, 1, 1], [], []>} : vector<4x2xf32>, vector<2x256xf32>, vector<4x256xf32> -> vector<4x256xf32>
    %69 = arith.addf %61, %68 : vector<4x256xf32>
    %70 = tpu.concatenate %2, %69 in 0 : vector<2x256xf32>, vector<4x256xf32> -> vector<6x256xf32>
    %c0_31 = arith.constant 0 : index
    %c0_32 = arith.constant 0 : index
    %c0_33 = arith.constant 0 : index
    %71 = vector.load %arg5[%c0_31, %c0_32, %c0_33] : memref<2x6x1xf32, #tpu.memory_space<vmem>>, vector<1x6x1xf32>
    %72 = vector.shape_cast %71 : vector<1x6x1xf32> to vector<6x1xf32>
    %c17_i32_34 = arith.constant 17 : i32
    %73 = tpu.dynamic_rotate %70 by %c17_i32_34 dim 1 : vector<6x256xf32>, i32 -> vector<6x256xf32>
    %74 = vector.extract_strided_slice %0 {offsets = [0, 0], sizes = [1, 256], strides = [1, 1]} : vector<9x256xf32> to vector<1x256xf32>
    %75 = vector.broadcast %74 : vector<1x256xf32> to vector<6x256xf32>
    %76 = arith.mulf %73, %75 : vector<6x256xf32>
    %c0_35 = arith.constant 0 : index
    %c0_36 = arith.constant 0 : index
    %c0_37 = arith.constant 0 : index
    %77 = vector.load %arg4[%c0_35, %c0_36, %c0_37] : memref<18x6x6xf32, #tpu.memory_space<vmem>>, vector<1x6x6xf32>
    %78 = vector.shape_cast %77 : vector<1x6x6xf32> to vector<6x6xf32>
    %cst_38 = arith.constant dense<0.000000e+00> : vector<6x256xf32>
    %79 = tpu.matmul %78, %76, %cst_38 {dimension_numbers = #tpu.dot_dimension_numbers<[1], [0], [0], [1], [0, 0, 1, 1], [], []>} : vector<6x6xf32>, vector<6x256xf32>, vector<6x256xf32> -> vector<6x256xf32>
    %c16_i32_39 = arith.constant 16 : i32
    %80 = tpu.dynamic_rotate %70 by %c16_i32_39 dim 1 : vector<6x256xf32>, i32 -> vector<6x256xf32>
    %81 = vector.extract_strided_slice %0 {offsets = [1, 0], sizes = [1, 256], strides = [1, 1]} : vector<9x256xf32> to vector<1x256xf32>
    %82 = vector.broadcast %81 : vector<1x256xf32> to vector<6x256xf32>
    %83 = arith.mulf %80, %82 : vector<6x256xf32>
    %c1_40 = arith.constant 1 : index
    %c0_41 = arith.constant 0 : index
    %c0_42 = arith.constant 0 : index
    %84 = vector.load %arg4[%c1_40, %c0_41, %c0_42] : memref<18x6x6xf32, #tpu.memory_space<vmem>>, vector<1x6x6xf32>
    %85 = vector.shape_cast %84 : vector<1x6x6xf32> to vector<6x6xf32>
    %cst_43 = arith.constant dense<0.000000e+00> : vector<6x256xf32>
    %86 = tpu.matmul %85, %83, %cst_43 {dimension_numbers = #tpu.dot_dimension_numbers<[1], [0], [0], [1], [0, 0, 1, 1], [], []>} : vector<6x6xf32>, vector<6x256xf32>, vector<6x256xf32> -> vector<6x256xf32>
    %87 = arith.addf %79, %86 : vector<6x256xf32>
    %c15_i32_44 = arith.constant 15 : i32
    %88 = tpu.dynamic_rotate %70 by %c15_i32_44 dim 1 : vector<6x256xf32>, i32 -> vector<6x256xf32>
    %89 = vector.extract_strided_slice %0 {offsets = [2, 0], sizes = [1, 256], strides = [1, 1]} : vector<9x256xf32> to vector<1x256xf32>
    %90 = vector.broadcast %89 : vector<1x256xf32> to vector<6x256xf32>
    %91 = arith.mulf %88, %90 : vector<6x256xf32>
    %c2_45 = arith.constant 2 : index
    %c0_46 = arith.constant 0 : index
    %c0_47 = arith.constant 0 : index
    %92 = vector.load %arg4[%c2_45, %c0_46, %c0_47] : memref<18x6x6xf32, #tpu.memory_space<vmem>>, vector<1x6x6xf32>
    %93 = vector.shape_cast %92 : vector<1x6x6xf32> to vector<6x6xf32>
    %cst_48 = arith.constant dense<0.000000e+00> : vector<6x256xf32>
    %94 = tpu.matmul %93, %91, %cst_48 {dimension_numbers = #tpu.dot_dimension_numbers<[1], [0], [0], [1], [0, 0, 1, 1], [], []>} : vector<6x6xf32>, vector<6x256xf32>, vector<6x256xf32> -> vector<6x256xf32>
    %95 = arith.addf %87, %94 : vector<6x256xf32>
    %c1_i32_49 = arith.constant 1 : i32
    %96 = tpu.dynamic_rotate %70 by %c1_i32_49 dim 1 : vector<6x256xf32>, i32 -> vector<6x256xf32>
    %97 = vector.extract_strided_slice %0 {offsets = [3, 0], sizes = [1, 256], strides = [1, 1]} : vector<9x256xf32> to vector<1x256xf32>
    %98 = vector.broadcast %97 : vector<1x256xf32> to vector<6x256xf32>
    %99 = arith.mulf %96, %98 : vector<6x256xf32>
    %c3_50 = arith.constant 3 : index
    %c0_51 = arith.constant 0 : index
    %c0_52 = arith.constant 0 : index
    %100 = vector.load %arg4[%c3_50, %c0_51, %c0_52] : memref<18x6x6xf32, #tpu.memory_space<vmem>>, vector<1x6x6xf32>
    %101 = vector.shape_cast %100 : vector<1x6x6xf32> to vector<6x6xf32>
    %cst_53 = arith.constant dense<0.000000e+00> : vector<6x256xf32>
    %102 = tpu.matmul %101, %99, %cst_53 {dimension_numbers = #tpu.dot_dimension_numbers<[1], [0], [0], [1], [0, 0, 1, 1], [], []>} : vector<6x6xf32>, vector<6x256xf32>, vector<6x256xf32> -> vector<6x256xf32>
    %103 = arith.addf %95, %102 : vector<6x256xf32>
    %c4_54 = arith.constant 4 : index
    %c0_55 = arith.constant 0 : index
    %c0_56 = arith.constant 0 : index
    %104 = vector.load %arg4[%c4_54, %c0_55, %c0_56] : memref<18x6x6xf32, #tpu.memory_space<vmem>>, vector<1x6x6xf32>
    %105 = vector.shape_cast %104 : vector<1x6x6xf32> to vector<6x6xf32>
    %cst_57 = arith.constant dense<0.000000e+00> : vector<6x256xf32>
    %106 = tpu.matmul %105, %70, %cst_57 {dimension_numbers = #tpu.dot_dimension_numbers<[1], [0], [0], [1], [0, 0, 1, 1], [], []>} : vector<6x6xf32>, vector<6x256xf32>, vector<6x256xf32> -> vector<6x256xf32>
    %107 = arith.addf %103, %106 : vector<6x256xf32>
    %c255_i32_58 = arith.constant 255 : i32
    %108 = tpu.dynamic_rotate %70 by %c255_i32_58 dim 1 : vector<6x256xf32>, i32 -> vector<6x256xf32>
    %109 = vector.extract_strided_slice %0 {offsets = [5, 0], sizes = [1, 256], strides = [1, 1]} : vector<9x256xf32> to vector<1x256xf32>
    %110 = vector.broadcast %109 : vector<1x256xf32> to vector<6x256xf32>
    %111 = arith.mulf %108, %110 : vector<6x256xf32>
    %c5_59 = arith.constant 5 : index
    %c0_60 = arith.constant 0 : index
    %c0_61 = arith.constant 0 : index
    %112 = vector.load %arg4[%c5_59, %c0_60, %c0_61] : memref<18x6x6xf32, #tpu.memory_space<vmem>>, vector<1x6x6xf32>
    %113 = vector.shape_cast %112 : vector<1x6x6xf32> to vector<6x6xf32>
    %cst_62 = arith.constant dense<0.000000e+00> : vector<6x256xf32>
    %114 = tpu.matmul %113, %111, %cst_62 {dimension_numbers = #tpu.dot_dimension_numbers<[1], [0], [0], [1], [0, 0, 1, 1], [], []>} : vector<6x6xf32>, vector<6x256xf32>, vector<6x256xf32> -> vector<6x256xf32>
    %115 = arith.addf %107, %114 : vector<6x256xf32>
    %c241_i32_63 = arith.constant 241 : i32
    %116 = tpu.dynamic_rotate %70 by %c241_i32_63 dim 1 : vector<6x256xf32>, i32 -> vector<6x256xf32>
    %117 = vector.extract_strided_slice %0 {offsets = [6, 0], sizes = [1, 256], strides = [1, 1]} : vector<9x256xf32> to vector<1x256xf32>
    %118 = vector.broadcast %117 : vector<1x256xf32> to vector<6x256xf32>
    %119 = arith.mulf %116, %118 : vector<6x256xf32>
    %c6_64 = arith.constant 6 : index
    %c0_65 = arith.constant 0 : index
    %c0_66 = arith.constant 0 : index
    %120 = vector.load %arg4[%c6_64, %c0_65, %c0_66] : memref<18x6x6xf32, #tpu.memory_space<vmem>>, vector<1x6x6xf32>
    %121 = vector.shape_cast %120 : vector<1x6x6xf32> to vector<6x6xf32>
    %cst_67 = arith.constant dense<0.000000e+00> : vector<6x256xf32>
    %122 = tpu.matmul %121, %119, %cst_67 {dimension_numbers = #tpu.dot_dimension_numbers<[1], [0], [0], [1], [0, 0, 1, 1], [], []>} : vector<6x6xf32>, vector<6x256xf32>, vector<6x256xf32> -> vector<6x256xf32>
    %123 = arith.addf %115, %122 : vector<6x256xf32>
    %c240_i32_68 = arith.constant 240 : i32
    %124 = tpu.dynamic_rotate %70 by %c240_i32_68 dim 1 : vector<6x256xf32>, i32 -> vector<6x256xf32>
    %125 = vector.extract_strided_slice %0 {offsets = [7, 0], sizes = [1, 256], strides = [1, 1]} : vector<9x256xf32> to vector<1x256xf32>
    %126 = vector.broadcast %125 : vector<1x256xf32> to vector<6x256xf32>
    %127 = arith.mulf %124, %126 : vector<6x256xf32>
    %c7_69 = arith.constant 7 : index
    %c0_70 = arith.constant 0 : index
    %c0_71 = arith.constant 0 : index
    %128 = vector.load %arg4[%c7_69, %c0_70, %c0_71] : memref<18x6x6xf32, #tpu.memory_space<vmem>>, vector<1x6x6xf32>
    %129 = vector.shape_cast %128 : vector<1x6x6xf32> to vector<6x6xf32>
    %cst_72 = arith.constant dense<0.000000e+00> : vector<6x256xf32>
    %130 = tpu.matmul %129, %127, %cst_72 {dimension_numbers = #tpu.dot_dimension_numbers<[1], [0], [0], [1], [0, 0, 1, 1], [], []>} : vector<6x6xf32>, vector<6x256xf32>, vector<6x256xf32> -> vector<6x256xf32>
    %131 = arith.addf %123, %130 : vector<6x256xf32>
    %c239_i32_73 = arith.constant 239 : i32
    %132 = tpu.dynamic_rotate %70 by %c239_i32_73 dim 1 : vector<6x256xf32>, i32 -> vector<6x256xf32>
    %133 = vector.extract_strided_slice %0 {offsets = [8, 0], sizes = [1, 256], strides = [1, 1]} : vector<9x256xf32> to vector<1x256xf32>
    %134 = vector.broadcast %133 : vector<1x256xf32> to vector<6x256xf32>
    %135 = arith.mulf %132, %134 : vector<6x256xf32>
    %c8_74 = arith.constant 8 : index
    %c0_75 = arith.constant 0 : index
    %c0_76 = arith.constant 0 : index
    %136 = vector.load %arg4[%c8_74, %c0_75, %c0_76] : memref<18x6x6xf32, #tpu.memory_space<vmem>>, vector<1x6x6xf32>
    %137 = vector.shape_cast %136 : vector<1x6x6xf32> to vector<6x6xf32>
    %cst_77 = arith.constant dense<0.000000e+00> : vector<6x256xf32>
    %138 = tpu.matmul %137, %135, %cst_77 {dimension_numbers = #tpu.dot_dimension_numbers<[1], [0], [0], [1], [0, 0, 1, 1], [], []>} : vector<6x6xf32>, vector<6x256xf32>, vector<6x256xf32> -> vector<6x256xf32>
    %139 = arith.addf %131, %138 : vector<6x256xf32>
    %140 = vector.broadcast %72 : vector<6x1xf32> to vector<6x256xf32>
    %141 = arith.addf %139, %140 : vector<6x256xf32>
    %cst_78 = arith.constant 0.000000e+00 : f32
    %142 = vector.broadcast %cst_78 : f32 to vector<6x256xf32>
    %143 = arith.maximumf %141, %142 : vector<6x256xf32>
    %c0_79 = arith.constant 0 : index
    %c0_80 = arith.constant 0 : index
    %c0_81 = arith.constant 0 : index
    %144 = vector.load %arg7[%c0_79, %c0_80, %c0_81] : memref<2x6x1xf32, #tpu.memory_space<vmem>>, vector<1x6x1xf32>
    %145 = vector.shape_cast %144 : vector<1x6x1xf32> to vector<6x1xf32>
    %c17_i32_82 = arith.constant 17 : i32
    %146 = tpu.dynamic_rotate %143 by %c17_i32_82 dim 1 : vector<6x256xf32>, i32 -> vector<6x256xf32>
    %147 = vector.extract_strided_slice %0 {offsets = [0, 0], sizes = [1, 256], strides = [1, 1]} : vector<9x256xf32> to vector<1x256xf32>
    %148 = vector.broadcast %147 : vector<1x256xf32> to vector<6x256xf32>
    %149 = arith.mulf %146, %148 : vector<6x256xf32>
    %c0_83 = arith.constant 0 : index
    %c0_84 = arith.constant 0 : index
    %c0_85 = arith.constant 0 : index
    %150 = vector.load %arg6[%c0_83, %c0_84, %c0_85] : memref<18x6x6xf32, #tpu.memory_space<vmem>>, vector<1x6x6xf32>
    %151 = vector.shape_cast %150 : vector<1x6x6xf32> to vector<6x6xf32>
    %cst_86 = arith.constant dense<0.000000e+00> : vector<6x256xf32>
    %152 = tpu.matmul %151, %149, %cst_86 {dimension_numbers = #tpu.dot_dimension_numbers<[1], [0], [0], [1], [0, 0, 1, 1], [], []>} : vector<6x6xf32>, vector<6x256xf32>, vector<6x256xf32> -> vector<6x256xf32>
    %c16_i32_87 = arith.constant 16 : i32
    %153 = tpu.dynamic_rotate %143 by %c16_i32_87 dim 1 : vector<6x256xf32>, i32 -> vector<6x256xf32>
    %154 = vector.extract_strided_slice %0 {offsets = [1, 0], sizes = [1, 256], strides = [1, 1]} : vector<9x256xf32> to vector<1x256xf32>
    %155 = vector.broadcast %154 : vector<1x256xf32> to vector<6x256xf32>
    %156 = arith.mulf %153, %155 : vector<6x256xf32>
    %c1_88 = arith.constant 1 : index
    %c0_89 = arith.constant 0 : index
    %c0_90 = arith.constant 0 : index
    %157 = vector.load %arg6[%c1_88, %c0_89, %c0_90] : memref<18x6x6xf32, #tpu.memory_space<vmem>>, vector<1x6x6xf32>
    %158 = vector.shape_cast %157 : vector<1x6x6xf32> to vector<6x6xf32>
    %cst_91 = arith.constant dense<0.000000e+00> : vector<6x256xf32>
    %159 = tpu.matmul %158, %156, %cst_91 {dimension_numbers = #tpu.dot_dimension_numbers<[1], [0], [0], [1], [0, 0, 1, 1], [], []>} : vector<6x6xf32>, vector<6x256xf32>, vector<6x256xf32> -> vector<6x256xf32>
    %160 = arith.addf %152, %159 : vector<6x256xf32>
    %c15_i32_92 = arith.constant 15 : i32
    %161 = tpu.dynamic_rotate %143 by %c15_i32_92 dim 1 : vector<6x256xf32>, i32 -> vector<6x256xf32>
    %162 = vector.extract_strided_slice %0 {offsets = [2, 0], sizes = [1, 256], strides = [1, 1]} : vector<9x256xf32> to vector<1x256xf32>
    %163 = vector.broadcast %162 : vector<1x256xf32> to vector<6x256xf32>
    %164 = arith.mulf %161, %163 : vector<6x256xf32>
    %c2_93 = arith.constant 2 : index
    %c0_94 = arith.constant 0 : index
    %c0_95 = arith.constant 0 : index
    %165 = vector.load %arg6[%c2_93, %c0_94, %c0_95] : memref<18x6x6xf32, #tpu.memory_space<vmem>>, vector<1x6x6xf32>
    %166 = vector.shape_cast %165 : vector<1x6x6xf32> to vector<6x6xf32>
    %cst_96 = arith.constant dense<0.000000e+00> : vector<6x256xf32>
    %167 = tpu.matmul %166, %164, %cst_96 {dimension_numbers = #tpu.dot_dimension_numbers<[1], [0], [0], [1], [0, 0, 1, 1], [], []>} : vector<6x6xf32>, vector<6x256xf32>, vector<6x256xf32> -> vector<6x256xf32>
    %168 = arith.addf %160, %167 : vector<6x256xf32>
    %c1_i32_97 = arith.constant 1 : i32
    %169 = tpu.dynamic_rotate %143 by %c1_i32_97 dim 1 : vector<6x256xf32>, i32 -> vector<6x256xf32>
    %170 = vector.extract_strided_slice %0 {offsets = [3, 0], sizes = [1, 256], strides = [1, 1]} : vector<9x256xf32> to vector<1x256xf32>
    %171 = vector.broadcast %170 : vector<1x256xf32> to vector<6x256xf32>
    %172 = arith.mulf %169, %171 : vector<6x256xf32>
    %c3_98 = arith.constant 3 : index
    %c0_99 = arith.constant 0 : index
    %c0_100 = arith.constant 0 : index
    %173 = vector.load %arg6[%c3_98, %c0_99, %c0_100] : memref<18x6x6xf32, #tpu.memory_space<vmem>>, vector<1x6x6xf32>
    %174 = vector.shape_cast %173 : vector<1x6x6xf32> to vector<6x6xf32>
    %cst_101 = arith.constant dense<0.000000e+00> : vector<6x256xf32>
    %175 = tpu.matmul %174, %172, %cst_101 {dimension_numbers = #tpu.dot_dimension_numbers<[1], [0], [0], [1], [0, 0, 1, 1], [], []>} : vector<6x6xf32>, vector<6x256xf32>, vector<6x256xf32> -> vector<6x256xf32>
    %176 = arith.addf %168, %175 : vector<6x256xf32>
    %c4_102 = arith.constant 4 : index
    %c0_103 = arith.constant 0 : index
    %c0_104 = arith.constant 0 : index
    %177 = vector.load %arg6[%c4_102, %c0_103, %c0_104] : memref<18x6x6xf32, #tpu.memory_space<vmem>>, vector<1x6x6xf32>
    %178 = vector.shape_cast %177 : vector<1x6x6xf32> to vector<6x6xf32>
    %cst_105 = arith.constant dense<0.000000e+00> : vector<6x256xf32>
    %179 = tpu.matmul %178, %143, %cst_105 {dimension_numbers = #tpu.dot_dimension_numbers<[1], [0], [0], [1], [0, 0, 1, 1], [], []>} : vector<6x6xf32>, vector<6x256xf32>, vector<6x256xf32> -> vector<6x256xf32>
    %180 = arith.addf %176, %179 : vector<6x256xf32>
    %c255_i32_106 = arith.constant 255 : i32
    %181 = tpu.dynamic_rotate %143 by %c255_i32_106 dim 1 : vector<6x256xf32>, i32 -> vector<6x256xf32>
    %182 = vector.extract_strided_slice %0 {offsets = [5, 0], sizes = [1, 256], strides = [1, 1]} : vector<9x256xf32> to vector<1x256xf32>
    %183 = vector.broadcast %182 : vector<1x256xf32> to vector<6x256xf32>
    %184 = arith.mulf %181, %183 : vector<6x256xf32>
    %c5_107 = arith.constant 5 : index
    %c0_108 = arith.constant 0 : index
    %c0_109 = arith.constant 0 : index
    %185 = vector.load %arg6[%c5_107, %c0_108, %c0_109] : memref<18x6x6xf32, #tpu.memory_space<vmem>>, vector<1x6x6xf32>
    %186 = vector.shape_cast %185 : vector<1x6x6xf32> to vector<6x6xf32>
    %cst_110 = arith.constant dense<0.000000e+00> : vector<6x256xf32>
    %187 = tpu.matmul %186, %184, %cst_110 {dimension_numbers = #tpu.dot_dimension_numbers<[1], [0], [0], [1], [0, 0, 1, 1], [], []>} : vector<6x6xf32>, vector<6x256xf32>, vector<6x256xf32> -> vector<6x256xf32>
    %188 = arith.addf %180, %187 : vector<6x256xf32>
    %c241_i32_111 = arith.constant 241 : i32
    %189 = tpu.dynamic_rotate %143 by %c241_i32_111 dim 1 : vector<6x256xf32>, i32 -> vector<6x256xf32>
    %190 = vector.extract_strided_slice %0 {offsets = [6, 0], sizes = [1, 256], strides = [1, 1]} : vector<9x256xf32> to vector<1x256xf32>
    %191 = vector.broadcast %190 : vector<1x256xf32> to vector<6x256xf32>
    %192 = arith.mulf %189, %191 : vector<6x256xf32>
    %c6_112 = arith.constant 6 : index
    %c0_113 = arith.constant 0 : index
    %c0_114 = arith.constant 0 : index
    %193 = vector.load %arg6[%c6_112, %c0_113, %c0_114] : memref<18x6x6xf32, #tpu.memory_space<vmem>>, vector<1x6x6xf32>
    %194 = vector.shape_cast %193 : vector<1x6x6xf32> to vector<6x6xf32>
    %cst_115 = arith.constant dense<0.000000e+00> : vector<6x256xf32>
    %195 = tpu.matmul %194, %192, %cst_115 {dimension_numbers = #tpu.dot_dimension_numbers<[1], [0], [0], [1], [0, 0, 1, 1], [], []>} : vector<6x6xf32>, vector<6x256xf32>, vector<6x256xf32> -> vector<6x256xf32>
    %196 = arith.addf %188, %195 : vector<6x256xf32>
    %c240_i32_116 = arith.constant 240 : i32
    %197 = tpu.dynamic_rotate %143 by %c240_i32_116 dim 1 : vector<6x256xf32>, i32 -> vector<6x256xf32>
    %198 = vector.extract_strided_slice %0 {offsets = [7, 0], sizes = [1, 256], strides = [1, 1]} : vector<9x256xf32> to vector<1x256xf32>
    %199 = vector.broadcast %198 : vector<1x256xf32> to vector<6x256xf32>
    %200 = arith.mulf %197, %199 : vector<6x256xf32>
    %c7_117 = arith.constant 7 : index
    %c0_118 = arith.constant 0 : index
    %c0_119 = arith.constant 0 : index
    %201 = vector.load %arg6[%c7_117, %c0_118, %c0_119] : memref<18x6x6xf32, #tpu.memory_space<vmem>>, vector<1x6x6xf32>
    %202 = vector.shape_cast %201 : vector<1x6x6xf32> to vector<6x6xf32>
    %cst_120 = arith.constant dense<0.000000e+00> : vector<6x256xf32>
    %203 = tpu.matmul %202, %200, %cst_120 {dimension_numbers = #tpu.dot_dimension_numbers<[1], [0], [0], [1], [0, 0, 1, 1], [], []>} : vector<6x6xf32>, vector<6x256xf32>, vector<6x256xf32> -> vector<6x256xf32>
    %204 = arith.addf %196, %203 : vector<6x256xf32>
    %c239_i32_121 = arith.constant 239 : i32
    %205 = tpu.dynamic_rotate %143 by %c239_i32_121 dim 1 : vector<6x256xf32>, i32 -> vector<6x256xf32>
    %206 = vector.extract_strided_slice %0 {offsets = [8, 0], sizes = [1, 256], strides = [1, 1]} : vector<9x256xf32> to vector<1x256xf32>
    %207 = vector.broadcast %206 : vector<1x256xf32> to vector<6x256xf32>
    %208 = arith.mulf %205, %207 : vector<6x256xf32>
    %c8_122 = arith.constant 8 : index
    %c0_123 = arith.constant 0 : index
    %c0_124 = arith.constant 0 : index
    %209 = vector.load %arg6[%c8_122, %c0_123, %c0_124] : memref<18x6x6xf32, #tpu.memory_space<vmem>>, vector<1x6x6xf32>
    %210 = vector.shape_cast %209 : vector<1x6x6xf32> to vector<6x6xf32>
    %cst_125 = arith.constant dense<0.000000e+00> : vector<6x256xf32>
    %211 = tpu.matmul %210, %208, %cst_125 {dimension_numbers = #tpu.dot_dimension_numbers<[1], [0], [0], [1], [0, 0, 1, 1], [], []>} : vector<6x6xf32>, vector<6x256xf32>, vector<6x256xf32> -> vector<6x256xf32>
    %212 = arith.addf %204, %211 : vector<6x256xf32>
    %213 = vector.broadcast %145 : vector<6x1xf32> to vector<6x256xf32>
    %214 = arith.addf %212, %213 : vector<6x256xf32>
    %215 = arith.addf %70, %214 : vector<6x256xf32>
    %c1_126 = arith.constant 1 : index
    %c0_127 = arith.constant 0 : index
    %c0_128 = arith.constant 0 : index
    %216 = vector.load %arg5[%c1_126, %c0_127, %c0_128] : memref<2x6x1xf32, #tpu.memory_space<vmem>>, vector<1x6x1xf32>
    %217 = vector.shape_cast %216 : vector<1x6x1xf32> to vector<6x1xf32>
    %c17_i32_129 = arith.constant 17 : i32
    %218 = tpu.dynamic_rotate %215 by %c17_i32_129 dim 1 : vector<6x256xf32>, i32 -> vector<6x256xf32>
    %219 = vector.extract_strided_slice %0 {offsets = [0, 0], sizes = [1, 256], strides = [1, 1]} : vector<9x256xf32> to vector<1x256xf32>
    %220 = vector.broadcast %219 : vector<1x256xf32> to vector<6x256xf32>
    %221 = arith.mulf %218, %220 : vector<6x256xf32>
    %c9 = arith.constant 9 : index
    %c0_130 = arith.constant 0 : index
    %c0_131 = arith.constant 0 : index
    %222 = vector.load %arg4[%c9, %c0_130, %c0_131] : memref<18x6x6xf32, #tpu.memory_space<vmem>>, vector<1x6x6xf32>
    %223 = vector.shape_cast %222 : vector<1x6x6xf32> to vector<6x6xf32>
    %cst_132 = arith.constant dense<0.000000e+00> : vector<6x256xf32>
    %224 = tpu.matmul %223, %221, %cst_132 {dimension_numbers = #tpu.dot_dimension_numbers<[1], [0], [0], [1], [0, 0, 1, 1], [], []>} : vector<6x6xf32>, vector<6x256xf32>, vector<6x256xf32> -> vector<6x256xf32>
    %c16_i32_133 = arith.constant 16 : i32
    %225 = tpu.dynamic_rotate %215 by %c16_i32_133 dim 1 : vector<6x256xf32>, i32 -> vector<6x256xf32>
    %226 = vector.extract_strided_slice %0 {offsets = [1, 0], sizes = [1, 256], strides = [1, 1]} : vector<9x256xf32> to vector<1x256xf32>
    %227 = vector.broadcast %226 : vector<1x256xf32> to vector<6x256xf32>
    %228 = arith.mulf %225, %227 : vector<6x256xf32>
    %c10 = arith.constant 10 : index
    %c0_134 = arith.constant 0 : index
    %c0_135 = arith.constant 0 : index
    %229 = vector.load %arg4[%c10, %c0_134, %c0_135] : memref<18x6x6xf32, #tpu.memory_space<vmem>>, vector<1x6x6xf32>
    %230 = vector.shape_cast %229 : vector<1x6x6xf32> to vector<6x6xf32>
    %cst_136 = arith.constant dense<0.000000e+00> : vector<6x256xf32>
    %231 = tpu.matmul %230, %228, %cst_136 {dimension_numbers = #tpu.dot_dimension_numbers<[1], [0], [0], [1], [0, 0, 1, 1], [], []>} : vector<6x6xf32>, vector<6x256xf32>, vector<6x256xf32> -> vector<6x256xf32>
    %232 = arith.addf %224, %231 : vector<6x256xf32>
    %c15_i32_137 = arith.constant 15 : i32
    %233 = tpu.dynamic_rotate %215 by %c15_i32_137 dim 1 : vector<6x256xf32>, i32 -> vector<6x256xf32>
    %234 = vector.extract_strided_slice %0 {offsets = [2, 0], sizes = [1, 256], strides = [1, 1]} : vector<9x256xf32> to vector<1x256xf32>
    %235 = vector.broadcast %234 : vector<1x256xf32> to vector<6x256xf32>
    %236 = arith.mulf %233, %235 : vector<6x256xf32>
    %c11 = arith.constant 11 : index
    %c0_138 = arith.constant 0 : index
    %c0_139 = arith.constant 0 : index
    %237 = vector.load %arg4[%c11, %c0_138, %c0_139] : memref<18x6x6xf32, #tpu.memory_space<vmem>>, vector<1x6x6xf32>
    %238 = vector.shape_cast %237 : vector<1x6x6xf32> to vector<6x6xf32>
    %cst_140 = arith.constant dense<0.000000e+00> : vector<6x256xf32>
    %239 = tpu.matmul %238, %236, %cst_140 {dimension_numbers = #tpu.dot_dimension_numbers<[1], [0], [0], [1], [0, 0, 1, 1], [], []>} : vector<6x6xf32>, vector<6x256xf32>, vector<6x256xf32> -> vector<6x256xf32>
    %240 = arith.addf %232, %239 : vector<6x256xf32>
    %c1_i32_141 = arith.constant 1 : i32
    %241 = tpu.dynamic_rotate %215 by %c1_i32_141 dim 1 : vector<6x256xf32>, i32 -> vector<6x256xf32>
    %242 = vector.extract_strided_slice %0 {offsets = [3, 0], sizes = [1, 256], strides = [1, 1]} : vector<9x256xf32> to vector<1x256xf32>
    %243 = vector.broadcast %242 : vector<1x256xf32> to vector<6x256xf32>
    %244 = arith.mulf %241, %243 : vector<6x256xf32>
    %c12 = arith.constant 12 : index
    %c0_142 = arith.constant 0 : index
    %c0_143 = arith.constant 0 : index
    %245 = vector.load %arg4[%c12, %c0_142, %c0_143] : memref<18x6x6xf32, #tpu.memory_space<vmem>>, vector<1x6x6xf32>
    %246 = vector.shape_cast %245 : vector<1x6x6xf32> to vector<6x6xf32>
    %cst_144 = arith.constant dense<0.000000e+00> : vector<6x256xf32>
    %247 = tpu.matmul %246, %244, %cst_144 {dimension_numbers = #tpu.dot_dimension_numbers<[1], [0], [0], [1], [0, 0, 1, 1], [], []>} : vector<6x6xf32>, vector<6x256xf32>, vector<6x256xf32> -> vector<6x256xf32>
    %248 = arith.addf %240, %247 : vector<6x256xf32>
    %c13 = arith.constant 13 : index
    %c0_145 = arith.constant 0 : index
    %c0_146 = arith.constant 0 : index
    %249 = vector.load %arg4[%c13, %c0_145, %c0_146] : memref<18x6x6xf32, #tpu.memory_space<vmem>>, vector<1x6x6xf32>
    %250 = vector.shape_cast %249 : vector<1x6x6xf32> to vector<6x6xf32>
    %cst_147 = arith.constant dense<0.000000e+00> : vector<6x256xf32>
    %251 = tpu.matmul %250, %215, %cst_147 {dimension_numbers = #tpu.dot_dimension_numbers<[1], [0], [0], [1], [0, 0, 1, 1], [], []>} : vector<6x6xf32>, vector<6x256xf32>, vector<6x256xf32> -> vector<6x256xf32>
    %252 = arith.addf %248, %251 : vector<6x256xf32>
    %c255_i32_148 = arith.constant 255 : i32
    %253 = tpu.dynamic_rotate %215 by %c255_i32_148 dim 1 : vector<6x256xf32>, i32 -> vector<6x256xf32>
    %254 = vector.extract_strided_slice %0 {offsets = [5, 0], sizes = [1, 256], strides = [1, 1]} : vector<9x256xf32> to vector<1x256xf32>
    %255 = vector.broadcast %254 : vector<1x256xf32> to vector<6x256xf32>
    %256 = arith.mulf %253, %255 : vector<6x256xf32>
    %c14 = arith.constant 14 : index
    %c0_149 = arith.constant 0 : index
    %c0_150 = arith.constant 0 : index
    %257 = vector.load %arg4[%c14, %c0_149, %c0_150] : memref<18x6x6xf32, #tpu.memory_space<vmem>>, vector<1x6x6xf32>
    %258 = vector.shape_cast %257 : vector<1x6x6xf32> to vector<6x6xf32>
    %cst_151 = arith.constant dense<0.000000e+00> : vector<6x256xf32>
    %259 = tpu.matmul %258, %256, %cst_151 {dimension_numbers = #tpu.dot_dimension_numbers<[1], [0], [0], [1], [0, 0, 1, 1], [], []>} : vector<6x6xf32>, vector<6x256xf32>, vector<6x256xf32> -> vector<6x256xf32>
    %260 = arith.addf %252, %259 : vector<6x256xf32>
    %c241_i32_152 = arith.constant 241 : i32
    %261 = tpu.dynamic_rotate %215 by %c241_i32_152 dim 1 : vector<6x256xf32>, i32 -> vector<6x256xf32>
    %262 = vector.extract_strided_slice %0 {offsets = [6, 0], sizes = [1, 256], strides = [1, 1]} : vector<9x256xf32> to vector<1x256xf32>
    %263 = vector.broadcast %262 : vector<1x256xf32> to vector<6x256xf32>
    %264 = arith.mulf %261, %263 : vector<6x256xf32>
    %c15 = arith.constant 15 : index
    %c0_153 = arith.constant 0 : index
    %c0_154 = arith.constant 0 : index
    %265 = vector.load %arg4[%c15, %c0_153, %c0_154] : memref<18x6x6xf32, #tpu.memory_space<vmem>>, vector<1x6x6xf32>
    %266 = vector.shape_cast %265 : vector<1x6x6xf32> to vector<6x6xf32>
    %cst_155 = arith.constant dense<0.000000e+00> : vector<6x256xf32>
    %267 = tpu.matmul %266, %264, %cst_155 {dimension_numbers = #tpu.dot_dimension_numbers<[1], [0], [0], [1], [0, 0, 1, 1], [], []>} : vector<6x6xf32>, vector<6x256xf32>, vector<6x256xf32> -> vector<6x256xf32>
    %268 = arith.addf %260, %267 : vector<6x256xf32>
    %c240_i32_156 = arith.constant 240 : i32
    %269 = tpu.dynamic_rotate %215 by %c240_i32_156 dim 1 : vector<6x256xf32>, i32 -> vector<6x256xf32>
    %270 = vector.extract_strided_slice %0 {offsets = [7, 0], sizes = [1, 256], strides = [1, 1]} : vector<9x256xf32> to vector<1x256xf32>
    %271 = vector.broadcast %270 : vector<1x256xf32> to vector<6x256xf32>
    %272 = arith.mulf %269, %271 : vector<6x256xf32>
    %c16 = arith.constant 16 : index
    %c0_157 = arith.constant 0 : index
    %c0_158 = arith.constant 0 : index
    %273 = vector.load %arg4[%c16, %c0_157, %c0_158] : memref<18x6x6xf32, #tpu.memory_space<vmem>>, vector<1x6x6xf32>
    %274 = vector.shape_cast %273 : vector<1x6x6xf32> to vector<6x6xf32>
    %cst_159 = arith.constant dense<0.000000e+00> : vector<6x256xf32>
    %275 = tpu.matmul %274, %272, %cst_159 {dimension_numbers = #tpu.dot_dimension_numbers<[1], [0], [0], [1], [0, 0, 1, 1], [], []>} : vector<6x6xf32>, vector<6x256xf32>, vector<6x256xf32> -> vector<6x256xf32>
    %276 = arith.addf %268, %275 : vector<6x256xf32>
    %c239_i32_160 = arith.constant 239 : i32
    %277 = tpu.dynamic_rotate %215 by %c239_i32_160 dim 1 : vector<6x256xf32>, i32 -> vector<6x256xf32>
    %278 = vector.extract_strided_slice %0 {offsets = [8, 0], sizes = [1, 256], strides = [1, 1]} : vector<9x256xf32> to vector<1x256xf32>
    %279 = vector.broadcast %278 : vector<1x256xf32> to vector<6x256xf32>
    %280 = arith.mulf %277, %279 : vector<6x256xf32>
    %c17 = arith.constant 17 : index
    %c0_161 = arith.constant 0 : index
    %c0_162 = arith.constant 0 : index
    %281 = vector.load %arg4[%c17, %c0_161, %c0_162] : memref<18x6x6xf32, #tpu.memory_space<vmem>>, vector<1x6x6xf32>
    %282 = vector.shape_cast %281 : vector<1x6x6xf32> to vector<6x6xf32>
    %cst_163 = arith.constant dense<0.000000e+00> : vector<6x256xf32>
    %283 = tpu.matmul %282, %280, %cst_163 {dimension_numbers = #tpu.dot_dimension_numbers<[1], [0], [0], [1], [0, 0, 1, 1], [], []>} : vector<6x6xf32>, vector<6x256xf32>, vector<6x256xf32> -> vector<6x256xf32>
    %284 = arith.addf %276, %283 : vector<6x256xf32>
    %285 = vector.broadcast %217 : vector<6x1xf32> to vector<6x256xf32>
    %286 = arith.addf %284, %285 : vector<6x256xf32>
    %cst_164 = arith.constant 0.000000e+00 : f32
    %287 = vector.broadcast %cst_164 : f32 to vector<6x256xf32>
    %288 = arith.maximumf %286, %287 : vector<6x256xf32>
    %c1_165 = arith.constant 1 : index
    %c0_166 = arith.constant 0 : index
    %c0_167 = arith.constant 0 : index
    %289 = vector.load %arg7[%c1_165, %c0_166, %c0_167] : memref<2x6x1xf32, #tpu.memory_space<vmem>>, vector<1x6x1xf32>
    %290 = vector.shape_cast %289 : vector<1x6x1xf32> to vector<6x1xf32>
    %c17_i32_168 = arith.constant 17 : i32
    %291 = tpu.dynamic_rotate %288 by %c17_i32_168 dim 1 : vector<6x256xf32>, i32 -> vector<6x256xf32>
    %292 = vector.extract_strided_slice %0 {offsets = [0, 0], sizes = [1, 256], strides = [1, 1]} : vector<9x256xf32> to vector<1x256xf32>
    %293 = vector.broadcast %292 : vector<1x256xf32> to vector<6x256xf32>
    %294 = arith.mulf %291, %293 : vector<6x256xf32>
    %c9_169 = arith.constant 9 : index
    %c0_170 = arith.constant 0 : index
    %c0_171 = arith.constant 0 : index
    %295 = vector.load %arg6[%c9_169, %c0_170, %c0_171] : memref<18x6x6xf32, #tpu.memory_space<vmem>>, vector<1x6x6xf32>
    %296 = vector.shape_cast %295 : vector<1x6x6xf32> to vector<6x6xf32>
    %cst_172 = arith.constant dense<0.000000e+00> : vector<6x256xf32>
    %297 = tpu.matmul %296, %294, %cst_172 {dimension_numbers = #tpu.dot_dimension_numbers<[1], [0], [0], [1], [0, 0, 1, 1], [], []>} : vector<6x6xf32>, vector<6x256xf32>, vector<6x256xf32> -> vector<6x256xf32>
    %c16_i32_173 = arith.constant 16 : i32
    %298 = tpu.dynamic_rotate %288 by %c16_i32_173 dim 1 : vector<6x256xf32>, i32 -> vector<6x256xf32>
    %299 = vector.extract_strided_slice %0 {offsets = [1, 0], sizes = [1, 256], strides = [1, 1]} : vector<9x256xf32> to vector<1x256xf32>
    %300 = vector.broadcast %299 : vector<1x256xf32> to vector<6x256xf32>
    %301 = arith.mulf %298, %300 : vector<6x256xf32>
    %c10_174 = arith.constant 10 : index
    %c0_175 = arith.constant 0 : index
    %c0_176 = arith.constant 0 : index
    %302 = vector.load %arg6[%c10_174, %c0_175, %c0_176] : memref<18x6x6xf32, #tpu.memory_space<vmem>>, vector<1x6x6xf32>
    %303 = vector.shape_cast %302 : vector<1x6x6xf32> to vector<6x6xf32>
    %cst_177 = arith.constant dense<0.000000e+00> : vector<6x256xf32>
    %304 = tpu.matmul %303, %301, %cst_177 {dimension_numbers = #tpu.dot_dimension_numbers<[1], [0], [0], [1], [0, 0, 1, 1], [], []>} : vector<6x6xf32>, vector<6x256xf32>, vector<6x256xf32> -> vector<6x256xf32>
    %305 = arith.addf %297, %304 : vector<6x256xf32>
    %c15_i32_178 = arith.constant 15 : i32
    %306 = tpu.dynamic_rotate %288 by %c15_i32_178 dim 1 : vector<6x256xf32>, i32 -> vector<6x256xf32>
    %307 = vector.extract_strided_slice %0 {offsets = [2, 0], sizes = [1, 256], strides = [1, 1]} : vector<9x256xf32> to vector<1x256xf32>
    %308 = vector.broadcast %307 : vector<1x256xf32> to vector<6x256xf32>
    %309 = arith.mulf %306, %308 : vector<6x256xf32>
    %c11_179 = arith.constant 11 : index
    %c0_180 = arith.constant 0 : index
    %c0_181 = arith.constant 0 : index
    %310 = vector.load %arg6[%c11_179, %c0_180, %c0_181] : memref<18x6x6xf32, #tpu.memory_space<vmem>>, vector<1x6x6xf32>
    %311 = vector.shape_cast %310 : vector<1x6x6xf32> to vector<6x6xf32>
    %cst_182 = arith.constant dense<0.000000e+00> : vector<6x256xf32>
    %312 = tpu.matmul %311, %309, %cst_182 {dimension_numbers = #tpu.dot_dimension_numbers<[1], [0], [0], [1], [0, 0, 1, 1], [], []>} : vector<6x6xf32>, vector<6x256xf32>, vector<6x256xf32> -> vector<6x256xf32>
    %313 = arith.addf %305, %312 : vector<6x256xf32>
    %c1_i32_183 = arith.constant 1 : i32
    %314 = tpu.dynamic_rotate %288 by %c1_i32_183 dim 1 : vector<6x256xf32>, i32 -> vector<6x256xf32>
    %315 = vector.extract_strided_slice %0 {offsets = [3, 0], sizes = [1, 256], strides = [1, 1]} : vector<9x256xf32> to vector<1x256xf32>
    %316 = vector.broadcast %315 : vector<1x256xf32> to vector<6x256xf32>
    %317 = arith.mulf %314, %316 : vector<6x256xf32>
    %c12_184 = arith.constant 12 : index
    %c0_185 = arith.constant 0 : index
    %c0_186 = arith.constant 0 : index
    %318 = vector.load %arg6[%c12_184, %c0_185, %c0_186] : memref<18x6x6xf32, #tpu.memory_space<vmem>>, vector<1x6x6xf32>
    %319 = vector.shape_cast %318 : vector<1x6x6xf32> to vector<6x6xf32>
    %cst_187 = arith.constant dense<0.000000e+00> : vector<6x256xf32>
    %320 = tpu.matmul %319, %317, %cst_187 {dimension_numbers = #tpu.dot_dimension_numbers<[1], [0], [0], [1], [0, 0, 1, 1], [], []>} : vector<6x6xf32>, vector<6x256xf32>, vector<6x256xf32> -> vector<6x256xf32>
    %321 = arith.addf %313, %320 : vector<6x256xf32>
    %c13_188 = arith.constant 13 : index
    %c0_189 = arith.constant 0 : index
    %c0_190 = arith.constant 0 : index
    %322 = vector.load %arg6[%c13_188, %c0_189, %c0_190] : memref<18x6x6xf32, #tpu.memory_space<vmem>>, vector<1x6x6xf32>
    %323 = vector.shape_cast %322 : vector<1x6x6xf32> to vector<6x6xf32>
    %cst_191 = arith.constant dense<0.000000e+00> : vector<6x256xf32>
    %324 = tpu.matmul %323, %288, %cst_191 {dimension_numbers = #tpu.dot_dimension_numbers<[1], [0], [0], [1], [0, 0, 1, 1], [], []>} : vector<6x6xf32>, vector<6x256xf32>, vector<6x256xf32> -> vector<6x256xf32>
    %325 = arith.addf %321, %324 : vector<6x256xf32>
    %c255_i32_192 = arith.constant 255 : i32
    %326 = tpu.dynamic_rotate %288 by %c255_i32_192 dim 1 : vector<6x256xf32>, i32 -> vector<6x256xf32>
    %327 = vector.extract_strided_slice %0 {offsets = [5, 0], sizes = [1, 256], strides = [1, 1]} : vector<9x256xf32> to vector<1x256xf32>
    %328 = vector.broadcast %327 : vector<1x256xf32> to vector<6x256xf32>
    %329 = arith.mulf %326, %328 : vector<6x256xf32>
    %c14_193 = arith.constant 14 : index
    %c0_194 = arith.constant 0 : index
    %c0_195 = arith.constant 0 : index
    %330 = vector.load %arg6[%c14_193, %c0_194, %c0_195] : memref<18x6x6xf32, #tpu.memory_space<vmem>>, vector<1x6x6xf32>
    %331 = vector.shape_cast %330 : vector<1x6x6xf32> to vector<6x6xf32>
    %cst_196 = arith.constant dense<0.000000e+00> : vector<6x256xf32>
    %332 = tpu.matmul %331, %329, %cst_196 {dimension_numbers = #tpu.dot_dimension_numbers<[1], [0], [0], [1], [0, 0, 1, 1], [], []>} : vector<6x6xf32>, vector<6x256xf32>, vector<6x256xf32> -> vector<6x256xf32>
    %333 = arith.addf %325, %332 : vector<6x256xf32>
    %c241_i32_197 = arith.constant 241 : i32
    %334 = tpu.dynamic_rotate %288 by %c241_i32_197 dim 1 : vector<6x256xf32>, i32 -> vector<6x256xf32>
    %335 = vector.extract_strided_slice %0 {offsets = [6, 0], sizes = [1, 256], strides = [1, 1]} : vector<9x256xf32> to vector<1x256xf32>
    %336 = vector.broadcast %335 : vector<1x256xf32> to vector<6x256xf32>
    %337 = arith.mulf %334, %336 : vector<6x256xf32>
    %c15_198 = arith.constant 15 : index
    %c0_199 = arith.constant 0 : index
    %c0_200 = arith.constant 0 : index
    %338 = vector.load %arg6[%c15_198, %c0_199, %c0_200] : memref<18x6x6xf32, #tpu.memory_space<vmem>>, vector<1x6x6xf32>
    %339 = vector.shape_cast %338 : vector<1x6x6xf32> to vector<6x6xf32>
    %cst_201 = arith.constant dense<0.000000e+00> : vector<6x256xf32>
    %340 = tpu.matmul %339, %337, %cst_201 {dimension_numbers = #tpu.dot_dimension_numbers<[1], [0], [0], [1], [0, 0, 1, 1], [], []>} : vector<6x6xf32>, vector<6x256xf32>, vector<6x256xf32> -> vector<6x256xf32>
    %341 = arith.addf %333, %340 : vector<6x256xf32>
    %c240_i32_202 = arith.constant 240 : i32
    %342 = tpu.dynamic_rotate %288 by %c240_i32_202 dim 1 : vector<6x256xf32>, i32 -> vector<6x256xf32>
    %343 = vector.extract_strided_slice %0 {offsets = [7, 0], sizes = [1, 256], strides = [1, 1]} : vector<9x256xf32> to vector<1x256xf32>
    %344 = vector.broadcast %343 : vector<1x256xf32> to vector<6x256xf32>
    %345 = arith.mulf %342, %344 : vector<6x256xf32>
    %c16_203 = arith.constant 16 : index
    %c0_204 = arith.constant 0 : index
    %c0_205 = arith.constant 0 : index
    %346 = vector.load %arg6[%c16_203, %c0_204, %c0_205] : memref<18x6x6xf32, #tpu.memory_space<vmem>>, vector<1x6x6xf32>
    %347 = vector.shape_cast %346 : vector<1x6x6xf32> to vector<6x6xf32>
    %cst_206 = arith.constant dense<0.000000e+00> : vector<6x256xf32>
    %348 = tpu.matmul %347, %345, %cst_206 {dimension_numbers = #tpu.dot_dimension_numbers<[1], [0], [0], [1], [0, 0, 1, 1], [], []>} : vector<6x6xf32>, vector<6x256xf32>, vector<6x256xf32> -> vector<6x256xf32>
    %349 = arith.addf %341, %348 : vector<6x256xf32>
    %c239_i32_207 = arith.constant 239 : i32
    %350 = tpu.dynamic_rotate %288 by %c239_i32_207 dim 1 : vector<6x256xf32>, i32 -> vector<6x256xf32>
    %351 = vector.extract_strided_slice %0 {offsets = [8, 0], sizes = [1, 256], strides = [1, 1]} : vector<9x256xf32> to vector<1x256xf32>
    %352 = vector.broadcast %351 : vector<1x256xf32> to vector<6x256xf32>
    %353 = arith.mulf %350, %352 : vector<6x256xf32>
    %c17_208 = arith.constant 17 : index
    %c0_209 = arith.constant 0 : index
    %c0_210 = arith.constant 0 : index
    %354 = vector.load %arg6[%c17_208, %c0_209, %c0_210] : memref<18x6x6xf32, #tpu.memory_space<vmem>>, vector<1x6x6xf32>
    %355 = vector.shape_cast %354 : vector<1x6x6xf32> to vector<6x6xf32>
    %cst_211 = arith.constant dense<0.000000e+00> : vector<6x256xf32>
    %356 = tpu.matmul %355, %353, %cst_211 {dimension_numbers = #tpu.dot_dimension_numbers<[1], [0], [0], [1], [0, 0, 1, 1], [], []>} : vector<6x6xf32>, vector<6x256xf32>, vector<6x256xf32> -> vector<6x256xf32>
    %357 = arith.addf %349, %356 : vector<6x256xf32>
    %358 = vector.broadcast %290 : vector<6x1xf32> to vector<6x256xf32>
    %359 = arith.addf %357, %358 : vector<6x256xf32>
    %360 = arith.addf %215, %359 : vector<6x256xf32>
    %c0_212 = arith.constant 0 : index
    %c0_213 = arith.constant 0 : index
    %c0_214 = arith.constant 0 : index
    %361 = vector.load %arg8[%c0_212, %c0_213, %c0_214] : memref<1x6x256xf32, #tpu.memory_space<vmem>>, vector<1x6x256xf32>
    %362 = vector.shape_cast %361 : vector<1x6x256xf32> to vector<6x256xf32>
    %363 = vector.shape_cast %360 : vector<6x256xf32> to vector<1x6x256xf32>
    tpu.vector_store %arg8[%c0_212, %c0_213, %c0_214], %363 {strides = array<i32>} : memref<1x6x256xf32, #tpu.memory_space<vmem>>, vector<1x6x256xf32>,
    return
  }
  func.func @transform_0(%arg0: i32) -> (i32, i32, i32) {
    %c0_i32 = arith.constant 0 : i32
    %c0_i32_0 = arith.constant 0 : i32
    %c0_i32_1 = arith.constant 0 : i32
    return %arg0, %c0_i32, %c0_i32_0 : i32, i32, i32
  }
  func.func @transform_1(%arg0: i32) -> (i32, i32) {
    %c0_i32 = arith.constant 0 : i32
    %c0_i32_0 = arith.constant 0 : i32
    %c0_i32_1 = arith.constant 0 : i32
    return %c0_i32, %c0_i32_0 : i32, i32
  }
  func.func @transform_2(%arg0: i32) -> (i32, i32, i32) {
    %c0_i32 = arith.constant 0 : i32
    %c0_i32_0 = arith.constant 0 : i32
    %c0_i32_1 = arith.constant 0 : i32
    %c0_i32_2 = arith.constant 0 : i32
    return %c0_i32, %c0_i32_0, %c0_i32_1 : i32, i32, i32
  }
  func.func @transform_3(%arg0: i32) -> (i32, i32, i32) {
    %c0_i32 = arith.constant 0 : i32
    %c0_i32_0 = arith.constant 0 : i32
    %c0_i32_1 = arith.constant 0 : i32
    %c0_i32_2 = arith.constant 0 : i32
    return %c0_i32, %c0_i32_0, %c0_i32_1 : i32, i32, i32
  }
  func.func @transform_4(%arg0: i32) -> (i32, i32, i32) {
    %c0_i32 = arith.constant 0 : i32
    %c0_i32_0 = arith.constant 0 : i32
    %c0_i32_1 = arith.constant 0 : i32
    %c0_i32_2 = arith.constant 0 : i32
    return %c0_i32, %c0_i32_0, %c0_i32_1 : i32, i32, i32
  }
  func.func @transform_5(%arg0: i32) -> (i32, i32, i32) {
    %c0_i32 = arith.constant 0 : i32
    %c0_i32_0 = arith.constant 0 : i32
    %c0_i32_1 = arith.constant 0 : i32
    %c0_i32_2 = arith.constant 0 : i32
    return %c0_i32, %c0_i32_0, %c0_i32_1 : i32, i32, i32
  }
  func.func @transform_6(%arg0: i32) -> (i32, i32, i32) {
    %c0_i32 = arith.constant 0 : i32
    %c0_i32_0 = arith.constant 0 : i32
    %c0_i32_1 = arith.constant 0 : i32
    %c0_i32_2 = arith.constant 0 : i32
    return %c0_i32, %c0_i32_0, %c0_i32_1 : i32, i32, i32
  }
  func.func @transform_7(%arg0: i32) -> (i32, i32, i32) {
    %c0_i32 = arith.constant 0 : i32
    %c0_i32_0 = arith.constant 0 : i32
    %c0_i32_1 = arith.constant 0 : i32
    return %arg0, %c0_i32, %c0_i32_0 : i32, i32, i32
  }
}

module attributes {stable_mosaic.version = 11 : i64} {
  func.func @_mask_stage_kernel(%arg0: i32, %arg1: memref<1xf32, #tpu.memory_space<smem>>, %arg2: memref<1xf32, #tpu.memory_space<smem>>, %arg3: memref<1x1x256xf32, #tpu.memory_space<vmem>>, %arg4: memref<1x1x256xf32, #tpu.memory_space<vmem>>, %arg5: memref<1x1x256xf32, #tpu.memory_space<vmem>>, %arg6: memref<1x1x256xf32, #tpu.memory_space<vmem>>, %arg7: memref<9x256xf32, #tpu.memory_space<vmem>>, %arg8: memref<9x3x1xf32, #tpu.memory_space<vmem>>, %arg9: memref<18x4x4xf32, #tpu.memory_space<vmem>>, %arg10: memref<2x4x1xf32, #tpu.memory_space<vmem>>, %arg11: memref<18x4x4xf32, #tpu.memory_space<vmem>>, %arg12: memref<2x4x1xf32, #tpu.memory_space<vmem>>, %arg13: memref<1x1x256xf32, #tpu.memory_space<vmem>>, %arg14: memref<1x1x256xf32, #tpu.memory_space<vmem>>, %arg15: memref<1x1x256xf32, #tpu.memory_space<vmem>>) attributes {dimension_semantics = [#tpu.dimension_semantics<parallel>], iteration_bounds = array<i64: 2>, scalar_prefetch = 0 : i64, scratch_operands = 0 : i64, tpu.core_type = #tpu.core_type<tc>, window_params = [{transform_indices = @transform_0, window_bounds = array<i64: 1>}, {transform_indices = @transform_1, window_bounds = array<i64: 1>}, {transform_indices = @transform_2, window_bounds = array<i64: 1, 1, 256>}, {transform_indices = @transform_3, window_bounds = array<i64: 1, 1, 256>}, {transform_indices = @transform_4, window_bounds = array<i64: 1, 1, 256>}, {transform_indices = @transform_5, window_bounds = array<i64: 1, 1, 256>}, {pipeline_mode = #tpu.pipeline_mode<synchronous>, transform_indices = @transform_6, window_bounds = array<i64: 9, 256>}, {pipeline_mode = #tpu.pipeline_mode<synchronous>, transform_indices = @transform_7, window_bounds = array<i64: 9, 3, 1>}, {pipeline_mode = #tpu.pipeline_mode<synchronous>, transform_indices = @transform_8, window_bounds = array<i64: 18, 4, 4>}, {pipeline_mode = #tpu.pipeline_mode<synchronous>, transform_indices = @transform_9, window_bounds = array<i64: 2, 4, 1>}, {pipeline_mode = #tpu.pipeline_mode<synchronous>, transform_indices = @transform_10, window_bounds = array<i64: 18, 4, 4>}, {pipeline_mode = #tpu.pipeline_mode<synchronous>, transform_indices = @transform_11, window_bounds = array<i64: 2, 4, 1>}, {transform_indices = @transform_12, window_bounds = array<i64: 1, 1, 256>}, {transform_indices = @transform_13, window_bounds = array<i64: 1, 1, 256>}, {transform_indices = @transform_14, window_bounds = array<i64: 1, 1, 256>}]} {
    %c0 = arith.constant 0 : index
    %c0_0 = arith.constant 0 : index
    %0 = vector.load %arg7[%c0, %c0_0] : memref<9x256xf32, #tpu.memory_space<vmem>>, vector<9x256xf32>
    %c0_1 = arith.constant 0 : index
    %1 = memref.load %arg1[%c0_1] : memref<1xf32, #tpu.memory_space<smem>>
    %c0_2 = arith.constant 0 : index
    %2 = memref.load %arg2[%c0_2] : memref<1xf32, #tpu.memory_space<smem>>
    %c0_3 = arith.constant 0 : index
    %c0_4 = arith.constant 0 : index
    %c0_5 = arith.constant 0 : index
    %3 = vector.load %arg3[%c0_3, %c0_4, %c0_5] : memref<1x1x256xf32, #tpu.memory_space<vmem>>, vector<1x1x256xf32>
    %4 = vector.shape_cast %3 : vector<1x1x256xf32> to vector<1x256xf32>
    %c0_6 = arith.constant 0 : index
    %c0_7 = arith.constant 0 : index
    %c0_8 = arith.constant 0 : index
    %5 = vector.load %arg4[%c0_6, %c0_7, %c0_8] : memref<1x1x256xf32, #tpu.memory_space<vmem>>, vector<1x1x256xf32>
    %6 = vector.shape_cast %5 : vector<1x1x256xf32> to vector<1x256xf32>
    %c0_9 = arith.constant 0 : index
    %c0_10 = arith.constant 0 : index
    %c0_11 = arith.constant 0 : index
    %7 = vector.load %arg5[%c0_9, %c0_10, %c0_11] : memref<1x1x256xf32, #tpu.memory_space<vmem>>, vector<1x1x256xf32>
    %8 = vector.shape_cast %7 : vector<1x1x256xf32> to vector<1x256xf32>
    %c0_12 = arith.constant 0 : index
    %c0_13 = arith.constant 0 : index
    %c0_14 = arith.constant 0 : index
    %9 = vector.load %arg6[%c0_12, %c0_13, %c0_14] : memref<1x1x256xf32, #tpu.memory_space<vmem>>, vector<1x1x256xf32>
    %10 = vector.shape_cast %9 : vector<1x1x256xf32> to vector<1x256xf32>
    %11 = arith.mulf %4, %4 : vector<1x256xf32>
    %12 = arith.mulf %6, %6 : vector<1x256xf32>
    %13 = arith.addf %11, %12 : vector<1x256xf32>
    %14 = vector.broadcast %1 : f32 to vector<1x256xf32>
    %15 = arith.mulf %14, %13 : vector<1x256xf32>
    %16 = arith.mulf %4, %8 : vector<1x256xf32>
    %17 = arith.mulf %6, %10 : vector<1x256xf32>
    %18 = arith.addf %16, %17 : vector<1x256xf32>
    %cst = arith.constant 2.000000e+00 : f32
    %19 = vector.broadcast %cst : f32 to vector<1x256xf32>
    %20 = arith.mulf %19, %18 : vector<1x256xf32>
    %21 = arith.addf %15, %20 : vector<1x256xf32>
    %22 = vector.broadcast %1 : f32 to vector<1x256xf32>
    %23 = arith.mulf %22, %13 : vector<1x256xf32>
    %24 = arith.mulf %8, %8 : vector<1x256xf32>
    %25 = arith.mulf %10, %10 : vector<1x256xf32>
    %26 = arith.addf %24, %25 : vector<1x256xf32>
    %27 = arith.addf %23, %26 : vector<1x256xf32>
    %28 = tpu.concatenate %21, %27 in 0 : vector<1x256xf32>, vector<1x256xf32> -> vector<2x256xf32>
    %c128_i32 = arith.constant 128 : i32
    %29 = tpu.dynamic_rotate %28 by %c128_i32 dim 1 : vector<2x256xf32>, i32 -> vector<2x256xf32>
    %30 = arith.addf %28, %29 : vector<2x256xf32>
    %c64_i32 = arith.constant 64 : i32
    %31 = tpu.dynamic_rotate %30 by %c64_i32 dim 1 : vector<2x256xf32>, i32 -> vector<2x256xf32>
    %32 = arith.addf %30, %31 : vector<2x256xf32>
    %c32_i32 = arith.constant 32 : i32
    %33 = tpu.dynamic_rotate %32 by %c32_i32 dim 1 : vector<2x256xf32>, i32 -> vector<2x256xf32>
    %34 = arith.addf %32, %33 : vector<2x256xf32>
    %c16_i32 = arith.constant 16 : i32
    %35 = tpu.dynamic_rotate %34 by %c16_i32 dim 1 : vector<2x256xf32>, i32 -> vector<2x256xf32>
    %36 = arith.addf %34, %35 : vector<2x256xf32>
    %37 = vector.extract_strided_slice %36 {offsets = [0, 0], sizes = [1, 256], strides = [1, 1]} : vector<2x256xf32> to vector<1x256xf32>
    %38 = vector.extract_strided_slice %36 {offsets = [1, 0], sizes = [1, 256], strides = [1, 1]} : vector<2x256xf32> to vector<1x256xf32>
    %39 = arith.divf %37, %38 : vector<1x256xf32>
    %c17_i32 = arith.constant 17 : i32
    %40 = tpu.dynamic_rotate %39 by %c17_i32 dim 1 : vector<1x256xf32>, i32 -> vector<1x256xf32>
    %41 = vector.extract_strided_slice %0 {offsets = [0, 0], sizes = [1, 256], strides = [1, 1]} : vector<9x256xf32> to vector<1x256xf32>
    %42 = arith.mulf %40, %41 : vector<1x256xf32>
    %c0_15 = arith.constant 0 : index
    %c0_16 = arith.constant 0 : index
    %c0_17 = arith.constant 0 : index
    %43 = vector.load %arg8[%c0_15, %c0_16, %c0_17] : memref<9x3x1xf32, #tpu.memory_space<vmem>>, vector<1x3x1xf32>
    %44 = vector.shape_cast %43 : vector<1x3x1xf32> to vector<3x1xf32>
    %45 = vector.broadcast %44 : vector<3x1xf32> to vector<3x256xf32>
    %46 = vector.broadcast %42 : vector<1x256xf32> to vector<3x256xf32>
    %47 = arith.mulf %45, %46 : vector<3x256xf32>
    %c16_i32_18 = arith.constant 16 : i32
    %48 = tpu.dynamic_rotate %39 by %c16_i32_18 dim 1 : vector<1x256xf32>, i32 -> vector<1x256xf32>
    %49 = vector.extract_strided_slice %0 {offsets = [1, 0], sizes = [1, 256], strides = [1, 1]} : vector<9x256xf32> to vector<1x256xf32>
    %50 = arith.mulf %48, %49 : vector<1x256xf32>
    %c1 = arith.constant 1 : index
    %c0_19 = arith.constant 0 : index
    %c0_20 = arith.constant 0 : index
    %51 = vector.load %arg8[%c1, %c0_19, %c0_20] : memref<9x3x1xf32, #tpu.memory_space<vmem>>, vector<1x3x1xf32>
    %52 = vector.shape_cast %51 : vector<1x3x1xf32> to vector<3x1xf32>
    %53 = vector.broadcast %52 : vector<3x1xf32> to vector<3x256xf32>
    %54 = vector.broadcast %50 : vector<1x256xf32> to vector<3x256xf32>
    %55 = arith.mulf %53, %54 : vector<3x256xf32>
    %56 = arith.addf %47, %55 : vector<3x256xf32>
    %c15_i32 = arith.constant 15 : i32
    %57 = tpu.dynamic_rotate %39 by %c15_i32 dim 1 : vector<1x256xf32>, i32 -> vector<1x256xf32>
    %58 = vector.extract_strided_slice %0 {offsets = [2, 0], sizes = [1, 256], strides = [1, 1]} : vector<9x256xf32> to vector<1x256xf32>
    %59 = arith.mulf %57, %58 : vector<1x256xf32>
    %c2 = arith.constant 2 : index
    %c0_21 = arith.constant 0 : index
    %c0_22 = arith.constant 0 : index
    %60 = vector.load %arg8[%c2, %c0_21, %c0_22] : memref<9x3x1xf32, #tpu.memory_space<vmem>>, vector<1x3x1xf32>
    %61 = vector.shape_cast %60 : vector<1x3x1xf32> to vector<3x1xf32>
    %62 = vector.broadcast %61 : vector<3x1xf32> to vector<3x256xf32>
    %63 = vector.broadcast %59 : vector<1x256xf32> to vector<3x256xf32>
    %64 = arith.mulf %62, %63 : vector<3x256xf32>
    %65 = arith.addf %56, %64 : vector<3x256xf32>
    %c1_i32 = arith.constant 1 : i32
    %66 = tpu.dynamic_rotate %39 by %c1_i32 dim 1 : vector<1x256xf32>, i32 -> vector<1x256xf32>
    %67 = vector.extract_strided_slice %0 {offsets = [3, 0], sizes = [1, 256], strides = [1, 1]} : vector<9x256xf32> to vector<1x256xf32>
    %68 = arith.mulf %66, %67 : vector<1x256xf32>
    %c3 = arith.constant 3 : index
    %c0_23 = arith.constant 0 : index
    %c0_24 = arith.constant 0 : index
    %69 = vector.load %arg8[%c3, %c0_23, %c0_24] : memref<9x3x1xf32, #tpu.memory_space<vmem>>, vector<1x3x1xf32>
    %70 = vector.shape_cast %69 : vector<1x3x1xf32> to vector<3x1xf32>
    %71 = vector.broadcast %70 : vector<3x1xf32> to vector<3x256xf32>
    %72 = vector.broadcast %68 : vector<1x256xf32> to vector<3x256xf32>
    %73 = arith.mulf %71, %72 : vector<3x256xf32>
    %74 = arith.addf %65, %73 : vector<3x256xf32>
    %c4 = arith.constant 4 : index
    %c0_25 = arith.constant 0 : index
    %c0_26 = arith.constant 0 : index
    %75 = vector.load %arg8[%c4, %c0_25, %c0_26] : memref<9x3x1xf32, #tpu.memory_space<vmem>>, vector<1x3x1xf32>
    %76 = vector.shape_cast %75 : vector<1x3x1xf32> to vector<3x1xf32>
    %77 = vector.broadcast %76 : vector<3x1xf32> to vector<3x256xf32>
    %78 = vector.broadcast %39 : vector<1x256xf32> to vector<3x256xf32>
    %79 = arith.mulf %77, %78 : vector<3x256xf32>
    %80 = arith.addf %74, %79 : vector<3x256xf32>
    %c255_i32 = arith.constant 255 : i32
    %81 = tpu.dynamic_rotate %39 by %c255_i32 dim 1 : vector<1x256xf32>, i32 -> vector<1x256xf32>
    %82 = vector.extract_strided_slice %0 {offsets = [5, 0], sizes = [1, 256], strides = [1, 1]} : vector<9x256xf32> to vector<1x256xf32>
    %83 = arith.mulf %81, %82 : vector<1x256xf32>
    %c5 = arith.constant 5 : index
    %c0_27 = arith.constant 0 : index
    %c0_28 = arith.constant 0 : index
    %84 = vector.load %arg8[%c5, %c0_27, %c0_28] : memref<9x3x1xf32, #tpu.memory_space<vmem>>, vector<1x3x1xf32>
    %85 = vector.shape_cast %84 : vector<1x3x1xf32> to vector<3x1xf32>
    %86 = vector.broadcast %85 : vector<3x1xf32> to vector<3x256xf32>
    %87 = vector.broadcast %83 : vector<1x256xf32> to vector<3x256xf32>
    %88 = arith.mulf %86, %87 : vector<3x256xf32>
    %89 = arith.addf %80, %88 : vector<3x256xf32>
    %c241_i32 = arith.constant 241 : i32
    %90 = tpu.dynamic_rotate %39 by %c241_i32 dim 1 : vector<1x256xf32>, i32 -> vector<1x256xf32>
    %91 = vector.extract_strided_slice %0 {offsets = [6, 0], sizes = [1, 256], strides = [1, 1]} : vector<9x256xf32> to vector<1x256xf32>
    %92 = arith.mulf %90, %91 : vector<1x256xf32>
    %c6 = arith.constant 6 : index
    %c0_29 = arith.constant 0 : index
    %c0_30 = arith.constant 0 : index
    %93 = vector.load %arg8[%c6, %c0_29, %c0_30] : memref<9x3x1xf32, #tpu.memory_space<vmem>>, vector<1x3x1xf32>
    %94 = vector.shape_cast %93 : vector<1x3x1xf32> to vector<3x1xf32>
    %95 = vector.broadcast %94 : vector<3x1xf32> to vector<3x256xf32>
    %96 = vector.broadcast %92 : vector<1x256xf32> to vector<3x256xf32>
    %97 = arith.mulf %95, %96 : vector<3x256xf32>
    %98 = arith.addf %89, %97 : vector<3x256xf32>
    %c240_i32 = arith.constant 240 : i32
    %99 = tpu.dynamic_rotate %39 by %c240_i32 dim 1 : vector<1x256xf32>, i32 -> vector<1x256xf32>
    %100 = vector.extract_strided_slice %0 {offsets = [7, 0], sizes = [1, 256], strides = [1, 1]} : vector<9x256xf32> to vector<1x256xf32>
    %101 = arith.mulf %99, %100 : vector<1x256xf32>
    %c7 = arith.constant 7 : index
    %c0_31 = arith.constant 0 : index
    %c0_32 = arith.constant 0 : index
    %102 = vector.load %arg8[%c7, %c0_31, %c0_32] : memref<9x3x1xf32, #tpu.memory_space<vmem>>, vector<1x3x1xf32>
    %103 = vector.shape_cast %102 : vector<1x3x1xf32> to vector<3x1xf32>
    %104 = vector.broadcast %103 : vector<3x1xf32> to vector<3x256xf32>
    %105 = vector.broadcast %101 : vector<1x256xf32> to vector<3x256xf32>
    %106 = arith.mulf %104, %105 : vector<3x256xf32>
    %107 = arith.addf %98, %106 : vector<3x256xf32>
    %c239_i32 = arith.constant 239 : i32
    %108 = tpu.dynamic_rotate %39 by %c239_i32 dim 1 : vector<1x256xf32>, i32 -> vector<1x256xf32>
    %109 = vector.extract_strided_slice %0 {offsets = [8, 0], sizes = [1, 256], strides = [1, 1]} : vector<9x256xf32> to vector<1x256xf32>
    %110 = arith.mulf %108, %109 : vector<1x256xf32>
    %c8 = arith.constant 8 : index
    %c0_33 = arith.constant 0 : index
    %c0_34 = arith.constant 0 : index
    %111 = vector.load %arg8[%c8, %c0_33, %c0_34] : memref<9x3x1xf32, #tpu.memory_space<vmem>>, vector<1x3x1xf32>
    %112 = vector.shape_cast %111 : vector<1x3x1xf32> to vector<3x1xf32>
    %113 = vector.broadcast %112 : vector<3x1xf32> to vector<3x256xf32>
    %114 = vector.broadcast %110 : vector<1x256xf32> to vector<3x256xf32>
    %115 = arith.mulf %113, %114 : vector<3x256xf32>
    %116 = arith.addf %107, %115 : vector<3x256xf32>
    %117 = tpu.concatenate %39, %116 in 0 : vector<1x256xf32>, vector<3x256xf32> -> vector<4x256xf32>
    %c0_35 = arith.constant 0 : index
    %c0_36 = arith.constant 0 : index
    %c0_37 = arith.constant 0 : index
    %118 = vector.load %arg10[%c0_35, %c0_36, %c0_37] : memref<2x4x1xf32, #tpu.memory_space<vmem>>, vector<1x4x1xf32>
    %119 = vector.shape_cast %118 : vector<1x4x1xf32> to vector<4x1xf32>
    %c17_i32_38 = arith.constant 17 : i32
    %120 = tpu.dynamic_rotate %117 by %c17_i32_38 dim 1 : vector<4x256xf32>, i32 -> vector<4x256xf32>
    %121 = vector.extract_strided_slice %0 {offsets = [0, 0], sizes = [1, 256], strides = [1, 1]} : vector<9x256xf32> to vector<1x256xf32>
    %122 = vector.broadcast %121 : vector<1x256xf32> to vector<4x256xf32>
    %123 = arith.mulf %120, %122 : vector<4x256xf32>
    %c0_39 = arith.constant 0 : index
    %c0_40 = arith.constant 0 : index
    %c0_41 = arith.constant 0 : index
    %124 = vector.load %arg9[%c0_39, %c0_40, %c0_41] : memref<18x4x4xf32, #tpu.memory_space<vmem>>, vector<1x4x4xf32>
    %125 = vector.shape_cast %124 : vector<1x4x4xf32> to vector<4x4xf32>
    %cst_42 = arith.constant dense<0.000000e+00> : vector<4x256xf32>
    %126 = tpu.matmul %125, %123, %cst_42 {dimension_numbers = #tpu.dot_dimension_numbers<[1], [0], [0], [1], [0, 0, 1, 1], [], []>} : vector<4x4xf32>, vector<4x256xf32>, vector<4x256xf32> -> vector<4x256xf32>
    %c16_i32_43 = arith.constant 16 : i32
    %127 = tpu.dynamic_rotate %117 by %c16_i32_43 dim 1 : vector<4x256xf32>, i32 -> vector<4x256xf32>
    %128 = vector.extract_strided_slice %0 {offsets = [1, 0], sizes = [1, 256], strides = [1, 1]} : vector<9x256xf32> to vector<1x256xf32>
    %129 = vector.broadcast %128 : vector<1x256xf32> to vector<4x256xf32>
    %130 = arith.mulf %127, %129 : vector<4x256xf32>
    %c1_44 = arith.constant 1 : index
    %c0_45 = arith.constant 0 : index
    %c0_46 = arith.constant 0 : index
    %131 = vector.load %arg9[%c1_44, %c0_45, %c0_46] : memref<18x4x4xf32, #tpu.memory_space<vmem>>, vector<1x4x4xf32>
    %132 = vector.shape_cast %131 : vector<1x4x4xf32> to vector<4x4xf32>
    %cst_47 = arith.constant dense<0.000000e+00> : vector<4x256xf32>
    %133 = tpu.matmul %132, %130, %cst_47 {dimension_numbers = #tpu.dot_dimension_numbers<[1], [0], [0], [1], [0, 0, 1, 1], [], []>} : vector<4x4xf32>, vector<4x256xf32>, vector<4x256xf32> -> vector<4x256xf32>
    %134 = arith.addf %126, %133 : vector<4x256xf32>
    %c15_i32_48 = arith.constant 15 : i32
    %135 = tpu.dynamic_rotate %117 by %c15_i32_48 dim 1 : vector<4x256xf32>, i32 -> vector<4x256xf32>
    %136 = vector.extract_strided_slice %0 {offsets = [2, 0], sizes = [1, 256], strides = [1, 1]} : vector<9x256xf32> to vector<1x256xf32>
    %137 = vector.broadcast %136 : vector<1x256xf32> to vector<4x256xf32>
    %138 = arith.mulf %135, %137 : vector<4x256xf32>
    %c2_49 = arith.constant 2 : index
    %c0_50 = arith.constant 0 : index
    %c0_51 = arith.constant 0 : index
    %139 = vector.load %arg9[%c2_49, %c0_50, %c0_51] : memref<18x4x4xf32, #tpu.memory_space<vmem>>, vector<1x4x4xf32>
    %140 = vector.shape_cast %139 : vector<1x4x4xf32> to vector<4x4xf32>
    %cst_52 = arith.constant dense<0.000000e+00> : vector<4x256xf32>
    %141 = tpu.matmul %140, %138, %cst_52 {dimension_numbers = #tpu.dot_dimension_numbers<[1], [0], [0], [1], [0, 0, 1, 1], [], []>} : vector<4x4xf32>, vector<4x256xf32>, vector<4x256xf32> -> vector<4x256xf32>
    %142 = arith.addf %134, %141 : vector<4x256xf32>
    %c1_i32_53 = arith.constant 1 : i32
    %143 = tpu.dynamic_rotate %117 by %c1_i32_53 dim 1 : vector<4x256xf32>, i32 -> vector<4x256xf32>
    %144 = vector.extract_strided_slice %0 {offsets = [3, 0], sizes = [1, 256], strides = [1, 1]} : vector<9x256xf32> to vector<1x256xf32>
    %145 = vector.broadcast %144 : vector<1x256xf32> to vector<4x256xf32>
    %146 = arith.mulf %143, %145 : vector<4x256xf32>
    %c3_54 = arith.constant 3 : index
    %c0_55 = arith.constant 0 : index
    %c0_56 = arith.constant 0 : index
    %147 = vector.load %arg9[%c3_54, %c0_55, %c0_56] : memref<18x4x4xf32, #tpu.memory_space<vmem>>, vector<1x4x4xf32>
    %148 = vector.shape_cast %147 : vector<1x4x4xf32> to vector<4x4xf32>
    %cst_57 = arith.constant dense<0.000000e+00> : vector<4x256xf32>
    %149 = tpu.matmul %148, %146, %cst_57 {dimension_numbers = #tpu.dot_dimension_numbers<[1], [0], [0], [1], [0, 0, 1, 1], [], []>} : vector<4x4xf32>, vector<4x256xf32>, vector<4x256xf32> -> vector<4x256xf32>
    %150 = arith.addf %142, %149 : vector<4x256xf32>
    %c4_58 = arith.constant 4 : index
    %c0_59 = arith.constant 0 : index
    %c0_60 = arith.constant 0 : index
    %151 = vector.load %arg9[%c4_58, %c0_59, %c0_60] : memref<18x4x4xf32, #tpu.memory_space<vmem>>, vector<1x4x4xf32>
    %152 = vector.shape_cast %151 : vector<1x4x4xf32> to vector<4x4xf32>
    %cst_61 = arith.constant dense<0.000000e+00> : vector<4x256xf32>
    %153 = tpu.matmul %152, %117, %cst_61 {dimension_numbers = #tpu.dot_dimension_numbers<[1], [0], [0], [1], [0, 0, 1, 1], [], []>} : vector<4x4xf32>, vector<4x256xf32>, vector<4x256xf32> -> vector<4x256xf32>
    %154 = arith.addf %150, %153 : vector<4x256xf32>
    %c255_i32_62 = arith.constant 255 : i32
    %155 = tpu.dynamic_rotate %117 by %c255_i32_62 dim 1 : vector<4x256xf32>, i32 -> vector<4x256xf32>
    %156 = vector.extract_strided_slice %0 {offsets = [5, 0], sizes = [1, 256], strides = [1, 1]} : vector<9x256xf32> to vector<1x256xf32>
    %157 = vector.broadcast %156 : vector<1x256xf32> to vector<4x256xf32>
    %158 = arith.mulf %155, %157 : vector<4x256xf32>
    %c5_63 = arith.constant 5 : index
    %c0_64 = arith.constant 0 : index
    %c0_65 = arith.constant 0 : index
    %159 = vector.load %arg9[%c5_63, %c0_64, %c0_65] : memref<18x4x4xf32, #tpu.memory_space<vmem>>, vector<1x4x4xf32>
    %160 = vector.shape_cast %159 : vector<1x4x4xf32> to vector<4x4xf32>
    %cst_66 = arith.constant dense<0.000000e+00> : vector<4x256xf32>
    %161 = tpu.matmul %160, %158, %cst_66 {dimension_numbers = #tpu.dot_dimension_numbers<[1], [0], [0], [1], [0, 0, 1, 1], [], []>} : vector<4x4xf32>, vector<4x256xf32>, vector<4x256xf32> -> vector<4x256xf32>
    %162 = arith.addf %154, %161 : vector<4x256xf32>
    %c241_i32_67 = arith.constant 241 : i32
    %163 = tpu.dynamic_rotate %117 by %c241_i32_67 dim 1 : vector<4x256xf32>, i32 -> vector<4x256xf32>
    %164 = vector.extract_strided_slice %0 {offsets = [6, 0], sizes = [1, 256], strides = [1, 1]} : vector<9x256xf32> to vector<1x256xf32>
    %165 = vector.broadcast %164 : vector<1x256xf32> to vector<4x256xf32>
    %166 = arith.mulf %163, %165 : vector<4x256xf32>
    %c6_68 = arith.constant 6 : index
    %c0_69 = arith.constant 0 : index
    %c0_70 = arith.constant 0 : index
    %167 = vector.load %arg9[%c6_68, %c0_69, %c0_70] : memref<18x4x4xf32, #tpu.memory_space<vmem>>, vector<1x4x4xf32>
    %168 = vector.shape_cast %167 : vector<1x4x4xf32> to vector<4x4xf32>
    %cst_71 = arith.constant dense<0.000000e+00> : vector<4x256xf32>
    %169 = tpu.matmul %168, %166, %cst_71 {dimension_numbers = #tpu.dot_dimension_numbers<[1], [0], [0], [1], [0, 0, 1, 1], [], []>} : vector<4x4xf32>, vector<4x256xf32>, vector<4x256xf32> -> vector<4x256xf32>
    %170 = arith.addf %162, %169 : vector<4x256xf32>
    %c240_i32_72 = arith.constant 240 : i32
    %171 = tpu.dynamic_rotate %117 by %c240_i32_72 dim 1 : vector<4x256xf32>, i32 -> vector<4x256xf32>
    %172 = vector.extract_strided_slice %0 {offsets = [7, 0], sizes = [1, 256], strides = [1, 1]} : vector<9x256xf32> to vector<1x256xf32>
    %173 = vector.broadcast %172 : vector<1x256xf32> to vector<4x256xf32>
    %174 = arith.mulf %171, %173 : vector<4x256xf32>
    %c7_73 = arith.constant 7 : index
    %c0_74 = arith.constant 0 : index
    %c0_75 = arith.constant 0 : index
    %175 = vector.load %arg9[%c7_73, %c0_74, %c0_75] : memref<18x4x4xf32, #tpu.memory_space<vmem>>, vector<1x4x4xf32>
    %176 = vector.shape_cast %175 : vector<1x4x4xf32> to vector<4x4xf32>
    %cst_76 = arith.constant dense<0.000000e+00> : vector<4x256xf32>
    %177 = tpu.matmul %176, %174, %cst_76 {dimension_numbers = #tpu.dot_dimension_numbers<[1], [0], [0], [1], [0, 0, 1, 1], [], []>} : vector<4x4xf32>, vector<4x256xf32>, vector<4x256xf32> -> vector<4x256xf32>
    %178 = arith.addf %170, %177 : vector<4x256xf32>
    %c239_i32_77 = arith.constant 239 : i32
    %179 = tpu.dynamic_rotate %117 by %c239_i32_77 dim 1 : vector<4x256xf32>, i32 -> vector<4x256xf32>
    %180 = vector.extract_strided_slice %0 {offsets = [8, 0], sizes = [1, 256], strides = [1, 1]} : vector<9x256xf32> to vector<1x256xf32>
    %181 = vector.broadcast %180 : vector<1x256xf32> to vector<4x256xf32>
    %182 = arith.mulf %179, %181 : vector<4x256xf32>
    %c8_78 = arith.constant 8 : index
    %c0_79 = arith.constant 0 : index
    %c0_80 = arith.constant 0 : index
    %183 = vector.load %arg9[%c8_78, %c0_79, %c0_80] : memref<18x4x4xf32, #tpu.memory_space<vmem>>, vector<1x4x4xf32>
    %184 = vector.shape_cast %183 : vector<1x4x4xf32> to vector<4x4xf32>
    %cst_81 = arith.constant dense<0.000000e+00> : vector<4x256xf32>
    %185 = tpu.matmul %184, %182, %cst_81 {dimension_numbers = #tpu.dot_dimension_numbers<[1], [0], [0], [1], [0, 0, 1, 1], [], []>} : vector<4x4xf32>, vector<4x256xf32>, vector<4x256xf32> -> vector<4x256xf32>
    %186 = arith.addf %178, %185 : vector<4x256xf32>
    %187 = vector.broadcast %119 : vector<4x1xf32> to vector<4x256xf32>
    %188 = arith.addf %186, %187 : vector<4x256xf32>
    %cst_82 = arith.constant 0.000000e+00 : f32
    %189 = vector.broadcast %cst_82 : f32 to vector<4x256xf32>
    %190 = arith.maximumf %188, %189 : vector<4x256xf32>
    %c0_83 = arith.constant 0 : index
    %c0_84 = arith.constant 0 : index
    %c0_85 = arith.constant 0 : index
    %191 = vector.load %arg12[%c0_83, %c0_84, %c0_85] : memref<2x4x1xf32, #tpu.memory_space<vmem>>, vector<1x4x1xf32>
    %192 = vector.shape_cast %191 : vector<1x4x1xf32> to vector<4x1xf32>
    %c17_i32_86 = arith.constant 17 : i32
    %193 = tpu.dynamic_rotate %190 by %c17_i32_86 dim 1 : vector<4x256xf32>, i32 -> vector<4x256xf32>
    %194 = vector.extract_strided_slice %0 {offsets = [0, 0], sizes = [1, 256], strides = [1, 1]} : vector<9x256xf32> to vector<1x256xf32>
    %195 = vector.broadcast %194 : vector<1x256xf32> to vector<4x256xf32>
    %196 = arith.mulf %193, %195 : vector<4x256xf32>
    %c0_87 = arith.constant 0 : index
    %c0_88 = arith.constant 0 : index
    %c0_89 = arith.constant 0 : index
    %197 = vector.load %arg11[%c0_87, %c0_88, %c0_89] : memref<18x4x4xf32, #tpu.memory_space<vmem>>, vector<1x4x4xf32>
    %198 = vector.shape_cast %197 : vector<1x4x4xf32> to vector<4x4xf32>
    %cst_90 = arith.constant dense<0.000000e+00> : vector<4x256xf32>
    %199 = tpu.matmul %198, %196, %cst_90 {dimension_numbers = #tpu.dot_dimension_numbers<[1], [0], [0], [1], [0, 0, 1, 1], [], []>} : vector<4x4xf32>, vector<4x256xf32>, vector<4x256xf32> -> vector<4x256xf32>
    %c16_i32_91 = arith.constant 16 : i32
    %200 = tpu.dynamic_rotate %190 by %c16_i32_91 dim 1 : vector<4x256xf32>, i32 -> vector<4x256xf32>
    %201 = vector.extract_strided_slice %0 {offsets = [1, 0], sizes = [1, 256], strides = [1, 1]} : vector<9x256xf32> to vector<1x256xf32>
    %202 = vector.broadcast %201 : vector<1x256xf32> to vector<4x256xf32>
    %203 = arith.mulf %200, %202 : vector<4x256xf32>
    %c1_92 = arith.constant 1 : index
    %c0_93 = arith.constant 0 : index
    %c0_94 = arith.constant 0 : index
    %204 = vector.load %arg11[%c1_92, %c0_93, %c0_94] : memref<18x4x4xf32, #tpu.memory_space<vmem>>, vector<1x4x4xf32>
    %205 = vector.shape_cast %204 : vector<1x4x4xf32> to vector<4x4xf32>
    %cst_95 = arith.constant dense<0.000000e+00> : vector<4x256xf32>
    %206 = tpu.matmul %205, %203, %cst_95 {dimension_numbers = #tpu.dot_dimension_numbers<[1], [0], [0], [1], [0, 0, 1, 1], [], []>} : vector<4x4xf32>, vector<4x256xf32>, vector<4x256xf32> -> vector<4x256xf32>
    %207 = arith.addf %199, %206 : vector<4x256xf32>
    %c15_i32_96 = arith.constant 15 : i32
    %208 = tpu.dynamic_rotate %190 by %c15_i32_96 dim 1 : vector<4x256xf32>, i32 -> vector<4x256xf32>
    %209 = vector.extract_strided_slice %0 {offsets = [2, 0], sizes = [1, 256], strides = [1, 1]} : vector<9x256xf32> to vector<1x256xf32>
    %210 = vector.broadcast %209 : vector<1x256xf32> to vector<4x256xf32>
    %211 = arith.mulf %208, %210 : vector<4x256xf32>
    %c2_97 = arith.constant 2 : index
    %c0_98 = arith.constant 0 : index
    %c0_99 = arith.constant 0 : index
    %212 = vector.load %arg11[%c2_97, %c0_98, %c0_99] : memref<18x4x4xf32, #tpu.memory_space<vmem>>, vector<1x4x4xf32>
    %213 = vector.shape_cast %212 : vector<1x4x4xf32> to vector<4x4xf32>
    %cst_100 = arith.constant dense<0.000000e+00> : vector<4x256xf32>
    %214 = tpu.matmul %213, %211, %cst_100 {dimension_numbers = #tpu.dot_dimension_numbers<[1], [0], [0], [1], [0, 0, 1, 1], [], []>} : vector<4x4xf32>, vector<4x256xf32>, vector<4x256xf32> -> vector<4x256xf32>
    %215 = arith.addf %207, %214 : vector<4x256xf32>
    %c1_i32_101 = arith.constant 1 : i32
    %216 = tpu.dynamic_rotate %190 by %c1_i32_101 dim 1 : vector<4x256xf32>, i32 -> vector<4x256xf32>
    %217 = vector.extract_strided_slice %0 {offsets = [3, 0], sizes = [1, 256], strides = [1, 1]} : vector<9x256xf32> to vector<1x256xf32>
    %218 = vector.broadcast %217 : vector<1x256xf32> to vector<4x256xf32>
    %219 = arith.mulf %216, %218 : vector<4x256xf32>
    %c3_102 = arith.constant 3 : index
    %c0_103 = arith.constant 0 : index
    %c0_104 = arith.constant 0 : index
    %220 = vector.load %arg11[%c3_102, %c0_103, %c0_104] : memref<18x4x4xf32, #tpu.memory_space<vmem>>, vector<1x4x4xf32>
    %221 = vector.shape_cast %220 : vector<1x4x4xf32> to vector<4x4xf32>
    %cst_105 = arith.constant dense<0.000000e+00> : vector<4x256xf32>
    %222 = tpu.matmul %221, %219, %cst_105 {dimension_numbers = #tpu.dot_dimension_numbers<[1], [0], [0], [1], [0, 0, 1, 1], [], []>} : vector<4x4xf32>, vector<4x256xf32>, vector<4x256xf32> -> vector<4x256xf32>
    %223 = arith.addf %215, %222 : vector<4x256xf32>
    %c4_106 = arith.constant 4 : index
    %c0_107 = arith.constant 0 : index
    %c0_108 = arith.constant 0 : index
    %224 = vector.load %arg11[%c4_106, %c0_107, %c0_108] : memref<18x4x4xf32, #tpu.memory_space<vmem>>, vector<1x4x4xf32>
    %225 = vector.shape_cast %224 : vector<1x4x4xf32> to vector<4x4xf32>
    %cst_109 = arith.constant dense<0.000000e+00> : vector<4x256xf32>
    %226 = tpu.matmul %225, %190, %cst_109 {dimension_numbers = #tpu.dot_dimension_numbers<[1], [0], [0], [1], [0, 0, 1, 1], [], []>} : vector<4x4xf32>, vector<4x256xf32>, vector<4x256xf32> -> vector<4x256xf32>
    %227 = arith.addf %223, %226 : vector<4x256xf32>
    %c255_i32_110 = arith.constant 255 : i32
    %228 = tpu.dynamic_rotate %190 by %c255_i32_110 dim 1 : vector<4x256xf32>, i32 -> vector<4x256xf32>
    %229 = vector.extract_strided_slice %0 {offsets = [5, 0], sizes = [1, 256], strides = [1, 1]} : vector<9x256xf32> to vector<1x256xf32>
    %230 = vector.broadcast %229 : vector<1x256xf32> to vector<4x256xf32>
    %231 = arith.mulf %228, %230 : vector<4x256xf32>
    %c5_111 = arith.constant 5 : index
    %c0_112 = arith.constant 0 : index
    %c0_113 = arith.constant 0 : index
    %232 = vector.load %arg11[%c5_111, %c0_112, %c0_113] : memref<18x4x4xf32, #tpu.memory_space<vmem>>, vector<1x4x4xf32>
    %233 = vector.shape_cast %232 : vector<1x4x4xf32> to vector<4x4xf32>
    %cst_114 = arith.constant dense<0.000000e+00> : vector<4x256xf32>
    %234 = tpu.matmul %233, %231, %cst_114 {dimension_numbers = #tpu.dot_dimension_numbers<[1], [0], [0], [1], [0, 0, 1, 1], [], []>} : vector<4x4xf32>, vector<4x256xf32>, vector<4x256xf32> -> vector<4x256xf32>
    %235 = arith.addf %227, %234 : vector<4x256xf32>
    %c241_i32_115 = arith.constant 241 : i32
    %236 = tpu.dynamic_rotate %190 by %c241_i32_115 dim 1 : vector<4x256xf32>, i32 -> vector<4x256xf32>
    %237 = vector.extract_strided_slice %0 {offsets = [6, 0], sizes = [1, 256], strides = [1, 1]} : vector<9x256xf32> to vector<1x256xf32>
    %238 = vector.broadcast %237 : vector<1x256xf32> to vector<4x256xf32>
    %239 = arith.mulf %236, %238 : vector<4x256xf32>
    %c6_116 = arith.constant 6 : index
    %c0_117 = arith.constant 0 : index
    %c0_118 = arith.constant 0 : index
    %240 = vector.load %arg11[%c6_116, %c0_117, %c0_118] : memref<18x4x4xf32, #tpu.memory_space<vmem>>, vector<1x4x4xf32>
    %241 = vector.shape_cast %240 : vector<1x4x4xf32> to vector<4x4xf32>
    %cst_119 = arith.constant dense<0.000000e+00> : vector<4x256xf32>
    %242 = tpu.matmul %241, %239, %cst_119 {dimension_numbers = #tpu.dot_dimension_numbers<[1], [0], [0], [1], [0, 0, 1, 1], [], []>} : vector<4x4xf32>, vector<4x256xf32>, vector<4x256xf32> -> vector<4x256xf32>
    %243 = arith.addf %235, %242 : vector<4x256xf32>
    %c240_i32_120 = arith.constant 240 : i32
    %244 = tpu.dynamic_rotate %190 by %c240_i32_120 dim 1 : vector<4x256xf32>, i32 -> vector<4x256xf32>
    %245 = vector.extract_strided_slice %0 {offsets = [7, 0], sizes = [1, 256], strides = [1, 1]} : vector<9x256xf32> to vector<1x256xf32>
    %246 = vector.broadcast %245 : vector<1x256xf32> to vector<4x256xf32>
    %247 = arith.mulf %244, %246 : vector<4x256xf32>
    %c7_121 = arith.constant 7 : index
    %c0_122 = arith.constant 0 : index
    %c0_123 = arith.constant 0 : index
    %248 = vector.load %arg11[%c7_121, %c0_122, %c0_123] : memref<18x4x4xf32, #tpu.memory_space<vmem>>, vector<1x4x4xf32>
    %249 = vector.shape_cast %248 : vector<1x4x4xf32> to vector<4x4xf32>
    %cst_124 = arith.constant dense<0.000000e+00> : vector<4x256xf32>
    %250 = tpu.matmul %249, %247, %cst_124 {dimension_numbers = #tpu.dot_dimension_numbers<[1], [0], [0], [1], [0, 0, 1, 1], [], []>} : vector<4x4xf32>, vector<4x256xf32>, vector<4x256xf32> -> vector<4x256xf32>
    %251 = arith.addf %243, %250 : vector<4x256xf32>
    %c239_i32_125 = arith.constant 239 : i32
    %252 = tpu.dynamic_rotate %190 by %c239_i32_125 dim 1 : vector<4x256xf32>, i32 -> vector<4x256xf32>
    %253 = vector.extract_strided_slice %0 {offsets = [8, 0], sizes = [1, 256], strides = [1, 1]} : vector<9x256xf32> to vector<1x256xf32>
    %254 = vector.broadcast %253 : vector<1x256xf32> to vector<4x256xf32>
    %255 = arith.mulf %252, %254 : vector<4x256xf32>
    %c8_126 = arith.constant 8 : index
    %c0_127 = arith.constant 0 : index
    %c0_128 = arith.constant 0 : index
    %256 = vector.load %arg11[%c8_126, %c0_127, %c0_128] : memref<18x4x4xf32, #tpu.memory_space<vmem>>, vector<1x4x4xf32>
    %257 = vector.shape_cast %256 : vector<1x4x4xf32> to vector<4x4xf32>
    %cst_129 = arith.constant dense<0.000000e+00> : vector<4x256xf32>
    %258 = tpu.matmul %257, %255, %cst_129 {dimension_numbers = #tpu.dot_dimension_numbers<[1], [0], [0], [1], [0, 0, 1, 1], [], []>} : vector<4x4xf32>, vector<4x256xf32>, vector<4x256xf32> -> vector<4x256xf32>
    %259 = arith.addf %251, %258 : vector<4x256xf32>
    %260 = vector.broadcast %192 : vector<4x1xf32> to vector<4x256xf32>
    %261 = arith.addf %259, %260 : vector<4x256xf32>
    %262 = arith.addf %117, %261 : vector<4x256xf32>
    %c1_130 = arith.constant 1 : index
    %c0_131 = arith.constant 0 : index
    %c0_132 = arith.constant 0 : index
    %263 = vector.load %arg10[%c1_130, %c0_131, %c0_132] : memref<2x4x1xf32, #tpu.memory_space<vmem>>, vector<1x4x1xf32>
    %264 = vector.shape_cast %263 : vector<1x4x1xf32> to vector<4x1xf32>
    %c17_i32_133 = arith.constant 17 : i32
    %265 = tpu.dynamic_rotate %262 by %c17_i32_133 dim 1 : vector<4x256xf32>, i32 -> vector<4x256xf32>
    %266 = vector.extract_strided_slice %0 {offsets = [0, 0], sizes = [1, 256], strides = [1, 1]} : vector<9x256xf32> to vector<1x256xf32>
    %267 = vector.broadcast %266 : vector<1x256xf32> to vector<4x256xf32>
    %268 = arith.mulf %265, %267 : vector<4x256xf32>
    %c9 = arith.constant 9 : index
    %c0_134 = arith.constant 0 : index
    %c0_135 = arith.constant 0 : index
    %269 = vector.load %arg9[%c9, %c0_134, %c0_135] : memref<18x4x4xf32, #tpu.memory_space<vmem>>, vector<1x4x4xf32>
    %270 = vector.shape_cast %269 : vector<1x4x4xf32> to vector<4x4xf32>
    %cst_136 = arith.constant dense<0.000000e+00> : vector<4x256xf32>
    %271 = tpu.matmul %270, %268, %cst_136 {dimension_numbers = #tpu.dot_dimension_numbers<[1], [0], [0], [1], [0, 0, 1, 1], [], []>} : vector<4x4xf32>, vector<4x256xf32>, vector<4x256xf32> -> vector<4x256xf32>
    %c16_i32_137 = arith.constant 16 : i32
    %272 = tpu.dynamic_rotate %262 by %c16_i32_137 dim 1 : vector<4x256xf32>, i32 -> vector<4x256xf32>
    %273 = vector.extract_strided_slice %0 {offsets = [1, 0], sizes = [1, 256], strides = [1, 1]} : vector<9x256xf32> to vector<1x256xf32>
    %274 = vector.broadcast %273 : vector<1x256xf32> to vector<4x256xf32>
    %275 = arith.mulf %272, %274 : vector<4x256xf32>
    %c10 = arith.constant 10 : index
    %c0_138 = arith.constant 0 : index
    %c0_139 = arith.constant 0 : index
    %276 = vector.load %arg9[%c10, %c0_138, %c0_139] : memref<18x4x4xf32, #tpu.memory_space<vmem>>, vector<1x4x4xf32>
    %277 = vector.shape_cast %276 : vector<1x4x4xf32> to vector<4x4xf32>
    %cst_140 = arith.constant dense<0.000000e+00> : vector<4x256xf32>
    %278 = tpu.matmul %277, %275, %cst_140 {dimension_numbers = #tpu.dot_dimension_numbers<[1], [0], [0], [1], [0, 0, 1, 1], [], []>} : vector<4x4xf32>, vector<4x256xf32>, vector<4x256xf32> -> vector<4x256xf32>
    %279 = arith.addf %271, %278 : vector<4x256xf32>
    %c15_i32_141 = arith.constant 15 : i32
    %280 = tpu.dynamic_rotate %262 by %c15_i32_141 dim 1 : vector<4x256xf32>, i32 -> vector<4x256xf32>
    %281 = vector.extract_strided_slice %0 {offsets = [2, 0], sizes = [1, 256], strides = [1, 1]} : vector<9x256xf32> to vector<1x256xf32>
    %282 = vector.broadcast %281 : vector<1x256xf32> to vector<4x256xf32>
    %283 = arith.mulf %280, %282 : vector<4x256xf32>
    %c11 = arith.constant 11 : index
    %c0_142 = arith.constant 0 : index
    %c0_143 = arith.constant 0 : index
    %284 = vector.load %arg9[%c11, %c0_142, %c0_143] : memref<18x4x4xf32, #tpu.memory_space<vmem>>, vector<1x4x4xf32>
    %285 = vector.shape_cast %284 : vector<1x4x4xf32> to vector<4x4xf32>
    %cst_144 = arith.constant dense<0.000000e+00> : vector<4x256xf32>
    %286 = tpu.matmul %285, %283, %cst_144 {dimension_numbers = #tpu.dot_dimension_numbers<[1], [0], [0], [1], [0, 0, 1, 1], [], []>} : vector<4x4xf32>, vector<4x256xf32>, vector<4x256xf32> -> vector<4x256xf32>
    %287 = arith.addf %279, %286 : vector<4x256xf32>
    %c1_i32_145 = arith.constant 1 : i32
    %288 = tpu.dynamic_rotate %262 by %c1_i32_145 dim 1 : vector<4x256xf32>, i32 -> vector<4x256xf32>
    %289 = vector.extract_strided_slice %0 {offsets = [3, 0], sizes = [1, 256], strides = [1, 1]} : vector<9x256xf32> to vector<1x256xf32>
    %290 = vector.broadcast %289 : vector<1x256xf32> to vector<4x256xf32>
    %291 = arith.mulf %288, %290 : vector<4x256xf32>
    %c12 = arith.constant 12 : index
    %c0_146 = arith.constant 0 : index
    %c0_147 = arith.constant 0 : index
    %292 = vector.load %arg9[%c12, %c0_146, %c0_147] : memref<18x4x4xf32, #tpu.memory_space<vmem>>, vector<1x4x4xf32>
    %293 = vector.shape_cast %292 : vector<1x4x4xf32> to vector<4x4xf32>
    %cst_148 = arith.constant dense<0.000000e+00> : vector<4x256xf32>
    %294 = tpu.matmul %293, %291, %cst_148 {dimension_numbers = #tpu.dot_dimension_numbers<[1], [0], [0], [1], [0, 0, 1, 1], [], []>} : vector<4x4xf32>, vector<4x256xf32>, vector<4x256xf32> -> vector<4x256xf32>
    %295 = arith.addf %287, %294 : vector<4x256xf32>
    %c13 = arith.constant 13 : index
    %c0_149 = arith.constant 0 : index
    %c0_150 = arith.constant 0 : index
    %296 = vector.load %arg9[%c13, %c0_149, %c0_150] : memref<18x4x4xf32, #tpu.memory_space<vmem>>, vector<1x4x4xf32>
    %297 = vector.shape_cast %296 : vector<1x4x4xf32> to vector<4x4xf32>
    %cst_151 = arith.constant dense<0.000000e+00> : vector<4x256xf32>
    %298 = tpu.matmul %297, %262, %cst_151 {dimension_numbers = #tpu.dot_dimension_numbers<[1], [0], [0], [1], [0, 0, 1, 1], [], []>} : vector<4x4xf32>, vector<4x256xf32>, vector<4x256xf32> -> vector<4x256xf32>
    %299 = arith.addf %295, %298 : vector<4x256xf32>
    %c255_i32_152 = arith.constant 255 : i32
    %300 = tpu.dynamic_rotate %262 by %c255_i32_152 dim 1 : vector<4x256xf32>, i32 -> vector<4x256xf32>
    %301 = vector.extract_strided_slice %0 {offsets = [5, 0], sizes = [1, 256], strides = [1, 1]} : vector<9x256xf32> to vector<1x256xf32>
    %302 = vector.broadcast %301 : vector<1x256xf32> to vector<4x256xf32>
    %303 = arith.mulf %300, %302 : vector<4x256xf32>
    %c14 = arith.constant 14 : index
    %c0_153 = arith.constant 0 : index
    %c0_154 = arith.constant 0 : index
    %304 = vector.load %arg9[%c14, %c0_153, %c0_154] : memref<18x4x4xf32, #tpu.memory_space<vmem>>, vector<1x4x4xf32>
    %305 = vector.shape_cast %304 : vector<1x4x4xf32> to vector<4x4xf32>
    %cst_155 = arith.constant dense<0.000000e+00> : vector<4x256xf32>
    %306 = tpu.matmul %305, %303, %cst_155 {dimension_numbers = #tpu.dot_dimension_numbers<[1], [0], [0], [1], [0, 0, 1, 1], [], []>} : vector<4x4xf32>, vector<4x256xf32>, vector<4x256xf32> -> vector<4x256xf32>
    %307 = arith.addf %299, %306 : vector<4x256xf32>
    %c241_i32_156 = arith.constant 241 : i32
    %308 = tpu.dynamic_rotate %262 by %c241_i32_156 dim 1 : vector<4x256xf32>, i32 -> vector<4x256xf32>
    %309 = vector.extract_strided_slice %0 {offsets = [6, 0], sizes = [1, 256], strides = [1, 1]} : vector<9x256xf32> to vector<1x256xf32>
    %310 = vector.broadcast %309 : vector<1x256xf32> to vector<4x256xf32>
    %311 = arith.mulf %308, %310 : vector<4x256xf32>
    %c15 = arith.constant 15 : index
    %c0_157 = arith.constant 0 : index
    %c0_158 = arith.constant 0 : index
    %312 = vector.load %arg9[%c15, %c0_157, %c0_158] : memref<18x4x4xf32, #tpu.memory_space<vmem>>, vector<1x4x4xf32>
    %313 = vector.shape_cast %312 : vector<1x4x4xf32> to vector<4x4xf32>
    %cst_159 = arith.constant dense<0.000000e+00> : vector<4x256xf32>
    %314 = tpu.matmul %313, %311, %cst_159 {dimension_numbers = #tpu.dot_dimension_numbers<[1], [0], [0], [1], [0, 0, 1, 1], [], []>} : vector<4x4xf32>, vector<4x256xf32>, vector<4x256xf32> -> vector<4x256xf32>
    %315 = arith.addf %307, %314 : vector<4x256xf32>
    %c240_i32_160 = arith.constant 240 : i32
    %316 = tpu.dynamic_rotate %262 by %c240_i32_160 dim 1 : vector<4x256xf32>, i32 -> vector<4x256xf32>
    %317 = vector.extract_strided_slice %0 {offsets = [7, 0], sizes = [1, 256], strides = [1, 1]} : vector<9x256xf32> to vector<1x256xf32>
    %318 = vector.broadcast %317 : vector<1x256xf32> to vector<4x256xf32>
    %319 = arith.mulf %316, %318 : vector<4x256xf32>
    %c16 = arith.constant 16 : index
    %c0_161 = arith.constant 0 : index
    %c0_162 = arith.constant 0 : index
    %320 = vector.load %arg9[%c16, %c0_161, %c0_162] : memref<18x4x4xf32, #tpu.memory_space<vmem>>, vector<1x4x4xf32>
    %321 = vector.shape_cast %320 : vector<1x4x4xf32> to vector<4x4xf32>
    %cst_163 = arith.constant dense<0.000000e+00> : vector<4x256xf32>
    %322 = tpu.matmul %321, %319, %cst_163 {dimension_numbers = #tpu.dot_dimension_numbers<[1], [0], [0], [1], [0, 0, 1, 1], [], []>} : vector<4x4xf32>, vector<4x256xf32>, vector<4x256xf32> -> vector<4x256xf32>
    %323 = arith.addf %315, %322 : vector<4x256xf32>
    %c239_i32_164 = arith.constant 239 : i32
    %324 = tpu.dynamic_rotate %262 by %c239_i32_164 dim 1 : vector<4x256xf32>, i32 -> vector<4x256xf32>
    %325 = vector.extract_strided_slice %0 {offsets = [8, 0], sizes = [1, 256], strides = [1, 1]} : vector<9x256xf32> to vector<1x256xf32>
    %326 = vector.broadcast %325 : vector<1x256xf32> to vector<4x256xf32>
    %327 = arith.mulf %324, %326 : vector<4x256xf32>
    %c17 = arith.constant 17 : index
    %c0_165 = arith.constant 0 : index
    %c0_166 = arith.constant 0 : index
    %328 = vector.load %arg9[%c17, %c0_165, %c0_166] : memref<18x4x4xf32, #tpu.memory_space<vmem>>, vector<1x4x4xf32>
    %329 = vector.shape_cast %328 : vector<1x4x4xf32> to vector<4x4xf32>
    %cst_167 = arith.constant dense<0.000000e+00> : vector<4x256xf32>
    %330 = tpu.matmul %329, %327, %cst_167 {dimension_numbers = #tpu.dot_dimension_numbers<[1], [0], [0], [1], [0, 0, 1, 1], [], []>} : vector<4x4xf32>, vector<4x256xf32>, vector<4x256xf32> -> vector<4x256xf32>
    %331 = arith.addf %323, %330 : vector<4x256xf32>
    %332 = vector.broadcast %264 : vector<4x1xf32> to vector<4x256xf32>
    %333 = arith.addf %331, %332 : vector<4x256xf32>
    %cst_168 = arith.constant 0.000000e+00 : f32
    %334 = vector.broadcast %cst_168 : f32 to vector<4x256xf32>
    %335 = arith.maximumf %333, %334 : vector<4x256xf32>
    %c1_169 = arith.constant 1 : index
    %c0_170 = arith.constant 0 : index
    %c0_171 = arith.constant 0 : index
    %336 = vector.load %arg12[%c1_169, %c0_170, %c0_171] : memref<2x4x1xf32, #tpu.memory_space<vmem>>, vector<1x4x1xf32>
    %337 = vector.shape_cast %336 : vector<1x4x1xf32> to vector<4x1xf32>
    %c17_i32_172 = arith.constant 17 : i32
    %338 = tpu.dynamic_rotate %335 by %c17_i32_172 dim 1 : vector<4x256xf32>, i32 -> vector<4x256xf32>
    %339 = vector.extract_strided_slice %0 {offsets = [0, 0], sizes = [1, 256], strides = [1, 1]} : vector<9x256xf32> to vector<1x256xf32>
    %340 = vector.broadcast %339 : vector<1x256xf32> to vector<4x256xf32>
    %341 = arith.mulf %338, %340 : vector<4x256xf32>
    %c9_173 = arith.constant 9 : index
    %c0_174 = arith.constant 0 : index
    %c0_175 = arith.constant 0 : index
    %342 = vector.load %arg11[%c9_173, %c0_174, %c0_175] : memref<18x4x4xf32, #tpu.memory_space<vmem>>, vector<1x4x4xf32>
    %343 = vector.shape_cast %342 : vector<1x4x4xf32> to vector<4x4xf32>
    %cst_176 = arith.constant dense<0.000000e+00> : vector<4x256xf32>
    %344 = tpu.matmul %343, %341, %cst_176 {dimension_numbers = #tpu.dot_dimension_numbers<[1], [0], [0], [1], [0, 0, 1, 1], [], []>} : vector<4x4xf32>, vector<4x256xf32>, vector<4x256xf32> -> vector<4x256xf32>
    %c16_i32_177 = arith.constant 16 : i32
    %345 = tpu.dynamic_rotate %335 by %c16_i32_177 dim 1 : vector<4x256xf32>, i32 -> vector<4x256xf32>
    %346 = vector.extract_strided_slice %0 {offsets = [1, 0], sizes = [1, 256], strides = [1, 1]} : vector<9x256xf32> to vector<1x256xf32>
    %347 = vector.broadcast %346 : vector<1x256xf32> to vector<4x256xf32>
    %348 = arith.mulf %345, %347 : vector<4x256xf32>
    %c10_178 = arith.constant 10 : index
    %c0_179 = arith.constant 0 : index
    %c0_180 = arith.constant 0 : index
    %349 = vector.load %arg11[%c10_178, %c0_179, %c0_180] : memref<18x4x4xf32, #tpu.memory_space<vmem>>, vector<1x4x4xf32>
    %350 = vector.shape_cast %349 : vector<1x4x4xf32> to vector<4x4xf32>
    %cst_181 = arith.constant dense<0.000000e+00> : vector<4x256xf32>
    %351 = tpu.matmul %350, %348, %cst_181 {dimension_numbers = #tpu.dot_dimension_numbers<[1], [0], [0], [1], [0, 0, 1, 1], [], []>} : vector<4x4xf32>, vector<4x256xf32>, vector<4x256xf32> -> vector<4x256xf32>
    %352 = arith.addf %344, %351 : vector<4x256xf32>
    %c15_i32_182 = arith.constant 15 : i32
    %353 = tpu.dynamic_rotate %335 by %c15_i32_182 dim 1 : vector<4x256xf32>, i32 -> vector<4x256xf32>
    %354 = vector.extract_strided_slice %0 {offsets = [2, 0], sizes = [1, 256], strides = [1, 1]} : vector<9x256xf32> to vector<1x256xf32>
    %355 = vector.broadcast %354 : vector<1x256xf32> to vector<4x256xf32>
    %356 = arith.mulf %353, %355 : vector<4x256xf32>
    %c11_183 = arith.constant 11 : index
    %c0_184 = arith.constant 0 : index
    %c0_185 = arith.constant 0 : index
    %357 = vector.load %arg11[%c11_183, %c0_184, %c0_185] : memref<18x4x4xf32, #tpu.memory_space<vmem>>, vector<1x4x4xf32>
    %358 = vector.shape_cast %357 : vector<1x4x4xf32> to vector<4x4xf32>
    %cst_186 = arith.constant dense<0.000000e+00> : vector<4x256xf32>
    %359 = tpu.matmul %358, %356, %cst_186 {dimension_numbers = #tpu.dot_dimension_numbers<[1], [0], [0], [1], [0, 0, 1, 1], [], []>} : vector<4x4xf32>, vector<4x256xf32>, vector<4x256xf32> -> vector<4x256xf32>
    %360 = arith.addf %352, %359 : vector<4x256xf32>
    %c1_i32_187 = arith.constant 1 : i32
    %361 = tpu.dynamic_rotate %335 by %c1_i32_187 dim 1 : vector<4x256xf32>, i32 -> vector<4x256xf32>
    %362 = vector.extract_strided_slice %0 {offsets = [3, 0], sizes = [1, 256], strides = [1, 1]} : vector<9x256xf32> to vector<1x256xf32>
    %363 = vector.broadcast %362 : vector<1x256xf32> to vector<4x256xf32>
    %364 = arith.mulf %361, %363 : vector<4x256xf32>
    %c12_188 = arith.constant 12 : index
    %c0_189 = arith.constant 0 : index
    %c0_190 = arith.constant 0 : index
    %365 = vector.load %arg11[%c12_188, %c0_189, %c0_190] : memref<18x4x4xf32, #tpu.memory_space<vmem>>, vector<1x4x4xf32>
    %366 = vector.shape_cast %365 : vector<1x4x4xf32> to vector<4x4xf32>
    %cst_191 = arith.constant dense<0.000000e+00> : vector<4x256xf32>
    %367 = tpu.matmul %366, %364, %cst_191 {dimension_numbers = #tpu.dot_dimension_numbers<[1], [0], [0], [1], [0, 0, 1, 1], [], []>} : vector<4x4xf32>, vector<4x256xf32>, vector<4x256xf32> -> vector<4x256xf32>
    %368 = arith.addf %360, %367 : vector<4x256xf32>
    %c13_192 = arith.constant 13 : index
    %c0_193 = arith.constant 0 : index
    %c0_194 = arith.constant 0 : index
    %369 = vector.load %arg11[%c13_192, %c0_193, %c0_194] : memref<18x4x4xf32, #tpu.memory_space<vmem>>, vector<1x4x4xf32>
    %370 = vector.shape_cast %369 : vector<1x4x4xf32> to vector<4x4xf32>
    %cst_195 = arith.constant dense<0.000000e+00> : vector<4x256xf32>
    %371 = tpu.matmul %370, %335, %cst_195 {dimension_numbers = #tpu.dot_dimension_numbers<[1], [0], [0], [1], [0, 0, 1, 1], [], []>} : vector<4x4xf32>, vector<4x256xf32>, vector<4x256xf32> -> vector<4x256xf32>
    %372 = arith.addf %368, %371 : vector<4x256xf32>
    %c255_i32_196 = arith.constant 255 : i32
    %373 = tpu.dynamic_rotate %335 by %c255_i32_196 dim 1 : vector<4x256xf32>, i32 -> vector<4x256xf32>
    %374 = vector.extract_strided_slice %0 {offsets = [5, 0], sizes = [1, 256], strides = [1, 1]} : vector<9x256xf32> to vector<1x256xf32>
    %375 = vector.broadcast %374 : vector<1x256xf32> to vector<4x256xf32>
    %376 = arith.mulf %373, %375 : vector<4x256xf32>
    %c14_197 = arith.constant 14 : index
    %c0_198 = arith.constant 0 : index
    %c0_199 = arith.constant 0 : index
    %377 = vector.load %arg11[%c14_197, %c0_198, %c0_199] : memref<18x4x4xf32, #tpu.memory_space<vmem>>, vector<1x4x4xf32>
    %378 = vector.shape_cast %377 : vector<1x4x4xf32> to vector<4x4xf32>
    %cst_200 = arith.constant dense<0.000000e+00> : vector<4x256xf32>
    %379 = tpu.matmul %378, %376, %cst_200 {dimension_numbers = #tpu.dot_dimension_numbers<[1], [0], [0], [1], [0, 0, 1, 1], [], []>} : vector<4x4xf32>, vector<4x256xf32>, vector<4x256xf32> -> vector<4x256xf32>
    %380 = arith.addf %372, %379 : vector<4x256xf32>
    %c241_i32_201 = arith.constant 241 : i32
    %381 = tpu.dynamic_rotate %335 by %c241_i32_201 dim 1 : vector<4x256xf32>, i32 -> vector<4x256xf32>
    %382 = vector.extract_strided_slice %0 {offsets = [6, 0], sizes = [1, 256], strides = [1, 1]} : vector<9x256xf32> to vector<1x256xf32>
    %383 = vector.broadcast %382 : vector<1x256xf32> to vector<4x256xf32>
    %384 = arith.mulf %381, %383 : vector<4x256xf32>
    %c15_202 = arith.constant 15 : index
    %c0_203 = arith.constant 0 : index
    %c0_204 = arith.constant 0 : index
    %385 = vector.load %arg11[%c15_202, %c0_203, %c0_204] : memref<18x4x4xf32, #tpu.memory_space<vmem>>, vector<1x4x4xf32>
    %386 = vector.shape_cast %385 : vector<1x4x4xf32> to vector<4x4xf32>
    %cst_205 = arith.constant dense<0.000000e+00> : vector<4x256xf32>
    %387 = tpu.matmul %386, %384, %cst_205 {dimension_numbers = #tpu.dot_dimension_numbers<[1], [0], [0], [1], [0, 0, 1, 1], [], []>} : vector<4x4xf32>, vector<4x256xf32>, vector<4x256xf32> -> vector<4x256xf32>
    %388 = arith.addf %380, %387 : vector<4x256xf32>
    %c240_i32_206 = arith.constant 240 : i32
    %389 = tpu.dynamic_rotate %335 by %c240_i32_206 dim 1 : vector<4x256xf32>, i32 -> vector<4x256xf32>
    %390 = vector.extract_strided_slice %0 {offsets = [7, 0], sizes = [1, 256], strides = [1, 1]} : vector<9x256xf32> to vector<1x256xf32>
    %391 = vector.broadcast %390 : vector<1x256xf32> to vector<4x256xf32>
    %392 = arith.mulf %389, %391 : vector<4x256xf32>
    %c16_207 = arith.constant 16 : index
    %c0_208 = arith.constant 0 : index
    %c0_209 = arith.constant 0 : index
    %393 = vector.load %arg11[%c16_207, %c0_208, %c0_209] : memref<18x4x4xf32, #tpu.memory_space<vmem>>, vector<1x4x4xf32>
    %394 = vector.shape_cast %393 : vector<1x4x4xf32> to vector<4x4xf32>
    %cst_210 = arith.constant dense<0.000000e+00> : vector<4x256xf32>
    %395 = tpu.matmul %394, %392, %cst_210 {dimension_numbers = #tpu.dot_dimension_numbers<[1], [0], [0], [1], [0, 0, 1, 1], [], []>} : vector<4x4xf32>, vector<4x256xf32>, vector<4x256xf32> -> vector<4x256xf32>
    %396 = arith.addf %388, %395 : vector<4x256xf32>
    %c239_i32_211 = arith.constant 239 : i32
    %397 = tpu.dynamic_rotate %335 by %c239_i32_211 dim 1 : vector<4x256xf32>, i32 -> vector<4x256xf32>
    %398 = vector.extract_strided_slice %0 {offsets = [8, 0], sizes = [1, 256], strides = [1, 1]} : vector<9x256xf32> to vector<1x256xf32>
    %399 = vector.broadcast %398 : vector<1x256xf32> to vector<4x256xf32>
    %400 = arith.mulf %397, %399 : vector<4x256xf32>
    %c17_212 = arith.constant 17 : index
    %c0_213 = arith.constant 0 : index
    %c0_214 = arith.constant 0 : index
    %401 = vector.load %arg11[%c17_212, %c0_213, %c0_214] : memref<18x4x4xf32, #tpu.memory_space<vmem>>, vector<1x4x4xf32>
    %402 = vector.shape_cast %401 : vector<1x4x4xf32> to vector<4x4xf32>
    %cst_215 = arith.constant dense<0.000000e+00> : vector<4x256xf32>
    %403 = tpu.matmul %402, %400, %cst_215 {dimension_numbers = #tpu.dot_dimension_numbers<[1], [0], [0], [1], [0, 0, 1, 1], [], []>} : vector<4x4xf32>, vector<4x256xf32>, vector<4x256xf32> -> vector<4x256xf32>
    %404 = arith.addf %396, %403 : vector<4x256xf32>
    %405 = vector.broadcast %337 : vector<4x1xf32> to vector<4x256xf32>
    %406 = arith.addf %404, %405 : vector<4x256xf32>
    %407 = arith.addf %262, %406 : vector<4x256xf32>
    %408 = vector.extract_strided_slice %407 {offsets = [0, 0], sizes = [1, 256], strides = [1, 1]} : vector<4x256xf32> to vector<1x256xf32>
    %c0_216 = arith.constant 0 : index
    %c0_217 = arith.constant 0 : index
    %c0_218 = arith.constant 0 : index
    %409 = vector.load %arg13[%c0_216, %c0_217, %c0_218] : memref<1x1x256xf32, #tpu.memory_space<vmem>>, vector<1x1x256xf32>
    %410 = vector.shape_cast %409 : vector<1x1x256xf32> to vector<1x256xf32>
    %411 = vector.shape_cast %408 : vector<1x256xf32> to vector<1x1x256xf32>
    tpu.vector_store %arg13[%c0_216, %c0_217, %c0_218], %411 {strides = array<i32>} : memref<1x1x256xf32, #tpu.memory_space<vmem>>, vector<1x1x256xf32>,
    %412 = vector.broadcast %2 : f32 to vector<1x256xf32>
    %413 = arith.mulf %412, %408 : vector<1x256xf32>
    %cst_219 = arith.constant 1.000000e+00 : f32
    %414 = vector.broadcast %cst_219 : f32 to vector<1x256xf32>
    %415 = arith.addf %414, %413 : vector<1x256xf32>
    %cst_220 = arith.constant 1.000000e+00 : f32
    %416 = vector.broadcast %cst_220 : f32 to vector<1x256xf32>
    %417 = arith.divf %416, %415 : vector<1x256xf32>
    %418 = arith.mulf %413, %4 : vector<1x256xf32>
    %419 = arith.addf %8, %418 : vector<1x256xf32>
    %420 = arith.mulf %419, %417 : vector<1x256xf32>
    %c0_221 = arith.constant 0 : index
    %c0_222 = arith.constant 0 : index
    %c0_223 = arith.constant 0 : index
    %421 = vector.load %arg14[%c0_221, %c0_222, %c0_223] : memref<1x1x256xf32, #tpu.memory_space<vmem>>, vector<1x1x256xf32>
    %422 = vector.shape_cast %421 : vector<1x1x256xf32> to vector<1x256xf32>
    %423 = vector.shape_cast %420 : vector<1x256xf32> to vector<1x1x256xf32>
    tpu.vector_store %arg14[%c0_221, %c0_222, %c0_223], %423 {strides = array<i32>} : memref<1x1x256xf32, #tpu.memory_space<vmem>>, vector<1x1x256xf32>,
    %424 = arith.mulf %413, %6 : vector<1x256xf32>
    %425 = arith.addf %10, %424 : vector<1x256xf32>
    %426 = arith.mulf %425, %417 : vector<1x256xf32>
    %c0_224 = arith.constant 0 : index
    %c0_225 = arith.constant 0 : index
    %c0_226 = arith.constant 0 : index
    %427 = vector.load %arg15[%c0_224, %c0_225, %c0_226] : memref<1x1x256xf32, #tpu.memory_space<vmem>>, vector<1x1x256xf32>
    %428 = vector.shape_cast %427 : vector<1x1x256xf32> to vector<1x256xf32>
    %429 = vector.shape_cast %426 : vector<1x256xf32> to vector<1x1x256xf32>
    tpu.vector_store %arg15[%c0_224, %c0_225, %c0_226], %429 {strides = array<i32>} : memref<1x1x256xf32, #tpu.memory_space<vmem>>, vector<1x1x256xf32>,
    return
  }
  func.func @transform_0(%arg0: i32) -> i32 {
    %c0_i32 = arith.constant 0 : i32
    %c0_i32_0 = arith.constant 0 : i32
    return %c0_i32 : i32
  }
  func.func @transform_1(%arg0: i32) -> i32 {
    %c0_i32 = arith.constant 0 : i32
    %c0_i32_0 = arith.constant 0 : i32
    return %c0_i32 : i32
  }
  func.func @transform_2(%arg0: i32) -> (i32, i32, i32) {
    %c0_i32 = arith.constant 0 : i32
    %c0_i32_0 = arith.constant 0 : i32
    %c0_i32_1 = arith.constant 0 : i32
    return %arg0, %c0_i32, %c0_i32_0 : i32, i32, i32
  }
  func.func @transform_3(%arg0: i32) -> (i32, i32, i32) {
    %c0_i32 = arith.constant 0 : i32
    %c0_i32_0 = arith.constant 0 : i32
    %c0_i32_1 = arith.constant 0 : i32
    return %arg0, %c0_i32, %c0_i32_0 : i32, i32, i32
  }
  func.func @transform_4(%arg0: i32) -> (i32, i32, i32) {
    %c0_i32 = arith.constant 0 : i32
    %c0_i32_0 = arith.constant 0 : i32
    %c0_i32_1 = arith.constant 0 : i32
    return %arg0, %c0_i32, %c0_i32_0 : i32, i32, i32
  }
  func.func @transform_5(%arg0: i32) -> (i32, i32, i32) {
    %c0_i32 = arith.constant 0 : i32
    %c0_i32_0 = arith.constant 0 : i32
    %c0_i32_1 = arith.constant 0 : i32
    return %arg0, %c0_i32, %c0_i32_0 : i32, i32, i32
  }
  func.func @transform_6(%arg0: i32) -> (i32, i32) {
    %c0_i32 = arith.constant 0 : i32
    %c0_i32_0 = arith.constant 0 : i32
    %c0_i32_1 = arith.constant 0 : i32
    return %c0_i32, %c0_i32_0 : i32, i32
  }
  func.func @transform_7(%arg0: i32) -> (i32, i32, i32) {
    %c0_i32 = arith.constant 0 : i32
    %c0_i32_0 = arith.constant 0 : i32
    %c0_i32_1 = arith.constant 0 : i32
    %c0_i32_2 = arith.constant 0 : i32
    return %c0_i32, %c0_i32_0, %c0_i32_1 : i32, i32, i32
  }
  func.func @transform_8(%arg0: i32) -> (i32, i32, i32) {
    %c0_i32 = arith.constant 0 : i32
    %c0_i32_0 = arith.constant 0 : i32
    %c0_i32_1 = arith.constant 0 : i32
    %c0_i32_2 = arith.constant 0 : i32
    return %c0_i32, %c0_i32_0, %c0_i32_1 : i32, i32, i32
  }
  func.func @transform_9(%arg0: i32) -> (i32, i32, i32) {
    %c0_i32 = arith.constant 0 : i32
    %c0_i32_0 = arith.constant 0 : i32
    %c0_i32_1 = arith.constant 0 : i32
    %c0_i32_2 = arith.constant 0 : i32
    return %c0_i32, %c0_i32_0, %c0_i32_1 : i32, i32, i32
  }
  func.func @transform_10(%arg0: i32) -> (i32, i32, i32) {
    %c0_i32 = arith.constant 0 : i32
    %c0_i32_0 = arith.constant 0 : i32
    %c0_i32_1 = arith.constant 0 : i32
    %c0_i32_2 = arith.constant 0 : i32
    return %c0_i32, %c0_i32_0, %c0_i32_1 : i32, i32, i32
  }
  func.func @transform_11(%arg0: i32) -> (i32, i32, i32) {
    %c0_i32 = arith.constant 0 : i32
    %c0_i32_0 = arith.constant 0 : i32
    %c0_i32_1 = arith.constant 0 : i32
    %c0_i32_2 = arith.constant 0 : i32
    return %c0_i32, %c0_i32_0, %c0_i32_1 : i32, i32, i32
  }
  func.func @transform_12(%arg0: i32) -> (i32, i32, i32) {
    %c0_i32 = arith.constant 0 : i32
    %c0_i32_0 = arith.constant 0 : i32
    %c0_i32_1 = arith.constant 0 : i32
    return %arg0, %c0_i32, %c0_i32_0 : i32, i32, i32
  }
  func.func @transform_13(%arg0: i32) -> (i32, i32, i32) {
    %c0_i32 = arith.constant 0 : i32
    %c0_i32_0 = arith.constant 0 : i32
    %c0_i32_1 = arith.constant 0 : i32
    return %arg0, %c0_i32, %c0_i32_0 : i32, i32, i32
  }
  func.func @transform_14(%arg0: i32) -> (i32, i32, i32) {
    %c0_i32 = arith.constant 0 : i32
    %c0_i32_0 = arith.constant 0 : i32
    %c0_i32_1 = arith.constant 0 : i32
    return %arg0, %c0_i32, %c0_i32_0 : i32, i32, i32
  }
}

module attributes {stable_mosaic.version = 11 : i64} {
  func.func @_x_loop_kernel(%arg0: i32, %arg1: memref<1x2x256xf32, #tpu.memory_space<vmem>>, %arg2: memref<1x4x256xf32, #tpu.memory_space<vmem>>, %arg3: memref<9x256xf32, #tpu.memory_space<vmem>>, %arg4: memref<18x6x6xf32, #tpu.memory_space<vmem>>, %arg5: memref<2x6x1xf32, #tpu.memory_space<vmem>>, %arg6: memref<18x6x6xf32, #tpu.memory_space<vmem>>, %arg7: memref<2x6x1xf32, #tpu.memory_space<vmem>>, %arg8: memref<1x6x256xf32, #tpu.memory_space<vmem>>) attributes {dimension_semantics = [#tpu.dimension_semantics<parallel>], iteration_bounds = array<i64: 2>, scalar_prefetch = 0 : i64, scratch_operands = 0 : i64, tpu.core_type = #tpu.core_type<tc>, window_params = [{transform_indices = @transform_0, window_bounds = array<i64: 1, 2, 256>}, {transform_indices = @transform_1, window_bounds = array<i64: 1, 4, 256>}, {pipeline_mode = #tpu.pipeline_mode<synchronous>, transform_indices = @transform_2, window_bounds = array<i64: 9, 256>}, {pipeline_mode = #tpu.pipeline_mode<synchronous>, transform_indices = @transform_3, window_bounds = array<i64: 18, 6, 6>}, {pipeline_mode = #tpu.pipeline_mode<synchronous>, transform_indices = @transform_4, window_bounds = array<i64: 2, 6, 1>}, {pipeline_mode = #tpu.pipeline_mode<synchronous>, transform_indices = @transform_5, window_bounds = array<i64: 18, 6, 6>}, {pipeline_mode = #tpu.pipeline_mode<synchronous>, transform_indices = @transform_6, window_bounds = array<i64: 2, 6, 1>}, {transform_indices = @transform_7, window_bounds = array<i64: 1, 6, 256>}]} {
    %c0 = arith.constant 0 : index
    %c0_0 = arith.constant 0 : index
    %0 = vector.load %arg3[%c0, %c0_0] : memref<9x256xf32, #tpu.memory_space<vmem>>, vector<9x256xf32>
    %c0_1 = arith.constant 0 : index
    %c0_2 = arith.constant 0 : index
    %c0_3 = arith.constant 0 : index
    %1 = vector.load %arg1[%c0_1, %c0_2, %c0_3] : memref<1x2x256xf32, #tpu.memory_space<vmem>>, vector<1x2x256xf32>
    %2 = vector.shape_cast %1 : vector<1x2x256xf32> to vector<2x256xf32>
    %c0_4 = arith.constant 0 : index
    %c0_5 = arith.constant 0 : index
    %c0_6 = arith.constant 0 : index
    %3 = vector.load %arg2[%c0_4, %c0_5, %c0_6] : memref<1x4x256xf32, #tpu.memory_space<vmem>>, vector<1x4x256xf32>
    %4 = vector.shape_cast %3 : vector<1x4x256xf32> to vector<4x256xf32>
    %5 = tpu.concatenate %2, %4 in 0 : vector<2x256xf32>, vector<4x256xf32> -> vector<6x256xf32>
    %c0_7 = arith.constant 0 : index
    %c0_8 = arith.constant 0 : index
    %c0_9 = arith.constant 0 : index
    %6 = vector.load %arg5[%c0_7, %c0_8, %c0_9] : memref<2x6x1xf32, #tpu.memory_space<vmem>>, vector<1x6x1xf32>
    %7 = vector.shape_cast %6 : vector<1x6x1xf32> to vector<6x1xf32>
    %c17_i32 = arith.constant 17 : i32
    %8 = tpu.dynamic_rotate %5 by %c17_i32 dim 1 : vector<6x256xf32>, i32 -> vector<6x256xf32>
    %9 = vector.extract_strided_slice %0 {offsets = [0, 0], sizes = [1, 256], strides = [1, 1]} : vector<9x256xf32> to vector<1x256xf32>
    %10 = vector.broadcast %9 : vector<1x256xf32> to vector<6x256xf32>
    %11 = arith.mulf %8, %10 : vector<6x256xf32>
    %c0_10 = arith.constant 0 : index
    %c0_11 = arith.constant 0 : index
    %c0_12 = arith.constant 0 : index
    %12 = vector.load %arg4[%c0_10, %c0_11, %c0_12] : memref<18x6x6xf32, #tpu.memory_space<vmem>>, vector<1x6x6xf32>
    %13 = vector.shape_cast %12 : vector<1x6x6xf32> to vector<6x6xf32>
    %cst = arith.constant dense<0.000000e+00> : vector<6x256xf32>
    %14 = tpu.matmul %13, %11, %cst {dimension_numbers = #tpu.dot_dimension_numbers<[1], [0], [0], [1], [0, 0, 1, 1], [], []>} : vector<6x6xf32>, vector<6x256xf32>, vector<6x256xf32> -> vector<6x256xf32>
    %c16_i32 = arith.constant 16 : i32
    %15 = tpu.dynamic_rotate %5 by %c16_i32 dim 1 : vector<6x256xf32>, i32 -> vector<6x256xf32>
    %16 = vector.extract_strided_slice %0 {offsets = [1, 0], sizes = [1, 256], strides = [1, 1]} : vector<9x256xf32> to vector<1x256xf32>
    %17 = vector.broadcast %16 : vector<1x256xf32> to vector<6x256xf32>
    %18 = arith.mulf %15, %17 : vector<6x256xf32>
    %c1 = arith.constant 1 : index
    %c0_13 = arith.constant 0 : index
    %c0_14 = arith.constant 0 : index
    %19 = vector.load %arg4[%c1, %c0_13, %c0_14] : memref<18x6x6xf32, #tpu.memory_space<vmem>>, vector<1x6x6xf32>
    %20 = vector.shape_cast %19 : vector<1x6x6xf32> to vector<6x6xf32>
    %cst_15 = arith.constant dense<0.000000e+00> : vector<6x256xf32>
    %21 = tpu.matmul %20, %18, %cst_15 {dimension_numbers = #tpu.dot_dimension_numbers<[1], [0], [0], [1], [0, 0, 1, 1], [], []>} : vector<6x6xf32>, vector<6x256xf32>, vector<6x256xf32> -> vector<6x256xf32>
    %22 = arith.addf %14, %21 : vector<6x256xf32>
    %c15_i32 = arith.constant 15 : i32
    %23 = tpu.dynamic_rotate %5 by %c15_i32 dim 1 : vector<6x256xf32>, i32 -> vector<6x256xf32>
    %24 = vector.extract_strided_slice %0 {offsets = [2, 0], sizes = [1, 256], strides = [1, 1]} : vector<9x256xf32> to vector<1x256xf32>
    %25 = vector.broadcast %24 : vector<1x256xf32> to vector<6x256xf32>
    %26 = arith.mulf %23, %25 : vector<6x256xf32>
    %c2 = arith.constant 2 : index
    %c0_16 = arith.constant 0 : index
    %c0_17 = arith.constant 0 : index
    %27 = vector.load %arg4[%c2, %c0_16, %c0_17] : memref<18x6x6xf32, #tpu.memory_space<vmem>>, vector<1x6x6xf32>
    %28 = vector.shape_cast %27 : vector<1x6x6xf32> to vector<6x6xf32>
    %cst_18 = arith.constant dense<0.000000e+00> : vector<6x256xf32>
    %29 = tpu.matmul %28, %26, %cst_18 {dimension_numbers = #tpu.dot_dimension_numbers<[1], [0], [0], [1], [0, 0, 1, 1], [], []>} : vector<6x6xf32>, vector<6x256xf32>, vector<6x256xf32> -> vector<6x256xf32>
    %30 = arith.addf %22, %29 : vector<6x256xf32>
    %c1_i32 = arith.constant 1 : i32
    %31 = tpu.dynamic_rotate %5 by %c1_i32 dim 1 : vector<6x256xf32>, i32 -> vector<6x256xf32>
    %32 = vector.extract_strided_slice %0 {offsets = [3, 0], sizes = [1, 256], strides = [1, 1]} : vector<9x256xf32> to vector<1x256xf32>
    %33 = vector.broadcast %32 : vector<1x256xf32> to vector<6x256xf32>
    %34 = arith.mulf %31, %33 : vector<6x256xf32>
    %c3 = arith.constant 3 : index
    %c0_19 = arith.constant 0 : index
    %c0_20 = arith.constant 0 : index
    %35 = vector.load %arg4[%c3, %c0_19, %c0_20] : memref<18x6x6xf32, #tpu.memory_space<vmem>>, vector<1x6x6xf32>
    %36 = vector.shape_cast %35 : vector<1x6x6xf32> to vector<6x6xf32>
    %cst_21 = arith.constant dense<0.000000e+00> : vector<6x256xf32>
    %37 = tpu.matmul %36, %34, %cst_21 {dimension_numbers = #tpu.dot_dimension_numbers<[1], [0], [0], [1], [0, 0, 1, 1], [], []>} : vector<6x6xf32>, vector<6x256xf32>, vector<6x256xf32> -> vector<6x256xf32>
    %38 = arith.addf %30, %37 : vector<6x256xf32>
    %c4 = arith.constant 4 : index
    %c0_22 = arith.constant 0 : index
    %c0_23 = arith.constant 0 : index
    %39 = vector.load %arg4[%c4, %c0_22, %c0_23] : memref<18x6x6xf32, #tpu.memory_space<vmem>>, vector<1x6x6xf32>
    %40 = vector.shape_cast %39 : vector<1x6x6xf32> to vector<6x6xf32>
    %cst_24 = arith.constant dense<0.000000e+00> : vector<6x256xf32>
    %41 = tpu.matmul %40, %5, %cst_24 {dimension_numbers = #tpu.dot_dimension_numbers<[1], [0], [0], [1], [0, 0, 1, 1], [], []>} : vector<6x6xf32>, vector<6x256xf32>, vector<6x256xf32> -> vector<6x256xf32>
    %42 = arith.addf %38, %41 : vector<6x256xf32>
    %c255_i32 = arith.constant 255 : i32
    %43 = tpu.dynamic_rotate %5 by %c255_i32 dim 1 : vector<6x256xf32>, i32 -> vector<6x256xf32>
    %44 = vector.extract_strided_slice %0 {offsets = [5, 0], sizes = [1, 256], strides = [1, 1]} : vector<9x256xf32> to vector<1x256xf32>
    %45 = vector.broadcast %44 : vector<1x256xf32> to vector<6x256xf32>
    %46 = arith.mulf %43, %45 : vector<6x256xf32>
    %c5 = arith.constant 5 : index
    %c0_25 = arith.constant 0 : index
    %c0_26 = arith.constant 0 : index
    %47 = vector.load %arg4[%c5, %c0_25, %c0_26] : memref<18x6x6xf32, #tpu.memory_space<vmem>>, vector<1x6x6xf32>
    %48 = vector.shape_cast %47 : vector<1x6x6xf32> to vector<6x6xf32>
    %cst_27 = arith.constant dense<0.000000e+00> : vector<6x256xf32>
    %49 = tpu.matmul %48, %46, %cst_27 {dimension_numbers = #tpu.dot_dimension_numbers<[1], [0], [0], [1], [0, 0, 1, 1], [], []>} : vector<6x6xf32>, vector<6x256xf32>, vector<6x256xf32> -> vector<6x256xf32>
    %50 = arith.addf %42, %49 : vector<6x256xf32>
    %c241_i32 = arith.constant 241 : i32
    %51 = tpu.dynamic_rotate %5 by %c241_i32 dim 1 : vector<6x256xf32>, i32 -> vector<6x256xf32>
    %52 = vector.extract_strided_slice %0 {offsets = [6, 0], sizes = [1, 256], strides = [1, 1]} : vector<9x256xf32> to vector<1x256xf32>
    %53 = vector.broadcast %52 : vector<1x256xf32> to vector<6x256xf32>
    %54 = arith.mulf %51, %53 : vector<6x256xf32>
    %c6 = arith.constant 6 : index
    %c0_28 = arith.constant 0 : index
    %c0_29 = arith.constant 0 : index
    %55 = vector.load %arg4[%c6, %c0_28, %c0_29] : memref<18x6x6xf32, #tpu.memory_space<vmem>>, vector<1x6x6xf32>
    %56 = vector.shape_cast %55 : vector<1x6x6xf32> to vector<6x6xf32>
    %cst_30 = arith.constant dense<0.000000e+00> : vector<6x256xf32>
    %57 = tpu.matmul %56, %54, %cst_30 {dimension_numbers = #tpu.dot_dimension_numbers<[1], [0], [0], [1], [0, 0, 1, 1], [], []>} : vector<6x6xf32>, vector<6x256xf32>, vector<6x256xf32> -> vector<6x256xf32>
    %58 = arith.addf %50, %57 : vector<6x256xf32>
    %c240_i32 = arith.constant 240 : i32
    %59 = tpu.dynamic_rotate %5 by %c240_i32 dim 1 : vector<6x256xf32>, i32 -> vector<6x256xf32>
    %60 = vector.extract_strided_slice %0 {offsets = [7, 0], sizes = [1, 256], strides = [1, 1]} : vector<9x256xf32> to vector<1x256xf32>
    %61 = vector.broadcast %60 : vector<1x256xf32> to vector<6x256xf32>
    %62 = arith.mulf %59, %61 : vector<6x256xf32>
    %c7 = arith.constant 7 : index
    %c0_31 = arith.constant 0 : index
    %c0_32 = arith.constant 0 : index
    %63 = vector.load %arg4[%c7, %c0_31, %c0_32] : memref<18x6x6xf32, #tpu.memory_space<vmem>>, vector<1x6x6xf32>
    %64 = vector.shape_cast %63 : vector<1x6x6xf32> to vector<6x6xf32>
    %cst_33 = arith.constant dense<0.000000e+00> : vector<6x256xf32>
    %65 = tpu.matmul %64, %62, %cst_33 {dimension_numbers = #tpu.dot_dimension_numbers<[1], [0], [0], [1], [0, 0, 1, 1], [], []>} : vector<6x6xf32>, vector<6x256xf32>, vector<6x256xf32> -> vector<6x256xf32>
    %66 = arith.addf %58, %65 : vector<6x256xf32>
    %c239_i32 = arith.constant 239 : i32
    %67 = tpu.dynamic_rotate %5 by %c239_i32 dim 1 : vector<6x256xf32>, i32 -> vector<6x256xf32>
    %68 = vector.extract_strided_slice %0 {offsets = [8, 0], sizes = [1, 256], strides = [1, 1]} : vector<9x256xf32> to vector<1x256xf32>
    %69 = vector.broadcast %68 : vector<1x256xf32> to vector<6x256xf32>
    %70 = arith.mulf %67, %69 : vector<6x256xf32>
    %c8 = arith.constant 8 : index
    %c0_34 = arith.constant 0 : index
    %c0_35 = arith.constant 0 : index
    %71 = vector.load %arg4[%c8, %c0_34, %c0_35] : memref<18x6x6xf32, #tpu.memory_space<vmem>>, vector<1x6x6xf32>
    %72 = vector.shape_cast %71 : vector<1x6x6xf32> to vector<6x6xf32>
    %cst_36 = arith.constant dense<0.000000e+00> : vector<6x256xf32>
    %73 = tpu.matmul %72, %70, %cst_36 {dimension_numbers = #tpu.dot_dimension_numbers<[1], [0], [0], [1], [0, 0, 1, 1], [], []>} : vector<6x6xf32>, vector<6x256xf32>, vector<6x256xf32> -> vector<6x256xf32>
    %74 = arith.addf %66, %73 : vector<6x256xf32>
    %75 = vector.broadcast %7 : vector<6x1xf32> to vector<6x256xf32>
    %76 = arith.addf %74, %75 : vector<6x256xf32>
    %cst_37 = arith.constant 0.000000e+00 : f32
    %77 = vector.broadcast %cst_37 : f32 to vector<6x256xf32>
    %78 = arith.maximumf %76, %77 : vector<6x256xf32>
    %c0_38 = arith.constant 0 : index
    %c0_39 = arith.constant 0 : index
    %c0_40 = arith.constant 0 : index
    %79 = vector.load %arg7[%c0_38, %c0_39, %c0_40] : memref<2x6x1xf32, #tpu.memory_space<vmem>>, vector<1x6x1xf32>
    %80 = vector.shape_cast %79 : vector<1x6x1xf32> to vector<6x1xf32>
    %c17_i32_41 = arith.constant 17 : i32
    %81 = tpu.dynamic_rotate %78 by %c17_i32_41 dim 1 : vector<6x256xf32>, i32 -> vector<6x256xf32>
    %82 = vector.extract_strided_slice %0 {offsets = [0, 0], sizes = [1, 256], strides = [1, 1]} : vector<9x256xf32> to vector<1x256xf32>
    %83 = vector.broadcast %82 : vector<1x256xf32> to vector<6x256xf32>
    %84 = arith.mulf %81, %83 : vector<6x256xf32>
    %c0_42 = arith.constant 0 : index
    %c0_43 = arith.constant 0 : index
    %c0_44 = arith.constant 0 : index
    %85 = vector.load %arg6[%c0_42, %c0_43, %c0_44] : memref<18x6x6xf32, #tpu.memory_space<vmem>>, vector<1x6x6xf32>
    %86 = vector.shape_cast %85 : vector<1x6x6xf32> to vector<6x6xf32>
    %cst_45 = arith.constant dense<0.000000e+00> : vector<6x256xf32>
    %87 = tpu.matmul %86, %84, %cst_45 {dimension_numbers = #tpu.dot_dimension_numbers<[1], [0], [0], [1], [0, 0, 1, 1], [], []>} : vector<6x6xf32>, vector<6x256xf32>, vector<6x256xf32> -> vector<6x256xf32>
    %c16_i32_46 = arith.constant 16 : i32
    %88 = tpu.dynamic_rotate %78 by %c16_i32_46 dim 1 : vector<6x256xf32>, i32 -> vector<6x256xf32>
    %89 = vector.extract_strided_slice %0 {offsets = [1, 0], sizes = [1, 256], strides = [1, 1]} : vector<9x256xf32> to vector<1x256xf32>
    %90 = vector.broadcast %89 : vector<1x256xf32> to vector<6x256xf32>
    %91 = arith.mulf %88, %90 : vector<6x256xf32>
    %c1_47 = arith.constant 1 : index
    %c0_48 = arith.constant 0 : index
    %c0_49 = arith.constant 0 : index
    %92 = vector.load %arg6[%c1_47, %c0_48, %c0_49] : memref<18x6x6xf32, #tpu.memory_space<vmem>>, vector<1x6x6xf32>
    %93 = vector.shape_cast %92 : vector<1x6x6xf32> to vector<6x6xf32>
    %cst_50 = arith.constant dense<0.000000e+00> : vector<6x256xf32>
    %94 = tpu.matmul %93, %91, %cst_50 {dimension_numbers = #tpu.dot_dimension_numbers<[1], [0], [0], [1], [0, 0, 1, 1], [], []>} : vector<6x6xf32>, vector<6x256xf32>, vector<6x256xf32> -> vector<6x256xf32>
    %95 = arith.addf %87, %94 : vector<6x256xf32>
    %c15_i32_51 = arith.constant 15 : i32
    %96 = tpu.dynamic_rotate %78 by %c15_i32_51 dim 1 : vector<6x256xf32>, i32 -> vector<6x256xf32>
    %97 = vector.extract_strided_slice %0 {offsets = [2, 0], sizes = [1, 256], strides = [1, 1]} : vector<9x256xf32> to vector<1x256xf32>
    %98 = vector.broadcast %97 : vector<1x256xf32> to vector<6x256xf32>
    %99 = arith.mulf %96, %98 : vector<6x256xf32>
    %c2_52 = arith.constant 2 : index
    %c0_53 = arith.constant 0 : index
    %c0_54 = arith.constant 0 : index
    %100 = vector.load %arg6[%c2_52, %c0_53, %c0_54] : memref<18x6x6xf32, #tpu.memory_space<vmem>>, vector<1x6x6xf32>
    %101 = vector.shape_cast %100 : vector<1x6x6xf32> to vector<6x6xf32>
    %cst_55 = arith.constant dense<0.000000e+00> : vector<6x256xf32>
    %102 = tpu.matmul %101, %99, %cst_55 {dimension_numbers = #tpu.dot_dimension_numbers<[1], [0], [0], [1], [0, 0, 1, 1], [], []>} : vector<6x6xf32>, vector<6x256xf32>, vector<6x256xf32> -> vector<6x256xf32>
    %103 = arith.addf %95, %102 : vector<6x256xf32>
    %c1_i32_56 = arith.constant 1 : i32
    %104 = tpu.dynamic_rotate %78 by %c1_i32_56 dim 1 : vector<6x256xf32>, i32 -> vector<6x256xf32>
    %105 = vector.extract_strided_slice %0 {offsets = [3, 0], sizes = [1, 256], strides = [1, 1]} : vector<9x256xf32> to vector<1x256xf32>
    %106 = vector.broadcast %105 : vector<1x256xf32> to vector<6x256xf32>
    %107 = arith.mulf %104, %106 : vector<6x256xf32>
    %c3_57 = arith.constant 3 : index
    %c0_58 = arith.constant 0 : index
    %c0_59 = arith.constant 0 : index
    %108 = vector.load %arg6[%c3_57, %c0_58, %c0_59] : memref<18x6x6xf32, #tpu.memory_space<vmem>>, vector<1x6x6xf32>
    %109 = vector.shape_cast %108 : vector<1x6x6xf32> to vector<6x6xf32>
    %cst_60 = arith.constant dense<0.000000e+00> : vector<6x256xf32>
    %110 = tpu.matmul %109, %107, %cst_60 {dimension_numbers = #tpu.dot_dimension_numbers<[1], [0], [0], [1], [0, 0, 1, 1], [], []>} : vector<6x6xf32>, vector<6x256xf32>, vector<6x256xf32> -> vector<6x256xf32>
    %111 = arith.addf %103, %110 : vector<6x256xf32>
    %c4_61 = arith.constant 4 : index
    %c0_62 = arith.constant 0 : index
    %c0_63 = arith.constant 0 : index
    %112 = vector.load %arg6[%c4_61, %c0_62, %c0_63] : memref<18x6x6xf32, #tpu.memory_space<vmem>>, vector<1x6x6xf32>
    %113 = vector.shape_cast %112 : vector<1x6x6xf32> to vector<6x6xf32>
    %cst_64 = arith.constant dense<0.000000e+00> : vector<6x256xf32>
    %114 = tpu.matmul %113, %78, %cst_64 {dimension_numbers = #tpu.dot_dimension_numbers<[1], [0], [0], [1], [0, 0, 1, 1], [], []>} : vector<6x6xf32>, vector<6x256xf32>, vector<6x256xf32> -> vector<6x256xf32>
    %115 = arith.addf %111, %114 : vector<6x256xf32>
    %c255_i32_65 = arith.constant 255 : i32
    %116 = tpu.dynamic_rotate %78 by %c255_i32_65 dim 1 : vector<6x256xf32>, i32 -> vector<6x256xf32>
    %117 = vector.extract_strided_slice %0 {offsets = [5, 0], sizes = [1, 256], strides = [1, 1]} : vector<9x256xf32> to vector<1x256xf32>
    %118 = vector.broadcast %117 : vector<1x256xf32> to vector<6x256xf32>
    %119 = arith.mulf %116, %118 : vector<6x256xf32>
    %c5_66 = arith.constant 5 : index
    %c0_67 = arith.constant 0 : index
    %c0_68 = arith.constant 0 : index
    %120 = vector.load %arg6[%c5_66, %c0_67, %c0_68] : memref<18x6x6xf32, #tpu.memory_space<vmem>>, vector<1x6x6xf32>
    %121 = vector.shape_cast %120 : vector<1x6x6xf32> to vector<6x6xf32>
    %cst_69 = arith.constant dense<0.000000e+00> : vector<6x256xf32>
    %122 = tpu.matmul %121, %119, %cst_69 {dimension_numbers = #tpu.dot_dimension_numbers<[1], [0], [0], [1], [0, 0, 1, 1], [], []>} : vector<6x6xf32>, vector<6x256xf32>, vector<6x256xf32> -> vector<6x256xf32>
    %123 = arith.addf %115, %122 : vector<6x256xf32>
    %c241_i32_70 = arith.constant 241 : i32
    %124 = tpu.dynamic_rotate %78 by %c241_i32_70 dim 1 : vector<6x256xf32>, i32 -> vector<6x256xf32>
    %125 = vector.extract_strided_slice %0 {offsets = [6, 0], sizes = [1, 256], strides = [1, 1]} : vector<9x256xf32> to vector<1x256xf32>
    %126 = vector.broadcast %125 : vector<1x256xf32> to vector<6x256xf32>
    %127 = arith.mulf %124, %126 : vector<6x256xf32>
    %c6_71 = arith.constant 6 : index
    %c0_72 = arith.constant 0 : index
    %c0_73 = arith.constant 0 : index
    %128 = vector.load %arg6[%c6_71, %c0_72, %c0_73] : memref<18x6x6xf32, #tpu.memory_space<vmem>>, vector<1x6x6xf32>
    %129 = vector.shape_cast %128 : vector<1x6x6xf32> to vector<6x6xf32>
    %cst_74 = arith.constant dense<0.000000e+00> : vector<6x256xf32>
    %130 = tpu.matmul %129, %127, %cst_74 {dimension_numbers = #tpu.dot_dimension_numbers<[1], [0], [0], [1], [0, 0, 1, 1], [], []>} : vector<6x6xf32>, vector<6x256xf32>, vector<6x256xf32> -> vector<6x256xf32>
    %131 = arith.addf %123, %130 : vector<6x256xf32>
    %c240_i32_75 = arith.constant 240 : i32
    %132 = tpu.dynamic_rotate %78 by %c240_i32_75 dim 1 : vector<6x256xf32>, i32 -> vector<6x256xf32>
    %133 = vector.extract_strided_slice %0 {offsets = [7, 0], sizes = [1, 256], strides = [1, 1]} : vector<9x256xf32> to vector<1x256xf32>
    %134 = vector.broadcast %133 : vector<1x256xf32> to vector<6x256xf32>
    %135 = arith.mulf %132, %134 : vector<6x256xf32>
    %c7_76 = arith.constant 7 : index
    %c0_77 = arith.constant 0 : index
    %c0_78 = arith.constant 0 : index
    %136 = vector.load %arg6[%c7_76, %c0_77, %c0_78] : memref<18x6x6xf32, #tpu.memory_space<vmem>>, vector<1x6x6xf32>
    %137 = vector.shape_cast %136 : vector<1x6x6xf32> to vector<6x6xf32>
    %cst_79 = arith.constant dense<0.000000e+00> : vector<6x256xf32>
    %138 = tpu.matmul %137, %135, %cst_79 {dimension_numbers = #tpu.dot_dimension_numbers<[1], [0], [0], [1], [0, 0, 1, 1], [], []>} : vector<6x6xf32>, vector<6x256xf32>, vector<6x256xf32> -> vector<6x256xf32>
    %139 = arith.addf %131, %138 : vector<6x256xf32>
    %c239_i32_80 = arith.constant 239 : i32
    %140 = tpu.dynamic_rotate %78 by %c239_i32_80 dim 1 : vector<6x256xf32>, i32 -> vector<6x256xf32>
    %141 = vector.extract_strided_slice %0 {offsets = [8, 0], sizes = [1, 256], strides = [1, 1]} : vector<9x256xf32> to vector<1x256xf32>
    %142 = vector.broadcast %141 : vector<1x256xf32> to vector<6x256xf32>
    %143 = arith.mulf %140, %142 : vector<6x256xf32>
    %c8_81 = arith.constant 8 : index
    %c0_82 = arith.constant 0 : index
    %c0_83 = arith.constant 0 : index
    %144 = vector.load %arg6[%c8_81, %c0_82, %c0_83] : memref<18x6x6xf32, #tpu.memory_space<vmem>>, vector<1x6x6xf32>
    %145 = vector.shape_cast %144 : vector<1x6x6xf32> to vector<6x6xf32>
    %cst_84 = arith.constant dense<0.000000e+00> : vector<6x256xf32>
    %146 = tpu.matmul %145, %143, %cst_84 {dimension_numbers = #tpu.dot_dimension_numbers<[1], [0], [0], [1], [0, 0, 1, 1], [], []>} : vector<6x6xf32>, vector<6x256xf32>, vector<6x256xf32> -> vector<6x256xf32>
    %147 = arith.addf %139, %146 : vector<6x256xf32>
    %148 = vector.broadcast %80 : vector<6x1xf32> to vector<6x256xf32>
    %149 = arith.addf %147, %148 : vector<6x256xf32>
    %150 = arith.addf %5, %149 : vector<6x256xf32>
    %c1_85 = arith.constant 1 : index
    %c0_86 = arith.constant 0 : index
    %c0_87 = arith.constant 0 : index
    %151 = vector.load %arg5[%c1_85, %c0_86, %c0_87] : memref<2x6x1xf32, #tpu.memory_space<vmem>>, vector<1x6x1xf32>
    %152 = vector.shape_cast %151 : vector<1x6x1xf32> to vector<6x1xf32>
    %c17_i32_88 = arith.constant 17 : i32
    %153 = tpu.dynamic_rotate %150 by %c17_i32_88 dim 1 : vector<6x256xf32>, i32 -> vector<6x256xf32>
    %154 = vector.extract_strided_slice %0 {offsets = [0, 0], sizes = [1, 256], strides = [1, 1]} : vector<9x256xf32> to vector<1x256xf32>
    %155 = vector.broadcast %154 : vector<1x256xf32> to vector<6x256xf32>
    %156 = arith.mulf %153, %155 : vector<6x256xf32>
    %c9 = arith.constant 9 : index
    %c0_89 = arith.constant 0 : index
    %c0_90 = arith.constant 0 : index
    %157 = vector.load %arg4[%c9, %c0_89, %c0_90] : memref<18x6x6xf32, #tpu.memory_space<vmem>>, vector<1x6x6xf32>
    %158 = vector.shape_cast %157 : vector<1x6x6xf32> to vector<6x6xf32>
    %cst_91 = arith.constant dense<0.000000e+00> : vector<6x256xf32>
    %159 = tpu.matmul %158, %156, %cst_91 {dimension_numbers = #tpu.dot_dimension_numbers<[1], [0], [0], [1], [0, 0, 1, 1], [], []>} : vector<6x6xf32>, vector<6x256xf32>, vector<6x256xf32> -> vector<6x256xf32>
    %c16_i32_92 = arith.constant 16 : i32
    %160 = tpu.dynamic_rotate %150 by %c16_i32_92 dim 1 : vector<6x256xf32>, i32 -> vector<6x256xf32>
    %161 = vector.extract_strided_slice %0 {offsets = [1, 0], sizes = [1, 256], strides = [1, 1]} : vector<9x256xf32> to vector<1x256xf32>
    %162 = vector.broadcast %161 : vector<1x256xf32> to vector<6x256xf32>
    %163 = arith.mulf %160, %162 : vector<6x256xf32>
    %c10 = arith.constant 10 : index
    %c0_93 = arith.constant 0 : index
    %c0_94 = arith.constant 0 : index
    %164 = vector.load %arg4[%c10, %c0_93, %c0_94] : memref<18x6x6xf32, #tpu.memory_space<vmem>>, vector<1x6x6xf32>
    %165 = vector.shape_cast %164 : vector<1x6x6xf32> to vector<6x6xf32>
    %cst_95 = arith.constant dense<0.000000e+00> : vector<6x256xf32>
    %166 = tpu.matmul %165, %163, %cst_95 {dimension_numbers = #tpu.dot_dimension_numbers<[1], [0], [0], [1], [0, 0, 1, 1], [], []>} : vector<6x6xf32>, vector<6x256xf32>, vector<6x256xf32> -> vector<6x256xf32>
    %167 = arith.addf %159, %166 : vector<6x256xf32>
    %c15_i32_96 = arith.constant 15 : i32
    %168 = tpu.dynamic_rotate %150 by %c15_i32_96 dim 1 : vector<6x256xf32>, i32 -> vector<6x256xf32>
    %169 = vector.extract_strided_slice %0 {offsets = [2, 0], sizes = [1, 256], strides = [1, 1]} : vector<9x256xf32> to vector<1x256xf32>
    %170 = vector.broadcast %169 : vector<1x256xf32> to vector<6x256xf32>
    %171 = arith.mulf %168, %170 : vector<6x256xf32>
    %c11 = arith.constant 11 : index
    %c0_97 = arith.constant 0 : index
    %c0_98 = arith.constant 0 : index
    %172 = vector.load %arg4[%c11, %c0_97, %c0_98] : memref<18x6x6xf32, #tpu.memory_space<vmem>>, vector<1x6x6xf32>
    %173 = vector.shape_cast %172 : vector<1x6x6xf32> to vector<6x6xf32>
    %cst_99 = arith.constant dense<0.000000e+00> : vector<6x256xf32>
    %174 = tpu.matmul %173, %171, %cst_99 {dimension_numbers = #tpu.dot_dimension_numbers<[1], [0], [0], [1], [0, 0, 1, 1], [], []>} : vector<6x6xf32>, vector<6x256xf32>, vector<6x256xf32> -> vector<6x256xf32>
    %175 = arith.addf %167, %174 : vector<6x256xf32>
    %c1_i32_100 = arith.constant 1 : i32
    %176 = tpu.dynamic_rotate %150 by %c1_i32_100 dim 1 : vector<6x256xf32>, i32 -> vector<6x256xf32>
    %177 = vector.extract_strided_slice %0 {offsets = [3, 0], sizes = [1, 256], strides = [1, 1]} : vector<9x256xf32> to vector<1x256xf32>
    %178 = vector.broadcast %177 : vector<1x256xf32> to vector<6x256xf32>
    %179 = arith.mulf %176, %178 : vector<6x256xf32>
    %c12 = arith.constant 12 : index
    %c0_101 = arith.constant 0 : index
    %c0_102 = arith.constant 0 : index
    %180 = vector.load %arg4[%c12, %c0_101, %c0_102] : memref<18x6x6xf32, #tpu.memory_space<vmem>>, vector<1x6x6xf32>
    %181 = vector.shape_cast %180 : vector<1x6x6xf32> to vector<6x6xf32>
    %cst_103 = arith.constant dense<0.000000e+00> : vector<6x256xf32>
    %182 = tpu.matmul %181, %179, %cst_103 {dimension_numbers = #tpu.dot_dimension_numbers<[1], [0], [0], [1], [0, 0, 1, 1], [], []>} : vector<6x6xf32>, vector<6x256xf32>, vector<6x256xf32> -> vector<6x256xf32>
    %183 = arith.addf %175, %182 : vector<6x256xf32>
    %c13 = arith.constant 13 : index
    %c0_104 = arith.constant 0 : index
    %c0_105 = arith.constant 0 : index
    %184 = vector.load %arg4[%c13, %c0_104, %c0_105] : memref<18x6x6xf32, #tpu.memory_space<vmem>>, vector<1x6x6xf32>
    %185 = vector.shape_cast %184 : vector<1x6x6xf32> to vector<6x6xf32>
    %cst_106 = arith.constant dense<0.000000e+00> : vector<6x256xf32>
    %186 = tpu.matmul %185, %150, %cst_106 {dimension_numbers = #tpu.dot_dimension_numbers<[1], [0], [0], [1], [0, 0, 1, 1], [], []>} : vector<6x6xf32>, vector<6x256xf32>, vector<6x256xf32> -> vector<6x256xf32>
    %187 = arith.addf %183, %186 : vector<6x256xf32>
    %c255_i32_107 = arith.constant 255 : i32
    %188 = tpu.dynamic_rotate %150 by %c255_i32_107 dim 1 : vector<6x256xf32>, i32 -> vector<6x256xf32>
    %189 = vector.extract_strided_slice %0 {offsets = [5, 0], sizes = [1, 256], strides = [1, 1]} : vector<9x256xf32> to vector<1x256xf32>
    %190 = vector.broadcast %189 : vector<1x256xf32> to vector<6x256xf32>
    %191 = arith.mulf %188, %190 : vector<6x256xf32>
    %c14 = arith.constant 14 : index
    %c0_108 = arith.constant 0 : index
    %c0_109 = arith.constant 0 : index
    %192 = vector.load %arg4[%c14, %c0_108, %c0_109] : memref<18x6x6xf32, #tpu.memory_space<vmem>>, vector<1x6x6xf32>
    %193 = vector.shape_cast %192 : vector<1x6x6xf32> to vector<6x6xf32>
    %cst_110 = arith.constant dense<0.000000e+00> : vector<6x256xf32>
    %194 = tpu.matmul %193, %191, %cst_110 {dimension_numbers = #tpu.dot_dimension_numbers<[1], [0], [0], [1], [0, 0, 1, 1], [], []>} : vector<6x6xf32>, vector<6x256xf32>, vector<6x256xf32> -> vector<6x256xf32>
    %195 = arith.addf %187, %194 : vector<6x256xf32>
    %c241_i32_111 = arith.constant 241 : i32
    %196 = tpu.dynamic_rotate %150 by %c241_i32_111 dim 1 : vector<6x256xf32>, i32 -> vector<6x256xf32>
    %197 = vector.extract_strided_slice %0 {offsets = [6, 0], sizes = [1, 256], strides = [1, 1]} : vector<9x256xf32> to vector<1x256xf32>
    %198 = vector.broadcast %197 : vector<1x256xf32> to vector<6x256xf32>
    %199 = arith.mulf %196, %198 : vector<6x256xf32>
    %c15 = arith.constant 15 : index
    %c0_112 = arith.constant 0 : index
    %c0_113 = arith.constant 0 : index
    %200 = vector.load %arg4[%c15, %c0_112, %c0_113] : memref<18x6x6xf32, #tpu.memory_space<vmem>>, vector<1x6x6xf32>
    %201 = vector.shape_cast %200 : vector<1x6x6xf32> to vector<6x6xf32>
    %cst_114 = arith.constant dense<0.000000e+00> : vector<6x256xf32>
    %202 = tpu.matmul %201, %199, %cst_114 {dimension_numbers = #tpu.dot_dimension_numbers<[1], [0], [0], [1], [0, 0, 1, 1], [], []>} : vector<6x6xf32>, vector<6x256xf32>, vector<6x256xf32> -> vector<6x256xf32>
    %203 = arith.addf %195, %202 : vector<6x256xf32>
    %c240_i32_115 = arith.constant 240 : i32
    %204 = tpu.dynamic_rotate %150 by %c240_i32_115 dim 1 : vector<6x256xf32>, i32 -> vector<6x256xf32>
    %205 = vector.extract_strided_slice %0 {offsets = [7, 0], sizes = [1, 256], strides = [1, 1]} : vector<9x256xf32> to vector<1x256xf32>
    %206 = vector.broadcast %205 : vector<1x256xf32> to vector<6x256xf32>
    %207 = arith.mulf %204, %206 : vector<6x256xf32>
    %c16 = arith.constant 16 : index
    %c0_116 = arith.constant 0 : index
    %c0_117 = arith.constant 0 : index
    %208 = vector.load %arg4[%c16, %c0_116, %c0_117] : memref<18x6x6xf32, #tpu.memory_space<vmem>>, vector<1x6x6xf32>
    %209 = vector.shape_cast %208 : vector<1x6x6xf32> to vector<6x6xf32>
    %cst_118 = arith.constant dense<0.000000e+00> : vector<6x256xf32>
    %210 = tpu.matmul %209, %207, %cst_118 {dimension_numbers = #tpu.dot_dimension_numbers<[1], [0], [0], [1], [0, 0, 1, 1], [], []>} : vector<6x6xf32>, vector<6x256xf32>, vector<6x256xf32> -> vector<6x256xf32>
    %211 = arith.addf %203, %210 : vector<6x256xf32>
    %c239_i32_119 = arith.constant 239 : i32
    %212 = tpu.dynamic_rotate %150 by %c239_i32_119 dim 1 : vector<6x256xf32>, i32 -> vector<6x256xf32>
    %213 = vector.extract_strided_slice %0 {offsets = [8, 0], sizes = [1, 256], strides = [1, 1]} : vector<9x256xf32> to vector<1x256xf32>
    %214 = vector.broadcast %213 : vector<1x256xf32> to vector<6x256xf32>
    %215 = arith.mulf %212, %214 : vector<6x256xf32>
    %c17 = arith.constant 17 : index
    %c0_120 = arith.constant 0 : index
    %c0_121 = arith.constant 0 : index
    %216 = vector.load %arg4[%c17, %c0_120, %c0_121] : memref<18x6x6xf32, #tpu.memory_space<vmem>>, vector<1x6x6xf32>
    %217 = vector.shape_cast %216 : vector<1x6x6xf32> to vector<6x6xf32>
    %cst_122 = arith.constant dense<0.000000e+00> : vector<6x256xf32>
    %218 = tpu.matmul %217, %215, %cst_122 {dimension_numbers = #tpu.dot_dimension_numbers<[1], [0], [0], [1], [0, 0, 1, 1], [], []>} : vector<6x6xf32>, vector<6x256xf32>, vector<6x256xf32> -> vector<6x256xf32>
    %219 = arith.addf %211, %218 : vector<6x256xf32>
    %220 = vector.broadcast %152 : vector<6x1xf32> to vector<6x256xf32>
    %221 = arith.addf %219, %220 : vector<6x256xf32>
    %cst_123 = arith.constant 0.000000e+00 : f32
    %222 = vector.broadcast %cst_123 : f32 to vector<6x256xf32>
    %223 = arith.maximumf %221, %222 : vector<6x256xf32>
    %c1_124 = arith.constant 1 : index
    %c0_125 = arith.constant 0 : index
    %c0_126 = arith.constant 0 : index
    %224 = vector.load %arg7[%c1_124, %c0_125, %c0_126] : memref<2x6x1xf32, #tpu.memory_space<vmem>>, vector<1x6x1xf32>
    %225 = vector.shape_cast %224 : vector<1x6x1xf32> to vector<6x1xf32>
    %c17_i32_127 = arith.constant 17 : i32
    %226 = tpu.dynamic_rotate %223 by %c17_i32_127 dim 1 : vector<6x256xf32>, i32 -> vector<6x256xf32>
    %227 = vector.extract_strided_slice %0 {offsets = [0, 0], sizes = [1, 256], strides = [1, 1]} : vector<9x256xf32> to vector<1x256xf32>
    %228 = vector.broadcast %227 : vector<1x256xf32> to vector<6x256xf32>
    %229 = arith.mulf %226, %228 : vector<6x256xf32>
    %c9_128 = arith.constant 9 : index
    %c0_129 = arith.constant 0 : index
    %c0_130 = arith.constant 0 : index
    %230 = vector.load %arg6[%c9_128, %c0_129, %c0_130] : memref<18x6x6xf32, #tpu.memory_space<vmem>>, vector<1x6x6xf32>
    %231 = vector.shape_cast %230 : vector<1x6x6xf32> to vector<6x6xf32>
    %cst_131 = arith.constant dense<0.000000e+00> : vector<6x256xf32>
    %232 = tpu.matmul %231, %229, %cst_131 {dimension_numbers = #tpu.dot_dimension_numbers<[1], [0], [0], [1], [0, 0, 1, 1], [], []>} : vector<6x6xf32>, vector<6x256xf32>, vector<6x256xf32> -> vector<6x256xf32>
    %c16_i32_132 = arith.constant 16 : i32
    %233 = tpu.dynamic_rotate %223 by %c16_i32_132 dim 1 : vector<6x256xf32>, i32 -> vector<6x256xf32>
    %234 = vector.extract_strided_slice %0 {offsets = [1, 0], sizes = [1, 256], strides = [1, 1]} : vector<9x256xf32> to vector<1x256xf32>
    %235 = vector.broadcast %234 : vector<1x256xf32> to vector<6x256xf32>
    %236 = arith.mulf %233, %235 : vector<6x256xf32>
    %c10_133 = arith.constant 10 : index
    %c0_134 = arith.constant 0 : index
    %c0_135 = arith.constant 0 : index
    %237 = vector.load %arg6[%c10_133, %c0_134, %c0_135] : memref<18x6x6xf32, #tpu.memory_space<vmem>>, vector<1x6x6xf32>
    %238 = vector.shape_cast %237 : vector<1x6x6xf32> to vector<6x6xf32>
    %cst_136 = arith.constant dense<0.000000e+00> : vector<6x256xf32>
    %239 = tpu.matmul %238, %236, %cst_136 {dimension_numbers = #tpu.dot_dimension_numbers<[1], [0], [0], [1], [0, 0, 1, 1], [], []>} : vector<6x6xf32>, vector<6x256xf32>, vector<6x256xf32> -> vector<6x256xf32>
    %240 = arith.addf %232, %239 : vector<6x256xf32>
    %c15_i32_137 = arith.constant 15 : i32
    %241 = tpu.dynamic_rotate %223 by %c15_i32_137 dim 1 : vector<6x256xf32>, i32 -> vector<6x256xf32>
    %242 = vector.extract_strided_slice %0 {offsets = [2, 0], sizes = [1, 256], strides = [1, 1]} : vector<9x256xf32> to vector<1x256xf32>
    %243 = vector.broadcast %242 : vector<1x256xf32> to vector<6x256xf32>
    %244 = arith.mulf %241, %243 : vector<6x256xf32>
    %c11_138 = arith.constant 11 : index
    %c0_139 = arith.constant 0 : index
    %c0_140 = arith.constant 0 : index
    %245 = vector.load %arg6[%c11_138, %c0_139, %c0_140] : memref<18x6x6xf32, #tpu.memory_space<vmem>>, vector<1x6x6xf32>
    %246 = vector.shape_cast %245 : vector<1x6x6xf32> to vector<6x6xf32>
    %cst_141 = arith.constant dense<0.000000e+00> : vector<6x256xf32>
    %247 = tpu.matmul %246, %244, %cst_141 {dimension_numbers = #tpu.dot_dimension_numbers<[1], [0], [0], [1], [0, 0, 1, 1], [], []>} : vector<6x6xf32>, vector<6x256xf32>, vector<6x256xf32> -> vector<6x256xf32>
    %248 = arith.addf %240, %247 : vector<6x256xf32>
    %c1_i32_142 = arith.constant 1 : i32
    %249 = tpu.dynamic_rotate %223 by %c1_i32_142 dim 1 : vector<6x256xf32>, i32 -> vector<6x256xf32>
    %250 = vector.extract_strided_slice %0 {offsets = [3, 0], sizes = [1, 256], strides = [1, 1]} : vector<9x256xf32> to vector<1x256xf32>
    %251 = vector.broadcast %250 : vector<1x256xf32> to vector<6x256xf32>
    %252 = arith.mulf %249, %251 : vector<6x256xf32>
    %c12_143 = arith.constant 12 : index
    %c0_144 = arith.constant 0 : index
    %c0_145 = arith.constant 0 : index
    %253 = vector.load %arg6[%c12_143, %c0_144, %c0_145] : memref<18x6x6xf32, #tpu.memory_space<vmem>>, vector<1x6x6xf32>
    %254 = vector.shape_cast %253 : vector<1x6x6xf32> to vector<6x6xf32>
    %cst_146 = arith.constant dense<0.000000e+00> : vector<6x256xf32>
    %255 = tpu.matmul %254, %252, %cst_146 {dimension_numbers = #tpu.dot_dimension_numbers<[1], [0], [0], [1], [0, 0, 1, 1], [], []>} : vector<6x6xf32>, vector<6x256xf32>, vector<6x256xf32> -> vector<6x256xf32>
    %256 = arith.addf %248, %255 : vector<6x256xf32>
    %c13_147 = arith.constant 13 : index
    %c0_148 = arith.constant 0 : index
    %c0_149 = arith.constant 0 : index
    %257 = vector.load %arg6[%c13_147, %c0_148, %c0_149] : memref<18x6x6xf32, #tpu.memory_space<vmem>>, vector<1x6x6xf32>
    %258 = vector.shape_cast %257 : vector<1x6x6xf32> to vector<6x6xf32>
    %cst_150 = arith.constant dense<0.000000e+00> : vector<6x256xf32>
    %259 = tpu.matmul %258, %223, %cst_150 {dimension_numbers = #tpu.dot_dimension_numbers<[1], [0], [0], [1], [0, 0, 1, 1], [], []>} : vector<6x6xf32>, vector<6x256xf32>, vector<6x256xf32> -> vector<6x256xf32>
    %260 = arith.addf %256, %259 : vector<6x256xf32>
    %c255_i32_151 = arith.constant 255 : i32
    %261 = tpu.dynamic_rotate %223 by %c255_i32_151 dim 1 : vector<6x256xf32>, i32 -> vector<6x256xf32>
    %262 = vector.extract_strided_slice %0 {offsets = [5, 0], sizes = [1, 256], strides = [1, 1]} : vector<9x256xf32> to vector<1x256xf32>
    %263 = vector.broadcast %262 : vector<1x256xf32> to vector<6x256xf32>
    %264 = arith.mulf %261, %263 : vector<6x256xf32>
    %c14_152 = arith.constant 14 : index
    %c0_153 = arith.constant 0 : index
    %c0_154 = arith.constant 0 : index
    %265 = vector.load %arg6[%c14_152, %c0_153, %c0_154] : memref<18x6x6xf32, #tpu.memory_space<vmem>>, vector<1x6x6xf32>
    %266 = vector.shape_cast %265 : vector<1x6x6xf32> to vector<6x6xf32>
    %cst_155 = arith.constant dense<0.000000e+00> : vector<6x256xf32>
    %267 = tpu.matmul %266, %264, %cst_155 {dimension_numbers = #tpu.dot_dimension_numbers<[1], [0], [0], [1], [0, 0, 1, 1], [], []>} : vector<6x6xf32>, vector<6x256xf32>, vector<6x256xf32> -> vector<6x256xf32>
    %268 = arith.addf %260, %267 : vector<6x256xf32>
    %c241_i32_156 = arith.constant 241 : i32
    %269 = tpu.dynamic_rotate %223 by %c241_i32_156 dim 1 : vector<6x256xf32>, i32 -> vector<6x256xf32>
    %270 = vector.extract_strided_slice %0 {offsets = [6, 0], sizes = [1, 256], strides = [1, 1]} : vector<9x256xf32> to vector<1x256xf32>
    %271 = vector.broadcast %270 : vector<1x256xf32> to vector<6x256xf32>
    %272 = arith.mulf %269, %271 : vector<6x256xf32>
    %c15_157 = arith.constant 15 : index
    %c0_158 = arith.constant 0 : index
    %c0_159 = arith.constant 0 : index
    %273 = vector.load %arg6[%c15_157, %c0_158, %c0_159] : memref<18x6x6xf32, #tpu.memory_space<vmem>>, vector<1x6x6xf32>
    %274 = vector.shape_cast %273 : vector<1x6x6xf32> to vector<6x6xf32>
    %cst_160 = arith.constant dense<0.000000e+00> : vector<6x256xf32>
    %275 = tpu.matmul %274, %272, %cst_160 {dimension_numbers = #tpu.dot_dimension_numbers<[1], [0], [0], [1], [0, 0, 1, 1], [], []>} : vector<6x6xf32>, vector<6x256xf32>, vector<6x256xf32> -> vector<6x256xf32>
    %276 = arith.addf %268, %275 : vector<6x256xf32>
    %c240_i32_161 = arith.constant 240 : i32
    %277 = tpu.dynamic_rotate %223 by %c240_i32_161 dim 1 : vector<6x256xf32>, i32 -> vector<6x256xf32>
    %278 = vector.extract_strided_slice %0 {offsets = [7, 0], sizes = [1, 256], strides = [1, 1]} : vector<9x256xf32> to vector<1x256xf32>
    %279 = vector.broadcast %278 : vector<1x256xf32> to vector<6x256xf32>
    %280 = arith.mulf %277, %279 : vector<6x256xf32>
    %c16_162 = arith.constant 16 : index
    %c0_163 = arith.constant 0 : index
    %c0_164 = arith.constant 0 : index
    %281 = vector.load %arg6[%c16_162, %c0_163, %c0_164] : memref<18x6x6xf32, #tpu.memory_space<vmem>>, vector<1x6x6xf32>
    %282 = vector.shape_cast %281 : vector<1x6x6xf32> to vector<6x6xf32>
    %cst_165 = arith.constant dense<0.000000e+00> : vector<6x256xf32>
    %283 = tpu.matmul %282, %280, %cst_165 {dimension_numbers = #tpu.dot_dimension_numbers<[1], [0], [0], [1], [0, 0, 1, 1], [], []>} : vector<6x6xf32>, vector<6x256xf32>, vector<6x256xf32> -> vector<6x256xf32>
    %284 = arith.addf %276, %283 : vector<6x256xf32>
    %c239_i32_166 = arith.constant 239 : i32
    %285 = tpu.dynamic_rotate %223 by %c239_i32_166 dim 1 : vector<6x256xf32>, i32 -> vector<6x256xf32>
    %286 = vector.extract_strided_slice %0 {offsets = [8, 0], sizes = [1, 256], strides = [1, 1]} : vector<9x256xf32> to vector<1x256xf32>
    %287 = vector.broadcast %286 : vector<1x256xf32> to vector<6x256xf32>
    %288 = arith.mulf %285, %287 : vector<6x256xf32>
    %c17_167 = arith.constant 17 : index
    %c0_168 = arith.constant 0 : index
    %c0_169 = arith.constant 0 : index
    %289 = vector.load %arg6[%c17_167, %c0_168, %c0_169] : memref<18x6x6xf32, #tpu.memory_space<vmem>>, vector<1x6x6xf32>
    %290 = vector.shape_cast %289 : vector<1x6x6xf32> to vector<6x6xf32>
    %cst_170 = arith.constant dense<0.000000e+00> : vector<6x256xf32>
    %291 = tpu.matmul %290, %288, %cst_170 {dimension_numbers = #tpu.dot_dimension_numbers<[1], [0], [0], [1], [0, 0, 1, 1], [], []>} : vector<6x6xf32>, vector<6x256xf32>, vector<6x256xf32> -> vector<6x256xf32>
    %292 = arith.addf %284, %291 : vector<6x256xf32>
    %293 = vector.broadcast %225 : vector<6x1xf32> to vector<6x256xf32>
    %294 = arith.addf %292, %293 : vector<6x256xf32>
    %295 = arith.addf %150, %294 : vector<6x256xf32>
    %c0_171 = arith.constant 0 : index
    %c0_172 = arith.constant 0 : index
    %c0_173 = arith.constant 0 : index
    %296 = vector.load %arg8[%c0_171, %c0_172, %c0_173] : memref<1x6x256xf32, #tpu.memory_space<vmem>>, vector<1x6x256xf32>
    %297 = vector.shape_cast %296 : vector<1x6x256xf32> to vector<6x256xf32>
    %298 = vector.shape_cast %295 : vector<6x256xf32> to vector<1x6x256xf32>
    tpu.vector_store %arg8[%c0_171, %c0_172, %c0_173], %298 {strides = array<i32>} : memref<1x6x256xf32, #tpu.memory_space<vmem>>, vector<1x6x256xf32>,
    return
  }
  func.func @transform_0(%arg0: i32) -> (i32, i32, i32) {
    %c0_i32 = arith.constant 0 : i32
    %c0_i32_0 = arith.constant 0 : i32
    %c0_i32_1 = arith.constant 0 : i32
    return %arg0, %c0_i32, %c0_i32_0 : i32, i32, i32
  }
  func.func @transform_1(%arg0: i32) -> (i32, i32, i32) {
    %c0_i32 = arith.constant 0 : i32
    %c0_i32_0 = arith.constant 0 : i32
    %c0_i32_1 = arith.constant 0 : i32
    return %arg0, %c0_i32, %c0_i32_0 : i32, i32, i32
  }
  func.func @transform_2(%arg0: i32) -> (i32, i32) {
    %c0_i32 = arith.constant 0 : i32
    %c0_i32_0 = arith.constant 0 : i32
    %c0_i32_1 = arith.constant 0 : i32
    return %c0_i32, %c0_i32_0 : i32, i32
  }
  func.func @transform_3(%arg0: i32) -> (i32, i32, i32) {
    %c0_i32 = arith.constant 0 : i32
    %c0_i32_0 = arith.constant 0 : i32
    %c0_i32_1 = arith.constant 0 : i32
    %c0_i32_2 = arith.constant 0 : i32
    return %c0_i32, %c0_i32_0, %c0_i32_1 : i32, i32, i32
  }
  func.func @transform_4(%arg0: i32) -> (i32, i32, i32) {
    %c0_i32 = arith.constant 0 : i32
    %c0_i32_0 = arith.constant 0 : i32
    %c0_i32_1 = arith.constant 0 : i32
    %c0_i32_2 = arith.constant 0 : i32
    return %c0_i32, %c0_i32_0, %c0_i32_1 : i32, i32, i32
  }
  func.func @transform_5(%arg0: i32) -> (i32, i32, i32) {
    %c0_i32 = arith.constant 0 : i32
    %c0_i32_0 = arith.constant 0 : i32
    %c0_i32_1 = arith.constant 0 : i32
    %c0_i32_2 = arith.constant 0 : i32
    return %c0_i32, %c0_i32_0, %c0_i32_1 : i32, i32, i32
  }
  func.func @transform_6(%arg0: i32) -> (i32, i32, i32) {
    %c0_i32 = arith.constant 0 : i32
    %c0_i32_0 = arith.constant 0 : i32
    %c0_i32_1 = arith.constant 0 : i32
    %c0_i32_2 = arith.constant 0 : i32
    return %c0_i32, %c0_i32_0, %c0_i32_1 : i32, i32, i32
  }
  func.func @transform_7(%arg0: i32) -> (i32, i32, i32) {
    %c0_i32 = arith.constant 0 : i32
    %c0_i32_0 = arith.constant 0 : i32
    %c0_i32_1 = arith.constant 0 : i32
    return %arg0, %c0_i32, %c0_i32_0 : i32, i32, i32
  }
}

module attributes {stable_mosaic.version = 11 : i64} {
  func.func @_mask_stage_kernel(%arg0: i32, %arg1: memref<1xf32, #tpu.memory_space<smem>>, %arg2: memref<1xf32, #tpu.memory_space<smem>>, %arg3: memref<1x1x256xf32, #tpu.memory_space<vmem>>, %arg4: memref<1x1x256xf32, #tpu.memory_space<vmem>>, %arg5: memref<1x1x256xf32, #tpu.memory_space<vmem>>, %arg6: memref<1x1x256xf32, #tpu.memory_space<vmem>>, %arg7: memref<9x256xf32, #tpu.memory_space<vmem>>, %arg8: memref<9x3x1xf32, #tpu.memory_space<vmem>>, %arg9: memref<18x4x4xf32, #tpu.memory_space<vmem>>, %arg10: memref<2x4x1xf32, #tpu.memory_space<vmem>>, %arg11: memref<18x4x4xf32, #tpu.memory_space<vmem>>, %arg12: memref<2x4x1xf32, #tpu.memory_space<vmem>>, %arg13: memref<1x1x256xf32, #tpu.memory_space<vmem>>, %arg14: memref<1x1x256xf32, #tpu.memory_space<vmem>>, %arg15: memref<1x1x256xf32, #tpu.memory_space<vmem>>) attributes {dimension_semantics = [#tpu.dimension_semantics<parallel>], iteration_bounds = array<i64: 2>, scalar_prefetch = 0 : i64, scratch_operands = 0 : i64, tpu.core_type = #tpu.core_type<tc>, window_params = [{transform_indices = @transform_0, window_bounds = array<i64: 1>}, {transform_indices = @transform_1, window_bounds = array<i64: 1>}, {transform_indices = @transform_2, window_bounds = array<i64: 1, 1, 256>}, {transform_indices = @transform_3, window_bounds = array<i64: 1, 1, 256>}, {transform_indices = @transform_4, window_bounds = array<i64: 1, 1, 256>}, {transform_indices = @transform_5, window_bounds = array<i64: 1, 1, 256>}, {pipeline_mode = #tpu.pipeline_mode<synchronous>, transform_indices = @transform_6, window_bounds = array<i64: 9, 256>}, {pipeline_mode = #tpu.pipeline_mode<synchronous>, transform_indices = @transform_7, window_bounds = array<i64: 9, 3, 1>}, {pipeline_mode = #tpu.pipeline_mode<synchronous>, transform_indices = @transform_8, window_bounds = array<i64: 18, 4, 4>}, {pipeline_mode = #tpu.pipeline_mode<synchronous>, transform_indices = @transform_9, window_bounds = array<i64: 2, 4, 1>}, {pipeline_mode = #tpu.pipeline_mode<synchronous>, transform_indices = @transform_10, window_bounds = array<i64: 18, 4, 4>}, {pipeline_mode = #tpu.pipeline_mode<synchronous>, transform_indices = @transform_11, window_bounds = array<i64: 2, 4, 1>}, {transform_indices = @transform_12, window_bounds = array<i64: 1, 1, 256>}, {transform_indices = @transform_13, window_bounds = array<i64: 1, 1, 256>}, {transform_indices = @transform_14, window_bounds = array<i64: 1, 1, 256>}]} {
    %c0 = arith.constant 0 : index
    %c0_0 = arith.constant 0 : index
    %0 = vector.load %arg7[%c0, %c0_0] : memref<9x256xf32, #tpu.memory_space<vmem>>, vector<9x256xf32>
    %c0_1 = arith.constant 0 : index
    %1 = memref.load %arg1[%c0_1] : memref<1xf32, #tpu.memory_space<smem>>
    %c0_2 = arith.constant 0 : index
    %2 = memref.load %arg2[%c0_2] : memref<1xf32, #tpu.memory_space<smem>>
    %c0_3 = arith.constant 0 : index
    %c0_4 = arith.constant 0 : index
    %c0_5 = arith.constant 0 : index
    %3 = vector.load %arg3[%c0_3, %c0_4, %c0_5] : memref<1x1x256xf32, #tpu.memory_space<vmem>>, vector<1x1x256xf32>
    %4 = vector.shape_cast %3 : vector<1x1x256xf32> to vector<1x256xf32>
    %c0_6 = arith.constant 0 : index
    %c0_7 = arith.constant 0 : index
    %c0_8 = arith.constant 0 : index
    %5 = vector.load %arg4[%c0_6, %c0_7, %c0_8] : memref<1x1x256xf32, #tpu.memory_space<vmem>>, vector<1x1x256xf32>
    %6 = vector.shape_cast %5 : vector<1x1x256xf32> to vector<1x256xf32>
    %c0_9 = arith.constant 0 : index
    %c0_10 = arith.constant 0 : index
    %c0_11 = arith.constant 0 : index
    %7 = vector.load %arg5[%c0_9, %c0_10, %c0_11] : memref<1x1x256xf32, #tpu.memory_space<vmem>>, vector<1x1x256xf32>
    %8 = vector.shape_cast %7 : vector<1x1x256xf32> to vector<1x256xf32>
    %c0_12 = arith.constant 0 : index
    %c0_13 = arith.constant 0 : index
    %c0_14 = arith.constant 0 : index
    %9 = vector.load %arg6[%c0_12, %c0_13, %c0_14] : memref<1x1x256xf32, #tpu.memory_space<vmem>>, vector<1x1x256xf32>
    %10 = vector.shape_cast %9 : vector<1x1x256xf32> to vector<1x256xf32>
    %11 = arith.mulf %4, %4 : vector<1x256xf32>
    %12 = arith.mulf %6, %6 : vector<1x256xf32>
    %13 = arith.addf %11, %12 : vector<1x256xf32>
    %14 = vector.broadcast %1 : f32 to vector<1x256xf32>
    %15 = arith.mulf %14, %13 : vector<1x256xf32>
    %16 = arith.mulf %4, %8 : vector<1x256xf32>
    %17 = arith.mulf %6, %10 : vector<1x256xf32>
    %18 = arith.addf %16, %17 : vector<1x256xf32>
    %cst = arith.constant 2.000000e+00 : f32
    %19 = vector.broadcast %cst : f32 to vector<1x256xf32>
    %20 = arith.mulf %19, %18 : vector<1x256xf32>
    %21 = arith.addf %15, %20 : vector<1x256xf32>
    %22 = vector.broadcast %1 : f32 to vector<1x256xf32>
    %23 = arith.mulf %22, %13 : vector<1x256xf32>
    %24 = arith.mulf %8, %8 : vector<1x256xf32>
    %25 = arith.mulf %10, %10 : vector<1x256xf32>
    %26 = arith.addf %24, %25 : vector<1x256xf32>
    %27 = arith.addf %23, %26 : vector<1x256xf32>
    %28 = tpu.concatenate %21, %27 in 0 : vector<1x256xf32>, vector<1x256xf32> -> vector<2x256xf32>
    %c128_i32 = arith.constant 128 : i32
    %29 = tpu.dynamic_rotate %28 by %c128_i32 dim 1 : vector<2x256xf32>, i32 -> vector<2x256xf32>
    %30 = arith.addf %28, %29 : vector<2x256xf32>
    %c64_i32 = arith.constant 64 : i32
    %31 = tpu.dynamic_rotate %30 by %c64_i32 dim 1 : vector<2x256xf32>, i32 -> vector<2x256xf32>
    %32 = arith.addf %30, %31 : vector<2x256xf32>
    %c32_i32 = arith.constant 32 : i32
    %33 = tpu.dynamic_rotate %32 by %c32_i32 dim 1 : vector<2x256xf32>, i32 -> vector<2x256xf32>
    %34 = arith.addf %32, %33 : vector<2x256xf32>
    %c16_i32 = arith.constant 16 : i32
    %35 = tpu.dynamic_rotate %34 by %c16_i32 dim 1 : vector<2x256xf32>, i32 -> vector<2x256xf32>
    %36 = arith.addf %34, %35 : vector<2x256xf32>
    %37 = vector.extract_strided_slice %36 {offsets = [0, 0], sizes = [1, 256], strides = [1, 1]} : vector<2x256xf32> to vector<1x256xf32>
    %38 = vector.extract_strided_slice %36 {offsets = [1, 0], sizes = [1, 256], strides = [1, 1]} : vector<2x256xf32> to vector<1x256xf32>
    %39 = arith.divf %37, %38 : vector<1x256xf32>
    %c17_i32 = arith.constant 17 : i32
    %40 = tpu.dynamic_rotate %39 by %c17_i32 dim 1 : vector<1x256xf32>, i32 -> vector<1x256xf32>
    %41 = vector.extract_strided_slice %0 {offsets = [0, 0], sizes = [1, 256], strides = [1, 1]} : vector<9x256xf32> to vector<1x256xf32>
    %42 = arith.mulf %40, %41 : vector<1x256xf32>
    %c0_15 = arith.constant 0 : index
    %c0_16 = arith.constant 0 : index
    %c0_17 = arith.constant 0 : index
    %43 = vector.load %arg8[%c0_15, %c0_16, %c0_17] : memref<9x3x1xf32, #tpu.memory_space<vmem>>, vector<1x3x1xf32>
    %44 = vector.shape_cast %43 : vector<1x3x1xf32> to vector<3x1xf32>
    %45 = vector.broadcast %44 : vector<3x1xf32> to vector<3x256xf32>
    %46 = vector.broadcast %42 : vector<1x256xf32> to vector<3x256xf32>
    %47 = arith.mulf %45, %46 : vector<3x256xf32>
    %c16_i32_18 = arith.constant 16 : i32
    %48 = tpu.dynamic_rotate %39 by %c16_i32_18 dim 1 : vector<1x256xf32>, i32 -> vector<1x256xf32>
    %49 = vector.extract_strided_slice %0 {offsets = [1, 0], sizes = [1, 256], strides = [1, 1]} : vector<9x256xf32> to vector<1x256xf32>
    %50 = arith.mulf %48, %49 : vector<1x256xf32>
    %c1 = arith.constant 1 : index
    %c0_19 = arith.constant 0 : index
    %c0_20 = arith.constant 0 : index
    %51 = vector.load %arg8[%c1, %c0_19, %c0_20] : memref<9x3x1xf32, #tpu.memory_space<vmem>>, vector<1x3x1xf32>
    %52 = vector.shape_cast %51 : vector<1x3x1xf32> to vector<3x1xf32>
    %53 = vector.broadcast %52 : vector<3x1xf32> to vector<3x256xf32>
    %54 = vector.broadcast %50 : vector<1x256xf32> to vector<3x256xf32>
    %55 = arith.mulf %53, %54 : vector<3x256xf32>
    %56 = arith.addf %47, %55 : vector<3x256xf32>
    %c15_i32 = arith.constant 15 : i32
    %57 = tpu.dynamic_rotate %39 by %c15_i32 dim 1 : vector<1x256xf32>, i32 -> vector<1x256xf32>
    %58 = vector.extract_strided_slice %0 {offsets = [2, 0], sizes = [1, 256], strides = [1, 1]} : vector<9x256xf32> to vector<1x256xf32>
    %59 = arith.mulf %57, %58 : vector<1x256xf32>
    %c2 = arith.constant 2 : index
    %c0_21 = arith.constant 0 : index
    %c0_22 = arith.constant 0 : index
    %60 = vector.load %arg8[%c2, %c0_21, %c0_22] : memref<9x3x1xf32, #tpu.memory_space<vmem>>, vector<1x3x1xf32>
    %61 = vector.shape_cast %60 : vector<1x3x1xf32> to vector<3x1xf32>
    %62 = vector.broadcast %61 : vector<3x1xf32> to vector<3x256xf32>
    %63 = vector.broadcast %59 : vector<1x256xf32> to vector<3x256xf32>
    %64 = arith.mulf %62, %63 : vector<3x256xf32>
    %65 = arith.addf %56, %64 : vector<3x256xf32>
    %c1_i32 = arith.constant 1 : i32
    %66 = tpu.dynamic_rotate %39 by %c1_i32 dim 1 : vector<1x256xf32>, i32 -> vector<1x256xf32>
    %67 = vector.extract_strided_slice %0 {offsets = [3, 0], sizes = [1, 256], strides = [1, 1]} : vector<9x256xf32> to vector<1x256xf32>
    %68 = arith.mulf %66, %67 : vector<1x256xf32>
    %c3 = arith.constant 3 : index
    %c0_23 = arith.constant 0 : index
    %c0_24 = arith.constant 0 : index
    %69 = vector.load %arg8[%c3, %c0_23, %c0_24] : memref<9x3x1xf32, #tpu.memory_space<vmem>>, vector<1x3x1xf32>
    %70 = vector.shape_cast %69 : vector<1x3x1xf32> to vector<3x1xf32>
    %71 = vector.broadcast %70 : vector<3x1xf32> to vector<3x256xf32>
    %72 = vector.broadcast %68 : vector<1x256xf32> to vector<3x256xf32>
    %73 = arith.mulf %71, %72 : vector<3x256xf32>
    %74 = arith.addf %65, %73 : vector<3x256xf32>
    %c4 = arith.constant 4 : index
    %c0_25 = arith.constant 0 : index
    %c0_26 = arith.constant 0 : index
    %75 = vector.load %arg8[%c4, %c0_25, %c0_26] : memref<9x3x1xf32, #tpu.memory_space<vmem>>, vector<1x3x1xf32>
    %76 = vector.shape_cast %75 : vector<1x3x1xf32> to vector<3x1xf32>
    %77 = vector.broadcast %76 : vector<3x1xf32> to vector<3x256xf32>
    %78 = vector.broadcast %39 : vector<1x256xf32> to vector<3x256xf32>
    %79 = arith.mulf %77, %78 : vector<3x256xf32>
    %80 = arith.addf %74, %79 : vector<3x256xf32>
    %c255_i32 = arith.constant 255 : i32
    %81 = tpu.dynamic_rotate %39 by %c255_i32 dim 1 : vector<1x256xf32>, i32 -> vector<1x256xf32>
    %82 = vector.extract_strided_slice %0 {offsets = [5, 0], sizes = [1, 256], strides = [1, 1]} : vector<9x256xf32> to vector<1x256xf32>
    %83 = arith.mulf %81, %82 : vector<1x256xf32>
    %c5 = arith.constant 5 : index
    %c0_27 = arith.constant 0 : index
    %c0_28 = arith.constant 0 : index
    %84 = vector.load %arg8[%c5, %c0_27, %c0_28] : memref<9x3x1xf32, #tpu.memory_space<vmem>>, vector<1x3x1xf32>
    %85 = vector.shape_cast %84 : vector<1x3x1xf32> to vector<3x1xf32>
    %86 = vector.broadcast %85 : vector<3x1xf32> to vector<3x256xf32>
    %87 = vector.broadcast %83 : vector<1x256xf32> to vector<3x256xf32>
    %88 = arith.mulf %86, %87 : vector<3x256xf32>
    %89 = arith.addf %80, %88 : vector<3x256xf32>
    %c241_i32 = arith.constant 241 : i32
    %90 = tpu.dynamic_rotate %39 by %c241_i32 dim 1 : vector<1x256xf32>, i32 -> vector<1x256xf32>
    %91 = vector.extract_strided_slice %0 {offsets = [6, 0], sizes = [1, 256], strides = [1, 1]} : vector<9x256xf32> to vector<1x256xf32>
    %92 = arith.mulf %90, %91 : vector<1x256xf32>
    %c6 = arith.constant 6 : index
    %c0_29 = arith.constant 0 : index
    %c0_30 = arith.constant 0 : index
    %93 = vector.load %arg8[%c6, %c0_29, %c0_30] : memref<9x3x1xf32, #tpu.memory_space<vmem>>, vector<1x3x1xf32>
    %94 = vector.shape_cast %93 : vector<1x3x1xf32> to vector<3x1xf32>
    %95 = vector.broadcast %94 : vector<3x1xf32> to vector<3x256xf32>
    %96 = vector.broadcast %92 : vector<1x256xf32> to vector<3x256xf32>
    %97 = arith.mulf %95, %96 : vector<3x256xf32>
    %98 = arith.addf %89, %97 : vector<3x256xf32>
    %c240_i32 = arith.constant 240 : i32
    %99 = tpu.dynamic_rotate %39 by %c240_i32 dim 1 : vector<1x256xf32>, i32 -> vector<1x256xf32>
    %100 = vector.extract_strided_slice %0 {offsets = [7, 0], sizes = [1, 256], strides = [1, 1]} : vector<9x256xf32> to vector<1x256xf32>
    %101 = arith.mulf %99, %100 : vector<1x256xf32>
    %c7 = arith.constant 7 : index
    %c0_31 = arith.constant 0 : index
    %c0_32 = arith.constant 0 : index
    %102 = vector.load %arg8[%c7, %c0_31, %c0_32] : memref<9x3x1xf32, #tpu.memory_space<vmem>>, vector<1x3x1xf32>
    %103 = vector.shape_cast %102 : vector<1x3x1xf32> to vector<3x1xf32>
    %104 = vector.broadcast %103 : vector<3x1xf32> to vector<3x256xf32>
    %105 = vector.broadcast %101 : vector<1x256xf32> to vector<3x256xf32>
    %106 = arith.mulf %104, %105 : vector<3x256xf32>
    %107 = arith.addf %98, %106 : vector<3x256xf32>
    %c239_i32 = arith.constant 239 : i32
    %108 = tpu.dynamic_rotate %39 by %c239_i32 dim 1 : vector<1x256xf32>, i32 -> vector<1x256xf32>
    %109 = vector.extract_strided_slice %0 {offsets = [8, 0], sizes = [1, 256], strides = [1, 1]} : vector<9x256xf32> to vector<1x256xf32>
    %110 = arith.mulf %108, %109 : vector<1x256xf32>
    %c8 = arith.constant 8 : index
    %c0_33 = arith.constant 0 : index
    %c0_34 = arith.constant 0 : index
    %111 = vector.load %arg8[%c8, %c0_33, %c0_34] : memref<9x3x1xf32, #tpu.memory_space<vmem>>, vector<1x3x1xf32>
    %112 = vector.shape_cast %111 : vector<1x3x1xf32> to vector<3x1xf32>
    %113 = vector.broadcast %112 : vector<3x1xf32> to vector<3x256xf32>
    %114 = vector.broadcast %110 : vector<1x256xf32> to vector<3x256xf32>
    %115 = arith.mulf %113, %114 : vector<3x256xf32>
    %116 = arith.addf %107, %115 : vector<3x256xf32>
    %117 = tpu.concatenate %39, %116 in 0 : vector<1x256xf32>, vector<3x256xf32> -> vector<4x256xf32>
    %c0_35 = arith.constant 0 : index
    %c0_36 = arith.constant 0 : index
    %c0_37 = arith.constant 0 : index
    %118 = vector.load %arg10[%c0_35, %c0_36, %c0_37] : memref<2x4x1xf32, #tpu.memory_space<vmem>>, vector<1x4x1xf32>
    %119 = vector.shape_cast %118 : vector<1x4x1xf32> to vector<4x1xf32>
    %c17_i32_38 = arith.constant 17 : i32
    %120 = tpu.dynamic_rotate %117 by %c17_i32_38 dim 1 : vector<4x256xf32>, i32 -> vector<4x256xf32>
    %121 = vector.extract_strided_slice %0 {offsets = [0, 0], sizes = [1, 256], strides = [1, 1]} : vector<9x256xf32> to vector<1x256xf32>
    %122 = vector.broadcast %121 : vector<1x256xf32> to vector<4x256xf32>
    %123 = arith.mulf %120, %122 : vector<4x256xf32>
    %c0_39 = arith.constant 0 : index
    %c0_40 = arith.constant 0 : index
    %c0_41 = arith.constant 0 : index
    %124 = vector.load %arg9[%c0_39, %c0_40, %c0_41] : memref<18x4x4xf32, #tpu.memory_space<vmem>>, vector<1x4x4xf32>
    %125 = vector.shape_cast %124 : vector<1x4x4xf32> to vector<4x4xf32>
    %cst_42 = arith.constant dense<0.000000e+00> : vector<4x256xf32>
    %126 = tpu.matmul %125, %123, %cst_42 {dimension_numbers = #tpu.dot_dimension_numbers<[1], [0], [0], [1], [0, 0, 1, 1], [], []>} : vector<4x4xf32>, vector<4x256xf32>, vector<4x256xf32> -> vector<4x256xf32>
    %c16_i32_43 = arith.constant 16 : i32
    %127 = tpu.dynamic_rotate %117 by %c16_i32_43 dim 1 : vector<4x256xf32>, i32 -> vector<4x256xf32>
    %128 = vector.extract_strided_slice %0 {offsets = [1, 0], sizes = [1, 256], strides = [1, 1]} : vector<9x256xf32> to vector<1x256xf32>
    %129 = vector.broadcast %128 : vector<1x256xf32> to vector<4x256xf32>
    %130 = arith.mulf %127, %129 : vector<4x256xf32>
    %c1_44 = arith.constant 1 : index
    %c0_45 = arith.constant 0 : index
    %c0_46 = arith.constant 0 : index
    %131 = vector.load %arg9[%c1_44, %c0_45, %c0_46] : memref<18x4x4xf32, #tpu.memory_space<vmem>>, vector<1x4x4xf32>
    %132 = vector.shape_cast %131 : vector<1x4x4xf32> to vector<4x4xf32>
    %cst_47 = arith.constant dense<0.000000e+00> : vector<4x256xf32>
    %133 = tpu.matmul %132, %130, %cst_47 {dimension_numbers = #tpu.dot_dimension_numbers<[1], [0], [0], [1], [0, 0, 1, 1], [], []>} : vector<4x4xf32>, vector<4x256xf32>, vector<4x256xf32> -> vector<4x256xf32>
    %134 = arith.addf %126, %133 : vector<4x256xf32>
    %c15_i32_48 = arith.constant 15 : i32
    %135 = tpu.dynamic_rotate %117 by %c15_i32_48 dim 1 : vector<4x256xf32>, i32 -> vector<4x256xf32>
    %136 = vector.extract_strided_slice %0 {offsets = [2, 0], sizes = [1, 256], strides = [1, 1]} : vector<9x256xf32> to vector<1x256xf32>
    %137 = vector.broadcast %136 : vector<1x256xf32> to vector<4x256xf32>
    %138 = arith.mulf %135, %137 : vector<4x256xf32>
    %c2_49 = arith.constant 2 : index
    %c0_50 = arith.constant 0 : index
    %c0_51 = arith.constant 0 : index
    %139 = vector.load %arg9[%c2_49, %c0_50, %c0_51] : memref<18x4x4xf32, #tpu.memory_space<vmem>>, vector<1x4x4xf32>
    %140 = vector.shape_cast %139 : vector<1x4x4xf32> to vector<4x4xf32>
    %cst_52 = arith.constant dense<0.000000e+00> : vector<4x256xf32>
    %141 = tpu.matmul %140, %138, %cst_52 {dimension_numbers = #tpu.dot_dimension_numbers<[1], [0], [0], [1], [0, 0, 1, 1], [], []>} : vector<4x4xf32>, vector<4x256xf32>, vector<4x256xf32> -> vector<4x256xf32>
    %142 = arith.addf %134, %141 : vector<4x256xf32>
    %c1_i32_53 = arith.constant 1 : i32
    %143 = tpu.dynamic_rotate %117 by %c1_i32_53 dim 1 : vector<4x256xf32>, i32 -> vector<4x256xf32>
    %144 = vector.extract_strided_slice %0 {offsets = [3, 0], sizes = [1, 256], strides = [1, 1]} : vector<9x256xf32> to vector<1x256xf32>
    %145 = vector.broadcast %144 : vector<1x256xf32> to vector<4x256xf32>
    %146 = arith.mulf %143, %145 : vector<4x256xf32>
    %c3_54 = arith.constant 3 : index
    %c0_55 = arith.constant 0 : index
    %c0_56 = arith.constant 0 : index
    %147 = vector.load %arg9[%c3_54, %c0_55, %c0_56] : memref<18x4x4xf32, #tpu.memory_space<vmem>>, vector<1x4x4xf32>
    %148 = vector.shape_cast %147 : vector<1x4x4xf32> to vector<4x4xf32>
    %cst_57 = arith.constant dense<0.000000e+00> : vector<4x256xf32>
    %149 = tpu.matmul %148, %146, %cst_57 {dimension_numbers = #tpu.dot_dimension_numbers<[1], [0], [0], [1], [0, 0, 1, 1], [], []>} : vector<4x4xf32>, vector<4x256xf32>, vector<4x256xf32> -> vector<4x256xf32>
    %150 = arith.addf %142, %149 : vector<4x256xf32>
    %c4_58 = arith.constant 4 : index
    %c0_59 = arith.constant 0 : index
    %c0_60 = arith.constant 0 : index
    %151 = vector.load %arg9[%c4_58, %c0_59, %c0_60] : memref<18x4x4xf32, #tpu.memory_space<vmem>>, vector<1x4x4xf32>
    %152 = vector.shape_cast %151 : vector<1x4x4xf32> to vector<4x4xf32>
    %cst_61 = arith.constant dense<0.000000e+00> : vector<4x256xf32>
    %153 = tpu.matmul %152, %117, %cst_61 {dimension_numbers = #tpu.dot_dimension_numbers<[1], [0], [0], [1], [0, 0, 1, 1], [], []>} : vector<4x4xf32>, vector<4x256xf32>, vector<4x256xf32> -> vector<4x256xf32>
    %154 = arith.addf %150, %153 : vector<4x256xf32>
    %c255_i32_62 = arith.constant 255 : i32
    %155 = tpu.dynamic_rotate %117 by %c255_i32_62 dim 1 : vector<4x256xf32>, i32 -> vector<4x256xf32>
    %156 = vector.extract_strided_slice %0 {offsets = [5, 0], sizes = [1, 256], strides = [1, 1]} : vector<9x256xf32> to vector<1x256xf32>
    %157 = vector.broadcast %156 : vector<1x256xf32> to vector<4x256xf32>
    %158 = arith.mulf %155, %157 : vector<4x256xf32>
    %c5_63 = arith.constant 5 : index
    %c0_64 = arith.constant 0 : index
    %c0_65 = arith.constant 0 : index
    %159 = vector.load %arg9[%c5_63, %c0_64, %c0_65] : memref<18x4x4xf32, #tpu.memory_space<vmem>>, vector<1x4x4xf32>
    %160 = vector.shape_cast %159 : vector<1x4x4xf32> to vector<4x4xf32>
    %cst_66 = arith.constant dense<0.000000e+00> : vector<4x256xf32>
    %161 = tpu.matmul %160, %158, %cst_66 {dimension_numbers = #tpu.dot_dimension_numbers<[1], [0], [0], [1], [0, 0, 1, 1], [], []>} : vector<4x4xf32>, vector<4x256xf32>, vector<4x256xf32> -> vector<4x256xf32>
    %162 = arith.addf %154, %161 : vector<4x256xf32>
    %c241_i32_67 = arith.constant 241 : i32
    %163 = tpu.dynamic_rotate %117 by %c241_i32_67 dim 1 : vector<4x256xf32>, i32 -> vector<4x256xf32>
    %164 = vector.extract_strided_slice %0 {offsets = [6, 0], sizes = [1, 256], strides = [1, 1]} : vector<9x256xf32> to vector<1x256xf32>
    %165 = vector.broadcast %164 : vector<1x256xf32> to vector<4x256xf32>
    %166 = arith.mulf %163, %165 : vector<4x256xf32>
    %c6_68 = arith.constant 6 : index
    %c0_69 = arith.constant 0 : index
    %c0_70 = arith.constant 0 : index
    %167 = vector.load %arg9[%c6_68, %c0_69, %c0_70] : memref<18x4x4xf32, #tpu.memory_space<vmem>>, vector<1x4x4xf32>
    %168 = vector.shape_cast %167 : vector<1x4x4xf32> to vector<4x4xf32>
    %cst_71 = arith.constant dense<0.000000e+00> : vector<4x256xf32>
    %169 = tpu.matmul %168, %166, %cst_71 {dimension_numbers = #tpu.dot_dimension_numbers<[1], [0], [0], [1], [0, 0, 1, 1], [], []>} : vector<4x4xf32>, vector<4x256xf32>, vector<4x256xf32> -> vector<4x256xf32>
    %170 = arith.addf %162, %169 : vector<4x256xf32>
    %c240_i32_72 = arith.constant 240 : i32
    %171 = tpu.dynamic_rotate %117 by %c240_i32_72 dim 1 : vector<4x256xf32>, i32 -> vector<4x256xf32>
    %172 = vector.extract_strided_slice %0 {offsets = [7, 0], sizes = [1, 256], strides = [1, 1]} : vector<9x256xf32> to vector<1x256xf32>
    %173 = vector.broadcast %172 : vector<1x256xf32> to vector<4x256xf32>
    %174 = arith.mulf %171, %173 : vector<4x256xf32>
    %c7_73 = arith.constant 7 : index
    %c0_74 = arith.constant 0 : index
    %c0_75 = arith.constant 0 : index
    %175 = vector.load %arg9[%c7_73, %c0_74, %c0_75] : memref<18x4x4xf32, #tpu.memory_space<vmem>>, vector<1x4x4xf32>
    %176 = vector.shape_cast %175 : vector<1x4x4xf32> to vector<4x4xf32>
    %cst_76 = arith.constant dense<0.000000e+00> : vector<4x256xf32>
    %177 = tpu.matmul %176, %174, %cst_76 {dimension_numbers = #tpu.dot_dimension_numbers<[1], [0], [0], [1], [0, 0, 1, 1], [], []>} : vector<4x4xf32>, vector<4x256xf32>, vector<4x256xf32> -> vector<4x256xf32>
    %178 = arith.addf %170, %177 : vector<4x256xf32>
    %c239_i32_77 = arith.constant 239 : i32
    %179 = tpu.dynamic_rotate %117 by %c239_i32_77 dim 1 : vector<4x256xf32>, i32 -> vector<4x256xf32>
    %180 = vector.extract_strided_slice %0 {offsets = [8, 0], sizes = [1, 256], strides = [1, 1]} : vector<9x256xf32> to vector<1x256xf32>
    %181 = vector.broadcast %180 : vector<1x256xf32> to vector<4x256xf32>
    %182 = arith.mulf %179, %181 : vector<4x256xf32>
    %c8_78 = arith.constant 8 : index
    %c0_79 = arith.constant 0 : index
    %c0_80 = arith.constant 0 : index
    %183 = vector.load %arg9[%c8_78, %c0_79, %c0_80] : memref<18x4x4xf32, #tpu.memory_space<vmem>>, vector<1x4x4xf32>
    %184 = vector.shape_cast %183 : vector<1x4x4xf32> to vector<4x4xf32>
    %cst_81 = arith.constant dense<0.000000e+00> : vector<4x256xf32>
    %185 = tpu.matmul %184, %182, %cst_81 {dimension_numbers = #tpu.dot_dimension_numbers<[1], [0], [0], [1], [0, 0, 1, 1], [], []>} : vector<4x4xf32>, vector<4x256xf32>, vector<4x256xf32> -> vector<4x256xf32>
    %186 = arith.addf %178, %185 : vector<4x256xf32>
    %187 = vector.broadcast %119 : vector<4x1xf32> to vector<4x256xf32>
    %188 = arith.addf %186, %187 : vector<4x256xf32>
    %cst_82 = arith.constant 0.000000e+00 : f32
    %189 = vector.broadcast %cst_82 : f32 to vector<4x256xf32>
    %190 = arith.maximumf %188, %189 : vector<4x256xf32>
    %c0_83 = arith.constant 0 : index
    %c0_84 = arith.constant 0 : index
    %c0_85 = arith.constant 0 : index
    %191 = vector.load %arg12[%c0_83, %c0_84, %c0_85] : memref<2x4x1xf32, #tpu.memory_space<vmem>>, vector<1x4x1xf32>
    %192 = vector.shape_cast %191 : vector<1x4x1xf32> to vector<4x1xf32>
    %c17_i32_86 = arith.constant 17 : i32
    %193 = tpu.dynamic_rotate %190 by %c17_i32_86 dim 1 : vector<4x256xf32>, i32 -> vector<4x256xf32>
    %194 = vector.extract_strided_slice %0 {offsets = [0, 0], sizes = [1, 256], strides = [1, 1]} : vector<9x256xf32> to vector<1x256xf32>
    %195 = vector.broadcast %194 : vector<1x256xf32> to vector<4x256xf32>
    %196 = arith.mulf %193, %195 : vector<4x256xf32>
    %c0_87 = arith.constant 0 : index
    %c0_88 = arith.constant 0 : index
    %c0_89 = arith.constant 0 : index
    %197 = vector.load %arg11[%c0_87, %c0_88, %c0_89] : memref<18x4x4xf32, #tpu.memory_space<vmem>>, vector<1x4x4xf32>
    %198 = vector.shape_cast %197 : vector<1x4x4xf32> to vector<4x4xf32>
    %cst_90 = arith.constant dense<0.000000e+00> : vector<4x256xf32>
    %199 = tpu.matmul %198, %196, %cst_90 {dimension_numbers = #tpu.dot_dimension_numbers<[1], [0], [0], [1], [0, 0, 1, 1], [], []>} : vector<4x4xf32>, vector<4x256xf32>, vector<4x256xf32> -> vector<4x256xf32>
    %c16_i32_91 = arith.constant 16 : i32
    %200 = tpu.dynamic_rotate %190 by %c16_i32_91 dim 1 : vector<4x256xf32>, i32 -> vector<4x256xf32>
    %201 = vector.extract_strided_slice %0 {offsets = [1, 0], sizes = [1, 256], strides = [1, 1]} : vector<9x256xf32> to vector<1x256xf32>
    %202 = vector.broadcast %201 : vector<1x256xf32> to vector<4x256xf32>
    %203 = arith.mulf %200, %202 : vector<4x256xf32>
    %c1_92 = arith.constant 1 : index
    %c0_93 = arith.constant 0 : index
    %c0_94 = arith.constant 0 : index
    %204 = vector.load %arg11[%c1_92, %c0_93, %c0_94] : memref<18x4x4xf32, #tpu.memory_space<vmem>>, vector<1x4x4xf32>
    %205 = vector.shape_cast %204 : vector<1x4x4xf32> to vector<4x4xf32>
    %cst_95 = arith.constant dense<0.000000e+00> : vector<4x256xf32>
    %206 = tpu.matmul %205, %203, %cst_95 {dimension_numbers = #tpu.dot_dimension_numbers<[1], [0], [0], [1], [0, 0, 1, 1], [], []>} : vector<4x4xf32>, vector<4x256xf32>, vector<4x256xf32> -> vector<4x256xf32>
    %207 = arith.addf %199, %206 : vector<4x256xf32>
    %c15_i32_96 = arith.constant 15 : i32
    %208 = tpu.dynamic_rotate %190 by %c15_i32_96 dim 1 : vector<4x256xf32>, i32 -> vector<4x256xf32>
    %209 = vector.extract_strided_slice %0 {offsets = [2, 0], sizes = [1, 256], strides = [1, 1]} : vector<9x256xf32> to vector<1x256xf32>
    %210 = vector.broadcast %209 : vector<1x256xf32> to vector<4x256xf32>
    %211 = arith.mulf %208, %210 : vector<4x256xf32>
    %c2_97 = arith.constant 2 : index
    %c0_98 = arith.constant 0 : index
    %c0_99 = arith.constant 0 : index
    %212 = vector.load %arg11[%c2_97, %c0_98, %c0_99] : memref<18x4x4xf32, #tpu.memory_space<vmem>>, vector<1x4x4xf32>
    %213 = vector.shape_cast %212 : vector<1x4x4xf32> to vector<4x4xf32>
    %cst_100 = arith.constant dense<0.000000e+00> : vector<4x256xf32>
    %214 = tpu.matmul %213, %211, %cst_100 {dimension_numbers = #tpu.dot_dimension_numbers<[1], [0], [0], [1], [0, 0, 1, 1], [], []>} : vector<4x4xf32>, vector<4x256xf32>, vector<4x256xf32> -> vector<4x256xf32>
    %215 = arith.addf %207, %214 : vector<4x256xf32>
    %c1_i32_101 = arith.constant 1 : i32
    %216 = tpu.dynamic_rotate %190 by %c1_i32_101 dim 1 : vector<4x256xf32>, i32 -> vector<4x256xf32>
    %217 = vector.extract_strided_slice %0 {offsets = [3, 0], sizes = [1, 256], strides = [1, 1]} : vector<9x256xf32> to vector<1x256xf32>
    %218 = vector.broadcast %217 : vector<1x256xf32> to vector<4x256xf32>
    %219 = arith.mulf %216, %218 : vector<4x256xf32>
    %c3_102 = arith.constant 3 : index
    %c0_103 = arith.constant 0 : index
    %c0_104 = arith.constant 0 : index
    %220 = vector.load %arg11[%c3_102, %c0_103, %c0_104] : memref<18x4x4xf32, #tpu.memory_space<vmem>>, vector<1x4x4xf32>
    %221 = vector.shape_cast %220 : vector<1x4x4xf32> to vector<4x4xf32>
    %cst_105 = arith.constant dense<0.000000e+00> : vector<4x256xf32>
    %222 = tpu.matmul %221, %219, %cst_105 {dimension_numbers = #tpu.dot_dimension_numbers<[1], [0], [0], [1], [0, 0, 1, 1], [], []>} : vector<4x4xf32>, vector<4x256xf32>, vector<4x256xf32> -> vector<4x256xf32>
    %223 = arith.addf %215, %222 : vector<4x256xf32>
    %c4_106 = arith.constant 4 : index
    %c0_107 = arith.constant 0 : index
    %c0_108 = arith.constant 0 : index
    %224 = vector.load %arg11[%c4_106, %c0_107, %c0_108] : memref<18x4x4xf32, #tpu.memory_space<vmem>>, vector<1x4x4xf32>
    %225 = vector.shape_cast %224 : vector<1x4x4xf32> to vector<4x4xf32>
    %cst_109 = arith.constant dense<0.000000e+00> : vector<4x256xf32>
    %226 = tpu.matmul %225, %190, %cst_109 {dimension_numbers = #tpu.dot_dimension_numbers<[1], [0], [0], [1], [0, 0, 1, 1], [], []>} : vector<4x4xf32>, vector<4x256xf32>, vector<4x256xf32> -> vector<4x256xf32>
    %227 = arith.addf %223, %226 : vector<4x256xf32>
    %c255_i32_110 = arith.constant 255 : i32
    %228 = tpu.dynamic_rotate %190 by %c255_i32_110 dim 1 : vector<4x256xf32>, i32 -> vector<4x256xf32>
    %229 = vector.extract_strided_slice %0 {offsets = [5, 0], sizes = [1, 256], strides = [1, 1]} : vector<9x256xf32> to vector<1x256xf32>
    %230 = vector.broadcast %229 : vector<1x256xf32> to vector<4x256xf32>
    %231 = arith.mulf %228, %230 : vector<4x256xf32>
    %c5_111 = arith.constant 5 : index
    %c0_112 = arith.constant 0 : index
    %c0_113 = arith.constant 0 : index
    %232 = vector.load %arg11[%c5_111, %c0_112, %c0_113] : memref<18x4x4xf32, #tpu.memory_space<vmem>>, vector<1x4x4xf32>
    %233 = vector.shape_cast %232 : vector<1x4x4xf32> to vector<4x4xf32>
    %cst_114 = arith.constant dense<0.000000e+00> : vector<4x256xf32>
    %234 = tpu.matmul %233, %231, %cst_114 {dimension_numbers = #tpu.dot_dimension_numbers<[1], [0], [0], [1], [0, 0, 1, 1], [], []>} : vector<4x4xf32>, vector<4x256xf32>, vector<4x256xf32> -> vector<4x256xf32>
    %235 = arith.addf %227, %234 : vector<4x256xf32>
    %c241_i32_115 = arith.constant 241 : i32
    %236 = tpu.dynamic_rotate %190 by %c241_i32_115 dim 1 : vector<4x256xf32>, i32 -> vector<4x256xf32>
    %237 = vector.extract_strided_slice %0 {offsets = [6, 0], sizes = [1, 256], strides = [1, 1]} : vector<9x256xf32> to vector<1x256xf32>
    %238 = vector.broadcast %237 : vector<1x256xf32> to vector<4x256xf32>
    %239 = arith.mulf %236, %238 : vector<4x256xf32>
    %c6_116 = arith.constant 6 : index
    %c0_117 = arith.constant 0 : index
    %c0_118 = arith.constant 0 : index
    %240 = vector.load %arg11[%c6_116, %c0_117, %c0_118] : memref<18x4x4xf32, #tpu.memory_space<vmem>>, vector<1x4x4xf32>
    %241 = vector.shape_cast %240 : vector<1x4x4xf32> to vector<4x4xf32>
    %cst_119 = arith.constant dense<0.000000e+00> : vector<4x256xf32>
    %242 = tpu.matmul %241, %239, %cst_119 {dimension_numbers = #tpu.dot_dimension_numbers<[1], [0], [0], [1], [0, 0, 1, 1], [], []>} : vector<4x4xf32>, vector<4x256xf32>, vector<4x256xf32> -> vector<4x256xf32>
    %243 = arith.addf %235, %242 : vector<4x256xf32>
    %c240_i32_120 = arith.constant 240 : i32
    %244 = tpu.dynamic_rotate %190 by %c240_i32_120 dim 1 : vector<4x256xf32>, i32 -> vector<4x256xf32>
    %245 = vector.extract_strided_slice %0 {offsets = [7, 0], sizes = [1, 256], strides = [1, 1]} : vector<9x256xf32> to vector<1x256xf32>
    %246 = vector.broadcast %245 : vector<1x256xf32> to vector<4x256xf32>
    %247 = arith.mulf %244, %246 : vector<4x256xf32>
    %c7_121 = arith.constant 7 : index
    %c0_122 = arith.constant 0 : index
    %c0_123 = arith.constant 0 : index
    %248 = vector.load %arg11[%c7_121, %c0_122, %c0_123] : memref<18x4x4xf32, #tpu.memory_space<vmem>>, vector<1x4x4xf32>
    %249 = vector.shape_cast %248 : vector<1x4x4xf32> to vector<4x4xf32>
    %cst_124 = arith.constant dense<0.000000e+00> : vector<4x256xf32>
    %250 = tpu.matmul %249, %247, %cst_124 {dimension_numbers = #tpu.dot_dimension_numbers<[1], [0], [0], [1], [0, 0, 1, 1], [], []>} : vector<4x4xf32>, vector<4x256xf32>, vector<4x256xf32> -> vector<4x256xf32>
    %251 = arith.addf %243, %250 : vector<4x256xf32>
    %c239_i32_125 = arith.constant 239 : i32
    %252 = tpu.dynamic_rotate %190 by %c239_i32_125 dim 1 : vector<4x256xf32>, i32 -> vector<4x256xf32>
    %253 = vector.extract_strided_slice %0 {offsets = [8, 0], sizes = [1, 256], strides = [1, 1]} : vector<9x256xf32> to vector<1x256xf32>
    %254 = vector.broadcast %253 : vector<1x256xf32> to vector<4x256xf32>
    %255 = arith.mulf %252, %254 : vector<4x256xf32>
    %c8_126 = arith.constant 8 : index
    %c0_127 = arith.constant 0 : index
    %c0_128 = arith.constant 0 : index
    %256 = vector.load %arg11[%c8_126, %c0_127, %c0_128] : memref<18x4x4xf32, #tpu.memory_space<vmem>>, vector<1x4x4xf32>
    %257 = vector.shape_cast %256 : vector<1x4x4xf32> to vector<4x4xf32>
    %cst_129 = arith.constant dense<0.000000e+00> : vector<4x256xf32>
    %258 = tpu.matmul %257, %255, %cst_129 {dimension_numbers = #tpu.dot_dimension_numbers<[1], [0], [0], [1], [0, 0, 1, 1], [], []>} : vector<4x4xf32>, vector<4x256xf32>, vector<4x256xf32> -> vector<4x256xf32>
    %259 = arith.addf %251, %258 : vector<4x256xf32>
    %260 = vector.broadcast %192 : vector<4x1xf32> to vector<4x256xf32>
    %261 = arith.addf %259, %260 : vector<4x256xf32>
    %262 = arith.addf %117, %261 : vector<4x256xf32>
    %c1_130 = arith.constant 1 : index
    %c0_131 = arith.constant 0 : index
    %c0_132 = arith.constant 0 : index
    %263 = vector.load %arg10[%c1_130, %c0_131, %c0_132] : memref<2x4x1xf32, #tpu.memory_space<vmem>>, vector<1x4x1xf32>
    %264 = vector.shape_cast %263 : vector<1x4x1xf32> to vector<4x1xf32>
    %c17_i32_133 = arith.constant 17 : i32
    %265 = tpu.dynamic_rotate %262 by %c17_i32_133 dim 1 : vector<4x256xf32>, i32 -> vector<4x256xf32>
    %266 = vector.extract_strided_slice %0 {offsets = [0, 0], sizes = [1, 256], strides = [1, 1]} : vector<9x256xf32> to vector<1x256xf32>
    %267 = vector.broadcast %266 : vector<1x256xf32> to vector<4x256xf32>
    %268 = arith.mulf %265, %267 : vector<4x256xf32>
    %c9 = arith.constant 9 : index
    %c0_134 = arith.constant 0 : index
    %c0_135 = arith.constant 0 : index
    %269 = vector.load %arg9[%c9, %c0_134, %c0_135] : memref<18x4x4xf32, #tpu.memory_space<vmem>>, vector<1x4x4xf32>
    %270 = vector.shape_cast %269 : vector<1x4x4xf32> to vector<4x4xf32>
    %cst_136 = arith.constant dense<0.000000e+00> : vector<4x256xf32>
    %271 = tpu.matmul %270, %268, %cst_136 {dimension_numbers = #tpu.dot_dimension_numbers<[1], [0], [0], [1], [0, 0, 1, 1], [], []>} : vector<4x4xf32>, vector<4x256xf32>, vector<4x256xf32> -> vector<4x256xf32>
    %c16_i32_137 = arith.constant 16 : i32
    %272 = tpu.dynamic_rotate %262 by %c16_i32_137 dim 1 : vector<4x256xf32>, i32 -> vector<4x256xf32>
    %273 = vector.extract_strided_slice %0 {offsets = [1, 0], sizes = [1, 256], strides = [1, 1]} : vector<9x256xf32> to vector<1x256xf32>
    %274 = vector.broadcast %273 : vector<1x256xf32> to vector<4x256xf32>
    %275 = arith.mulf %272, %274 : vector<4x256xf32>
    %c10 = arith.constant 10 : index
    %c0_138 = arith.constant 0 : index
    %c0_139 = arith.constant 0 : index
    %276 = vector.load %arg9[%c10, %c0_138, %c0_139] : memref<18x4x4xf32, #tpu.memory_space<vmem>>, vector<1x4x4xf32>
    %277 = vector.shape_cast %276 : vector<1x4x4xf32> to vector<4x4xf32>
    %cst_140 = arith.constant dense<0.000000e+00> : vector<4x256xf32>
    %278 = tpu.matmul %277, %275, %cst_140 {dimension_numbers = #tpu.dot_dimension_numbers<[1], [0], [0], [1], [0, 0, 1, 1], [], []>} : vector<4x4xf32>, vector<4x256xf32>, vector<4x256xf32> -> vector<4x256xf32>
    %279 = arith.addf %271, %278 : vector<4x256xf32>
    %c15_i32_141 = arith.constant 15 : i32
    %280 = tpu.dynamic_rotate %262 by %c15_i32_141 dim 1 : vector<4x256xf32>, i32 -> vector<4x256xf32>
    %281 = vector.extract_strided_slice %0 {offsets = [2, 0], sizes = [1, 256], strides = [1, 1]} : vector<9x256xf32> to vector<1x256xf32>
    %282 = vector.broadcast %281 : vector<1x256xf32> to vector<4x256xf32>
    %283 = arith.mulf %280, %282 : vector<4x256xf32>
    %c11 = arith.constant 11 : index
    %c0_142 = arith.constant 0 : index
    %c0_143 = arith.constant 0 : index
    %284 = vector.load %arg9[%c11, %c0_142, %c0_143] : memref<18x4x4xf32, #tpu.memory_space<vmem>>, vector<1x4x4xf32>
    %285 = vector.shape_cast %284 : vector<1x4x4xf32> to vector<4x4xf32>
    %cst_144 = arith.constant dense<0.000000e+00> : vector<4x256xf32>
    %286 = tpu.matmul %285, %283, %cst_144 {dimension_numbers = #tpu.dot_dimension_numbers<[1], [0], [0], [1], [0, 0, 1, 1], [], []>} : vector<4x4xf32>, vector<4x256xf32>, vector<4x256xf32> -> vector<4x256xf32>
    %287 = arith.addf %279, %286 : vector<4x256xf32>
    %c1_i32_145 = arith.constant 1 : i32
    %288 = tpu.dynamic_rotate %262 by %c1_i32_145 dim 1 : vector<4x256xf32>, i32 -> vector<4x256xf32>
    %289 = vector.extract_strided_slice %0 {offsets = [3, 0], sizes = [1, 256], strides = [1, 1]} : vector<9x256xf32> to vector<1x256xf32>
    %290 = vector.broadcast %289 : vector<1x256xf32> to vector<4x256xf32>
    %291 = arith.mulf %288, %290 : vector<4x256xf32>
    %c12 = arith.constant 12 : index
    %c0_146 = arith.constant 0 : index
    %c0_147 = arith.constant 0 : index
    %292 = vector.load %arg9[%c12, %c0_146, %c0_147] : memref<18x4x4xf32, #tpu.memory_space<vmem>>, vector<1x4x4xf32>
    %293 = vector.shape_cast %292 : vector<1x4x4xf32> to vector<4x4xf32>
    %cst_148 = arith.constant dense<0.000000e+00> : vector<4x256xf32>
    %294 = tpu.matmul %293, %291, %cst_148 {dimension_numbers = #tpu.dot_dimension_numbers<[1], [0], [0], [1], [0, 0, 1, 1], [], []>} : vector<4x4xf32>, vector<4x256xf32>, vector<4x256xf32> -> vector<4x256xf32>
    %295 = arith.addf %287, %294 : vector<4x256xf32>
    %c13 = arith.constant 13 : index
    %c0_149 = arith.constant 0 : index
    %c0_150 = arith.constant 0 : index
    %296 = vector.load %arg9[%c13, %c0_149, %c0_150] : memref<18x4x4xf32, #tpu.memory_space<vmem>>, vector<1x4x4xf32>
    %297 = vector.shape_cast %296 : vector<1x4x4xf32> to vector<4x4xf32>
    %cst_151 = arith.constant dense<0.000000e+00> : vector<4x256xf32>
    %298 = tpu.matmul %297, %262, %cst_151 {dimension_numbers = #tpu.dot_dimension_numbers<[1], [0], [0], [1], [0, 0, 1, 1], [], []>} : vector<4x4xf32>, vector<4x256xf32>, vector<4x256xf32> -> vector<4x256xf32>
    %299 = arith.addf %295, %298 : vector<4x256xf32>
    %c255_i32_152 = arith.constant 255 : i32
    %300 = tpu.dynamic_rotate %262 by %c255_i32_152 dim 1 : vector<4x256xf32>, i32 -> vector<4x256xf32>
    %301 = vector.extract_strided_slice %0 {offsets = [5, 0], sizes = [1, 256], strides = [1, 1]} : vector<9x256xf32> to vector<1x256xf32>
    %302 = vector.broadcast %301 : vector<1x256xf32> to vector<4x256xf32>
    %303 = arith.mulf %300, %302 : vector<4x256xf32>
    %c14 = arith.constant 14 : index
    %c0_153 = arith.constant 0 : index
    %c0_154 = arith.constant 0 : index
    %304 = vector.load %arg9[%c14, %c0_153, %c0_154] : memref<18x4x4xf32, #tpu.memory_space<vmem>>, vector<1x4x4xf32>
    %305 = vector.shape_cast %304 : vector<1x4x4xf32> to vector<4x4xf32>
    %cst_155 = arith.constant dense<0.000000e+00> : vector<4x256xf32>
    %306 = tpu.matmul %305, %303, %cst_155 {dimension_numbers = #tpu.dot_dimension_numbers<[1], [0], [0], [1], [0, 0, 1, 1], [], []>} : vector<4x4xf32>, vector<4x256xf32>, vector<4x256xf32> -> vector<4x256xf32>
    %307 = arith.addf %299, %306 : vector<4x256xf32>
    %c241_i32_156 = arith.constant 241 : i32
    %308 = tpu.dynamic_rotate %262 by %c241_i32_156 dim 1 : vector<4x256xf32>, i32 -> vector<4x256xf32>
    %309 = vector.extract_strided_slice %0 {offsets = [6, 0], sizes = [1, 256], strides = [1, 1]} : vector<9x256xf32> to vector<1x256xf32>
    %310 = vector.broadcast %309 : vector<1x256xf32> to vector<4x256xf32>
    %311 = arith.mulf %308, %310 : vector<4x256xf32>
    %c15 = arith.constant 15 : index
    %c0_157 = arith.constant 0 : index
    %c0_158 = arith.constant 0 : index
    %312 = vector.load %arg9[%c15, %c0_157, %c0_158] : memref<18x4x4xf32, #tpu.memory_space<vmem>>, vector<1x4x4xf32>
    %313 = vector.shape_cast %312 : vector<1x4x4xf32> to vector<4x4xf32>
    %cst_159 = arith.constant dense<0.000000e+00> : vector<4x256xf32>
    %314 = tpu.matmul %313, %311, %cst_159 {dimension_numbers = #tpu.dot_dimension_numbers<[1], [0], [0], [1], [0, 0, 1, 1], [], []>} : vector<4x4xf32>, vector<4x256xf32>, vector<4x256xf32> -> vector<4x256xf32>
    %315 = arith.addf %307, %314 : vector<4x256xf32>
    %c240_i32_160 = arith.constant 240 : i32
    %316 = tpu.dynamic_rotate %262 by %c240_i32_160 dim 1 : vector<4x256xf32>, i32 -> vector<4x256xf32>
    %317 = vector.extract_strided_slice %0 {offsets = [7, 0], sizes = [1, 256], strides = [1, 1]} : vector<9x256xf32> to vector<1x256xf32>
    %318 = vector.broadcast %317 : vector<1x256xf32> to vector<4x256xf32>
    %319 = arith.mulf %316, %318 : vector<4x256xf32>
    %c16 = arith.constant 16 : index
    %c0_161 = arith.constant 0 : index
    %c0_162 = arith.constant 0 : index
    %320 = vector.load %arg9[%c16, %c0_161, %c0_162] : memref<18x4x4xf32, #tpu.memory_space<vmem>>, vector<1x4x4xf32>
    %321 = vector.shape_cast %320 : vector<1x4x4xf32> to vector<4x4xf32>
    %cst_163 = arith.constant dense<0.000000e+00> : vector<4x256xf32>
    %322 = tpu.matmul %321, %319, %cst_163 {dimension_numbers = #tpu.dot_dimension_numbers<[1], [0], [0], [1], [0, 0, 1, 1], [], []>} : vector<4x4xf32>, vector<4x256xf32>, vector<4x256xf32> -> vector<4x256xf32>
    %323 = arith.addf %315, %322 : vector<4x256xf32>
    %c239_i32_164 = arith.constant 239 : i32
    %324 = tpu.dynamic_rotate %262 by %c239_i32_164 dim 1 : vector<4x256xf32>, i32 -> vector<4x256xf32>
    %325 = vector.extract_strided_slice %0 {offsets = [8, 0], sizes = [1, 256], strides = [1, 1]} : vector<9x256xf32> to vector<1x256xf32>
    %326 = vector.broadcast %325 : vector<1x256xf32> to vector<4x256xf32>
    %327 = arith.mulf %324, %326 : vector<4x256xf32>
    %c17 = arith.constant 17 : index
    %c0_165 = arith.constant 0 : index
    %c0_166 = arith.constant 0 : index
    %328 = vector.load %arg9[%c17, %c0_165, %c0_166] : memref<18x4x4xf32, #tpu.memory_space<vmem>>, vector<1x4x4xf32>
    %329 = vector.shape_cast %328 : vector<1x4x4xf32> to vector<4x4xf32>
    %cst_167 = arith.constant dense<0.000000e+00> : vector<4x256xf32>
    %330 = tpu.matmul %329, %327, %cst_167 {dimension_numbers = #tpu.dot_dimension_numbers<[1], [0], [0], [1], [0, 0, 1, 1], [], []>} : vector<4x4xf32>, vector<4x256xf32>, vector<4x256xf32> -> vector<4x256xf32>
    %331 = arith.addf %323, %330 : vector<4x256xf32>
    %332 = vector.broadcast %264 : vector<4x1xf32> to vector<4x256xf32>
    %333 = arith.addf %331, %332 : vector<4x256xf32>
    %cst_168 = arith.constant 0.000000e+00 : f32
    %334 = vector.broadcast %cst_168 : f32 to vector<4x256xf32>
    %335 = arith.maximumf %333, %334 : vector<4x256xf32>
    %c1_169 = arith.constant 1 : index
    %c0_170 = arith.constant 0 : index
    %c0_171 = arith.constant 0 : index
    %336 = vector.load %arg12[%c1_169, %c0_170, %c0_171] : memref<2x4x1xf32, #tpu.memory_space<vmem>>, vector<1x4x1xf32>
    %337 = vector.shape_cast %336 : vector<1x4x1xf32> to vector<4x1xf32>
    %c17_i32_172 = arith.constant 17 : i32
    %338 = tpu.dynamic_rotate %335 by %c17_i32_172 dim 1 : vector<4x256xf32>, i32 -> vector<4x256xf32>
    %339 = vector.extract_strided_slice %0 {offsets = [0, 0], sizes = [1, 256], strides = [1, 1]} : vector<9x256xf32> to vector<1x256xf32>
    %340 = vector.broadcast %339 : vector<1x256xf32> to vector<4x256xf32>
    %341 = arith.mulf %338, %340 : vector<4x256xf32>
    %c9_173 = arith.constant 9 : index
    %c0_174 = arith.constant 0 : index
    %c0_175 = arith.constant 0 : index
    %342 = vector.load %arg11[%c9_173, %c0_174, %c0_175] : memref<18x4x4xf32, #tpu.memory_space<vmem>>, vector<1x4x4xf32>
    %343 = vector.shape_cast %342 : vector<1x4x4xf32> to vector<4x4xf32>
    %cst_176 = arith.constant dense<0.000000e+00> : vector<4x256xf32>
    %344 = tpu.matmul %343, %341, %cst_176 {dimension_numbers = #tpu.dot_dimension_numbers<[1], [0], [0], [1], [0, 0, 1, 1], [], []>} : vector<4x4xf32>, vector<4x256xf32>, vector<4x256xf32> -> vector<4x256xf32>
    %c16_i32_177 = arith.constant 16 : i32
    %345 = tpu.dynamic_rotate %335 by %c16_i32_177 dim 1 : vector<4x256xf32>, i32 -> vector<4x256xf32>
    %346 = vector.extract_strided_slice %0 {offsets = [1, 0], sizes = [1, 256], strides = [1, 1]} : vector<9x256xf32> to vector<1x256xf32>
    %347 = vector.broadcast %346 : vector<1x256xf32> to vector<4x256xf32>
    %348 = arith.mulf %345, %347 : vector<4x256xf32>
    %c10_178 = arith.constant 10 : index
    %c0_179 = arith.constant 0 : index
    %c0_180 = arith.constant 0 : index
    %349 = vector.load %arg11[%c10_178, %c0_179, %c0_180] : memref<18x4x4xf32, #tpu.memory_space<vmem>>, vector<1x4x4xf32>
    %350 = vector.shape_cast %349 : vector<1x4x4xf32> to vector<4x4xf32>
    %cst_181 = arith.constant dense<0.000000e+00> : vector<4x256xf32>
    %351 = tpu.matmul %350, %348, %cst_181 {dimension_numbers = #tpu.dot_dimension_numbers<[1], [0], [0], [1], [0, 0, 1, 1], [], []>} : vector<4x4xf32>, vector<4x256xf32>, vector<4x256xf32> -> vector<4x256xf32>
    %352 = arith.addf %344, %351 : vector<4x256xf32>
    %c15_i32_182 = arith.constant 15 : i32
    %353 = tpu.dynamic_rotate %335 by %c15_i32_182 dim 1 : vector<4x256xf32>, i32 -> vector<4x256xf32>
    %354 = vector.extract_strided_slice %0 {offsets = [2, 0], sizes = [1, 256], strides = [1, 1]} : vector<9x256xf32> to vector<1x256xf32>
    %355 = vector.broadcast %354 : vector<1x256xf32> to vector<4x256xf32>
    %356 = arith.mulf %353, %355 : vector<4x256xf32>
    %c11_183 = arith.constant 11 : index
    %c0_184 = arith.constant 0 : index
    %c0_185 = arith.constant 0 : index
    %357 = vector.load %arg11[%c11_183, %c0_184, %c0_185] : memref<18x4x4xf32, #tpu.memory_space<vmem>>, vector<1x4x4xf32>
    %358 = vector.shape_cast %357 : vector<1x4x4xf32> to vector<4x4xf32>
    %cst_186 = arith.constant dense<0.000000e+00> : vector<4x256xf32>
    %359 = tpu.matmul %358, %356, %cst_186 {dimension_numbers = #tpu.dot_dimension_numbers<[1], [0], [0], [1], [0, 0, 1, 1], [], []>} : vector<4x4xf32>, vector<4x256xf32>, vector<4x256xf32> -> vector<4x256xf32>
    %360 = arith.addf %352, %359 : vector<4x256xf32>
    %c1_i32_187 = arith.constant 1 : i32
    %361 = tpu.dynamic_rotate %335 by %c1_i32_187 dim 1 : vector<4x256xf32>, i32 -> vector<4x256xf32>
    %362 = vector.extract_strided_slice %0 {offsets = [3, 0], sizes = [1, 256], strides = [1, 1]} : vector<9x256xf32> to vector<1x256xf32>
    %363 = vector.broadcast %362 : vector<1x256xf32> to vector<4x256xf32>
    %364 = arith.mulf %361, %363 : vector<4x256xf32>
    %c12_188 = arith.constant 12 : index
    %c0_189 = arith.constant 0 : index
    %c0_190 = arith.constant 0 : index
    %365 = vector.load %arg11[%c12_188, %c0_189, %c0_190] : memref<18x4x4xf32, #tpu.memory_space<vmem>>, vector<1x4x4xf32>
    %366 = vector.shape_cast %365 : vector<1x4x4xf32> to vector<4x4xf32>
    %cst_191 = arith.constant dense<0.000000e+00> : vector<4x256xf32>
    %367 = tpu.matmul %366, %364, %cst_191 {dimension_numbers = #tpu.dot_dimension_numbers<[1], [0], [0], [1], [0, 0, 1, 1], [], []>} : vector<4x4xf32>, vector<4x256xf32>, vector<4x256xf32> -> vector<4x256xf32>
    %368 = arith.addf %360, %367 : vector<4x256xf32>
    %c13_192 = arith.constant 13 : index
    %c0_193 = arith.constant 0 : index
    %c0_194 = arith.constant 0 : index
    %369 = vector.load %arg11[%c13_192, %c0_193, %c0_194] : memref<18x4x4xf32, #tpu.memory_space<vmem>>, vector<1x4x4xf32>
    %370 = vector.shape_cast %369 : vector<1x4x4xf32> to vector<4x4xf32>
    %cst_195 = arith.constant dense<0.000000e+00> : vector<4x256xf32>
    %371 = tpu.matmul %370, %335, %cst_195 {dimension_numbers = #tpu.dot_dimension_numbers<[1], [0], [0], [1], [0, 0, 1, 1], [], []>} : vector<4x4xf32>, vector<4x256xf32>, vector<4x256xf32> -> vector<4x256xf32>
    %372 = arith.addf %368, %371 : vector<4x256xf32>
    %c255_i32_196 = arith.constant 255 : i32
    %373 = tpu.dynamic_rotate %335 by %c255_i32_196 dim 1 : vector<4x256xf32>, i32 -> vector<4x256xf32>
    %374 = vector.extract_strided_slice %0 {offsets = [5, 0], sizes = [1, 256], strides = [1, 1]} : vector<9x256xf32> to vector<1x256xf32>
    %375 = vector.broadcast %374 : vector<1x256xf32> to vector<4x256xf32>
    %376 = arith.mulf %373, %375 : vector<4x256xf32>
    %c14_197 = arith.constant 14 : index
    %c0_198 = arith.constant 0 : index
    %c0_199 = arith.constant 0 : index
    %377 = vector.load %arg11[%c14_197, %c0_198, %c0_199] : memref<18x4x4xf32, #tpu.memory_space<vmem>>, vector<1x4x4xf32>
    %378 = vector.shape_cast %377 : vector<1x4x4xf32> to vector<4x4xf32>
    %cst_200 = arith.constant dense<0.000000e+00> : vector<4x256xf32>
    %379 = tpu.matmul %378, %376, %cst_200 {dimension_numbers = #tpu.dot_dimension_numbers<[1], [0], [0], [1], [0, 0, 1, 1], [], []>} : vector<4x4xf32>, vector<4x256xf32>, vector<4x256xf32> -> vector<4x256xf32>
    %380 = arith.addf %372, %379 : vector<4x256xf32>
    %c241_i32_201 = arith.constant 241 : i32
    %381 = tpu.dynamic_rotate %335 by %c241_i32_201 dim 1 : vector<4x256xf32>, i32 -> vector<4x256xf32>
    %382 = vector.extract_strided_slice %0 {offsets = [6, 0], sizes = [1, 256], strides = [1, 1]} : vector<9x256xf32> to vector<1x256xf32>
    %383 = vector.broadcast %382 : vector<1x256xf32> to vector<4x256xf32>
    %384 = arith.mulf %381, %383 : vector<4x256xf32>
    %c15_202 = arith.constant 15 : index
    %c0_203 = arith.constant 0 : index
    %c0_204 = arith.constant 0 : index
    %385 = vector.load %arg11[%c15_202, %c0_203, %c0_204] : memref<18x4x4xf32, #tpu.memory_space<vmem>>, vector<1x4x4xf32>
    %386 = vector.shape_cast %385 : vector<1x4x4xf32> to vector<4x4xf32>
    %cst_205 = arith.constant dense<0.000000e+00> : vector<4x256xf32>
    %387 = tpu.matmul %386, %384, %cst_205 {dimension_numbers = #tpu.dot_dimension_numbers<[1], [0], [0], [1], [0, 0, 1, 1], [], []>} : vector<4x4xf32>, vector<4x256xf32>, vector<4x256xf32> -> vector<4x256xf32>
    %388 = arith.addf %380, %387 : vector<4x256xf32>
    %c240_i32_206 = arith.constant 240 : i32
    %389 = tpu.dynamic_rotate %335 by %c240_i32_206 dim 1 : vector<4x256xf32>, i32 -> vector<4x256xf32>
    %390 = vector.extract_strided_slice %0 {offsets = [7, 0], sizes = [1, 256], strides = [1, 1]} : vector<9x256xf32> to vector<1x256xf32>
    %391 = vector.broadcast %390 : vector<1x256xf32> to vector<4x256xf32>
    %392 = arith.mulf %389, %391 : vector<4x256xf32>
    %c16_207 = arith.constant 16 : index
    %c0_208 = arith.constant 0 : index
    %c0_209 = arith.constant 0 : index
    %393 = vector.load %arg11[%c16_207, %c0_208, %c0_209] : memref<18x4x4xf32, #tpu.memory_space<vmem>>, vector<1x4x4xf32>
    %394 = vector.shape_cast %393 : vector<1x4x4xf32> to vector<4x4xf32>
    %cst_210 = arith.constant dense<0.000000e+00> : vector<4x256xf32>
    %395 = tpu.matmul %394, %392, %cst_210 {dimension_numbers = #tpu.dot_dimension_numbers<[1], [0], [0], [1], [0, 0, 1, 1], [], []>} : vector<4x4xf32>, vector<4x256xf32>, vector<4x256xf32> -> vector<4x256xf32>
    %396 = arith.addf %388, %395 : vector<4x256xf32>
    %c239_i32_211 = arith.constant 239 : i32
    %397 = tpu.dynamic_rotate %335 by %c239_i32_211 dim 1 : vector<4x256xf32>, i32 -> vector<4x256xf32>
    %398 = vector.extract_strided_slice %0 {offsets = [8, 0], sizes = [1, 256], strides = [1, 1]} : vector<9x256xf32> to vector<1x256xf32>
    %399 = vector.broadcast %398 : vector<1x256xf32> to vector<4x256xf32>
    %400 = arith.mulf %397, %399 : vector<4x256xf32>
    %c17_212 = arith.constant 17 : index
    %c0_213 = arith.constant 0 : index
    %c0_214 = arith.constant 0 : index
    %401 = vector.load %arg11[%c17_212, %c0_213, %c0_214] : memref<18x4x4xf32, #tpu.memory_space<vmem>>, vector<1x4x4xf32>
    %402 = vector.shape_cast %401 : vector<1x4x4xf32> to vector<4x4xf32>
    %cst_215 = arith.constant dense<0.000000e+00> : vector<4x256xf32>
    %403 = tpu.matmul %402, %400, %cst_215 {dimension_numbers = #tpu.dot_dimension_numbers<[1], [0], [0], [1], [0, 0, 1, 1], [], []>} : vector<4x4xf32>, vector<4x256xf32>, vector<4x256xf32> -> vector<4x256xf32>
    %404 = arith.addf %396, %403 : vector<4x256xf32>
    %405 = vector.broadcast %337 : vector<4x1xf32> to vector<4x256xf32>
    %406 = arith.addf %404, %405 : vector<4x256xf32>
    %407 = arith.addf %262, %406 : vector<4x256xf32>
    %408 = vector.extract_strided_slice %407 {offsets = [0, 0], sizes = [1, 256], strides = [1, 1]} : vector<4x256xf32> to vector<1x256xf32>
    %c0_216 = arith.constant 0 : index
    %c0_217 = arith.constant 0 : index
    %c0_218 = arith.constant 0 : index
    %409 = vector.load %arg13[%c0_216, %c0_217, %c0_218] : memref<1x1x256xf32, #tpu.memory_space<vmem>>, vector<1x1x256xf32>
    %410 = vector.shape_cast %409 : vector<1x1x256xf32> to vector<1x256xf32>
    %411 = vector.shape_cast %408 : vector<1x256xf32> to vector<1x1x256xf32>
    tpu.vector_store %arg13[%c0_216, %c0_217, %c0_218], %411 {strides = array<i32>} : memref<1x1x256xf32, #tpu.memory_space<vmem>>, vector<1x1x256xf32>,
    %412 = vector.broadcast %2 : f32 to vector<1x256xf32>
    %413 = arith.mulf %412, %408 : vector<1x256xf32>
    %cst_219 = arith.constant 1.000000e+00 : f32
    %414 = vector.broadcast %cst_219 : f32 to vector<1x256xf32>
    %415 = arith.addf %414, %413 : vector<1x256xf32>
    %cst_220 = arith.constant 1.000000e+00 : f32
    %416 = vector.broadcast %cst_220 : f32 to vector<1x256xf32>
    %417 = arith.divf %416, %415 : vector<1x256xf32>
    %418 = arith.mulf %413, %4 : vector<1x256xf32>
    %419 = arith.addf %8, %418 : vector<1x256xf32>
    %420 = arith.mulf %419, %417 : vector<1x256xf32>
    %c0_221 = arith.constant 0 : index
    %c0_222 = arith.constant 0 : index
    %c0_223 = arith.constant 0 : index
    %421 = vector.load %arg14[%c0_221, %c0_222, %c0_223] : memref<1x1x256xf32, #tpu.memory_space<vmem>>, vector<1x1x256xf32>
    %422 = vector.shape_cast %421 : vector<1x1x256xf32> to vector<1x256xf32>
    %423 = vector.shape_cast %420 : vector<1x256xf32> to vector<1x1x256xf32>
    tpu.vector_store %arg14[%c0_221, %c0_222, %c0_223], %423 {strides = array<i32>} : memref<1x1x256xf32, #tpu.memory_space<vmem>>, vector<1x1x256xf32>,
    %424 = arith.mulf %413, %6 : vector<1x256xf32>
    %425 = arith.addf %10, %424 : vector<1x256xf32>
    %426 = arith.mulf %425, %417 : vector<1x256xf32>
    %c0_224 = arith.constant 0 : index
    %c0_225 = arith.constant 0 : index
    %c0_226 = arith.constant 0 : index
    %427 = vector.load %arg15[%c0_224, %c0_225, %c0_226] : memref<1x1x256xf32, #tpu.memory_space<vmem>>, vector<1x1x256xf32>
    %428 = vector.shape_cast %427 : vector<1x1x256xf32> to vector<1x256xf32>
    %429 = vector.shape_cast %426 : vector<1x256xf32> to vector<1x1x256xf32>
    tpu.vector_store %arg15[%c0_224, %c0_225, %c0_226], %429 {strides = array<i32>} : memref<1x1x256xf32, #tpu.memory_space<vmem>>, vector<1x1x256xf32>,
    return
  }
  func.func @transform_0(%arg0: i32) -> i32 {
    %c0_i32 = arith.constant 0 : i32
    %c0_i32_0 = arith.constant 0 : i32
    return %c0_i32 : i32
  }
  func.func @transform_1(%arg0: i32) -> i32 {
    %c0_i32 = arith.constant 0 : i32
    %c0_i32_0 = arith.constant 0 : i32
    return %c0_i32 : i32
  }
  func.func @transform_2(%arg0: i32) -> (i32, i32, i32) {
    %c0_i32 = arith.constant 0 : i32
    %c0_i32_0 = arith.constant 0 : i32
    %c0_i32_1 = arith.constant 0 : i32
    return %arg0, %c0_i32, %c0_i32_0 : i32, i32, i32
  }
  func.func @transform_3(%arg0: i32) -> (i32, i32, i32) {
    %c0_i32 = arith.constant 0 : i32
    %c0_i32_0 = arith.constant 0 : i32
    %c0_i32_1 = arith.constant 0 : i32
    return %arg0, %c0_i32, %c0_i32_0 : i32, i32, i32
  }
  func.func @transform_4(%arg0: i32) -> (i32, i32, i32) {
    %c0_i32 = arith.constant 0 : i32
    %c0_i32_0 = arith.constant 0 : i32
    %c0_i32_1 = arith.constant 0 : i32
    return %arg0, %c0_i32, %c0_i32_0 : i32, i32, i32
  }
  func.func @transform_5(%arg0: i32) -> (i32, i32, i32) {
    %c0_i32 = arith.constant 0 : i32
    %c0_i32_0 = arith.constant 0 : i32
    %c0_i32_1 = arith.constant 0 : i32
    return %arg0, %c0_i32, %c0_i32_0 : i32, i32, i32
  }
  func.func @transform_6(%arg0: i32) -> (i32, i32) {
    %c0_i32 = arith.constant 0 : i32
    %c0_i32_0 = arith.constant 0 : i32
    %c0_i32_1 = arith.constant 0 : i32
    return %c0_i32, %c0_i32_0 : i32, i32
  }
  func.func @transform_7(%arg0: i32) -> (i32, i32, i32) {
    %c0_i32 = arith.constant 0 : i32
    %c0_i32_0 = arith.constant 0 : i32
    %c0_i32_1 = arith.constant 0 : i32
    %c0_i32_2 = arith.constant 0 : i32
    return %c0_i32, %c0_i32_0, %c0_i32_1 : i32, i32, i32
  }
  func.func @transform_8(%arg0: i32) -> (i32, i32, i32) {
    %c0_i32 = arith.constant 0 : i32
    %c0_i32_0 = arith.constant 0 : i32
    %c0_i32_1 = arith.constant 0 : i32
    %c0_i32_2 = arith.constant 0 : i32
    return %c0_i32, %c0_i32_0, %c0_i32_1 : i32, i32, i32
  }
  func.func @transform_9(%arg0: i32) -> (i32, i32, i32) {
    %c0_i32 = arith.constant 0 : i32
    %c0_i32_0 = arith.constant 0 : i32
    %c0_i32_1 = arith.constant 0 : i32
    %c0_i32_2 = arith.constant 0 : i32
    return %c0_i32, %c0_i32_0, %c0_i32_1 : i32, i32, i32
  }
  func.func @transform_10(%arg0: i32) -> (i32, i32, i32) {
    %c0_i32 = arith.constant 0 : i32
    %c0_i32_0 = arith.constant 0 : i32
    %c0_i32_1 = arith.constant 0 : i32
    %c0_i32_2 = arith.constant 0 : i32
    return %c0_i32, %c0_i32_0, %c0_i32_1 : i32, i32, i32
  }
  func.func @transform_11(%arg0: i32) -> (i32, i32, i32) {
    %c0_i32 = arith.constant 0 : i32
    %c0_i32_0 = arith.constant 0 : i32
    %c0_i32_1 = arith.constant 0 : i32
    %c0_i32_2 = arith.constant 0 : i32
    return %c0_i32, %c0_i32_0, %c0_i32_1 : i32, i32, i32
  }
  func.func @transform_12(%arg0: i32) -> (i32, i32, i32) {
    %c0_i32 = arith.constant 0 : i32
    %c0_i32_0 = arith.constant 0 : i32
    %c0_i32_1 = arith.constant 0 : i32
    return %arg0, %c0_i32, %c0_i32_0 : i32, i32, i32
  }
  func.func @transform_13(%arg0: i32) -> (i32, i32, i32) {
    %c0_i32 = arith.constant 0 : i32
    %c0_i32_0 = arith.constant 0 : i32
    %c0_i32_1 = arith.constant 0 : i32
    return %arg0, %c0_i32, %c0_i32_0 : i32, i32, i32
  }
  func.func @transform_14(%arg0: i32) -> (i32, i32, i32) {
    %c0_i32 = arith.constant 0 : i32
    %c0_i32_0 = arith.constant 0 : i32
    %c0_i32_1 = arith.constant 0 : i32
    return %arg0, %c0_i32, %c0_i32_0 : i32, i32, i32
  }
}

</mosaic_0001>

<bundles_post_ra>
// kernel: squeeze.8
= control target key start
LH: loop header
LB: loop body
LE: loop exit
PB: predicated region body
PF: predicated region fallthrough
CT: control target
= control target key end

     0   :  { %s89_s8 = smov 112   ;;  %s90_s11 = smov 80   ;;  %vm3_vm0 = vcmask 130048   ;;  %vm9_vm1 = vcmask 1048448   ;;  %vm15_vm2 = vcmask 917248   ;;  %vm21_vm3 = vcmask 786048   ;;  %s142_s0 = inlined_call_operand.vmem [shape: f32[2,1,16,16,1], index: 0, kind: input, shape index: {}]   ;;  %s143_s1 = inlined_call_operand.vmem [shape: f32[2,1,256], index: 1, kind: output, shape index: {}]  }
   0x1   :  { %v72_v0 = vld [vmem:[%s142_s0 + $0x7] ss:$8 sm:$0xf]   ;;  %v74_v1 = vld [vmem:[%s142_s0 + $0x5] ss:$8 sm:$0xf]  }
   0x2   :  { %7 = vrot.lane.b32.xlu0 %v72_v0, %s89_s8  ;;  %19 = vrot.lane.b32.xlu1 %v74_v1, %s90_s11  ;;  %v73_v2 = vld [vmem:[%s142_s0 + $0x6] ss:$8 sm:$0xf]   ;;  %v75_v3 = vld [vmem:[%s142_s0 + $0x4] ss:$8 sm:$0xf]  }
   0x3   :  { %s91_s16 = smov 96   ;;  %v2_v4 = vld [vmem:[%s142_s0] ss:$8 sm:$0xf]   ;;  %s92_s19 = smov 64   ;;  %vm27_vm4 = vcmask 654848  }
   0x4   :  { %v76_v5 = vld [vmem:[%s142_s0 + $0x3] ss:$8 sm:$0xf]   ;;  %4 = vst.msk [vmem:[#allocation0] ss:$8 sm:$0xf] %vm3_vm0, %v2_v4  }
   0x5   :  { %v77_v6 = vld [vmem:[%s142_s0 + $0x2] ss:$8 sm:$0xf]   ;;  %s93_s24 = smov 48   ;;  %s94_s25 = smov 32   ;;  %vm33_vm5 = vcmask 523648  }
   0x6   :  { %13 = vrot.lane.b32.xlu0 %v73_v2, %s91_s16  ;;  %25 = vrot.lane.b32.xlu1 %v75_v3, %s92_s19  ;;  %v78_v7 = vld [vmem:[%s142_s0 + $0x1] ss:$8 sm:$0xf]   ;;  %s95_s0 = smov 16   ;;  %vm39_vm6 = vcmask 392448   ;;  %vm45_vm7 = vcmask 261248  }
   0xa   :  { %31 = vrot.lane.b32.xlu0 %v76_v5, %s93_s24  ;;  %37 = vrot.lane.b32.xlu1 %v77_v6, %s94_s25 }
   0xe   :  { %43 = vrot.lane.b32.xlu0 %v78_v7, %s95_s0 }
  0x74   :  { %v8_v8 = vpop.permute.xlu0 %7   ;;  %v20_v9 = vpop.permute.xlu1 %19  }
  0x75   :  { %10 = vst.msk [vmem:[#allocation0] ss:$8 sm:$0xf] %vm9_vm1, %v8_v8  }
  0x78   :  { %v14_v10 = vpop.permute.xlu0 %13   ;;  %v26_v11 = vpop.permute.xlu1 %25  }
  0x79   :  { %16 = vst.msk [vmem:[#allocation0] ss:$8 sm:$0xf] %vm15_vm2, %v14_v10  }
  0x7a   :  { %22 = vst.msk [vmem:[#allocation0] ss:$8 sm:$0xf] %vm21_vm3, %v20_v9  }
  0x7b   :  { %28 = vst.msk [vmem:[#allocation0] ss:$8 sm:$0xf] %vm27_vm4, %v26_v11  }
  0x7c   :  { %v32_v12 = vpop.permute.xlu0 %31   ;;  %v38_v13 = vpop.permute.xlu1 %37  }
  0x7d   :  { %34 = vst.msk [vmem:[#allocation0] ss:$8 sm:$0xf] %vm33_vm5, %v32_v12  }
  0x7e   :  { %40 = vst.msk [vmem:[#allocation0] ss:$8 sm:$0xf] %vm39_vm6, %v38_v13  }
  0x80   :  { %v44_v14 = vpop.permute.xlu0 %43  }
  0x81   :  { %46 = vst.msk [vmem:[#allocation0] ss:$8 sm:$0xf] %vm45_vm7, %v44_v14  }
  0x88   :  { %v50_v15 = vld [vmem:[#allocation0] sm:$0x1]  ;;  %v54_v16 = vld [vmem:[#allocation0 + $0x8] sm:$0x1]  ;;  %v59_v17 = vld [vmem:[#allocation0 + $0x10] sm:$0x1] }
  0x89   :  { %52 = vst [vmem:[%s143_s1] sm:$0x1] %v50_v15  ;;  %79 = vst [vmem:[%s143_s1 + $0x1] sm:$0x1] %v54_v16  ;;  %v65_v18 = vld [vmem:[#allocation0 + $0x18] sm:$0x1] }
  0x8a   :  { %80 = vst [vmem:[%s143_s1 + $0x2] sm:$0x1] %v59_v17  ;;  %81 = vst [vmem:[%s143_s1 + $0x3] sm:$0x1] %v65_v18 }

// kernel: mxnet_forward.5
= control target key start
LH: loop header
LB: loop body
LE: loop exit
PB: predicated region body
PF: predicated region fallthrough
CT: control target
= control target key end

     0   :  { %s4908_s24 = smov 0   ;;  %s5755_s0 = inlined_call_operand.vmem [shape: f32[2,2,256], index: 0, kind: input, shape index: {}]   ;;  %s5756_s1 = inlined_call_operand.vmem [shape: f32[9,256], index: 1, kind: input, shape index: {}]   ;;  %s5757_s2 = inlined_call_operand.vmem [shape: f32[9,4,2], index: 2, kind: input, shape index: {}]   ;;  %s5758_s3 = inlined_call_operand.vmem [shape: f32[18,6,6], index: 3, kind: input, shape index: {}]   ;;  %s5759_s4 = inlined_call_operand.vmem [shape: f32[2,6,1], index: 4, kind: input, shape index: {}]   ;;  %s5760_s5 = inlined_call_operand.vmem [shape: f32[18,6,6], index: 5, kind: input, shape index: {}]   ;;  %s5761_s6 = inlined_call_operand.vmem [shape: f32[2,6,1], index: 6, kind: input, shape index: {}]   ;;  %s5762_s7 = inlined_call_operand.vmem [shape: f32[2,6,256], index: 7, kind: output, shape index: {}]  }
   0x1 LB: > { %s4555_s25 = sadd.s32 4294967295, %s4856_s24   ;;  %p4559_p0 = scmp.ge.s32.totalorder %s4856_s24, 1  ;;  %s4856_s24 = sphi %s4908_s24, %s17_s24  }
   0x2   : > { %p237_p1 = scmp.lt.s32.totalorder %s4856_s24, 3 }
   0x4   : > { %p238_p2 = pnand %p4559_p0, %p237_p1 }
   0x5   : > { %p269_p3 = scmp.lt.s32.totalorder (!%p238_p2), %s4555_s25, 1  ;;  %v4858_v0 = vmov (!%p238_p2), 0.0   ;;  %vm338_vm0 = vcmask (!%p238_p2), 1041408   ;;  %s4859_s30 = smov (!%p238_p2), 127   ;;  %vm334_vm1 = vcmask (!%p238_p2), 15360   ;;  %v299_v4 = vlaneseq (!%p238_p2)  ;;  %v4980_v9 = vld [vmem:[%s5756_s1] sm:$0xff] (!%p238_p2) }
   0x6   : > { %241 = sbr.rel (%p238_p2) target bundleno = 1991 (0x7c7), region = 48  ;;  %771 = vmatprep.mubr.f32.mxu0 (!%p238_p2), %v4858_v0  ;;  %409 = vmatprep.mubr.f32.mxu1 (!%p238_p2), %v4858_v0  ;;  %s4860_s8 = smov (!%p238_p2), 16   ;;  %v4580_v3 = vld [vmem:[%s5757_s2 + $0x10] sm:$0xf] (!%p238_p2)  ;;  %v4985_v10 = vld [vmem:[%s5756_s1 + $0x8] sm:$0xff] (!%p238_p2)  ;;  %vm1216_vm10 = vcmask (!%p238_p2), 1045504  }
   0x7   : > { %s4861_s11 = smov (!%p238_p2), 17   ;;  %s4862_s12 = smov (!%p238_p2), 113   ;;  %v4971_v5 = vshrl.u32 (!%p238_p2), %v299_v4, 7  ;;  %v4973_v6 = vand.u32 (!%p238_p2), 127, %v299_v4  ;;  %v4565_v31 = vld [vmem:[%s5757_s2 + $0x4] sm:$0xf] (!%p238_p2) }
   0x8   : > { %s4863_s13 = smov (!%p238_p2), 15   ;;  %s4864_s14 = smov (!%p238_p2), 112   ;;  %v4584_v32 = vld [vmem:[%s5757_s2 + $0x14] sm:$0xf] (!%p238_p2)  ;;  %v314_v51 = vld [vmem:[%s5757_s2] sm:$0xf] (!%p238_p2) }
   0x9   : > { %s4865_s15 = smov (!%p238_p2), 1   ;;  %s4866_s16 = smov (!%p238_p2), 111   ;;  %v789_v7 = vsub.s32 (!%p238_p2), 5, %v4971_v5  ;;  %v324_v8 = vsub.s32 (!%p238_p2), 1, %v4971_v5  ;;  %v306_v13 = vsub.s32 (!%p238_p2), 0, %v4971_v5  ;;  %vm784_vm2 = vcmp.lt.s32.totalorder (!%p238_p2), %v4973_v6, 127 }
   0xa   : > { %vm319_vm3 = vcmp.lt.s32.totalorder (!%p238_p2), %v4973_v6, 16  ;;  %vm301_vm4 = vcmp.lt.s32.totalorder (!%p238_p2), %v4973_v6, 17  ;;  %v890_v22 = vsub.s32 (!%p238_p2), 6, %v4971_v5  ;;  %vm885_vm5 = vcmp.lt.s32.totalorder (!%p238_p2), %v4973_v6, 113  ;;  %v4588_v52 = vld [vmem:[%s5757_s2 + $0x18] sm:$0xf] (!%p238_p2) }
   0xb   : > { %v4991_v14 = vrot.slane (!%p238_p2), %v4980_v9, %v789_v7  ;;  %v4994_v15 = vrot.slane (!%p238_p2), %v4985_v10, %v789_v7  ;;  %v4997_v16 = vrot.slane (!%p238_p2), %v4980_v9, %v324_v8  ;;  %v5000_v17 = vrot.slane (!%p238_p2), %v4985_v10, %v324_v8 }
   0xc   : > { %v5004_v20 = vrot.slane (!%p238_p2), %v4980_v9, %v306_v13  ;;  %v5007_v21 = vrot.slane (!%p238_p2), %v4985_v10, %v306_v13  ;;  %v5038_v37 = vrot.slane (!%p238_p2), %v4980_v9, %v890_v22  ;;  %v5045_v40 = vrot.slane (!%p238_p2), %v4985_v10, %v890_v22  ;;  %v4592_v13 = vld [vmem:[%s5757_s2 + $0x1c] sm:$0xf] (!%p238_p2) }
   0xd   : > { %s5764_s25 = smov (!%p269_p3, %s4555_s25), 1  ;;  %v505_v41 = vsub.s32 2, %v4971_v5  ;;  %vm500_vm6 = vcmp.lt.s32.totalorder %v4973_v6, 15  ;;  %v991_v46 = vsub.s32 7, %v4971_v5  ;;  %vm986_vm7 = vcmp.lt.s32.totalorder %v4973_v6, 112 }
   0xe   : > { %s4748_s26 = sshll.u32 %s5764_s25, 2  ;;  %v606_v61 = vsub.s32 3, %v4971_v5  ;;  %vm601_vm8 = vcmp.lt.s32.totalorder %v4973_v6, 1  ;;  %vm1087_vm9 = vcmp.lt.s32.totalorder %v4973_v6, 111  ;;  %vm1212_vm11 = vcmask 48128   ;;  %s4749_s22 = sshll.u32 %s5764_s25, 4 }
   0xf   : > { %s273_s29 = scalar_lea.vmem %s5755_s0, %s4748_s26  ;;  %v5061_v49 = vrot.slane %v4980_v9, %v505_v41  ;;  %v5064_v50 = vrot.slane %v4985_v10, %v505_v41  ;;  %v5080_v57 = vrot.slane %v4980_v9, %v991_v46  ;;  %v5087_v60 = vrot.slane %v4985_v10, %v991_v46 }
  0x10   : > { %v4924_v1 = vld.sshfl [vmem:[%s273_s29] sm:$0x33 pattern:$0x76325410]  ;;  %v5102_v8 = vrot.slane %v4980_v9, %v606_v61 }
  0x11   : > { %780 = vrot.lane.b32.xlu1 %v4924_v1, %s4859_s30  ;;  %315 = vrot.lane.b32.xlu0 %v4924_v1, %s4860_s8  ;;  %v4932_v2 = vcombine.high %v4924_v1, %v4924_v1 }
  0x13   : > { %4581 = vmatprep.subr.msk.mxu0 %vm338_vm0, %v4932_v2 }
  0x14   : > { %4582 = vmatpush1.msk.msra.mxu0 %vm338_vm0, %v4924_v1 }
  0x15   : > { %782 = vrot.lane.b32.xlu1 %v4932_v2, %s4859_s30  ;;  %317 = vrot.lane.b32.xlu0 %v4932_v2, %s4860_s8 }
  0x16   : > { %4583 = vmatmul.mubr.msk.f32.vlgmr.msra.gmra.mrb[0].mxu0 %vm334_vm1, %v4580_v3 }
  0x17   : > { %872 = vmatprep.mubr.f32.mxu0 %v4858_v0 }
  0x19   : > { %297 = vrot.lane.b32.xlu1 %v4932_v2, %s4861_s11  ;;  %295 = vrot.lane.b32.xlu0 %v4924_v1, %s4861_s11 }
  0x1d   : > { %883 = vrot.lane.b32.xlu1 %v4932_v2, %s4862_s12  ;;  %881 = vrot.lane.b32.xlu0 %v4924_v1, %s4862_s12 }
  0x21   : > { %498 = vrot.lane.b32.xlu1 %v4932_v2, %s4863_s13  ;;  %496 = vrot.lane.b32.xlu0 %v4924_v1, %s4863_s13 }
  0x25   : > { %984 = vrot.lane.b32.xlu1 %v4932_v2, %s4864_s14  ;;  %982 = vrot.lane.b32.xlu0 %v4924_v1, %s4864_s14 }
  0x29   : > { %599 = vrot.lane.b32.xlu1 %v4932_v2, %s4865_s15  ;;  %597 = vrot.lane.b32.xlu0 %v4924_v1, %s4865_s15 }
  0x2d   : > { %1085 = vrot.lane.b32.xlu1 %v4932_v2, %s4866_s16  ;;  %1083 = vrot.lane.b32.xlu0 %v4924_v1, %s4866_s16 }
  0x83   : > { %v781_v11 = vpop.permute.xlu1 %780  ;;  %v316_v12 = vpop.permute.xlu0 %315 }
  0x87   : > { %v783_v18 = vpop.permute.xlu1 %782  ;;  %v318_v19 = vpop.permute.xlu0 %317 }
  0x88   : > { %v785_v23 = vsel %vm784_vm2, %v781_v11, %v783_v18  ;;  %v786_v24 = vsel %vm784_vm2, %v783_v18, %v781_v11  ;;  %v320_v25 = vsel %vm319_vm3, %v316_v12, %v318_v19  ;;  %v321_v26 = vsel %vm319_vm3, %v318_v19, %v316_v12  ;;  %v4572_v12 = vld [vmem:[%s5757_s2 + $0x8] sm:$0xf] }
  0x89   : > { %v795_v27 = vmul.f32 %v4991_v14, %v785_v23  ;;  %v796_v28 = vmul.f32 %v4994_v15, %v786_v24  ;;  %v330_v29 = vmul.f32 %v4997_v16, %v321_v26  ;;  %v331_v30 = vmul.f32 %v5000_v17, %v320_v25  ;;  %v5127_v24 = vld [vmem:[%s5756_s1 + $0x10] ss:$0 sm:$0xff]  ;;  %v5132_v25 = vld [vmem:[%s5756_s1 + $0x18] ss:$0 sm:$0xff] }
  0x8a   : > { %v5105_v11 = vrot.slane %v4985_v10, %v606_v61 }
  0x8b   : > { %v298_v33 = vpop.permute.xlu1 %297  ;;  %4566 = vmatprep.subr.msk.mxu1 %vm338_vm0, %v331_v30  ;;  %v296_v34 = vpop.permute.xlu0 %295  ;;  %4585 = vmatprep.subr.msk.mxu0 %vm338_vm0, %v796_v28 }
  0x8c   : > { %v302_v35 = vsel %vm301_vm4, %v296_v34, %v298_v33  ;;  %v303_v36 = vsel %vm301_vm4, %v298_v33, %v296_v34  ;;  %4567 = vmatpush1.msk.msra.mxu1 %vm338_vm0, %v330_v29  ;;  %4586 = vmatpush1.msk.msra.mxu0 %vm338_vm0, %v795_v27  ;;  %v4598_v33 = vld [vmem:[%s5757_s2 + $0x20] sm:$0xf] }
  0x8d   : > { %v312_v38 = vmul.f32 %v5004_v20, %v303_v36  ;;  %v313_v39 = vmul.f32 %v5007_v21, %v302_v35  ;;  %4568 = vmatmul.mubr.msk.f32.vlgmr.msra.gmra.mrb[0].mxu1 %vm334_vm1, %v4565_v31  ;;  %4587 = vmatmul.mubr.msk.f32.vlgmr.msra.gmra.mrb[0].mxu0 %vm334_vm1, %v4584_v32  ;;  %v4576_v32 = vld [vmem:[%s5757_s2 + $0xc] sm:$0xf] }
  0x8e   : > { %489 = vmatprep.mubr.f32.mxu1 %v4858_v0  ;;  %973 = vmatprep.mubr.f32.mxu0 %v4858_v0 }
  0x8f   : > { %v884_v42 = vpop.permute.xlu1 %883  ;;  %4569 = vmatprep.subr.msk.mxu1 %vm338_vm0, %v313_v39  ;;  %v882_v43 = vpop.permute.xlu0 %881 }
  0x90   : > { %v886_v44 = vsel %vm885_vm5, %v882_v43, %v884_v42  ;;  %v887_v45 = vsel %vm885_vm5, %v884_v42, %v882_v43  ;;  %4570 = vmatpush1.msk.msra.mxu1 %vm338_vm0, %v312_v38 }
  0x91   : > { %v896_v47 = vmul.f32 %v5038_v37, %v886_v44  ;;  %v897_v48 = vmul.f32 %v5045_v40, %v887_v45 }
  0x93   : > { %v499_v53 = vpop.permute.xlu1 %498  ;;  %v497_v54 = vpop.permute.xlu0 %496  ;;  %4589 = vmatprep.subr.msk.mxu0 %vm338_vm0, %v897_v48 }
  0x94   : > { %v501_v55 = vsel %vm500_vm6, %v497_v54, %v499_v53  ;;  %v502_v56 = vsel %vm500_vm6, %v499_v53, %v497_v54  ;;  %4590 = vmatpush1.msk.msra.mxu0 %vm338_vm0, %v896_v47 }
  0x95   : > { %v511_v58 = vmul.f32 %v5061_v49, %v502_v56  ;;  %v512_v59 = vmul.f32 %v5064_v50, %v501_v55  ;;  %4571 = vmatmul.mubr.msk.f32.vlgmr.msra.gmra.mrb[0].mxu1 %vm334_vm1, %v314_v51  ;;  %4591 = vmatmul.mubr.msk.f32.vlgmr.msra.gmra.mrb[0].mxu0 %vm334_vm1, %v4588_v52  ;;  %v4602_v55 = vld [vmem:[%s5758_s3 + $0x8] sm:$0x3f] }
  0x96   : > { %588 = vmatprep.mubr.f32.mxu1 %v4858_v0  ;;  %1074 = vmatprep.mubr.f32.mxu0 %v4858_v0 }
  0x97   : > { %v985_v62 = vpop.permute.xlu1 %984  ;;  %4573 = vmatprep.subr.msk.mxu1 %vm338_vm0, %v512_v59  ;;  %v983_v63 = vpop.permute.xlu0 %982 }
  0x98   : > { %v987_v3 = vsel %vm986_vm7, %v983_v63, %v985_v62  ;;  %v988_v4 = vsel %vm986_vm7, %v985_v62, %v983_v63  ;;  %4574 = vmatpush1.msk.msra.mxu1 %vm338_vm0, %v511_v58 }
  0x99   : > { %v997_v5 = vmul.f32 %v5080_v57, %v987_v3  ;;  %v998_v7 = vmul.f32 %v5087_v60, %v988_v4 }
  0x9b   : > { %v600_v18 = vpop.permute.xlu1 %599  ;;  %v598_v19 = vpop.permute.xlu0 %597  ;;  %4593 = vmatprep.subr.msk.mxu0 %vm338_vm0, %v998_v7 }
  0x9c   : > { %v602_v22 = vsel %vm601_vm8, %v598_v19, %v600_v18  ;;  %v603_v9 = vsel %vm601_vm8, %v600_v18, %v598_v19  ;;  %4594 = vmatpush1.msk.msra.mxu0 %vm338_vm0, %v997_v5 }
  0x9d   : > { %v612_v10 = vmul.f32 %v5102_v8, %v603_v9  ;;  %v613_v23 = vmul.f32 %v5105_v11, %v602_v22  ;;  %4575 = vmatmul.mubr.msk.f32.vlgmr.msra.gmra.mrb[0].mxu1 %vm334_vm1, %v4572_v12  ;;  %4595 = vmatmul.mubr.msk.f32.vlgmr.msra.gmra.mrb[0].mxu0 %vm334_vm1, %v4592_v13  ;;  %v1201_v13 = vld [vmem:[%s5758_s3] sm:$0x3f] }
  0x9e   : > { %689 = vmatprep.mubr.f32.mxu1 %v4858_v0  ;;  %1175 = vmatprep.mubr.f32.mxu0 %v4858_v0 }
  0x9f   : > { %v1086_v26 = vpop.permute.xlu1 %1085  ;;  %4577 = vmatprep.subr.msk.mxu1 %vm338_vm0, %v613_v23  ;;  %v1084_v27 = vpop.permute.xlu0 %1083  ;;  %v4609_v23 = vld [vmem:[%s5758_s3 + $0x10] sm:$0x3f] }
  0xa0   : > { %v1088_v28 = vsel %vm1087_vm9, %v1084_v27, %v1086_v26  ;;  %v1089_v29 = vsel %vm1087_vm9, %v1086_v26, %v1084_v27  ;;  %4578 = vmatpush1.msk.msra.mxu1 %vm338_vm0, %v612_v10 }
  0xa1   : > { %v1098_v30 = vmul.f32 %v5127_v24, %v1088_v28  ;;  %v1099_v31 = vmul.f32 %v5132_v25, %v1089_v29 }
  0xa3   : > { %4599 = vmatprep.subr.msk.mxu0 %vm338_vm0, %v1099_v31 }
  0xa4   : > { %4600 = vmatpush1.msk.msra.mxu0 %vm338_vm0, %v1098_v30  ;;  %v4613_v30 = vld [vmem:[%s5758_s3 + $0x18] sm:$0x3f] }
  0xa5   : > { %4579 = vmatmul.mubr.msk.f32.vlgmr.msra.gmra.mrb[0].mxu1 %vm334_vm1, %v4576_v32  ;;  %4601 = vmatmul.mubr.msk.f32.vlgmr.msra.gmra.mrb[0].mxu0 %vm334_vm1, %v4598_v33 }
  0xa6   : > { %1287 = vmatprep.mubr.f32.mxu1 %v4858_v0  ;;  %2112 = vmatprep.mubr.f32.mxu0 %v4858_v0 }
 0x178   : > { %v691_v34 = vpop.f32.mrb[0].mxu1  ;;  %v1177_v35 = vpop.f32.mrb[0].mxu0 }
 0x179   : > { %v4750_v36 = vadd.f32 %v1177_v35, %v691_v34  ;;  %v693_v38 = vpop.f32.mrb[1].mxu1  ;;  %v1179_v39 = vpop.f32.mrb[1].mxu0 }
 0x17a   : > { %v4751_v41 = vadd.f32 %v1179_v39, %v693_v38 }
 0x17b   : > { %v1186_v42 = vrot.slane %v4750_v36, 6  ;;  %v4617_v36 = vld [vmem:[%s5758_s3 + $0x20] sm:$0x3f] }
 0x17c   : > { %v1187_v43 = vrot.slane %v4751_v41, 6 }
 0x17d   : > { %v5158_v44 = vsel %vm338_vm0, %v4924_v1, %v1186_v42  ;;  %v1192_v1 = vld [vmem:[%s5759_s4] sm:$0x3f] }
 0x17e   : > { %v5162_v45 = vsel %vm338_vm0, %v4932_v2, %v1187_v43  ;;  %1202 = vrot.lane.b32.xlu0 %v5158_v44, %s4860_s8  ;;  %v4867_v2 = vmov 0  }
 0x17f   : > { %1204 = vrot.lane.b32.xlu1 %v5162_v45, %s4860_s8  ;;  %4848 = vset.pattern.permute.xlu0 %v4867_v2 }
 0x180   : > { %4849 = vset.pattern.permute.xlu1 %v4867_v2  ;;  %v4621_v2 = vld [vmem:[%s5758_s3 + $0x28] sm:$0x3f] }
 0x182   : > { %1193 = vrot.lane.b32.xlu0 %v5158_v44, %s4861_s11 }
 0x183   : > { %1195 = vrot.lane.b32.xlu1 %v5162_v45, %s4861_s11 }
 0x186   : > { %1374 = vrot.lane.b32.xlu0 %v5158_v44, %s4863_s13 }
 0x187   : > { %1376 = vrot.lane.b32.xlu1 %v5162_v45, %s4863_s13 }
 0x18a   : > { %1466 = vrot.lane.b32.xlu0 %v5158_v44, %s4865_s15 }
 0x18b   : > { %1468 = vrot.lane.b32.xlu1 %v5162_v45, %s4865_s15 }
 0x18e   : > { %1642 = vrot.lane.b32.xlu0 %v5158_v44, %s4859_s30 }
 0x18f   : > { %1644 = vrot.lane.b32.xlu1 %v5162_v45, %s4859_s30 }
 0x192   : > { %1734 = vrot.lane.b32.xlu0 %v5158_v44, %s4862_s12 }
 0x193   : > { %1736 = vrot.lane.b32.xlu1 %v5162_v45, %s4862_s12 }
 0x196   : > { %1826 = vrot.lane.b32.xlu0 %v5158_v44, %s4864_s14 }
 0x197   : > { %1828 = vrot.lane.b32.xlu1 %v5162_v45, %s4864_s14 }
 0x19a   : > { %1918 = vrot.lane.b32.xlu0 %v5158_v44, %s4866_s16 }
 0x19b   : > { %1920 = vrot.lane.b32.xlu1 %v5162_v45, %s4866_s16 }
 0x19e   : > { %2012 = vperm.xlu0 %4848, %v1192_v1  }
 0x1f0   : > { %v1203_v46 = vpop.permute.xlu0 %1202 }
 0x1f1   : > { %v1205_v47 = vpop.permute.xlu1 %1204 }
 0x1f2   : > { %v1206_v48 = vsel %vm319_vm3, %v1203_v46, %v1205_v47  ;;  %v1207_v51 = vsel %vm319_vm3, %v1205_v47, %v1203_v46 }
 0x1f3   : > { %v1208_v52 = vmul.f32 %v1207_v51, %v4997_v16  ;;  %v1209_v53 = vmul.f32 %v1206_v48, %v5000_v17 }
 0x1f4   : > { %v1194_v54 = vpop.permute.xlu0 %1193 }
 0x1f5   : > { %4603 = vmatprep.subr.msk.mxu1 %vm1216_vm10, %v1209_v53  ;;  %v1196_v56 = vpop.permute.xlu1 %1195 }
 0x1f6   : > { %v1197_v58 = vsel %vm301_vm4, %v1194_v54, %v1196_v56  ;;  %v1198_v59 = vsel %vm301_vm4, %v1196_v56, %v1194_v54  ;;  %4604 = vmatpush1.msk.msra.mxu1 %vm1216_vm10, %v1208_v52  ;;  %v4625_v54 = vld [vmem:[%s5758_s3 + $0x30] sm:$0x3f] }
 0x1f7   : > { %v1199_v61 = vmul.f32 %v1198_v59, %v5004_v20  ;;  %v1200_v62 = vmul.f32 %v1197_v58, %v5007_v21  ;;  %4605 = vmatmul.mubr.msk.f32.vlgmr.msra.gmra.mrb[2].mxu1 %vm1212_vm11, %v4602_v55  ;;  %v4629_v59 = vld [vmem:[%s5758_s3 + $0x38] sm:$0x3f] }
 0x1f8   : > { %v1375_v63 = vpop.permute.xlu0 %1374  ;;  %1367 = vmatprep.mubr.f32.mxu1 %v4858_v0 }
 0x1f9   : > { %4606 = vmatprep.subr.msk.mxu1 %vm1216_vm10, %v1200_v62  ;;  %v1377_v3 = vpop.permute.xlu1 %1376  ;;  %v4633_v62 = vld [vmem:[%s5758_s3 + $0x40] sm:$0x3f] }
 0x1fa   : > { %v1378_v4 = vsel %vm500_vm6, %v1375_v63, %v1377_v3  ;;  %4607 = vmatpush1.msk.msra.mxu1 %vm1216_vm10, %v1199_v61  ;;  %v1379_v5 = vsel %vm500_vm6, %v1377_v3, %v1375_v63 }
 0x1fb   : > { %v1381_v7 = vmul.f32 %v1378_v4, %v5064_v50  ;;  %v1380_v19 = vmul.f32 %v1379_v5, %v5061_v49 }
 0x1fc   : > { %v1467_v12 = vpop.permute.xlu0 %1466 }
 0x1fd   : > { %4610 = vmatprep.subr.msk.mxu1 %vm1216_vm10, %v1381_v7  ;;  %v1469_v18 = vpop.permute.xlu1 %1468 }
 0x1fe   : > { %v1470_v22 = vsel %vm601_vm8, %v1467_v12, %v1469_v18  ;;  %v1471_v10 = vsel %vm601_vm8, %v1469_v18, %v1467_v12  ;;  %v2019_v18 = vld [vmem:[%s5761_s6] sm:$0x3f] }
 0x1ff   : > { %v1473_v9 = vmul.f32 %v1470_v22, %v5105_v11  ;;  %4608 = vmatmul.mubr.msk.f32.vlgmr.msra.gmra.mrb[2].mxu1 %vm1212_vm11, %v1201_v13  ;;  %v1472_v26 = vmul.f32 %v1471_v10, %v5102_v8 }
 0x200   : > { %4611 = vmatpush1.msk.msra.mxu1 %vm1216_vm10, %v1380_v19  ;;  %1457 = vmatprep.mubr.f32.mxu1 %v4858_v0  ;;  %v1643_v27 = vpop.permute.xlu0 %1642 }
 0x201   : > { %4614 = vmatprep.subr.msk.mxu1 %vm1216_vm10, %v1473_v9  ;;  %v1645_v28 = vpop.permute.xlu1 %1644 }
 0x202   : > { %v1647_v29 = vsel %vm784_vm2, %v1645_v28, %v1643_v27  ;;  %v1646_v34 = vsel %vm784_vm2, %v1643_v27, %v1645_v28  ;;  %v4637_v28 = vld [vmem:[%s5760_s5 + $0x8] sm:$0x3f] }
 0x203   : > { %v1649_v31 = vmul.f32 %v1647_v29, %v4994_v15  ;;  %v1648_v38 = vmul.f32 %v1646_v34, %v4991_v14 }
 0x204   : > { %v1735_v32 = vpop.permute.xlu0 %1734 }
 0x205   : > { %v1737_v33 = vpop.permute.xlu1 %1736 }
 0x206   : > { %v1739_v35 = vsel %vm885_vm5, %v1737_v33, %v1735_v32  ;;  %v1738_v43 = vsel %vm885_vm5, %v1735_v32, %v1737_v33 }
 0x207   : > { %4612 = vmatmul.mubr.msk.f32.vlgmr.msra.gmra.mrb[2].mxu1 %vm1212_vm11, %v4609_v23  ;;  %v1741_v39 = vmul.f32 %v1739_v35, %v5045_v40  ;;  %v1740_v46 = vmul.f32 %v1738_v43, %v5038_v37 }
 0x208   : > { %4615 = vmatpush1.msk.msra.mxu1 %vm1216_vm10, %v1472_v26  ;;  %1549 = vmatprep.mubr.f32.mxu1 %v4858_v0  ;;  %v1827_v41 = vpop.permute.xlu0 %1826 }
 0x209   : > { %4618 = vmatprep.subr.msk.mxu1 %vm1216_vm10, %v5162_v45  ;;  %v1829_v42 = vpop.permute.xlu1 %1828 }
 0x20a   : > { %v1831_v1 = vsel %vm986_vm7, %v1829_v42, %v1827_v41  ;;  %v1830_v52 = vsel %vm986_vm7, %v1827_v41, %v1829_v42  ;;  %v2028_v41 = vld [vmem:[%s5760_s5] sm:$0x3f] }
 0x20b   : > { %v1833_v47 = vmul.f32 %v1831_v1, %v5087_v60  ;;  %v1832_v55 = vmul.f32 %v1830_v52, %v5080_v57 }
 0x20c   : > { %v1919_v48 = vpop.permute.xlu0 %1918 }
 0x20d   : > { %v1921_v51 = vpop.permute.xlu1 %1920 }
 0x20e   : > { %v1923_v53 = vsel %vm1087_vm9, %v1921_v51, %v1919_v48  ;;  %v1922_v58 = vsel %vm1087_vm9, %v1919_v48, %v1921_v51  ;;  %v4644_v48 = vld [vmem:[%s5760_s5 + $0x10] sm:$0x3f] }
 0x20f   : > { %4616 = vmatmul.mubr.msk.f32.vlgmr.msra.gmra.mrb[2].mxu1 %vm1212_vm11, %v4613_v30  ;;  %v1925_v56 = vmul.f32 %v5132_v25, %v1923_v53  ;;  %v1924_v61 = vmul.f32 %v5127_v24, %v1922_v58 }
 0x210   : > { %4619 = vmatpush1.msk.msra.mxu1 %vm1216_vm10, %v5158_v44  ;;  %1633 = vmatprep.mubr.f32.mxu1 %v4858_v0 }
 0x211   : > { %4622 = vmatprep.subr.msk.mxu1 %vm1216_vm10, %v1649_v31 }
 0x217   : > { %4620 = vmatmul.mubr.msk.f32.vlgmr.msra.gmra.mrb[2].mxu1 %vm1212_vm11, %v4617_v36 }
 0x218   : > { %4623 = vmatpush1.msk.msra.mxu1 %vm1216_vm10, %v1648_v38  ;;  %1725 = vmatprep.mubr.f32.mxu1 %v4858_v0 }
 0x219   : > { %4626 = vmatprep.subr.msk.mxu1 %vm1216_vm10, %v1741_v39 }
 0x21d   : > { %v2013_v63 = vpop.permute.xlu0 %2012 }
 0x21f   : > { %4624 = vmatmul.mubr.msk.f32.vlgmr.msra.gmra.mrb[2].mxu1 %vm1212_vm11, %v4621_v2 }
 0x220   : > { %4627 = vmatpush1.msk.msra.mxu1 %vm1216_vm10, %v1740_v46  ;;  %1817 = vmatprep.mubr.f32.mxu1 %v4858_v0 }
 0x221   : > { %4630 = vmatprep.subr.msk.mxu1 %vm1216_vm10, %v1833_v47 }
 0x227   : > { %4628 = vmatmul.mubr.msk.f32.vlgmr.msra.gmra.mrb[2].mxu1 %vm1212_vm11, %v4625_v54 }
 0x228   : > { %4631 = vmatpush1.msk.msra.mxu1 %vm1216_vm10, %v1832_v55  ;;  %1909 = vmatprep.mubr.f32.mxu1 %v4858_v0  ;;  %v4648_v55 = vld [vmem:[%s5760_s5 + $0x18] sm:$0x3f] }
 0x229   : > { %4634 = vmatprep.subr.msk.mxu1 %vm1216_vm10, %v1925_v56 }
 0x22f   : > { %4632 = vmatmul.mubr.msk.f32.vlgmr.msra.gmra.mrb[2].mxu1 %vm1212_vm11, %v4629_v59 }
 0x230   : > { %4635 = vmatpush1.msk.msra.mxu1 %vm1216_vm10, %v1924_v61  ;;  %2001 = vmatprep.mubr.f32.mxu1 %v4858_v0 }
 0x237   : > { %4636 = vmatmul.mubr.msk.f32.vlgmr.msra.gmra.mrb[2].mxu1 %vm1212_vm11, %v4633_v62 }
 0x238   : > { %2939 = vmatprep.mubr.f32.mxu1 %v4858_v0 }
 0x30a   : > { %v2003_v3 = vpop.f32.mrb[2].mxu1 }
 0x30b   : > { %v2015_v4 = vadd.f32 %v2013_v63, %v2003_v3  ;;  %v2005_v5 = vpop.f32.mrb[3].mxu1 }
 0x30c   : > { %v2016_v12 = vadd.f32 %v2013_v63, %v2005_v5  ;;  %v4652_v63 = vld [vmem:[%s5760_s5 + $0x20] sm:$0x3f] }
 0x30d   : > { %v5312_v7 = vmax.f32 %v2015_v4, 0.0 }
 0x30e   : > { %v2018_v13 = vmax.f32 %v2016_v12, 0.0 }
 0x30f   : > { %2020 = vrot.lane.b32.xlu0 %v5312_v7, %s4861_s11  ;;  %2029 = vrot.lane.b32.xlu1 %v5312_v7, %s4860_s8 }
 0x313   : > { %2199 = vrot.lane.b32.xlu0 %v5312_v7, %s4863_s13  ;;  %2031 = vrot.lane.b32.xlu1 %v2018_v13, %s4860_s8 }
 0x317   : > { %2291 = vrot.lane.b32.xlu0 %v5312_v7, %s4865_s15  ;;  %2022 = vrot.lane.b32.xlu1 %v2018_v13, %s4861_s11 }
 0x31b   : > { %2467 = vrot.lane.b32.xlu0 %v5312_v7, %s4859_s30  ;;  %2201 = vrot.lane.b32.xlu1 %v2018_v13, %s4863_s13 }
 0x31f   : > { %2559 = vrot.lane.b32.xlu0 %v5312_v7, %s4862_s12  ;;  %2293 = vrot.lane.b32.xlu1 %v2018_v13, %s4865_s15 }
 0x323   : > { %2651 = vrot.lane.b32.xlu0 %v5312_v7, %s4864_s14  ;;  %2469 = vrot.lane.b32.xlu1 %v2018_v13, %s4859_s30 }
 0x327   : > { %2743 = vrot.lane.b32.xlu0 %v5312_v7, %s4866_s16  ;;  %2561 = vrot.lane.b32.xlu1 %v2018_v13, %s4862_s12 }
 0x32b   : > { %2837 = vperm.xlu0 %4848, %v2019_v18   ;;  %2653 = vrot.lane.b32.xlu1 %v2018_v13, %s4864_s14  ;;  %v4656_v18 = vld [vmem:[%s5760_s5 + $0x28] sm:$0x3f] }
 0x32f   : > { %2745 = vrot.lane.b32.xlu1 %v2018_v13, %s4866_s16 }
 0x381   : > { %v2030_v19 = vpop.permute.xlu1 %2029  ;;  %v2021_v22 = vpop.permute.xlu0 %2020 }
 0x385   : > { %v2032_v9 = vpop.permute.xlu1 %2031  ;;  %v2200_v32 = vpop.permute.xlu0 %2199 }
 0x386   : > { %v2033_v10 = vsel %vm319_vm3, %v2030_v19, %v2032_v9  ;;  %v2034_v23 = vsel %vm319_vm3, %v2032_v9, %v2030_v19 }
 0x387   : > { %v2035_v26 = vmul.f32 %v2034_v23, %v4997_v16  ;;  %v2036_v27 = vmul.f32 %v2033_v10, %v5000_v17 }
 0x389   : > { %4638 = vmatprep.subr.msk.mxu0 %vm1216_vm10, %v2036_v27  ;;  %v2023_v29 = vpop.permute.xlu1 %2022  ;;  %v2292_v42 = vpop.permute.xlu0 %2291  ;;  %v4660_v27 = vld [vmem:[%s5760_s5 + $0x30] sm:$0x3f] }
 0x38a   : > { %v2024_v30 = vsel %vm301_vm4, %v2021_v22, %v2023_v29  ;;  %v2025_v31 = vsel %vm301_vm4, %v2023_v29, %v2021_v22  ;;  %4639 = vmatpush1.msk.msra.mxu0 %vm1216_vm10, %v2035_v26 }
 0x38b   : > { %v2026_v33 = vmul.f32 %v2025_v31, %v5004_v20  ;;  %v2027_v34 = vmul.f32 %v2024_v30, %v5007_v21  ;;  %4640 = vmatmul.mubr.msk.f32.vlgmr.msra.gmra.mrb[2].mxu0 %vm1212_vm11, %v4637_v28  ;;  %v4664_v31 = vld [vmem:[%s5760_s5 + $0x38] sm:$0x3f] }
 0x38c   : > { %2192 = vmatprep.mubr.f32.mxu0 %v4858_v0 }
 0x38d   : > { %4641 = vmatprep.subr.msk.mxu0 %vm1216_vm10, %v2027_v34  ;;  %v2202_v35 = vpop.permute.xlu1 %2201  ;;  %v2468_v53 = vpop.permute.xlu0 %2467 }
 0x38e   : > { %v2203_v36 = vsel %vm500_vm6, %v2200_v32, %v2202_v35  ;;  %4642 = vmatpush1.msk.msra.mxu0 %vm1216_vm10, %v2026_v33  ;;  %v2204_v38 = vsel %vm500_vm6, %v2202_v35, %v2200_v32  ;;  %v4668_v33 = vld [vmem:[%s5760_s5 + $0x40] sm:$0x3f] }
 0x38f   : > { %v2206_v39 = vmul.f32 %v2203_v36, %v5064_v50  ;;  %v2205_v1 = vmul.f32 %v2204_v38, %v5061_v49 }
 0x391   : > { %4645 = vmatprep.subr.msk.mxu0 %vm1216_vm10, %v2206_v39  ;;  %v2294_v43 = vpop.permute.xlu1 %2293  ;;  %v2560_v59 = vpop.permute.xlu0 %2559 }
 0x392   : > { %v2295_v2 = vsel %vm601_vm8, %v2292_v42, %v2294_v43  ;;  %v2296_v47 = vsel %vm601_vm8, %v2294_v43, %v2292_v42 }
 0x393   : > { %v2298_v46 = vmul.f32 %v2295_v2, %v5105_v11  ;;  %4643 = vmatmul.mubr.msk.f32.vlgmr.msra.gmra.mrb[2].mxu0 %vm1212_vm11, %v2028_v41  ;;  %v2297_v51 = vmul.f32 %v2296_v47, %v5102_v8 }
 0x394   : > { %4646 = vmatpush1.msk.msra.mxu0 %vm1216_vm10, %v2205_v1  ;;  %2282 = vmatprep.mubr.f32.mxu0 %v4858_v0 }
 0x395   : > { %4649 = vmatprep.subr.msk.mxu0 %vm1216_vm10, %v2298_v46  ;;  %v2470_v52 = vpop.permute.xlu1 %2469 }
 0x396   : > { %v2472_v54 = vsel %vm784_vm2, %v2470_v52, %v2468_v53  ;;  %v2471_v61 = vsel %vm784_vm2, %v2468_v53, %v2470_v52 }
 0x397   : > { %v2474_v56 = vmul.f32 %v2472_v54, %v4994_v15  ;;  %v2473_v3 = vmul.f32 %v2471_v61, %v4991_v14 }
 0x399   : > { %v2562_v58 = vpop.permute.xlu1 %2561 }
 0x39a   : > { %v2564_v62 = vsel %vm885_vm5, %v2562_v58, %v2560_v59  ;;  %v2563_v12 = vsel %vm885_vm5, %v2560_v59, %v2562_v58 }
 0x39b   : > { %4647 = vmatmul.mubr.msk.f32.vlgmr.msra.gmra.mrb[2].mxu0 %vm1212_vm11, %v4644_v48  ;;  %v2566_v4 = vmul.f32 %v2564_v62, %v5045_v40  ;;  %v2565_v19 = vmul.f32 %v2563_v12, %v5038_v37 }
 0x39c   : > { %4650 = vmatpush1.msk.msra.mxu0 %vm1216_vm10, %v2297_v51  ;;  %2374 = vmatprep.mubr.f32.mxu0 %v4858_v0  ;;  %v4674_v51 = vld [vmem:[%s5758_s3 + $0x50] sm:$0x3f] }
 0x39d   : > { %4653 = vmatprep.subr.msk.mxu0 %vm1216_vm10, %v2018_v13  ;;  %v2654_v5 = vpop.permute.xlu1 %2653 }
 0x3a1   : > { %v2746_v9 = vpop.permute.xlu1 %2745 }
 0x3a3   : > { %4651 = vmatmul.mubr.msk.f32.vlgmr.msra.gmra.mrb[2].mxu0 %vm1212_vm11, %v4648_v55 }
 0x3a4   : > { %4654 = vmatpush1.msk.msra.mxu0 %vm1216_vm10, %v5312_v7  ;;  %2458 = vmatprep.mubr.f32.mxu0 %v4858_v0  ;;  %v2652_v7 = vpop.permute.xlu0 %2651 }
 0x3a5   : > { %4657 = vmatprep.subr.msk.mxu0 %vm1216_vm10, %v2474_v56  ;;  %v2656_v13 = vsel %vm986_vm7, %v2654_v5, %v2652_v7  ;;  %v2655_v23 = vsel %vm986_vm7, %v2652_v7, %v2654_v5 }
 0x3a6   : > { %v2658_v22 = vmul.f32 %v2656_v13, %v5087_v60  ;;  %v2657_v28 = vmul.f32 %v2655_v23, %v5080_v57 }
 0x3a8   : > { %v2744_v10 = vpop.permute.xlu0 %2743 }
 0x3a9   : > { %v2748_v26 = vsel %vm1087_vm9, %v2746_v9, %v2744_v10  ;;  %v2747_v30 = vsel %vm1087_vm9, %v2744_v10, %v2746_v9 }
 0x3aa   : > { %v2750_v29 = vmul.f32 %v5132_v25, %v2748_v26  ;;  %v2749_v32 = vmul.f32 %v5127_v24, %v2747_v30  ;;  %v4685_v26 = vld [vmem:[%s5758_s3 + $0x60] sm:$0x3f] }
 0x3ab   : > { %4655 = vmatmul.mubr.msk.f32.vlgmr.msra.gmra.mrb[2].mxu0 %vm1212_vm11, %v4652_v63 }
 0x3ac   : > { %4658 = vmatpush1.msk.msra.mxu0 %vm1216_vm10, %v2473_v3  ;;  %2550 = vmatprep.mubr.f32.mxu0 %v4858_v0  ;;  %v2838_v34 = vpop.permute.xlu0 %2837 }
 0x3ad   : > { %4661 = vmatprep.subr.msk.mxu0 %vm1216_vm10, %v2566_v4  ;;  %v4673_v4 = vld [vmem:[%s5758_s3 + $0x48] sm:$0x3f] }
 0x3b3   : > { %4659 = vmatmul.mubr.msk.f32.vlgmr.msra.gmra.mrb[2].mxu0 %vm1212_vm11, %v4656_v18 }
 0x3b4   : > { %4662 = vmatpush1.msk.msra.mxu0 %vm1216_vm10, %v2565_v19  ;;  %2642 = vmatprep.mubr.f32.mxu0 %v4858_v0  ;;  %v4681_v19 = vld [vmem:[%s5758_s3 + $0x58] sm:$0x3f] }
 0x3b5   : > { %4665 = vmatprep.subr.msk.mxu0 %vm1216_vm10, %v2658_v22 }
 0x3bb   : > { %4663 = vmatmul.mubr.msk.f32.vlgmr.msra.gmra.mrb[2].mxu0 %vm1212_vm11, %v4660_v27 }
 0x3bc   : > { %4666 = vmatpush1.msk.msra.mxu0 %vm1216_vm10, %v2657_v28  ;;  %2734 = vmatprep.mubr.f32.mxu0 %v4858_v0 }
 0x3bd   : > { %4669 = vmatprep.subr.msk.mxu0 %vm1216_vm10, %v2750_v29 }
 0x3c3   : > { %4667 = vmatmul.mubr.msk.f32.vlgmr.msra.gmra.mrb[2].mxu0 %vm1212_vm11, %v4664_v31 }
 0x3c4   : > { %4670 = vmatpush1.msk.msra.mxu0 %vm1216_vm10, %v2749_v32  ;;  %2826 = vmatprep.mubr.f32.mxu0 %v4858_v0  ;;  %v4689_v32 = vld [vmem:[%s5758_s3 + $0x68] sm:$0x3f] }
 0x3cb   : > { %4671 = vmatmul.mubr.msk.f32.vlgmr.msra.gmra.mrb[2].mxu0 %vm1212_vm11, %v4668_v33 }
 0x3cc   : > { %3766 = vmatprep.mubr.f32.mxu0 %v4858_v0 }
 0x49e   : > { %v2828_v35 = vpop.f32.mrb[2].mxu0 }
 0x49f   : > { %v2840_v36 = vadd.f32 %v2838_v34, %v2828_v35  ;;  %v2830_v38 = vpop.f32.mrb[3].mxu0 }
 0x4a0   : > { %v2841_v39 = vadd.f32 %v2838_v34, %v2830_v38 }
 0x4a1   : > { %v5454_v41 = vadd.f32 %v2840_v36, %v5158_v44  ;;  %v4672_v44 = vld [vmem:[%s5759_s4 + $0x8] sm:$0x3f] }
 0x4a2   : > { %v5457_v42 = vadd.f32 %v2841_v39, %v5162_v45 }
 0x4a3   : > { %2856 = vrot.lane.b32.xlu1 %v5454_v41, %s4860_s8 }
 0x4a4   : > { %2858 = vrot.lane.b32.xlu0 %v5457_v42, %s4860_s8 }
 0x4a7   : > { %2846 = vrot.lane.b32.xlu1 %v5454_v41, %s4861_s11 }
 0x4a8   : > { %2848 = vrot.lane.b32.xlu0 %v5457_v42, %s4861_s11 }
 0x4ab   : > { %3026 = vrot.lane.b32.xlu1 %v5454_v41, %s4863_s13 }
 0x4ac   : > { %3028 = vrot.lane.b32.xlu0 %v5457_v42, %s4863_s13 }
 0x4af   : > { %3118 = vrot.lane.b32.xlu1 %v5454_v41, %s4865_s15 }
 0x4b0   : > { %3120 = vrot.lane.b32.xlu0 %v5457_v42, %s4865_s15 }
 0x4b3   : > { %3294 = vrot.lane.b32.xlu1 %v5454_v41, %s4859_s30 }
 0x4b4   : > { %3296 = vrot.lane.b32.xlu0 %v5457_v42, %s4859_s30 }
 0x4b7   : > { %3386 = vrot.lane.b32.xlu1 %v5454_v41, %s4862_s12 }
 0x4b8   : > { %3388 = vrot.lane.b32.xlu0 %v5457_v42, %s4862_s12 }
 0x4bb   : > { %3478 = vrot.lane.b32.xlu1 %v5454_v41, %s4864_s14 }
 0x4bc   : > { %3480 = vrot.lane.b32.xlu0 %v5457_v42, %s4864_s14 }
 0x4bf   : > { %3570 = vrot.lane.b32.xlu1 %v5454_v41, %s4866_s16 }
 0x4c0   : > { %3572 = vrot.lane.b32.xlu0 %v5457_v42, %s4866_s16 }
 0x4c3   : > { %3664 = vperm.xlu1 %4849, %v4672_v44   ;;  %v4693_v44 = vld [vmem:[%s5758_s3 + $0x70] sm:$0x3f] }
 0x515   : > { %v2857_v45 = vpop.permute.xlu1 %2856 }
 0x516   : > { %v2859_v43 = vpop.permute.xlu0 %2858 }
 0x517   : > { %v2860_v1 = vsel %vm319_vm3, %v2857_v45, %v2859_v43  ;;  %v2861_v2 = vsel %vm319_vm3, %v2859_v43, %v2857_v45 }
 0x518   : > { %v2862_v46 = vmul.f32 %v2861_v2, %v4997_v16  ;;  %v2863_v47 = vmul.f32 %v2860_v1, %v5000_v17 }
 0x519   : > { %v2847_v48 = vpop.permute.xlu1 %2846 }
 0x51a   : > { %4675 = vmatprep.subr.msk.mxu1 %vm1216_vm10, %v2863_v47  ;;  %v2849_v52 = vpop.permute.xlu0 %2848 }
 0x51b   : > { %v2850_v53 = vsel %vm301_vm4, %v2847_v48, %v2849_v52  ;;  %v2851_v54 = vsel %vm301_vm4, %v2849_v52, %v2847_v48  ;;  %4676 = vmatpush1.msk.msra.mxu1 %vm1216_vm10, %v2862_v46  ;;  %v4697_v48 = vld [vmem:[%s5758_s3 + $0x78] sm:$0x3f] }
 0x51c   : > { %v2852_v55 = vmul.f32 %v2851_v54, %v5004_v20  ;;  %v2853_v56 = vmul.f32 %v2850_v53, %v5007_v21  ;;  %4677 = vmatmul.mubr.msk.f32.vlgmr.msra.gmra.mrb[4].mxu1 %vm1212_vm11, %v4674_v51  ;;  %v4701_v54 = vld [vmem:[%s5758_s3 + $0x80] sm:$0x3f] }
 0x51d   : > { %v3027_v58 = vpop.permute.xlu1 %3026  ;;  %3019 = vmatprep.mubr.f32.mxu1 %v4858_v0 }
 0x51e   : > { %4678 = vmatprep.subr.msk.mxu1 %vm1216_vm10, %v2853_v56  ;;  %v3029_v59 = vpop.permute.xlu0 %3028  ;;  %v4705_v56 = vld [vmem:[%s5758_s3 + $0x88] sm:$0x3f] }
 0x51f   : > { %v3030_v61 = vsel %vm500_vm6, %v3027_v58, %v3029_v59  ;;  %4679 = vmatpush1.msk.msra.mxu1 %vm1216_vm10, %v2852_v55  ;;  %v3031_v62 = vsel %vm500_vm6, %v3029_v59, %v3027_v58 }
 0x520   : > { %v3033_v63 = vmul.f32 %v3030_v61, %v5064_v50  ;;  %v3032_v7 = vmul.f32 %v3031_v62, %v5061_v49 }
 0x521   : > { %v3119_v3 = vpop.permute.xlu1 %3118 }
 0x522   : > { %4682 = vmatprep.subr.msk.mxu1 %vm1216_vm10, %v3033_v63  ;;  %v3121_v5 = vpop.permute.xlu0 %3120 }
 0x523   : > { %v3122_v12 = vsel %vm601_vm8, %v3119_v3, %v3121_v5  ;;  %v3123_v18 = vsel %vm601_vm8, %v3121_v5, %v3119_v3  ;;  %v4709_v5 = vld [vmem:[%s5761_s6 + $0x8] sm:$0x3f] }
 0x524   : > { %v3125_v13 = vmul.f32 %v3122_v12, %v5105_v11  ;;  %4680 = vmatmul.mubr.msk.f32.vlgmr.msra.gmra.mrb[4].mxu1 %vm1212_vm11, %v4673_v4  ;;  %v3124_v22 = vmul.f32 %v3123_v18, %v5102_v8 }
 0x525   : > { %4683 = vmatpush1.msk.msra.mxu1 %vm1216_vm10, %v3032_v7  ;;  %3109 = vmatprep.mubr.f32.mxu1 %v4858_v0  ;;  %v3295_v9 = vpop.permute.xlu1 %3294 }
 0x526   : > { %4686 = vmatprep.subr.msk.mxu1 %vm1216_vm10, %v3125_v13  ;;  %v3297_v10 = vpop.permute.xlu0 %3296 }
 0x527   : > { %v3299_v23 = vsel %vm784_vm2, %v3297_v10, %v3295_v9  ;;  %v3298_v30 = vsel %vm784_vm2, %v3295_v9, %v3297_v10  ;;  %v4711_v10 = vld [vmem:[%s5760_s5 + $0x50] sm:$0x3f] }
 0x528   : > { %v3301_v27 = vmul.f32 %v3299_v23, %v4994_v15  ;;  %v3300_v33 = vmul.f32 %v3298_v30, %v4991_v14 }
 0x529   : > { %v3387_v28 = vpop.permute.xlu1 %3386 }
 0x52a   : > { %v3389_v29 = vpop.permute.xlu0 %3388 }
 0x52b   : > { %v3391_v31 = vsel %vm885_vm5, %v3389_v29, %v3387_v28  ;;  %v3390_v38 = vsel %vm885_vm5, %v3387_v28, %v3389_v29 }
 0x52c   : > { %4684 = vmatmul.mubr.msk.f32.vlgmr.msra.gmra.mrb[4].mxu1 %vm1212_vm11, %v4681_v19  ;;  %v3393_v34 = vmul.f32 %v3391_v31, %v5045_v40  ;;  %v3392_v45 = vmul.f32 %v3390_v38, %v5038_v37 }
 0x52d   : > { %4687 = vmatpush1.msk.msra.mxu1 %vm1216_vm10, %v3124_v22  ;;  %3201 = vmatprep.mubr.f32.mxu1 %v4858_v0  ;;  %v3479_v35 = vpop.permute.xlu1 %3478 }
 0x52e   : > { %4690 = vmatprep.subr.msk.mxu1 %vm1216_vm10, %v5457_v42  ;;  %v3481_v36 = vpop.permute.xlu0 %3480 }
 0x52f   : > { %v3483_v39 = vsel %vm986_vm7, %v3481_v36, %v3479_v35  ;;  %v3482_v46 = vsel %vm986_vm7, %v3479_v35, %v3481_v36 }
 0x530   : > { %v3485_v43 = vmul.f32 %v3483_v39, %v5087_v60  ;;  %v3484_v51 = vmul.f32 %v3482_v46, %v5080_v57 }
 0x531   : > { %v3571_v1 = vpop.permute.xlu1 %3570 }
 0x532   : > { %v3573_v2 = vpop.permute.xlu0 %3572 }
 0x533   : > { %v3575_v47 = vsel %vm1087_vm9, %v3573_v2, %v3571_v1  ;;  %v3574_v53 = vsel %vm1087_vm9, %v3571_v1, %v3573_v2 }
 0x534   : > { %4688 = vmatmul.mubr.msk.f32.vlgmr.msra.gmra.mrb[4].mxu1 %vm1212_vm11, %v4685_v26  ;;  %v3577_v52 = vmul.f32 %v5132_v25, %v3575_v47  ;;  %v3576_v55 = vmul.f32 %v5127_v24, %v3574_v53 }
 0x535   : > { %4691 = vmatpush1.msk.msra.mxu1 %vm1216_vm10, %v5454_v41  ;;  %3285 = vmatprep.mubr.f32.mxu1 %v4858_v0 }
 0x536   : > { %4694 = vmatprep.subr.msk.mxu1 %vm1216_vm10, %v3301_v27 }
 0x53c   : > { %4692 = vmatmul.mubr.msk.f32.vlgmr.msra.gmra.mrb[4].mxu1 %vm1212_vm11, %v4689_v32 }
 0x53d   : > { %4695 = vmatpush1.msk.msra.mxu1 %vm1216_vm10, %v3300_v33  ;;  %3377 = vmatprep.mubr.f32.mxu1 %v4858_v0 }
 0x53e   : > { %4698 = vmatprep.subr.msk.mxu1 %vm1216_vm10, %v3393_v34 }
 0x542   : > { %v3665_v58 = vpop.permute.xlu1 %3664 }
 0x544   : > { %4696 = vmatmul.mubr.msk.f32.vlgmr.msra.gmra.mrb[4].mxu1 %vm1212_vm11, %v4693_v44 }
 0x545   : > { %4699 = vmatpush1.msk.msra.mxu1 %vm1216_vm10, %v3392_v45  ;;  %3469 = vmatprep.mubr.f32.mxu1 %v4858_v0  ;;  %v4722_v45 = vld [vmem:[%s5760_s5 + $0x60] sm:$0x3f] }
 0x546   : > { %4702 = vmatprep.subr.msk.mxu1 %vm1216_vm10, %v3485_v43 }
 0x54c   : > { %4700 = vmatmul.mubr.msk.f32.vlgmr.msra.gmra.mrb[4].mxu1 %vm1212_vm11, %v4697_v48 }
 0x54d   : > { %4703 = vmatpush1.msk.msra.mxu1 %vm1216_vm10, %v3484_v51  ;;  %3561 = vmatprep.mubr.f32.mxu1 %v4858_v0 }
 0x54e   : > { %4706 = vmatprep.subr.msk.mxu1 %vm1216_vm10, %v3577_v52 }
 0x554   : > { %4704 = vmatmul.mubr.msk.f32.vlgmr.msra.gmra.mrb[4].mxu1 %vm1212_vm11, %v4701_v54 }
 0x555   : > { %4707 = vmatpush1.msk.msra.mxu1 %vm1216_vm10, %v3576_v55  ;;  %3653 = vmatprep.mubr.f32.mxu1 %v4858_v0 }
 0x55c   : > { %4708 = vmatmul.mubr.msk.f32.vlgmr.msra.gmra.mrb[4].mxu1 %vm1212_vm11, %v4705_v56 }
 0x62f   : > { %v3655_v59 = vpop.f32.mrb[4].mxu1 }
 0x630   : > { %v3667_v61 = vadd.f32 %v3665_v58, %v3655_v59  ;;  %v3657_v62 = vpop.f32.mrb[5].mxu1 }
 0x631   : > { %v3668_v63 = vadd.f32 %v3665_v58, %v3657_v62 }
 0x632   : > { %v5606_v3 = vmax.f32 %v3667_v61, 0.0 }
 0x633   : > { %v3670_v4 = vmax.f32 %v3668_v63, 0.0 }
 0x634   : > { %3683 = vrot.lane.b32.xlu0 %v5606_v3, %s4860_s8 }
 0x635   : > { %3685 = vrot.lane.b32.xlu1 %v3670_v4, %s4860_s8 }
 0x638   : > { %3673 = vrot.lane.b32.xlu0 %v5606_v3, %s4861_s11 }
 0x639   : > { %3675 = vrot.lane.b32.xlu1 %v3670_v4, %s4861_s11 }
 0x63c   : > { %3853 = vrot.lane.b32.xlu0 %v5606_v3, %s4863_s13 }
 0x63d   : > { %3855 = vrot.lane.b32.xlu1 %v3670_v4, %s4863_s13 }
 0x640   : > { %3945 = vrot.lane.b32.xlu0 %v5606_v3, %s4865_s15 }
 0x641   : > { %3947 = vrot.lane.b32.xlu1 %v3670_v4, %s4865_s15 }
 0x644   : > { %4121 = vrot.lane.b32.xlu0 %v5606_v3, %s4859_s30 }
 0x645   : > { %4123 = vrot.lane.b32.xlu1 %v3670_v4, %s4859_s30  ;;  %s278_s30 = scalar_lea.vmem %s5762_s7, %s4749_s22 }
 0x648   : > { %4213 = vrot.lane.b32.xlu0 %v5606_v3, %s4862_s12 }
 0x649   : > { %4215 = vrot.lane.b32.xlu1 %v3670_v4, %s4862_s12 }
 0x64c   : > { %4305 = vrot.lane.b32.xlu0 %v5606_v3, %s4864_s14 }
 0x64d   : > { %4307 = vrot.lane.b32.xlu1 %v3670_v4, %s4864_s14 }
 0x650   : > { %4397 = vrot.lane.b32.xlu0 %v5606_v3, %s4866_s16 }
 0x651   : > { %4399 = vrot.lane.b32.xlu1 %v3670_v4, %s4866_s16 }
 0x654   : > { %4491 = vperm.xlu0 %4848, %v4709_v5  }
 0x6a6   : > { %v3684_v7 = vpop.permute.xlu0 %3683 }
 0x6a7   : > { %v3686_v12 = vpop.permute.xlu1 %3685 }
 0x6a8   : > { %v3687_v13 = vsel %vm319_vm3, %v3684_v7, %v3686_v12  ;;  %v3688_v18 = vsel %vm319_vm3, %v3686_v12, %v3684_v7 }
 0x6a9   : > { %v3689_v19 = vmul.f32 %v3688_v18, %v4997_v16  ;;  %v3690_v22 = vmul.f32 %v3687_v13, %v5000_v17 }
 0x6aa   : > { %v3674_v9 = vpop.permute.xlu0 %3673 }
 0x6ab   : > { %4712 = vmatprep.subr.msk.mxu0 %vm1216_vm10, %v3690_v22  ;;  %v3676_v23 = vpop.permute.xlu1 %3675 }
 0x6ac   : > { %v3677_v26 = vsel %vm301_vm4, %v3674_v9, %v3676_v23  ;;  %v3678_v27 = vsel %vm301_vm4, %v3676_v23, %v3674_v9  ;;  %4713 = vmatpush1.msk.msra.mxu0 %vm1216_vm10, %v3689_v19 }
 0x6ad   : > { %v3679_v16 = vmul.f32 %v3678_v27, %v5004_v20  ;;  %v3680_v17 = vmul.f32 %v3677_v26, %v5007_v21  ;;  %4714 = vmatmul.mubr.msk.f32.vlgmr.msra.gmra.mrb[4].mxu0 %vm1212_vm11, %v4711_v10  ;;  %v4710_v21 = vld [vmem:[%s5760_s5 + $0x48] sm:$0x3f] }
 0x6ae   : > { %v3854_v28 = vpop.permute.xlu0 %3853  ;;  %3846 = vmatprep.mubr.f32.mxu0 %v4858_v0 }
 0x6af   : > { %4715 = vmatprep.subr.msk.mxu0 %vm1216_vm10, %v3680_v17  ;;  %v3856_v29 = vpop.permute.xlu1 %3855 }
 0x6b0   : > { %v3857_v30 = vsel %vm500_vm6, %v3854_v28, %v3856_v29  ;;  %4716 = vmatpush1.msk.msra.mxu0 %vm1216_vm10, %v3679_v16  ;;  %v3858_v31 = vsel %vm500_vm6, %v3856_v29, %v3854_v28 }
 0x6b1   : > { %v3860_v20 = vmul.f32 %v3857_v30, %v5064_v50  ;;  %v3859_v34 = vmul.f32 %v3858_v31, %v5061_v49  ;;  %v4718_v49 = vld [vmem:[%s5760_s5 + $0x58] sm:$0x3f] }
 0x6b2   : > { %v3946_v32 = vpop.permute.xlu0 %3945 }
 0x6b3   : > { %4719 = vmatprep.subr.msk.mxu0 %vm1216_vm10, %v3860_v20  ;;  %v3948_v33 = vpop.permute.xlu1 %3947 }
 0x6b4   : > { %v3949_v35 = vsel %vm601_vm8, %v3946_v32, %v3948_v33  ;;  %v3950_v50 = vsel %vm601_vm8, %v3948_v33, %v3946_v32 }
 0x6b5   : > { %v3952_v36 = vmul.f32 %v3949_v35, %v5105_v11  ;;  %4717 = vmatmul.mubr.msk.f32.vlgmr.msra.gmra.mrb[4].mxu0 %vm1212_vm11, %v4710_v21  ;;  %v3951_v38 = vmul.f32 %v3950_v50, %v5102_v8 }
 0x6b6   : > { %4720 = vmatpush1.msk.msra.mxu0 %vm1216_vm10, %v3859_v34  ;;  %3936 = vmatprep.mubr.f32.mxu0 %v4858_v0  ;;  %v4122_v11 = vpop.permute.xlu0 %4121 }
 0x6b7   : > { %4723 = vmatprep.subr.msk.mxu0 %vm1216_vm10, %v3952_v36  ;;  %v4124_v39 = vpop.permute.xlu1 %4123 }
 0x6b8   : > { %v4126_v44 = vsel %vm784_vm2, %v4124_v39, %v4122_v11  ;;  %v4125_v2 = vsel %vm784_vm2, %v4122_v11, %v4124_v39 }
 0x6b9   : > { %v4128_v43 = vmul.f32 %v4126_v44, %v4994_v15  ;;  %v4726_v15 = vld [vmem:[%s5760_s5 + $0x68] sm:$0x3f]  ;;  %v4127_v47 = vmul.f32 %v4125_v2, %v4991_v14  ;;  %v4730_v14 = vld [vmem:[%s5760_s5 + $0x70] sm:$0x3f] }
 0x6ba   : > { %v4214_v8 = vpop.permute.xlu0 %4213 }
 0x6bb   : > { %v4216_v1 = vpop.permute.xlu1 %4215 }
 0x6bc   : > { %v4218_v46 = vsel %vm885_vm5, %v4216_v1, %v4214_v8  ;;  %v4217_v53 = vsel %vm885_vm5, %v4214_v8, %v4216_v1 }
 0x6bd   : > { %4721 = vmatmul.mubr.msk.f32.vlgmr.msra.gmra.mrb[4].mxu0 %vm1212_vm11, %v4718_v49  ;;  %v4220_v48 = vmul.f32 %v4218_v46, %v5045_v40  ;;  %v4219_v40 = vmul.f32 %v4217_v53, %v5038_v37  ;;  %v4734_v37 = vld [vmem:[%s5760_s5 + $0x78] sm:$0x3f] }
 0x6be   : > { %4724 = vmatpush1.msk.msra.mxu0 %vm1216_vm10, %v3951_v38  ;;  %4028 = vmatprep.mubr.f32.mxu0 %v4858_v0  ;;  %v4306_v51 = vpop.permute.xlu0 %4305 }
 0x6bf   : > { %4727 = vmatprep.subr.msk.mxu0 %vm1216_vm10, %v3670_v4  ;;  %v4308_v52 = vpop.permute.xlu1 %4307 }
 0x6c0   : > { %v4310_v54 = vsel %vm986_vm7, %v4308_v52, %v4306_v51  ;;  %v4309_v59 = vsel %vm986_vm7, %v4306_v51, %v4308_v52 }
 0x6c1   : > { %v4312_v55 = vmul.f32 %v4310_v54, %v5087_v60  ;;  %v4311_v60 = vmul.f32 %v4309_v59, %v5080_v57  ;;  %v4742_v57 = vld [vmem:[%s5760_s5 + $0x88] sm:$0x3f] }
 0x6c2   : > { %v4398_v56 = vpop.permute.xlu0 %4397 }
 0x6c3   : > { %v4400_v58 = vpop.permute.xlu1 %4399 }
 0x6c4   : > { %v4402_v61 = vsel %vm1087_vm9, %v4400_v58, %v4398_v56  ;;  %v4401_v63 = vsel %vm1087_vm9, %v4398_v56, %v4400_v58 }
 0x6c5   : > { %4725 = vmatmul.mubr.msk.f32.vlgmr.msra.gmra.mrb[4].mxu0 %vm1212_vm11, %v4722_v45  ;;  %v4404_v62 = vmul.f32 %v5132_v25, %v4402_v61  ;;  %v4403_v4 = vmul.f32 %v5127_v24, %v4401_v63 }
 0x6c6   : > { %4728 = vmatpush1.msk.msra.mxu0 %vm1216_vm10, %v5606_v3  ;;  %4112 = vmatprep.mubr.f32.mxu0 %v4858_v0  ;;  %v4738_v3 = vld [vmem:[%s5760_s5 + $0x80] sm:$0x3f] }
 0x6c7   : > { %4731 = vmatprep.subr.msk.mxu0 %vm1216_vm10, %v4128_v43 }
 0x6cd   : > { %4729 = vmatmul.mubr.msk.f32.vlgmr.msra.gmra.mrb[4].mxu0 %vm1212_vm11, %v4726_v15 }
 0x6ce   : > { %4732 = vmatpush1.msk.msra.mxu0 %vm1216_vm10, %v4127_v47  ;;  %4204 = vmatprep.mubr.f32.mxu0 %v4858_v0 }
 0x6cf   : > { %4735 = vmatprep.subr.msk.mxu0 %vm1216_vm10, %v4220_v48 }
 0x6d3   : > { %v4492_v6 = vpop.permute.xlu0 %4491 }
 0x6d5   : > { %4733 = vmatmul.mubr.msk.f32.vlgmr.msra.gmra.mrb[4].mxu0 %vm1212_vm11, %v4730_v14 }
 0x6d6   : > { %4736 = vmatpush1.msk.msra.mxu0 %vm1216_vm10, %v4219_v40  ;;  %4296 = vmatprep.mubr.f32.mxu0 %v4858_v0 }
 0x6d7   : > { %4739 = vmatprep.subr.msk.mxu0 %vm1216_vm10, %v4312_v55 }
 0x6dd   : > { %4737 = vmatmul.mubr.msk.f32.vlgmr.msra.gmra.mrb[4].mxu0 %vm1212_vm11, %v4734_v37 }
 0x6de   : > { %4740 = vmatpush1.msk.msra.mxu0 %vm1216_vm10, %v4311_v60  ;;  %4388 = vmatprep.mubr.f32.mxu0 %v4858_v0 }
 0x6df   : > { %4743 = vmatprep.subr.msk.mxu0 %vm1216_vm10, %v4404_v62 }
 0x6e5   : > { %4741 = vmatmul.mubr.msk.f32.vlgmr.msra.gmra.mrb[4].mxu0 %vm1212_vm11, %v4738_v3 }
 0x6e6   : > { %4744 = vmatpush1.msk.msra.mxu0 %vm1216_vm10, %v4403_v4  ;;  %4480 = vmatprep.mubr.f32.mxu0 %v4858_v0 }
 0x6ed   : > { %4745 = vmatmul.mubr.msk.f32.vlgmr.msra.gmra.mrb[4].mxu0 %vm1212_vm11, %v4742_v57 }
 0x7c0   : > { %v4482_v25 = vpop.f32.mrb[4].mxu0 }
 0x7c1   : > { %v4494_v5 = vadd.f32 %v4492_v6, %v4482_v25  ;;  %v4484_v7 = vpop.f32.mrb[5].mxu0 }
 0x7c2   : > { %v4495_v24 = vadd.f32 %v4492_v6, %v4484_v7 }
 0x7c3   : > { %v4496_v12 = vadd.f32 %v4494_v5, %v5454_v41 }
 0x7c4   : > { %v4497_v0 = vadd.f32 %v4495_v24, %v5457_v42 }
 0x7c5   : > { %4498 = vst [vmem:[%s278_s30] sm:$0x3f] %v4496_v12 }
 0x7c6   : > { %4499 = vst [vmem:[%s278_s30 + $0x8] sm:$0x3f] %v4497_v0 }
 0x7c7 PF: > { %s17_s24 = sadd.s32 1, %s4856_s24  }
 0x7c8   : > { %p14_p4 = scmp.ge.s32.totalorder %s17_s24, 4  }
 0x7ca   :  { %16 = sbr.rel (!%p14_p4) target bundleno = 1 (0x1), region = 122 }

// kernel: mxnet_forward.6
= control target key start
LH: loop header
LB: loop body
LE: loop exit
PB: predicated region body
PF: predicated region fallthrough
CT: control target
= control target key end

     0   :  { %s5912_s0 = inlined_call_operand.<no memory space> [shape: f32[1], index: 0, kind: input, shape index: {}]   ;;  %s5913_s1 = inlined_call_operand.<no memory space> [shape: f32[1], index: 1, kind: input, shape index: {}]   ;;  %s5914_s2 = inlined_call_operand.vmem [shape: f32[2,1,256], index: 2, kind: input, shape index: {}]   ;;  %s5915_s3 = inlined_call_operand.vmem [shape: f32[2,1,256], index: 3, kind: input, shape index: {}]   ;;  %s5916_s4 = inlined_call_operand.vmem [shape: f32[2,1,256], index: 4, kind: input, shape index: {}]   ;;  %s5917_s5 = inlined_call_operand.vmem [shape: f32[2,1,256], index: 5, kind: input, shape index: {}]   ;;  %s5918_s6 = inlined_call_operand.vmem [shape: f32[9,256], index: 6, kind: input, shape index: {}]   ;;  %s5919_s7 = inlined_call_operand.vmem [shape: f32[9,3,1], index: 7, kind: input, shape index: {}]   ;;  %s5920_s8 = inlined_call_operand.vmem [shape: f32[18,4,4], index: 8, kind: input, shape index: {}]   ;;  %s5921_s9 = inlined_call_operand.vmem [shape: f32[2,4,1], index: 9, kind: input, shape index: {}]   ;;  %s5922_s10 = inlined_call_operand.vmem [shape: f32[18,4,4], index: 10, kind: input, shape index: {}]   ;;  %s5923_s11 = inlined_call_operand.vmem [shape: f32[2,4,1], index: 11, kind: input, shape index: {}]   ;;  %s5924_s12 = inlined_call_operand.hbm [shape: f32[2,1,256], index: 12, kind: output, shape index: {0}]   ;;  %s5925_s13 = inlined_call_operand.vmem [shape: f32[2,1,256], index: 13, kind: output, shape index: {1}]   ;;  %s5926_s14 = inlined_call_operand.vmem [shape: f32[2,1,256], index: 14, kind: output, shape index: {2}]  }
   0x1   :  { %5947 = sst [smem:[#allocation11_spill]] %s5914_s2 }
   0x2   :  { %5948 = sst [smem:[#allocation12_spill]] %s5915_s3 }
   0x3   :  { %5949 = sst [smem:[#allocation13_spill]] %s5916_s4 }
   0x4   :  { %20 = sst [smem:[#allocation2]] %s5912_s0 }
   0x5   :  { %21 = sst [smem:[#allocation3]] %s5913_s1 }
   0x6   :  { %22 = vsyncpa [#allocation5], 0 }
   0x7   :  { %24 = vsyncpa [#allocation5 + $0x1], 0  ;;  %s4956_s17 = smov 0   ;;  %s4958_s18 = smov 0  }
   0x8   :  { %s4960_s19 = smov 0   ;;  %s4962_s20 = smov 0  }
   0x9 LB: > { %5950 = sst [smem:[#allocation7_spill]] %s4855_s19  ;;  %s4977_s0 = sadd.s32 4294967295, %s4859_s20   ;;  %s4859_s20 = sphi %s4962_s20, %s5970_s20   ;;  %s4855_s19 = sphi %s4960_s19, %s5972_s19   ;;  %s4851_s18 = sphi %s4958_s18, %s5974_s18   ;;  %s4847_s17 = sphi %s4956_s17, %s5973_s17  }
   0xa   : > { %s4500_s1 = sadd.s32 4294967294, %s4859_s20   ;;  %s4981_s21 = sadd.s32 1, %s4859_s20  }
   0xb   : > { %5951 = sst [smem:[#allocation8_spill]] %s4981_s21  ;;  %s309_s22 = sadd.s32 1, %s4855_s19 }
   0xc   : > { %s306_s23 = ssub.s32 %s4859_s20, %s4981_s21  ;;  %p319_p0 = scmp.ne.s32.totalorder %s4855_s19, %s4851_s18 }
   0xd   : > { %p307_p1 = scmp.eq.s32.totalorder %s306_s23, 0  ;;  %p320_p2 = scmp.eq.s32.totalorder %s4977_s0, 1 }
   0xe   : > { %p325_p3 = scmp.ne.s32.totalorder %s4851_s18, %s4847_s17  ;;  %p326_p4 = scmp.eq.s32.totalorder %s4500_s1, 1 }
   0xf   : > { %s4992_s24 = scalar_select %p307_p1, %s4855_s19, %s309_s22  }
  0x10   : > { %p4994_p5 = por %p320_p2, %p319_p0  ;;  %p4998_p6 = por %p326_p4, %p325_p3 }
  0x11   : > { %5952 = sst [smem:[#allocation9_spill]] %s4992_s24  ;;  %p4503_p7 = scmp.ge.s32.totalorder %s4859_s20, 1 }
  0x12   : > { %s5954_s26 = scalar_select %p4998_p6, 1, 0 }
  0x13   : > { %p448_p8 = scmp.lt.s32.totalorder %s4859_s20, 3 }
  0x14   : > { %5955 = sst [smem:[#allocation10_spill]] %s5954_s26 }
  0x15   : > { %p449_p9 = pnand %p4503_p7, %p448_p8 }
  0x16   : > { %p513_p10 = scmp.lt.s32.totalorder (!%p449_p9), %s4977_s0, 1  ;;  %s541_s27 = sld [smem:[#allocation2]] (!%p449_p9)  ;;  %v562_v0 = vlaneseq (!%p449_p9)  ;;  %vm583_vm0 = vcmask (!%p449_p9), 1040384   ;;  %v4862_v29 = vmov (!%p449_p9), 0   ;;  %v4511_v32 = vld [vmem:[%s5919_s7 + $0x4] sm:$0x7] (!%p449_p9) }
  0x17   : > { %452 = sbr.rel (%p449_p9) target bundleno = 2210 (0x8a2), region = 68  ;;  %s5956_s2 = sld [smem:[#allocation11_spill]] (!%p449_p9)  ;;  %4785 = vset.pattern.permute.xlu1 (!%p449_p9), %v4862_v29  ;;  %4786 = vset.pattern.permute.xlu0 (!%p449_p9), %v4862_v29  ;;  %v4516_v33 = vld [vmem:[%s5919_s7 + $0x18] sm:$0x7] (!%p449_p9)  ;;  %v609_v36 = vld [vmem:[%s5919_s7] sm:$0x7] (!%p449_p9) }
  0x18   : > { %s5957_s3 = sld [smem:[#allocation12_spill]] (!%p449_p9)  ;;  %s5958_s4 = sld [smem:[#allocation13_spill]] (!%p449_p9)  ;;  %v5037_v8 = vshrl.u32 (!%p449_p9), %v562_v0, 7  ;;  %v4512_v37 = vld [vmem:[%s5919_s7 + $0x8] sm:$0x7] (!%p449_p9)  ;;  %v5104_v55 = vld [vmem:[%s5918_s6] sm:$0xff] (!%p449_p9) }
  0x19   : > { %s4861_s19 = smov (!%p449_p9), 64   ;;  %s4863_s21 = smov (!%p449_p9), 32   ;;  %v4513_v38 = vld [vmem:[%s5919_s7 + $0xc] sm:$0x7] (!%p449_p9)  ;;  %v4514_v39 = vld [vmem:[%s5919_s7 + $0x10] sm:$0x7] (!%p449_p9) }
  0x1a   : > { %v5040_v17 = vsub.s32 (!%p449_p9), 0, %v5037_v8  ;;  %v5043_v18 = vsub.s32 (!%p449_p9), 1, %v5037_v8  ;;  %s5931_s1 = smov (!%p449_p9), 16   ;;  %v4515_v40 = vld [vmem:[%s5919_s7 + $0x14] sm:$0x7] (!%p449_p9)  ;;  %s5945_s22 = smov (!%p449_p9), 17  }
  0x1b   : > { %v4517_v46 = vld [vmem:[%s5919_s7 + $0x1c] sm:$0x7] (!%p449_p9)  ;;  %v4518_v47 = vld [vmem:[%s5919_s7 + $0x20] sm:$0x7] (!%p449_p9)  ;;  %v5109_v57 = vld [vmem:[%s5918_s6 + $0x8] sm:$0xff] (!%p449_p9)  ;;  %v629_v58 = vrot.slane (!%p449_p9), %v5104_v55, 1 }
  0x1c   : > { %v550_v7 = vstv (!%p449_p9), %s541_s27  ;;  %s5939_s27 = smov (!%p449_p9), 112   ;;  %v630_v60 = vrot.slane (!%p449_p9), %v5109_v57, 1  ;;  %v657_v62 = vrot.slane (!%p449_p9), %v5104_v55, 2  ;;  %v658_v63 = vrot.slane (!%p449_p9), %v5109_v57, 2  ;;  %s5960_s24 = smov (!%p449_p9), 15  }
  0x1d   : > { %s5961_s26 = smov (!%p449_p9), 127   ;;  %vm880_vm2 = vcmask (!%p449_p9), 1043456   ;;  %vm876_vm4 = vcmask (!%p449_p9), 31744   ;;  %s542_s15 = sld [smem:[#allocation3]] (!%p449_p9)  ;;  %vm5838_vm11 = vcmp.lt.s32.totalorder (!%p449_p9), %v562_v0, 256 }
  0x1e   : > { %s514_s28 = scalar_select %p513_p10, %s4977_s0, 1 }
  0x20   : > { %s5006_s29 = sshll.u32 %s514_s28, 1 }
  0x21   : > { %s5012_s16 = scalar_lea.vmem %s5956_s2, %s5006_s29  ;;  %s5018_s23 = scalar_lea.vmem %s5957_s3, %s5006_s29 }
  0x22   : > { %s5024_s28 = scalar_lea.vmem %s5958_s4, %s5006_s29  ;;  %s5030_s30 = scalar_lea.vmem %s5917_s5, %s5006_s29  ;;  %v543_v1 = vld [vmem:[%s5012_s16] sm:$0x3] }
  0x23   : > { %v544_v2 = vld [vmem:[%s5018_s23] sm:$0x3]  ;;  %v547_v5 = vmul.f32 %v543_v1, %v543_v1  ;;  %s5959_s2 = smov 16   ;;  %s5935_s3 = smov 127  }
  0x24   : > { %v545_v3 = vld [vmem:[%s5024_s28] sm:$0x3]  ;;  %v548_v6 = vmul.f32 %v544_v2, %v544_v2  ;;  %s5966_s4 = smov 17  }
  0x25   : > { %v546_v4 = vld [vmem:[%s5030_s30] sm:$0x3]  ;;  %v552_v9 = vmul.f32 %v545_v3, %v543_v1  ;;  %v557_v11 = vmul.f32 %v545_v3, %v545_v3  ;;  %v685_v3 = vrot.slane %v5104_v55, 3 }
  0x26   : > { %v553_v10 = vmul.f32 %v546_v4, %v544_v2  ;;  %v558_v12 = vmul.f32 %v546_v4, %v546_v4  ;;  %v549_v13 = vadd.f32 %v548_v6, %v547_v5  ;;  %v686_v6 = vrot.slane %v5109_v57, 3 }
  0x28   : > { %v554_v14 = vadd.f32 %v553_v10, %v552_v9  ;;  %v559_v15 = vadd.f32 %v558_v12, %v557_v11  ;;  %v551_v16 = vmul.f32 %v550_v7, %v549_v13 }
  0x2a   : > { %v555_v19 = vmul.f32 2.0, %v554_v14  ;;  %v560_v20 = vadd.f32 %v559_v15, %v551_v16 }
  0x2c   : > { %v556_v21 = vadd.f32 %v555_v19, %v551_v16  ;;  %v576_v22 = vrot.slane %v560_v20, %v5040_v17  ;;  %v580_v23 = vrot.slane %v560_v20, %v5043_v18 }
  0x2e   : > { %v565_v24 = vrot.slane %v556_v21, %v5040_v17  ;;  %v569_v25 = vrot.slane %v556_v21, %v5043_v18 }
  0x30   : > { %v584_v26 = vsel %vm583_vm0, %v565_v24, %v576_v22  ;;  %v585_v27 = vsel %vm583_vm0, %v569_v25, %v580_v23 }
  0x31   : > { %v586_v28 = vadd.f32 %v585_v27, %v584_v26 }
  0x33   : > { %587 = vrot.lane.b32.xlu0 %v586_v28, %s4861_s19  ;;  %s5933_s19 = smov 15  }
  0xa5   : > { %v588_v30 = vpop.permute.xlu0 %587 }
  0xa6   : > { %v591_v31 = vadd.f32 %v588_v30, %v586_v28  ;;  %v727_v28 = vrot.slane %v5104_v55, 5  ;;  %v728_v30 = vrot.slane %v5109_v57, 5 }
  0xa8   : > { %592 = vrot.lane.b32.xlu0 %v591_v31, %s4863_s21  ;;  %s5941_s21 = smov 113  }
  0xac   : > { %639 = vperm.xlu0 %4786, %v4511_v32  }
  0xb0   : > { %765 = vperm.xlu0 %4786, %v4516_v33  }
 0x11a   : > { %v593_v34 = vpop.permute.xlu0 %592 }
 0x11b   : > { %v594_v35 = vadd.f32 %v593_v34, %v591_v31 }
 0x11d   : > { %595 = vrot.lane.b32.xlu1 %v594_v35, %s5931_s1  ;;  %s5943_s1 = smov 1  }
 0x121   : > { %612 = vperm.xlu1 %4785, %v609_v36  }
 0x125   : > { %667 = vperm.xlu1 %4785, %v4512_v37  }
 0x129   : > { %695 = vperm.xlu1 %4785, %v4513_v38  }
 0x12b   : > { %v640_v51 = vpop.permute.xlu0 %639 }
 0x12d   : > { %714 = vperm.xlu1 %4785, %v4514_v39   ;;  %v755_v39 = vrot.slane %v5104_v55, 6 }
 0x12f   : > { %v5097_v53 = vpop.permute.xlu0 %765 }
 0x131   : > { %737 = vperm.xlu1 %4785, %v4515_v40   ;;  %v756_v40 = vrot.slane %v5109_v57, 6 }
 0x18f   : > { %v596_v41 = vpop.permute.xlu1 %595 }
 0x190   : > { %v598_v42 = vadd.f32 %v596_v41, %v594_v35 }
 0x192   : > { %v600_v43 = vrot.slane %v598_v42, 1 }
 0x194   : > { %4787 = vrcp.f32 %v600_v43 }
 0x19e   : > { %v4788_v44 = vpop.eup %4787 }
 0x19f   : > { %v5073_v45 = vmul.f32 %v4788_v44, %v598_v42 }
 0x1a0   : > { %v613_v48 = vpop.permute.xlu1 %612 }
 0x1a1   : > { %625 = vrot.lane.b32.xlu0 %v5073_v45, %s5959_s2  ;;  %604 = vrot.lane.b32.xlu1 %v5073_v45, %s5945_s22  ;;  %v720_v43 = vrot.slane %v5073_v45, %v5040_v17 }
 0x1a4   : > { %v668_v49 = vpop.permute.xlu1 %667 }
 0x1a5   : > { %654 = vrot.lane.b32.xlu0 %v5073_v45, %s5933_s19  ;;  %724 = vrot.lane.b32.xlu1 %v5073_v45, %s5935_s3  ;;  %s5937_s3 = smov 111  }
 0x1a8   : > { %v696_v50 = vpop.permute.xlu1 %695 }
 0x1a9   : > { %682 = vrot.lane.b32.xlu0 %v5073_v45, %s5943_s1  ;;  %752 = vrot.lane.b32.xlu1 %v5073_v45, %s5941_s21 }
 0x1ac   : > { %v715_v52 = vpop.permute.xlu1 %714 }
 0x1ad   : > { %793 = vperm.xlu0 %4786, %v4517_v46   ;;  %780 = vrot.lane.b32.xlu1 %v5073_v45, %s5939_s27 }
 0x1b0   : > { %v5099_v54 = vpop.permute.xlu1 %737 }
 0x1b1   : > { %817 = vperm.xlu0 %4786, %v4518_v47   ;;  %v783_v47 = vrot.slane %v5104_v55, 7 }
 0x1b5   : > { %808 = vrot.lane.b32.xlu0 %v5073_v45, %s5937_s3 }
 0x213   : > { %v626_v56 = vpop.permute.xlu0 %625  ;;  %v605_v59 = vpop.permute.xlu1 %604 }
 0x214   : > { %v607_v1 = vmul.f32 %v605_v59, %v5104_v55  ;;  %v633_v2 = vmul.f32 %v629_v58, %v626_v56  ;;  %v608_v4 = vmul.f32 %v605_v59, %v5109_v57  ;;  %v634_v5 = vmul.f32 %v630_v60, %v626_v56 }
 0x216   : > { %v618_v11 = vrot.slane %v607_v1, %v5040_v17  ;;  %v645_v12 = vrot.slane %v633_v2, %v5040_v17  ;;  %v622_v14 = vrot.slane %v608_v4, %v5040_v17  ;;  %v649_v15 = vrot.slane %v634_v5, %v5040_v17 }
 0x217   : > { %v655_v61 = vpop.permute.xlu0 %654  ;;  %v725_v19 = vpop.permute.xlu1 %724 }
 0x218   : > { %v661_v9 = vmul.f32 %v657_v62, %v655_v61  ;;  %v662_v10 = vmul.f32 %v658_v63, %v655_v61  ;;  %v623_v22 = vmul.f32 %v618_v11, %v613_v48  ;;  %v650_v23 = vmul.f32 %v645_v12, %v640_v51 }
 0x219   : > { %v624_v25 = vmul.f32 %v622_v14, %v613_v48  ;;  %v651_v26 = vmul.f32 %v649_v15, %v640_v51  ;;  %v731_v37 = vmul.f32 %v727_v28, %v725_v19  ;;  %v732_v41 = vmul.f32 %v728_v30, %v725_v19 }
 0x21a   : > { %v673_v20 = vrot.slane %v661_v9, %v5040_v17  ;;  %v677_v21 = vrot.slane %v662_v10, %v5040_v17  ;;  %v652_v32 = vadd.f32 %v650_v23, %v623_v22  ;;  %v784_v48 = vrot.slane %v5109_v57, 7  ;;  %v5149_v9 = vld [vmem:[%s5918_s6 + $0x18] sm:$0x1] }
 0x21b   : > { %v683_v7 = vpop.permute.xlu0 %682  ;;  %v753_v33 = vpop.permute.xlu1 %752  ;;  %v653_v35 = vadd.f32 %v651_v26, %v624_v25  ;;  %v747_v60 = vrot.slane %v732_v41, %v5040_v17  ;;  %v4872_v25 = vmov 0.0  }
 0x21c   : > { %v689_v13 = vmul.f32 %v685_v3, %v683_v7  ;;  %v690_v16 = vmul.f32 %v686_v6, %v683_v7  ;;  %v678_v29 = vmul.f32 %v673_v20, %v668_v49  ;;  %v679_v31 = vmul.f32 %v677_v21, %v668_v49  ;;  %v5144_v7 = vld [vmem:[%s5918_s6 + $0x10] sm:$0x1]  ;;  %951 = vmatprep.mubr.f32.mxu0 %v4872_v25 }
 0x21d   : > { %v721_v49 = vmul.f32 %v720_v43, %v715_v52  ;;  %v759_v51 = vmul.f32 %v755_v39, %v753_v33  ;;  %v760_v56 = vmul.f32 %v756_v40, %v753_v33  ;;  %v749_v52 = vmul.f32 %v747_v60, %v5099_v54  ;;  %1824 = vmatprep.mubr.f32.mxu1 %v4872_v25 }
 0x21e   : > { %v701_v24 = vrot.slane %v689_v13, %v5040_v17  ;;  %v705_v27 = vrot.slane %v690_v16, %v5040_v17  ;;  %v680_v38 = vadd.f32 %v678_v29, %v652_v32  ;;  %v681_v42 = vadd.f32 %v679_v31, %v653_v35 }
 0x21f   : > { %v781_v58 = vpop.permute.xlu1 %780  ;;  %v771_v3 = vrot.slane %v759_v51, %v5040_v17  ;;  %v775_v4 = vrot.slane %v760_v56, %v5040_v17  ;;  %v5205_v35 = vand.u32 127, %v562_v0 }
 0x220   : > { %v706_v34 = vmul.f32 %v701_v24, %v696_v50  ;;  %v707_v36 = vmul.f32 %v705_v27, %v696_v50  ;;  %v743_v50 = vrot.slane %v731_v37, %v5040_v17  ;;  %v787_v62 = vmul.f32 %v783_v47, %v781_v58 }
 0x221   : > { %v788_v63 = vmul.f32 %v784_v48, %v781_v58  ;;  %v776_v13 = vmul.f32 %v771_v3, %v5097_v53  ;;  %vm597_vm1 = vcmp.lt.s32.totalorder %v5205_v35, 16  ;;  %v5214_v37 = vrot.slane %v5109_v57, %v5043_v18  ;;  %v4519_v48 = vld [vmem:[%s5920_s8 + $0x4] sm:$0xf] }
 0x222   : > { %v708_v44 = vadd.f32 %v706_v34, %v680_v38  ;;  %v709_v46 = vadd.f32 %v707_v36, %v681_v42  ;;  %v748_v2 = vmul.f32 %v743_v50, %v5099_v54  ;;  %v799_v11 = vrot.slane %v787_v62, %v5040_v17 }
 0x223   : > { %v803_v12 = vrot.slane %v788_v63, %v5040_v17  ;;  %v777_v54 = vmul.f32 %v775_v4, %v5097_v53  ;;  %v5210_v36 = vrot.slane %v5104_v55, %v5043_v18  ;;  %vm606_vm3 = vcmp.lt.s32.totalorder %v5205_v35, 17 }
 0x224   : > { %v722_v61 = vadd.f32 %v721_v49, %v708_v44  ;;  %v723_v1 = vadd.f32 %v721_v49, %v709_v46  ;;  %v5223_v42 = vrot.slane %v5104_v55, %v5040_v17  ;;  %v5229_v46 = vrot.slane %v5109_v57, %v5040_v17 }
 0x225   : > { %v1046_v47 = vsub.s32 2, %v5037_v8  ;;  %vm656_vm5 = vcmp.lt.s32.totalorder %v5205_v35, 15  ;;  %vm684_vm6 = vcmp.lt.s32.totalorder %v5205_v35, 1  ;;  %vm726_vm7 = vcmp.lt.s32.totalorder %v5205_v35, 127 }
 0x226   : > { %v750_v6 = vadd.f32 %v748_v2, %v722_v61  ;;  %v751_v10 = vadd.f32 %v749_v52, %v723_v1  ;;  %v1146_v61 = vsub.s32 3, %v5037_v8  ;;  %v857_v52 = vld [vmem:[%s5920_s8] sm:$0xf]  ;;  %vm754_vm8 = vcmp.lt.s32.totalorder %v5205_v35, 113 }
 0x227   : > { %v5246_v60 = vrot.slane %v5109_v57, %v1046_v47  ;;  %v5252_v1 = vrot.slane %v5104_v55, %v1046_v47  ;;  %vm782_vm9 = vcmp.lt.s32.totalorder %v5205_v35, 112  ;;  %vm810_vm10 = vcmp.lt.s32.totalorder %v5205_v35, 111 }
 0x228   : > { %v778_v21 = vadd.f32 %v776_v13, %v750_v6  ;;  %v779_v22 = vadd.f32 %v777_v54, %v751_v10  ;;  %v5277_v54 = vrot.slane %v5104_v55, %v1146_v61  ;;  %v4873_v35 = vmov 1966171168  }
 0x22c   : > { %v794_v59 = vpop.permute.xlu0 %793 }
 0x22d   : > { %v804_v15 = vmul.f32 %v799_v11, %v794_v59  ;;  %v805_v16 = vmul.f32 %v803_v12, %v794_v59 }
 0x22f   : > { %v806_v26 = vadd.f32 %v804_v15, %v778_v21  ;;  %v807_v53 = vadd.f32 %v805_v16, %v779_v22  ;;  %v4526_v15 = vld [vmem:[%s5920_s8 + $0x8] sm:$0xf] }
 0x230   : > { %v818_v5 = vpop.permute.xlu0 %817 }
 0x234   : > { %v809_v14 = vpop.permute.xlu0 %808 }
 0x235   : > { %v811_v19 = vmul.f32 %v809_v14, %v5144_v7  ;;  %v812_v20 = vmul.f32 %v809_v14, %v5149_v9 }
 0x237   : > { %v823_v23 = vrot.slane %v811_v19, %v5040_v17  ;;  %v827_v24 = vrot.slane %v812_v20, %v5040_v17  ;;  %v1330_v19 = vsub.s32 5, %v5037_v8 }
 0x239   : > { %v828_v27 = vmul.f32 %v823_v23, %v818_v5  ;;  %v829_v28 = vmul.f32 %v827_v24, %v818_v5  ;;  %v5262_v5 = vrot.slane %v5109_v57, %v1146_v61  ;;  %v5293_v22 = vrot.slane %v5109_v57, %v1330_v19  ;;  %v4530_v24 = vld [vmem:[%s5920_s8 + $0xc] sm:$0xf] }
 0x23a   : > { %v5354_v61 = vrot.slane %v5149_v9, %v5040_v17 }
 0x23b   : > { %v830_v29 = vadd.f32 %v828_v27, %v806_v26  ;;  %v831_v30 = vadd.f32 %v829_v28, %v807_v53  ;;  %v1430_v53 = vsub.s32 6, %v5037_v8 }
 0x23d   : > { %v834_v31 = vrot.slane %v830_v29, 7  ;;  %v835_v32 = vrot.slane %v831_v30, 7  ;;  %v5309_v29 = vrot.slane %v5104_v55, %v1330_v19  ;;  %v1731_v19 = vld [vmem:[%s5923_s11] sm:$0xf] }
 0x23f   : > { %v5163_v33 = vsel %vm583_vm0, %v5073_v45, %v834_v31  ;;  %v5167_v34 = vsel %vm583_vm0, %v5073_v45, %v835_v32  ;;  %v840_v45 = vld [vmem:[%s5921_s9] sm:$0xf]  ;;  %v5314_v31 = vrot.slane %v5109_v57, %v1430_v53 }
 0x240   : > { %860 = vrot.lane.b32.xlu0 %v5167_v34, %s5959_s2  ;;  %858 = vrot.lane.b32.xlu1 %v5163_v33, %s5959_s2 }
 0x244   : > { %843 = vrot.lane.b32.xlu0 %v5167_v34, %s5945_s22  ;;  %841 = vrot.lane.b32.xlu1 %v5163_v33, %s5945_s22 }
 0x248   : > { %1040 = vrot.lane.b32.xlu0 %v5167_v34, %s5960_s24  ;;  %1038 = vrot.lane.b32.xlu1 %v5163_v33, %s5960_s24 }
 0x24c   : > { %1140 = vrot.lane.b32.xlu0 %v5167_v34, %s5943_s1  ;;  %1138 = vrot.lane.b32.xlu1 %v5163_v33, %s5943_s1 }
 0x250   : > { %1324 = vrot.lane.b32.xlu0 %v5167_v34, %s5961_s26  ;;  %1322 = vrot.lane.b32.xlu1 %v5163_v33, %s5961_s26 }
 0x254   : > { %1424 = vrot.lane.b32.xlu0 %v5167_v34, %s5941_s21  ;;  %1422 = vrot.lane.b32.xlu1 %v5163_v33, %s5941_s21 }
 0x258   : > { %1524 = vrot.lane.b32.xlu0 %v5167_v34, %s5939_s27  ;;  %1522 = vrot.lane.b32.xlu1 %v5163_v33, %s5939_s27  ;;  %s5963_s27 = smov 111  }
 0x25c   : > { %1624 = vrot.lane.b32.xlu0 %v5167_v34, %s5937_s3  ;;  %1622 = vrot.lane.b32.xlu1 %v5163_v33, %s5937_s3  ;;  %s5962_s3 = smov 112  }
 0x260   : > { %1724 = vperm.xlu1 %4785, %v840_v45   ;;  %v4534_v45 = vld [vmem:[%s5920_s8 + $0x10] sm:$0xf] }
 0x2b2   : > { %v861_v38 = vpop.permute.xlu0 %860  ;;  %v859_v39 = vpop.permute.xlu1 %858 }
 0x2b3   : > { %v862_v40 = vsel %vm597_vm1, %v859_v39, %v861_v38  ;;  %v863_v41 = vsel %vm597_vm1, %v861_v38, %v859_v39 }
 0x2b4   : > { %v872_v43 = vmul.f32 %v5210_v36, %v863_v41  ;;  %v873_v44 = vmul.f32 %v5214_v37, %v862_v40  ;;  %v1530_v40 = vsub.s32 7, %v5037_v8 }
 0x2b6   : > { %v844_v49 = vpop.permute.xlu0 %843  ;;  %4520 = vmatprep.subr.msk.mxu0 %vm880_vm2, %v873_v44  ;;  %v842_v50 = vpop.permute.xlu1 %841  ;;  %v5330_v44 = vrot.slane %v5104_v55, %v1430_v53 }
 0x2b7   : > { %v845_v51 = vsel %vm606_vm3, %v842_v50, %v844_v49  ;;  %v846_v56 = vsel %vm606_vm3, %v844_v49, %v842_v50  ;;  %4521 = vmatpush1.msk.msra.mxu0 %vm880_vm2, %v872_v43  ;;  %v4538_v50 = vld [vmem:[%s5920_s8 + $0x14] sm:$0xf] }
 0x2b8   : > { %v855_v58 = vmul.f32 %v5223_v42, %v846_v56  ;;  %v856_v59 = vmul.f32 %v5229_v46, %v845_v51  ;;  %4522 = vmatmul.mubr.msk.f32.vlgmr.msra.gmra.mrb[0].mxu0 %vm876_vm4, %v4519_v48  ;;  %v5335_v48 = vrot.slane %v5109_v57, %v1530_v40 }
 0x2b9   : > { %1031 = vmatprep.mubr.f32.mxu0 %v4872_v25 }
 0x2ba   : > { %v1041_v62 = vpop.permute.xlu0 %1040  ;;  %4523 = vmatprep.subr.msk.mxu0 %vm880_vm2, %v856_v59  ;;  %v1039_v63 = vpop.permute.xlu1 %1038  ;;  %v5350_v59 = vrot.slane %v5104_v55, %v1530_v40  ;;  %v5371_v55 = vrot.slane %v5144_v7, %v5040_v17  ;;  %v4550_v7 = vld [vmem:[%s5920_s8 + $0x20] sm:$0xf] }
 0x2bb   : > { %v1042_v2 = vsel %vm656_vm5, %v1039_v63, %v1041_v62  ;;  %4524 = vmatpush1.msk.msra.mxu0 %vm880_vm2, %v855_v58  ;;  %v1043_v3 = vsel %vm656_vm5, %v1041_v62, %v1039_v63 }
 0x2bc   : > { %v1053_v4 = vmul.f32 %v5246_v60, %v1042_v2  ;;  %v1052_v11 = vmul.f32 %v5252_v1, %v1043_v3  ;;  %v4542_v2 = vld [vmem:[%s5920_s8 + $0x18] sm:$0xf] }
 0x2be   : > { %v1141_v6 = vpop.permute.xlu0 %1140  ;;  %4527 = vmatprep.subr.msk.mxu0 %vm880_vm2, %v1053_v4  ;;  %v1139_v10 = vpop.permute.xlu1 %1138 }
 0x2bf   : > { %v1142_v12 = vsel %vm684_vm6, %v1139_v10, %v1141_v6  ;;  %v1143_v14 = vsel %vm684_vm6, %v1141_v6, %v1139_v10 }
 0x2c0   : > { %v1153_v13 = vmul.f32 %v5262_v5, %v1142_v12  ;;  %4525 = vmatmul.mubr.msk.f32.vlgmr.msra.gmra.mrb[0].mxu0 %vm876_vm4, %v857_v52  ;;  %v1152_v16 = vmul.f32 %v5277_v54, %v1143_v14  ;;  %v4546_v52 = vld [vmem:[%s5920_s8 + $0x1c] sm:$0xf] }
 0x2c1   : > { %4528 = vmatpush1.msk.msra.mxu0 %vm880_vm2, %v1052_v11  ;;  %1129 = vmatprep.mubr.f32.mxu0 %v4872_v25 }
 0x2c2   : > { %4531 = vmatprep.subr.msk.mxu0 %vm880_vm2, %v1153_v13  ;;  %v1325_v20 = vpop.permute.xlu0 %1324  ;;  %v1323_v21 = vpop.permute.xlu1 %1322 }
 0x2c3   : > { %v1327_v23 = vsel %vm726_vm7, %v1325_v20, %v1323_v21  ;;  %v1326_v30 = vsel %vm726_vm7, %v1323_v21, %v1325_v20 }
 0x2c4   : > { %v1337_v26 = vmul.f32 %v5293_v22, %v1327_v23  ;;  %v1336_v38 = vmul.f32 %v5309_v29, %v1326_v30 }
 0x2c6   : > { %v1425_v27 = vpop.permute.xlu0 %1424  ;;  %v1423_v28 = vpop.permute.xlu1 %1422 }
 0x2c7   : > { %v1427_v32 = vsel %vm754_vm8, %v1425_v27, %v1423_v28  ;;  %v1426_v47 = vsel %vm754_vm8, %v1423_v28, %v1425_v27  ;;  %v4554_v28 = vld [vmem:[%s5922_s10 + $0x4] sm:$0xf] }
 0x2c8   : > { %4529 = vmatmul.mubr.msk.f32.vlgmr.msra.gmra.mrb[0].mxu0 %vm876_vm4, %v4526_v15  ;;  %v1437_v39 = vmul.f32 %v5314_v31, %v1427_v32  ;;  %v1436_v51 = vmul.f32 %v5330_v44, %v1426_v47 }
 0x2c9   : > { %4532 = vmatpush1.msk.msra.mxu0 %vm880_vm2, %v1152_v16  ;;  %1229 = vmatprep.mubr.f32.mxu0 %v4872_v25 }
 0x2ca   : > { %4535 = vmatprep.subr.msk.mxu0 %vm880_vm2, %v5167_v34  ;;  %v1525_v41 = vpop.permute.xlu0 %1524  ;;  %v1523_v43 = vpop.permute.xlu1 %1522 }
 0x2cb   : > { %v1527_v49 = vsel %vm782_vm9, %v1525_v41, %v1523_v43  ;;  %v1526_v62 = vsel %vm782_vm9, %v1523_v43, %v1525_v41 }
 0x2cc   : > { %v1537_v56 = vmul.f32 %v5335_v48, %v1527_v49  ;;  %v1536_v3 = vmul.f32 %v5350_v59, %v1526_v62 }
 0x2ce   : > { %v1625_v58 = vpop.permute.xlu0 %1624  ;;  %v1623_v57 = vpop.permute.xlu1 %1622 }
 0x2cf   : > { %v1627_v63 = vsel %vm810_vm10, %v1625_v58, %v1623_v57  ;;  %v1626_v9 = vsel %vm810_vm10, %v1623_v57, %v1625_v58 }
 0x2d0   : > { %4533 = vmatmul.mubr.msk.f32.vlgmr.msra.gmra.mrb[0].mxu0 %vm876_vm4, %v4530_v24  ;;  %v1637_v4 = vmul.f32 %v5354_v61, %v1627_v63  ;;  %v1636_v6 = vmul.f32 %v5371_v55, %v1626_v9 }
 0x2d1   : > { %4536 = vmatpush1.msk.msra.mxu0 %vm880_vm2, %v5163_v33  ;;  %1313 = vmatprep.mubr.f32.mxu0 %v4872_v25 }
 0x2d2   : > { %4539 = vmatprep.subr.msk.mxu0 %vm880_vm2, %v1337_v26 }
 0x2d8   : > { %4537 = vmatmul.mubr.msk.f32.vlgmr.msra.gmra.mrb[0].mxu0 %vm876_vm4, %v4534_v45 }
 0x2d9   : > { %4540 = vmatpush1.msk.msra.mxu0 %vm880_vm2, %v1336_v38  ;;  %1413 = vmatprep.mubr.f32.mxu0 %v4872_v25 }
 0x2da   : > { %4543 = vmatprep.subr.msk.mxu0 %vm880_vm2, %v1437_v39 }
 0x2df   : > { %v1725_v10 = vpop.permute.xlu1 %1724 }
 0x2e0   : > { %4541 = vmatmul.mubr.msk.f32.vlgmr.msra.gmra.mrb[0].mxu0 %vm876_vm4, %v4538_v50 }
 0x2e1   : > { %4544 = vmatpush1.msk.msra.mxu0 %vm880_vm2, %v1436_v51  ;;  %1513 = vmatprep.mubr.f32.mxu0 %v4872_v25  ;;  %v1740_v51 = vld [vmem:[%s5922_s10] sm:$0xf] }
 0x2e2   : > { %4547 = vmatprep.subr.msk.mxu0 %vm880_vm2, %v1537_v56 }
 0x2e8   : > { %4545 = vmatmul.mubr.msk.f32.vlgmr.msra.gmra.mrb[0].mxu0 %vm876_vm4, %v4542_v2  ;;  %v4561_v2 = vld [vmem:[%s5922_s10 + $0x8] sm:$0xf] }
 0x2e9   : > { %4548 = vmatpush1.msk.msra.mxu0 %vm880_vm2, %v1536_v3  ;;  %1613 = vmatprep.mubr.f32.mxu0 %v4872_v25 }
 0x2ea   : > { %4551 = vmatprep.subr.msk.mxu0 %vm880_vm2, %v1637_v4 }
 0x2f0   : > { %4549 = vmatmul.mubr.msk.f32.vlgmr.msra.gmra.mrb[0].mxu0 %vm876_vm4, %v4546_v52 }
 0x2f1   : > { %4552 = vmatpush1.msk.msra.mxu0 %vm880_vm2, %v1636_v6  ;;  %1713 = vmatprep.mubr.f32.mxu0 %v4872_v25  ;;  %v4565_v6 = vld [vmem:[%s5922_s10 + $0xc] sm:$0xf] }
 0x2f8   : > { %4553 = vmatmul.mubr.msk.f32.vlgmr.msra.gmra.mrb[0].mxu0 %vm876_vm4, %v4550_v7 }
 0x2f9   : > { %2651 = vmatprep.mubr.f32.mxu0 %v4872_v25 }
 0x3cb   : > { %v1715_v11 = vpop.f32.mrb[0].mxu0 }
 0x3cc   : > { %v1727_v12 = vadd.f32 %v1725_v10, %v1715_v11  ;;  %v1717_v13 = vpop.f32.mrb[1].mxu0 }
 0x3cd   : > { %v1728_v14 = vadd.f32 %v1725_v10, %v1717_v13 }
 0x3ce   : > { %v5387_v15 = vmax.f32 %v1727_v12, 0.0 }
 0x3cf   : > { %v1730_v16 = vmax.f32 %v1728_v14, 0.0  ;;  %v4569_v14 = vld [vmem:[%s5922_s10 + $0x10] sm:$0xf] }
 0x3d0   : > { %1741 = vrot.lane.b32.xlu0 %v5387_v15, %s5959_s2 }
 0x3d1   : > { %1743 = vrot.lane.b32.xlu1 %v1730_v16, %s5959_s2 }
 0x3d4   : > { %1732 = vrot.lane.b32.xlu0 %v5387_v15, %s5945_s22 }
 0x3d5   : > { %1734 = vrot.lane.b32.xlu1 %v1730_v16, %s5945_s22 }
 0x3d8   : > { %1911 = vrot.lane.b32.xlu0 %v5387_v15, %s5960_s24 }
 0x3d9   : > { %1913 = vrot.lane.b32.xlu1 %v1730_v16, %s5960_s24 }
 0x3dc   : > { %2003 = vrot.lane.b32.xlu0 %v5387_v15, %s5943_s1 }
 0x3dd   : > { %2005 = vrot.lane.b32.xlu1 %v1730_v16, %s5943_s1  ;;  %s5964_s1 = smov 1  }
 0x3e0   : > { %2179 = vrot.lane.b32.xlu0 %v5387_v15, %s5961_s26 }
 0x3e1   : > { %2181 = vrot.lane.b32.xlu1 %v1730_v16, %s5961_s26 }
 0x3e4   : > { %2271 = vrot.lane.b32.xlu0 %v5387_v15, %s5941_s21 }
 0x3e5   : > { %2273 = vrot.lane.b32.xlu1 %v1730_v16, %s5941_s21  ;;  %s5965_s21 = smov 113  }
 0x3e8   : > { %2363 = vrot.lane.b32.xlu0 %v5387_v15, %s5962_s3 }
 0x3e9   : > { %2365 = vrot.lane.b32.xlu1 %v1730_v16, %s5962_s3 }
 0x3ec   : > { %2455 = vrot.lane.b32.xlu0 %v5387_v15, %s5963_s27 }
 0x3ed   : > { %2457 = vrot.lane.b32.xlu1 %v1730_v16, %s5963_s27 }
 0x3f0   : > { %2549 = vperm.xlu0 %4786, %v1731_v19  }
 0x442   : > { %v1742_v20 = vpop.permute.xlu0 %1741 }
 0x443   : > { %v1744_v21 = vpop.permute.xlu1 %1743 }
 0x444   : > { %v1745_v23 = vsel %vm597_vm1, %v1742_v20, %v1744_v21  ;;  %v1746_v24 = vsel %vm597_vm1, %v1744_v21, %v1742_v20 }
 0x445   : > { %v1747_v26 = vmul.f32 %v1746_v24, %v5210_v36  ;;  %v1748_v53 = vmul.f32 %v1745_v23, %v5214_v37  ;;  %v4573_v24 = vld [vmem:[%s5922_s10 + $0x14] sm:$0xf] }
 0x446   : > { %v1733_v27 = vpop.permute.xlu0 %1732 }
 0x447   : > { %v1735_v30 = vpop.permute.xlu1 %1734  ;;  %4555 = vmatprep.subr.msk.mxu1 %vm880_vm2, %v1748_v53 }
 0x448   : > { %v1736_v32 = vsel %vm606_vm3, %v1733_v27, %v1735_v30  ;;  %v1737_v45 = vsel %vm606_vm3, %v1735_v30, %v1733_v27  ;;  %4556 = vmatpush1.msk.msra.mxu1 %vm880_vm2, %v1747_v26 }
 0x449   : > { %v1738_v38 = vmul.f32 %v1737_v45, %v5223_v42  ;;  %v1739_v39 = vmul.f32 %v1736_v32, %v5229_v46  ;;  %4557 = vmatmul.mubr.msk.f32.vlgmr.msra.gmra.mrb[0].mxu1 %vm876_vm4, %v4554_v28  ;;  %v4577_v45 = vld [vmem:[%s5922_s10 + $0x18] sm:$0xf] }
 0x44a   : > { %v1912_v40 = vpop.permute.xlu0 %1911  ;;  %1904 = vmatprep.mubr.f32.mxu1 %v4872_v25 }
 0x44b   : > { %v1914_v41 = vpop.permute.xlu1 %1913  ;;  %4558 = vmatprep.subr.msk.mxu1 %vm880_vm2, %v1739_v39 }
 0x44c   : > { %v1915_v43 = vsel %vm656_vm5, %v1912_v40, %v1914_v41  ;;  %4559 = vmatpush1.msk.msra.mxu1 %vm880_vm2, %v1738_v38  ;;  %v1916_v47 = vsel %vm656_vm5, %v1914_v41, %v1912_v40  ;;  %v4581_v41 = vld [vmem:[%s5922_s10 + $0x1c] sm:$0xf] }
 0x44d   : > { %v1918_v49 = vmul.f32 %v1915_v43, %v5246_v60  ;;  %v1917_v58 = vmul.f32 %v1916_v47, %v5252_v1  ;;  %v4585_v47 = vld [vmem:[%s5922_s10 + $0x20] sm:$0xf] }
 0x44e   : > { %v2004_v50 = vpop.permute.xlu0 %2003 }
 0x44f   : > { %v2006_v56 = vpop.permute.xlu1 %2005  ;;  %4562 = vmatprep.subr.msk.mxu1 %vm880_vm2, %v1918_v49 }
 0x450   : > { %v2007_v57 = vsel %vm684_vm6, %v2004_v50, %v2006_v56  ;;  %v2008_v63 = vsel %vm684_vm6, %v2006_v56, %v2004_v50 }
 0x451   : > { %v2010_v62 = vmul.f32 %v2007_v57, %v5262_v5  ;;  %4560 = vmatmul.mubr.msk.f32.vlgmr.msra.gmra.mrb[0].mxu1 %vm876_vm4, %v1740_v51  ;;  %v2009_v3 = vmul.f32 %v2008_v63, %v5277_v54 }
 0x452   : > { %4563 = vmatpush1.msk.msra.mxu1 %vm880_vm2, %v1917_v58  ;;  %1994 = vmatprep.mubr.f32.mxu1 %v4872_v25  ;;  %v2180_v4 = vpop.permute.xlu0 %2179 }
 0x453   : > { %4566 = vmatprep.subr.msk.mxu1 %vm880_vm2, %v2010_v62  ;;  %v2182_v9 = vpop.permute.xlu1 %2181 }
 0x454   : > { %v2184_v52 = vsel %vm726_vm7, %v2182_v9, %v2180_v4  ;;  %v2183_v12 = vsel %vm726_vm7, %v2180_v4, %v2182_v9 }
 0x455   : > { %v2186_v7 = vmul.f32 %v2184_v52, %v5293_v22 }
 0x456   : > { %v2272_v10 = vpop.permute.xlu0 %2271 }
 0x457   : > { %v2274_v11 = vpop.permute.xlu1 %2273 }
 0x458   : > { %v2276_v13 = vsel %vm754_vm8, %v2274_v11, %v2272_v10  ;;  %v2275_v21 = vsel %vm754_vm8, %v2272_v10, %v2274_v11 }
 0x459   : > { %4564 = vmatmul.mubr.msk.f32.vlgmr.msra.gmra.mrb[0].mxu1 %vm876_vm4, %v4561_v2  ;;  %v2277_v26 = vmul.f32 %v2275_v21, %v5330_v44 }
 0x45a   : > { %4567 = vmatpush1.msk.msra.mxu1 %vm880_vm2, %v2009_v3  ;;  %2086 = vmatprep.mubr.f32.mxu1 %v4872_v25  ;;  %v2364_v19 = vpop.permute.xlu0 %2363 }
 0x45b   : > { %4570 = vmatprep.subr.msk.mxu1 %vm880_vm2, %v1730_v16  ;;  %v2185_v16 = vmul.f32 %v2183_v12, %v5309_v29  ;;  %v2366_v20 = vpop.permute.xlu1 %2365 }
 0x45c   : > { %v2368_v23 = vsel %vm782_vm9, %v2366_v20, %v2364_v19  ;;  %v2367_v30 = vsel %vm782_vm9, %v2364_v19, %v2366_v20 }
 0x45d   : > { %v2370_v53 = vmul.f32 %v2368_v23, %v5335_v48  ;;  %v2369_v38 = vmul.f32 %v2367_v30, %v5350_v59  ;;  %v4590_v23 = vld [vmem:[%s5920_s8 + $0x24] sm:$0xf]  ;;  %v4598_v30 = vld [vmem:[%s5920_s8 + $0x2c] sm:$0xf] }
 0x45e   : > { %v2456_v27 = vpop.permute.xlu0 %2455 }
 0x45f   : > { %v2458_v28 = vpop.permute.xlu1 %2457 }
 0x460   : > { %v2460_v32 = vsel %vm810_vm10, %v2458_v28, %v2456_v27  ;;  %v2459_v40 = vsel %vm810_vm10, %v2456_v27, %v2458_v28 }
 0x461   : > { %4568 = vmatmul.mubr.msk.f32.vlgmr.msra.gmra.mrb[0].mxu1 %vm876_vm4, %v4565_v6  ;;  %v2462_v39 = vmul.f32 %v2460_v32, %v5354_v61  ;;  %v2461_v43 = vmul.f32 %v2459_v40, %v5371_v55  ;;  %v4591_v6 = vld [vmem:[%s5920_s8 + $0x28] sm:$0xf]  ;;  %v4602_v40 = vld [vmem:[%s5920_s8 + $0x30] sm:$0xf] }
 0x462   : > { %4571 = vmatpush1.msk.msra.mxu1 %vm880_vm2, %v5387_v15  ;;  %2170 = vmatprep.mubr.f32.mxu1 %v4872_v25  ;;  %v2278_v15 = vmul.f32 %v2276_v13, %v5314_v31 }
 0x463   : > { %4574 = vmatprep.subr.msk.mxu1 %vm880_vm2, %v2186_v7 }
 0x469   : > { %4572 = vmatmul.mubr.msk.f32.vlgmr.msra.gmra.mrb[0].mxu1 %vm876_vm4, %v4569_v14 }
 0x46a   : > { %4575 = vmatpush1.msk.msra.mxu1 %vm880_vm2, %v2185_v16  ;;  %2262 = vmatprep.mubr.f32.mxu1 %v4872_v25 }
 0x46b   : > { %4578 = vmatprep.subr.msk.mxu1 %vm880_vm2, %v2278_v15 }
 0x46f   : > { %v2550_v49 = vpop.permute.xlu0 %2549 }
 0x471   : > { %4576 = vmatmul.mubr.msk.f32.vlgmr.msra.gmra.mrb[0].mxu1 %vm876_vm4, %v4573_v24 }
 0x472   : > { %4579 = vmatpush1.msk.msra.mxu1 %vm880_vm2, %v2277_v26  ;;  %2354 = vmatprep.mubr.f32.mxu1 %v4872_v25 }
 0x473   : > { %4582 = vmatprep.subr.msk.mxu1 %vm880_vm2, %v2370_v53 }
 0x479   : > { %4580 = vmatmul.mubr.msk.f32.vlgmr.msra.gmra.mrb[0].mxu1 %vm876_vm4, %v4577_v45 }
 0x47a   : > { %4583 = vmatpush1.msk.msra.mxu1 %vm880_vm2, %v2369_v38  ;;  %2446 = vmatprep.mubr.f32.mxu1 %v4872_v25 }
 0x47b   : > { %4586 = vmatprep.subr.msk.mxu1 %vm880_vm2, %v2462_v39 }
 0x481   : > { %4584 = vmatmul.mubr.msk.f32.vlgmr.msra.gmra.mrb[0].mxu1 %vm876_vm4, %v4581_v41 }
 0x482   : > { %4587 = vmatpush1.msk.msra.mxu1 %vm880_vm2, %v2461_v43  ;;  %2538 = vmatprep.mubr.f32.mxu1 %v4872_v25 }
 0x489   : > { %4588 = vmatmul.mubr.msk.f32.vlgmr.msra.gmra.mrb[0].mxu1 %vm876_vm4, %v4585_v47 }
 0x48a   : > { %3478 = vmatprep.mubr.f32.mxu1 %v4872_v25 }
 0x55c   : > { %v2540_v50 = vpop.f32.mrb[0].mxu1 }
 0x55d   : > { %v2552_v51 = vadd.f32 %v2550_v49, %v2540_v50  ;;  %v2542_v56 = vpop.f32.mrb[1].mxu1 }
 0x55e   : > { %v2553_v58 = vadd.f32 %v2550_v49, %v2542_v56 }
 0x55f   : > { %v5529_v57 = vadd.f32 %v2552_v51, %v5163_v33  ;;  %v4589_v33 = vld [vmem:[%s5921_s9 + $0x4] sm:$0xf]  ;;  %v4606_v51 = vld [vmem:[%s5920_s8 + $0x34] sm:$0xf] }
 0x560   : > { %v5532_v62 = vadd.f32 %v2553_v58, %v5167_v34 }
 0x561   : > { %2568 = vrot.lane.b32.xlu1 %v5529_v57, %s5959_s2 }
 0x562   : > { %2570 = vrot.lane.b32.xlu0 %v5532_v62, %s5959_s2 }
 0x565   : > { %2558 = vrot.lane.b32.xlu1 %v5529_v57, %s5945_s22 }
 0x566   : > { %2560 = vrot.lane.b32.xlu0 %v5532_v62, %s5945_s22 }
 0x569   : > { %2738 = vrot.lane.b32.xlu1 %v5529_v57, %s5960_s24 }
 0x56a   : > { %2740 = vrot.lane.b32.xlu0 %v5532_v62, %s5960_s24 }
 0x56d   : > { %2830 = vrot.lane.b32.xlu1 %v5529_v57, %s5964_s1 }
 0x56e   : > { %2832 = vrot.lane.b32.xlu0 %v5532_v62, %s5964_s1 }
 0x571   : > { %3006 = vrot.lane.b32.xlu1 %v5529_v57, %s5961_s26 }
 0x572   : > { %3008 = vrot.lane.b32.xlu0 %v5532_v62, %s5961_s26 }
 0x575   : > { %3098 = vrot.lane.b32.xlu1 %v5529_v57, %s5965_s21 }
 0x576   : > { %3100 = vrot.lane.b32.xlu0 %v5532_v62, %s5965_s21 }
 0x579   : > { %3190 = vrot.lane.b32.xlu1 %v5529_v57, %s5962_s3 }
 0x57a   : > { %3192 = vrot.lane.b32.xlu0 %v5532_v62, %s5962_s3 }
 0x57d   : > { %3282 = vrot.lane.b32.xlu1 %v5529_v57, %s5963_s27 }
 0x57e   : > { %3284 = vrot.lane.b32.xlu0 %v5532_v62, %s5963_s27 }
 0x581   : > { %3376 = vperm.xlu1 %4785, %v4589_v33  }
 0x5d3   : > { %v2569_v34 = vpop.permute.xlu1 %2568 }
 0x5d4   : > { %v2571_v63 = vpop.permute.xlu0 %2570 }
 0x5d5   : > { %v2572_v2 = vsel %vm597_vm1, %v2569_v34, %v2571_v63  ;;  %v2573_v3 = vsel %vm597_vm1, %v2571_v63, %v2569_v34 }
 0x5d6   : > { %v2574_v4 = vmul.f32 %v2573_v3, %v5210_v36  ;;  %v2575_v9 = vmul.f32 %v2572_v2, %v5214_v37  ;;  %v4610_v3 = vld [vmem:[%s5920_s8 + $0x38] sm:$0xf] }
 0x5d7   : > { %v2559_v52 = vpop.permute.xlu1 %2558 }
 0x5d8   : > { %v2561_v7 = vpop.permute.xlu0 %2560  ;;  %4592 = vmatprep.subr.msk.mxu0 %vm880_vm2, %v2575_v9 }
 0x5d9   : > { %v2562_v10 = vsel %vm606_vm3, %v2559_v52, %v2561_v7  ;;  %v2563_v11 = vsel %vm606_vm3, %v2561_v7, %v2559_v52  ;;  %4593 = vmatpush1.msk.msra.mxu0 %vm880_vm2, %v2574_v4 }
 0x5da   : > { %v2564_v12 = vmul.f32 %v2563_v11, %v5223_v42  ;;  %v2565_v13 = vmul.f32 %v2562_v10, %v5229_v46  ;;  %4594 = vmatmul.mubr.msk.f32.vlgmr.msra.gmra.mrb[2].mxu0 %vm876_vm4, %v4591_v6  ;;  %v4614_v11 = vld [vmem:[%s5920_s8 + $0x3c] sm:$0xf] }
 0x5db   : > { %v2739_v14 = vpop.permute.xlu1 %2738  ;;  %2731 = vmatprep.mubr.f32.mxu0 %v4872_v25 }
 0x5dc   : > { %v2741_v16 = vpop.permute.xlu0 %2740  ;;  %4595 = vmatprep.subr.msk.mxu0 %vm880_vm2, %v2565_v13 }
 0x5dd   : > { %v2742_v15 = vsel %vm656_vm5, %v2739_v14, %v2741_v16  ;;  %4596 = vmatpush1.msk.msra.mxu0 %vm880_vm2, %v2564_v12  ;;  %v2743_v19 = vsel %vm656_vm5, %v2741_v16, %v2739_v14  ;;  %v4618_v16 = vld [vmem:[%s5920_s8 + $0x40] sm:$0xf] }
 0x5de   : > { %v2745_v20 = vmul.f32 %v2742_v15, %v5246_v60  ;;  %v2744_v26 = vmul.f32 %v2743_v19, %v5252_v1  ;;  %v4622_v19 = vld [vmem:[%s5920_s8 + $0x44] sm:$0xf] }
 0x5df   : > { %v2831_v21 = vpop.permute.xlu1 %2830 }
 0x5e0   : > { %v2833_v24 = vpop.permute.xlu0 %2832  ;;  %4599 = vmatprep.subr.msk.mxu0 %vm880_vm2, %v2745_v20 }
 0x5e1   : > { %v2834_v53 = vsel %vm684_vm6, %v2831_v21, %v2833_v24  ;;  %v2835_v28 = vsel %vm684_vm6, %v2833_v24, %v2831_v21 }
 0x5e2   : > { %v2837_v27 = vmul.f32 %v2834_v53, %v5262_v5  ;;  %4597 = vmatmul.mubr.msk.f32.vlgmr.msra.gmra.mrb[2].mxu0 %vm876_vm4, %v4590_v23  ;;  %v2836_v32 = vmul.f32 %v2835_v28, %v5277_v54  ;;  %v4626_v28 = vld [vmem:[%s5923_s11 + $0x4] sm:$0xf] }
 0x5e3   : > { %4600 = vmatpush1.msk.msra.mxu0 %vm880_vm2, %v2744_v26  ;;  %2821 = vmatprep.mubr.f32.mxu0 %v4872_v25  ;;  %v3007_v45 = vpop.permute.xlu1 %3006 }
 0x5e4   : > { %4603 = vmatprep.subr.msk.mxu0 %vm880_vm2, %v2837_v27  ;;  %v3009_v38 = vpop.permute.xlu0 %3008 }
 0x5e5   : > { %v3011_v39 = vsel %vm726_vm7, %v3009_v38, %v3007_v45  ;;  %v3010_v49 = vsel %vm726_vm7, %v3007_v45, %v3009_v38 }
 0x5e6   : > { %v3013_v41 = vmul.f32 %v3011_v39, %v5293_v22  ;;  %v3012_v56 = vmul.f32 %v3010_v49, %v5309_v29 }
 0x5e7   : > { %v3099_v43 = vpop.permute.xlu1 %3098 }
 0x5e8   : > { %v3101_v47 = vpop.permute.xlu0 %3100 }
 0x5e9   : > { %v3103_v50 = vsel %vm754_vm8, %v3101_v47, %v3099_v43  ;;  %v3102_v63 = vsel %vm754_vm8, %v3099_v43, %v3101_v47  ;;  %v4628_v43 = vld [vmem:[%s5922_s10 + $0x28] sm:$0xf] }
 0x5ea   : > { %4601 = vmatmul.mubr.msk.f32.vlgmr.msra.gmra.mrb[2].mxu0 %vm876_vm4, %v4598_v30  ;;  %v3105_v58 = vmul.f32 %v3103_v50, %v5314_v31  ;;  %v3104_v4 = vmul.f32 %v3102_v63, %v5330_v44 }
 0x5eb   : > { %4604 = vmatpush1.msk.msra.mxu0 %vm880_vm2, %v2836_v32  ;;  %2913 = vmatprep.mubr.f32.mxu0 %v4872_v25  ;;  %v3191_v33 = vpop.permute.xlu1 %3190 }
 0x5ec   : > { %4607 = vmatprep.subr.msk.mxu0 %vm880_vm2, %v5532_v62  ;;  %v3193_v34 = vpop.permute.xlu0 %3192 }
 0x5ed   : > { %v3195_v2 = vsel %vm782_vm9, %v3193_v34, %v3191_v33  ;;  %v3194_v7 = vsel %vm782_vm9, %v3191_v33, %v3193_v34 }
 0x5ee   : > { %v3197_v9 = vmul.f32 %v3195_v2, %v5335_v48  ;;  %v3196_v12 = vmul.f32 %v3194_v7, %v5350_v59  ;;  %v4639_v7 = vld [vmem:[%s5922_s10 + $0x30] sm:$0xf] }
 0x5ef   : > { %v3283_v52 = vpop.permute.xlu1 %3282 }
 0x5f0   : > { %v3285_v6 = vpop.permute.xlu0 %3284 }
 0x5f1   : > { %v3287_v10 = vsel %vm810_vm10, %v3285_v6, %v3283_v52  ;;  %v3286_v14 = vsel %vm810_vm10, %v3283_v52, %v3285_v6 }
 0x5f2   : > { %4605 = vmatmul.mubr.msk.f32.vlgmr.msra.gmra.mrb[2].mxu0 %vm876_vm4, %v4602_v40  ;;  %v3289_v13 = vmul.f32 %v3287_v10, %v5354_v61  ;;  %v3288_v15 = vmul.f32 %v3286_v14, %v5371_v55 }
 0x5f3   : > { %4608 = vmatpush1.msk.msra.mxu0 %vm880_vm2, %v5529_v57  ;;  %2997 = vmatprep.mubr.f32.mxu0 %v4872_v25 }
 0x5f4   : > { %4611 = vmatprep.subr.msk.mxu0 %vm880_vm2, %v3013_v41 }
 0x5fa   : > { %4609 = vmatmul.mubr.msk.f32.vlgmr.msra.gmra.mrb[2].mxu0 %vm876_vm4, %v4606_v51 }
 0x5fb   : > { %4612 = vmatpush1.msk.msra.mxu0 %vm880_vm2, %v3012_v56  ;;  %3089 = vmatprep.mubr.f32.mxu0 %v4872_v25 }
 0x5fc   : > { %4615 = vmatprep.subr.msk.mxu0 %vm880_vm2, %v3105_v58 }
 0x600   : > { %v3377_v20 = vpop.permute.xlu1 %3376 }
 0x602   : > { %4613 = vmatmul.mubr.msk.f32.vlgmr.msra.gmra.mrb[2].mxu0 %vm876_vm4, %v4610_v3 }
 0x603   : > { %4616 = vmatpush1.msk.msra.mxu0 %vm880_vm2, %v3104_v4  ;;  %3181 = vmatprep.mubr.f32.mxu0 %v4872_v25 }
 0x604   : > { %4619 = vmatprep.subr.msk.mxu0 %vm880_vm2, %v3197_v9 }
 0x60a   : > { %4617 = vmatmul.mubr.msk.f32.vlgmr.msra.gmra.mrb[2].mxu0 %vm876_vm4, %v4614_v11 }
 0x60b   : > { %4620 = vmatpush1.msk.msra.mxu0 %vm880_vm2, %v3196_v12  ;;  %3273 = vmatprep.mubr.f32.mxu0 %v4872_v25 }
 0x60c   : > { %4623 = vmatprep.subr.msk.mxu0 %vm880_vm2, %v3289_v13 }
 0x612   : > { %4621 = vmatmul.mubr.msk.f32.vlgmr.msra.gmra.mrb[2].mxu0 %vm876_vm4, %v4618_v16 }
 0x613   : > { %4624 = vmatpush1.msk.msra.mxu0 %vm880_vm2, %v3288_v15  ;;  %3365 = vmatprep.mubr.f32.mxu0 %v4872_v25 }
 0x61a   : > { %4625 = vmatmul.mubr.msk.f32.vlgmr.msra.gmra.mrb[2].mxu0 %vm876_vm4, %v4622_v19 }
 0x6ed   : > { %v3367_v21 = vpop.f32.mrb[2].mxu0 }
 0x6ee   : > { %v3379_v23 = vadd.f32 %v3377_v20, %v3367_v21  ;;  %v3369_v24 = vpop.f32.mrb[3].mxu0 }
 0x6ef   : > { %v3380_v26 = vadd.f32 %v3377_v20, %v3369_v24 }
 0x6f0   : > { %v5681_v53 = vmax.f32 %v3379_v23, 0.0 }
 0x6f1   : > { %v3382_v27 = vmax.f32 %v3380_v26, 0.0 }
 0x6f2   : > { %3395 = vrot.lane.b32.xlu0 %v5681_v53, %s5959_s2 }
 0x6f3   : > { %3397 = vrot.lane.b32.xlu1 %v3382_v27, %s5959_s2 }
 0x6f6   : > { %3385 = vrot.lane.b32.xlu0 %v5681_v53, %s5966_s4 }
 0x6f7   : > { %3387 = vrot.lane.b32.xlu1 %v3382_v27, %s5966_s4  ;;  %s498_s4 = sand.u32 1, %s4851_s18  }
 0x6f8   : > { %s4504_s2 = sshll.u32 %s498_s4, 1 }
 0x6fa   : > { %3565 = vrot.lane.b32.xlu0 %v5681_v53, %s5960_s24 }
 0x6fb   : > { %3567 = vrot.lane.b32.xlu1 %v3382_v27, %s5960_s24 }
 0x6fe   : > { %3657 = vrot.lane.b32.xlu0 %v5681_v53, %s5964_s1 }
 0x6ff   : > { %3659 = vrot.lane.b32.xlu1 %v3382_v27, %s5964_s1 }
 0x702   : > { %3833 = vrot.lane.b32.xlu0 %v5681_v53, %s5961_s26 }
 0x703   : > { %3835 = vrot.lane.b32.xlu1 %v3382_v27, %s5961_s26 }
 0x706   : > { %3925 = vrot.lane.b32.xlu0 %v5681_v53, %s5965_s21 }
 0x707   : > { %3927 = vrot.lane.b32.xlu1 %v3382_v27, %s5965_s21  ;;  %s4874_s21 = smov [#allocation4]  }
 0x708   : > { %s4801_s22 = sshll.u32 %s4874_s21, 4  ;;  %s4802_s22 = int_to_ptr.vmem [resolvable:$false] %s4801_s22 }
 0x709   : > { %s4803_s19 = scalar_lea.vmem %s4802_s22, 64 }
 0x70a   : > { %4017 = vrot.lane.b32.xlu0 %v5681_v53, %s5962_s3 }
 0x70b   : > { %4019 = vrot.lane.b32.xlu1 %v3382_v27, %s5962_s3 }
 0x70e   : > { %4109 = vrot.lane.b32.xlu0 %v5681_v53, %s5963_s27 }
 0x70f   : > { %4111 = vrot.lane.b32.xlu1 %v3382_v27, %s5963_s27  ;;  %s4329_s27 = scalar_lea.sflag [#allocation5], %s498_s4 }
 0x712   : > { %4203 = vperm.xlu0 %4786, %v4626_v28  }
 0x764   : > { %v3396_v30 = vpop.permute.xlu0 %3395 }
 0x765   : > { %v3398_v32 = vpop.permute.xlu1 %3397 }
 0x766   : > { %v3399_v45 = vsel %vm597_vm1, %v3396_v30, %v3398_v32  ;;  %v3400_v38 = vsel %vm597_vm1, %v3398_v32, %v3396_v30  ;;  %v4655_v32 = vld [vmem:[%s5922_s10 + $0x40] sm:$0xf] }
 0x767   : > { %v3401_v39 = vmul.f32 %v3400_v38, %v5210_v36  ;;  %v3402_v40 = vmul.f32 %v3399_v45, %v5214_v37  ;;  %v4214_v45 = vunpack.c.l.s4 %v4873_v35 }
 0x768   : > { %v3386_v41 = vpop.permute.xlu0 %3385 }
 0x769   : > { %v3388_v47 = vpop.permute.xlu1 %3387  ;;  %4629 = vmatprep.subr.msk.mxu1 %vm880_vm2, %v3402_v40 }
 0x76a   : > { %v3389_v49 = vsel %vm606_vm3, %v3386_v41, %v3388_v47  ;;  %v3390_v50 = vsel %vm606_vm3, %v3388_v47, %v3386_v41  ;;  %4630 = vmatpush1.msk.msra.mxu1 %vm880_vm2, %v3401_v39  ;;  %v4215_v39 = vunpack.c.0.s8 %v4214_v45 }
 0x76b   : > { %v3391_v36 = vmul.f32 %v3390_v50, %v5223_v42  ;;  %v3392_v37 = vmul.f32 %v3389_v49, %v5229_v46  ;;  %4631 = vmatmul.mubr.msk.f32.vlgmr.msra.gmra.mrb[2].mxu1 %vm876_vm4, %v4628_v43  ;;  %v4627_v46 = vld [vmem:[%s5922_s10 + $0x24] sm:$0xf]  ;;  %v4233_v43 = vstv %s542_s15  ;;  %v4793_v49 = vld [vmem:[%s5012_s16] sm:$0x3]  ;;  %s4668_s16 = sshll.u32 %s4977_s0, 5 }
 0x76c   : > { %v3566_v51 = vpop.permute.xlu0 %3565  ;;  %3558 = vmatprep.mubr.f32.mxu1 %v4872_v25  ;;  %v4246_v50 = vrot.slane %v4793_v49, %v5040_v17  ;;  %s5846_s3 = scalar_lea.hbm %s5924_s12, %s4668_s16 }
 0x76d   : > { %v3568_v56 = vpop.permute.xlu1 %3567  ;;  %4632 = vmatprep.subr.msk.mxu1 %vm880_vm2, %v3392_v37 }
 0x76e   : > { %v3569_v58 = vsel %vm656_vm5, %v3566_v51, %v3568_v56  ;;  %4633 = vmatpush1.msk.msra.mxu1 %vm880_vm2, %v3391_v36  ;;  %v3570_v33 = vsel %vm656_vm5, %v3568_v56, %v3566_v51  ;;  %v4794_v36 = vld [vmem:[%s5018_s23] sm:$0x3]  ;;  %v5831_v56 = vsub.s32 %v4215_v39, %v5037_v8  ;;  %s500_s23 = scalar_lea.vmem [#allocation4], %s4504_s2 }
 0x76f   : > { %v3572_v42 = vmul.f32 %v3569_v58, %v5246_v60  ;;  %v3571_v2 = vmul.f32 %v3570_v33, %v5252_v1  ;;  %v4635_v1 = vld [vmem:[%s5922_s10 + $0x2c] sm:$0xf]  ;;  %v4298_v37 = vrot.slane %v4794_v36, %v5040_v17  ;;  %v4250_v58 = vrot.slane %v4793_v49, %v5043_v18  ;;  %s4351_s24 = sshll.u32 %s500_s23, 4  ;;  %s5848_s24 = int_to_ptr.vmem [resolvable:$true] %s4351_s24 }
 0x770   : > { %v3658_v34 = vpop.permute.xlu0 %3657  ;;  %v4302_v33 = vrot.slane %v4794_v36, %v5043_v18  ;;  %s4797_s1 = scalar_lea.vmem %s5848_s24, 32  ;;  %p4804_p0 = scmp.lt.s32.totalorder %s5848_s24, %s4802_s22 }
 0x771   : > { %v3660_v63 = vpop.permute.xlu1 %3659  ;;  %4636 = vmatprep.subr.msk.mxu1 %vm880_vm2, %v3572_v42  ;;  %p4798_p11 = scmp.ne.s32.totalorder %s5848_s24, %s4797_s1  ;;  %p4805_p1 = scmp.lt.s32.totalorder %s4803_s19, %s4797_s1 }
 0x772   : > { %v3661_v3 = vsel %vm684_vm6, %v3658_v34, %v3660_v63  ;;  %v3662_v60 = vsel %vm684_vm6, %v3660_v63, %v3658_v34 }
 0x773   : > { %v3664_v4 = vmul.f32 %v3661_v3, %v5262_v5  ;;  %4634 = vmatmul.mubr.msk.f32.vlgmr.msra.gmra.mrb[2].mxu1 %vm876_vm4, %v4627_v46  ;;  %v3663_v9 = vmul.f32 %v3662_v60, %v5277_v54  ;;  %p4799_p12 = pnand %p4798_p11, %p4994_p5  ;;  %p4806_p2 = por %p4805_p1, %p4804_p0 }
 0x774   : > { %4637 = vmatpush1.msk.msra.mxu1 %vm880_vm2, %v3571_v2  ;;  %3648 = vmatprep.mubr.f32.mxu1 %v4872_v25  ;;  %v3834_v5 = vpop.permute.xlu0 %3833 }
 0x775   : > { %4640 = vmatprep.subr.msk.mxu1 %vm880_vm2, %v3664_v4  ;;  %v3836_v52 = vpop.permute.xlu1 %3835  ;;  %p4800_p13 = pneg %p4799_p12 }
 0x776   : > { %v3838_v6 = vsel %vm726_vm7, %v3836_v52, %v3834_v5  ;;  %v3837_v12 = vsel %vm726_vm7, %v3834_v5, %v3836_v52 }
 0x777   : > { %v3840_v10 = vmul.f32 %v3838_v6, %v5293_v22  ;;  %v4643_v22 = vld [vmem:[%s5922_s10 + $0x34] sm:$0xf]  ;;  %v3839_v14 = vmul.f32 %v3837_v12, %v5309_v29  ;;  %v4647_v29 = vld [vmem:[%s5922_s10 + $0x38] sm:$0xf]  ;;  %p4807_p3 = pnand %p4806_p2, %p4800_p13 }
 0x778   : > { %v3926_v54 = vpop.permute.xlu0 %3925 }
 0x779   : > { %v3928_v11 = vpop.permute.xlu1 %3927 }
 0x77a   : > { %v3930_v13 = vsel %vm754_vm8, %v3928_v11, %v3926_v54  ;;  %v3929_v20 = vsel %vm754_vm8, %v3926_v54, %v3928_v11 }
 0x77b   : > { %4638 = vmatmul.mubr.msk.f32.vlgmr.msra.gmra.mrb[2].mxu1 %vm876_vm4, %v4635_v1  ;;  %v3932_v16 = vmul.f32 %v3930_v13, %v5314_v31  ;;  %v3931_v31 = vmul.f32 %v3929_v20, %v5330_v44  ;;  %v4651_v44 = vld [vmem:[%s5922_s10 + $0x3c] sm:$0xf] }
 0x77c   : > { %4641 = vmatpush1.msk.msra.mxu1 %vm880_vm2, %v3663_v9  ;;  %3740 = vmatprep.mubr.f32.mxu1 %v4872_v25  ;;  %v4018_v15 = vpop.permute.xlu0 %4017 }
 0x77d   : > { %4644 = vmatprep.subr.msk.mxu1 %vm880_vm2, %v3382_v27  ;;  %v4020_v19 = vpop.permute.xlu1 %4019 }
 0x77e   : > { %v4022_v21 = vsel %vm782_vm9, %v4020_v19, %v4018_v15 }
 0x77f   : > { %v4024_v23 = vmul.f32 %v4022_v21, %v5335_v48 }
 0x780   : > { %v4110_v24 = vpop.permute.xlu0 %4109 }
 0x781   : > { %v4112_v26 = vpop.permute.xlu1 %4111 }
 0x782   : > { %v4114_v27 = vsel %vm810_vm10, %v4112_v26, %v4110_v24  ;;  %v4113_v30 = vsel %vm810_vm10, %v4110_v24, %v4112_v26 }
 0x783   : > { %4642 = vmatmul.mubr.msk.f32.vlgmr.msra.gmra.mrb[2].mxu1 %vm876_vm4, %v4639_v7  ;;  %v4116_v28 = vmul.f32 %v4114_v27, %v5354_v61  ;;  %v4659_v61 = vld [vmem:[%s5922_s10 + $0x44] sm:$0xf] }
 0x784   : > { %4645 = vmatpush1.msk.msra.mxu1 %vm880_vm2, %v5681_v53  ;;  %3824 = vmatprep.mubr.f32.mxu1 %v4872_v25  ;;  %v4021_v53 = vsel %vm782_vm9, %v4018_v15, %v4020_v19 }
 0x785   : > { %4648 = vmatprep.subr.msk.mxu1 %vm880_vm2, %v3840_v10  ;;  %v4023_v48 = vmul.f32 %v4021_v53, %v5350_v59  ;;  %v4115_v59 = vmul.f32 %v4113_v30, %v5371_v55 }
 0x78b   : > { %4646 = vmatmul.mubr.msk.f32.vlgmr.msra.gmra.mrb[2].mxu1 %vm876_vm4, %v4643_v22 }
 0x78c   : > { %4649 = vmatpush1.msk.msra.mxu1 %vm880_vm2, %v3839_v14  ;;  %3916 = vmatprep.mubr.f32.mxu1 %v4872_v25 }
 0x78d   : > { %4652 = vmatprep.subr.msk.mxu1 %vm880_vm2, %v3932_v16 }
 0x791   : > { %v4204_v38 = vpop.permute.xlu0 %4203 }
 0x793   : > { %4650 = vmatmul.mubr.msk.f32.vlgmr.msra.gmra.mrb[2].mxu1 %vm876_vm4, %v4647_v29 }
 0x794   : > { %4653 = vmatpush1.msk.msra.mxu1 %vm880_vm2, %v3931_v31  ;;  %4008 = vmatprep.mubr.f32.mxu1 %v4872_v25 }
 0x795   : > { %4656 = vmatprep.subr.msk.mxu1 %vm880_vm2, %v4024_v23 }
 0x79b   : > { %4654 = vmatmul.mubr.msk.f32.vlgmr.msra.gmra.mrb[2].mxu1 %vm876_vm4, %v4651_v44 }
 0x79c   : > { %4657 = vmatpush1.msk.msra.mxu1 %vm880_vm2, %v4023_v48  ;;  %4100 = vmatprep.mubr.f32.mxu1 %v4872_v25 }
 0x79d   : > { %4660 = vmatprep.subr.msk.mxu1 %vm880_vm2, %v4116_v28 }
 0x7a3   : > { %4658 = vmatmul.mubr.msk.f32.vlgmr.msra.gmra.mrb[2].mxu1 %vm876_vm4, %v4655_v32 }
 0x7a4   : > { %4661 = vmatpush1.msk.msra.mxu1 %vm880_vm2, %v4115_v59  ;;  %4192 = vmatprep.mubr.f32.mxu1 %v4872_v25 }
 0x7ab   : > { %4662 = vmatmul.mubr.msk.f32.vlgmr.msra.gmra.mrb[2].mxu1 %vm876_vm4, %v4659_v61 }
 0x87e   : > { %v4194_v55 = vpop.f32.mrb[2].mxu1 }
 0x87f   : > { %v4206_v40 = vadd.f32 %v4204_v38, %v4194_v55  ;;  %v4196_v41 = vpop.f32.mrb[3].mxu1 }
 0x880   : > { %v4207_v47 = vadd.f32 %v4204_v38, %v4196_v41 }
 0x881   : > { %v4208_v25 = vadd.f32 %v4206_v40, %v5529_v57 }
 0x882   : > { %v4209_v51 = vadd.f32 %v4207_v47, %v5532_v62 }
 0x883   : > { %v4234_v42 = vmul.f32 %v4233_v43, %v4208_v25 }
 0x884   : > { %v4212_v57 = vcombine.low %v4208_v25, %v4209_v51  ;;  %v4235_v34 = vmul.f32 %v4233_v43, %v4209_v51 }
 0x885   : > { %v4236_v46 = vadd.f32 1.0, %v4234_v42  ;;  %v4253_v63 = vmul.f32 %v4246_v50, %v4234_v42  ;;  %v4305_v2 = vmul.f32 %v4298_v37, %v4234_v42 }
 0x886   : > { %v4219_v17 = vrot.slane %v4212_v57, %v5831_v56  ;;  %v4237_v62 = vadd.f32 1.0, %v4235_v34  ;;  %v4254_v8 = vmul.f32 %v4250_v58, %v4235_v34  ;;  %v4306_v3 = vmul.f32 %v4302_v33, %v4235_v34 }
 0x887   : > { %4789 = vrcp.f32 %v4236_v46 }
 0x888   : > { %4791 = vrcp.f32 %v4237_v62  ;;  %v4257_v4 = vcombine.low %v4253_v63, %v4254_v8  ;;  %v4309_v60 = vcombine.low %v4305_v2, %v4306_v3  ;;  %v4226_v1 = vrot.slane %v4219_v17, %v5831_v56 }
 0x88a   : > { %4232 = vst.msk [vmem:[%s500_s23] sm:$0x3] %vm5838_vm11, %v4226_v1 }
 0x88b   : > { %4810 = shalt.err (!%p4807_p3)
}
 0x88c   : > { %s4811_s15 = scalar_lea.hbm %s5846_s3, 32  ;;  %s4815_s16 = scalar_lea.hbm %s5924_s12, 64 }
 0x88d   : > { %p4812_p4 = scmp.ne.s32.totalorder %s5846_s3, %s4811_s15  ;;  %p4816_p9 = scmp.lt.u32.totalorder %s5846_s3, %s5924_s12 }
 0x88e   : > { %p4817_p10 = scmp.lt.u32.totalorder %s4815_s16, %s4811_s15  ;;  %p4819_p12 = scmp.lt.u32.totalorder %s4811_s15, %s5846_s3 }
 0x88f   : > { %p4813_p7 = pnand %p4812_p4, %p4994_p5 }
 0x890   : > { %p4818_p11 = por %p4817_p10, %p4816_p9 }
 0x891   : > { %p4814_p8 = pneg %p4813_p7 }
 0x892   : > { %p4820_p13 = por %p4819_p12, %p4818_p11 }
 0x894   : > { %p4821_p0 = pnand %p4820_p13, %p4814_p8 }
 0x896   : > { %4824 = shalt.err (!%p4821_p0)
}
 0x897   : > { %4733 = dma.vmem_to_hbm [thread:$0]  (%p4994_p5), %s5848_s24, 32, %s5846_s3, %s4329_s27   ;;  %v4264_v0 = vrot.slane %v4257_v4, %v5831_v56  ;;  %v4316_v9 = vrot.slane %v4309_v60, %v5831_v56  ;;  %v4790_v5 = vpop.eup %4789  ;;  %v4795_v11 = vld [vmem:[%s5024_s28] sm:$0x3] }
 0x898   : > { %v4792_v52 = vpop.eup %4791  ;;  %v4796_v22 = vld [vmem:[%s5030_s30] sm:$0x3]  ;;  %s532_s26 = scalar_lea.vmem %s5925_s13, %s5006_s29  ;;  %s536_s1 = scalar_lea.vmem %s5926_s14, %s5006_s29 }
 0x899   : > { %v4271_v6 = vrot.slane %v4264_v0, %v5831_v56  ;;  %v4323_v7 = vrot.slane %v4316_v9, %v5831_v56  ;;  %v4276_v10 = vcombine.low %v4790_v5, %v4792_v52 }
 0x89b   : > { %v4283_v54 = vrot.slane %v4276_v10, %v5831_v56  ;;  %v4273_v12 = vadd.f32 %v4795_v11, %v4271_v6  ;;  %v4325_v14 = vadd.f32 %v4796_v22, %v4323_v7 }
 0x89d   : > { %v4290_v13 = vrot.slane %v4283_v54, %v5831_v56 }
 0x89f   : > { %v4292_v16 = vmul.f32 %v4290_v13, %v4273_v12  ;;  %v4326_v15 = vmul.f32 %v4325_v14, %v4290_v13 }
 0x8a1   : > { %4293 = vst.msk [vmem:[%s532_s26] sm:$0x3] %vm5838_vm11, %v4292_v16  ;;  %4327 = vst.msk [vmem:[%s536_s1] sm:$0x3] %vm5838_vm11, %v4326_v15 }
 0x8a2 PF: > { %p4739_p5 = scmp.ge.s32.totalorder %s4859_s20, 2  ;;  %s4369_s30 = sand.u32 1, %s4847_s17  }
 0x8a3   : > { %s4370_s21 = scalar_lea.sflag [#allocation5], %s4369_s30 }
 0x8a4   : > { %p4736_p1 = pnand %p4739_p5, %p4998_p6 }
 0x8a6   : > { %4842 = dma.done.wait (!%p4736_p1), %s4370_s21, 32  }
 0x8a7   : > { %4844 = vsyncadd (!%p4736_p1), %s4370_s21, 4294967264  ;;  %s5970_s20 = sld [smem:[#allocation8_spill]]  ;;  %s5971_s29 = sld [smem:[#allocation7_spill]] }
 0x8a8   : > { %s5972_s19 = sld [smem:[#allocation9_spill]]  ;;  %s5973_s17 = smov %s4851_s18 }
 0x8ad   : > { %p27_p2 = scmp.ge.s32.totalorder %s5970_s20, 4   ;;  %s5974_s18 = smov %s5971_s29 }
 0x8af   :  { %29 = sbr.rel (!%p27_p2) target bundleno = 9 (0x9), region = 180 }
 0x8b6   :  { %4389 = vsyncpa [#allocation5], 1 }
 0x8b7   :  { %4391 = vsyncpa [#allocation5 + $0x1], 1 }

// kernel: mxnet_forward.7
= control target key start
LH: loop header
LB: loop body
LE: loop exit
PB: predicated region body
PF: predicated region fallthrough
CT: control target
= control target key end

     0   :  { %s4080_s24 = smov 0   ;;  %s4776_s0 = inlined_call_operand.vmem [shape: f32[2,2,256], index: 0, kind: input, shape index: {}]   ;;  %s4777_s1 = inlined_call_operand.vmem [shape: f32[2,4,256], index: 1, kind: input, shape index: {}]   ;;  %s4778_s2 = inlined_call_operand.vmem [shape: f32[9,256], index: 2, kind: input, shape index: {}]   ;;  %s4779_s3 = inlined_call_operand.vmem [shape: f32[18,6,6], index: 3, kind: input, shape index: {}]   ;;  %s4780_s4 = inlined_call_operand.vmem [shape: f32[2,6,1], index: 4, kind: input, shape index: {}]   ;;  %s4781_s5 = inlined_call_operand.vmem [shape: f32[18,6,6], index: 5, kind: input, shape index: {}]   ;;  %s4782_s6 = inlined_call_operand.vmem [shape: f32[2,6,1], index: 6, kind: input, shape index: {}]   ;;  %s4783_s7 = inlined_call_operand.vmem [shape: f32[2,6,256], index: 7, kind: output, shape index: {}]  }
   0x1 LB: > { %s3774_s25 = sadd.s32 4294967295, %s4028_s24   ;;  %p3778_p0 = scmp.ge.s32.totalorder %s4028_s24, 1  ;;  %s4028_s24 = sphi %s4080_s24, %s17_s24  }
   0x2   : > { %p247_p1 = scmp.lt.s32.totalorder %s4028_s24, 3 }
   0x4   : > { %p248_p2 = pnand %p3778_p0, %p247_p1 }
   0x5   : > { %p284_p3 = scmp.lt.s32.totalorder (!%p248_p2), %s3774_s25, 1  ;;  %vm322_vm0 = vcmask (!%p248_p2), 1041408   ;;  %v4030_v2 = vmov (!%p248_p2), 0.0   ;;  %s4031_s11 = smov (!%p248_p2), 17   ;;  %v325_v9 = vld [vmem:[%s4780_s4] sm:$0x3f] (!%p248_p2)  ;;  %v330_v11 = vlaneseq (!%p248_p2) }
   0x6   : > { %251 = sbr.rel (%p248_p2) target bundleno = 1633 (0x661), region = 48  ;;  %440 = vmatprep.mubr.f32.mxu0 (!%p248_p2), %v4030_v2  ;;  %1319 = vmatprep.mubr.f32.mxu1 (!%p248_p2), %v4030_v2  ;;  %s4032_s12 = smov (!%p248_p2), 16   ;;  %v4039_v10 = vmov (!%p248_p2), 0   ;;  %v4148_v16 = vld [vmem:[%s4778_s2] sm:$0xff] (!%p248_p2)  ;;  %v4153_v17 = vld [vmem:[%s4778_s2 + $0x8] sm:$0xff] (!%p248_p2)  ;;  %vm369_vm3 = vcmask (!%p248_p2), 1045504  }
   0x7   : > { %s4033_s13 = smov (!%p248_p2), 15   ;;  %s4034_s14 = smov (!%p248_p2), 1   ;;  %4019 = vset.pattern.permute.xlu0 (!%p248_p2), %v4039_v10  ;;  %4020 = vset.pattern.permute.xlu1 (!%p248_p2), %v4039_v10  ;;  %v4139_v12 = vshrl.u32 (!%p248_p2), %v330_v11, 7  ;;  %v4141_v13 = vand.u32 (!%p248_p2), 127, %v330_v11  ;;  %v3786_v36 = vld [vmem:[%s4779_s3 + $0x8] sm:$0x3f] (!%p248_p2) }
   0x8   : > { %s4035_s15 = smov (!%p248_p2), 127   ;;  %s4036_s16 = smov (!%p248_p2), 113   ;;  %vm365_vm5 = vcmask (!%p248_p2), 48128   ;;  %v345_v49 = vld [vmem:[%s4779_s3] sm:$0x3f] (!%p248_p2) }
   0x9   : > { %s4037_s17 = smov (!%p248_p2), 112   ;;  %s4038_s18 = smov (!%p248_p2), 111   ;;  %v337_v14 = vsub.s32 (!%p248_p2), 0, %v4139_v12  ;;  %v355_v15 = vsub.s32 (!%p248_p2), 1, %v4139_v12  ;;  %vm332_vm1 = vcmp.lt.s32.totalorder (!%p248_p2), %v4141_v13, 17  ;;  %vm350_vm2 = vcmp.lt.s32.totalorder (!%p248_p2), %v4141_v13, 16 }
   0xa   : > { %v536_v23 = vsub.s32 (!%p248_p2), 2, %v4139_v12  ;;  %vm531_vm4 = vcmp.lt.s32.totalorder (!%p248_p2), %v4141_v13, 15  ;;  %v637_v39 = vsub.s32 (!%p248_p2), 3, %v4139_v12  ;;  %vm632_vm6 = vcmp.lt.s32.totalorder (!%p248_p2), %v4141_v13, 1  ;;  %v3793_v54 = vld [vmem:[%s4779_s3 + $0x10] sm:$0x3f] (!%p248_p2) }
   0xb   : > { %v4158_v20 = vrot.slane (!%p248_p2), %v4153_v17, %v337_v14  ;;  %v4161_v21 = vrot.slane (!%p248_p2), %v4148_v16, %v355_v15  ;;  %v4164_v22 = vrot.slane (!%p248_p2), %v4153_v17, %v355_v15  ;;  %v4168_v24 = vrot.slane (!%p248_p2), %v4148_v16, %v337_v14  ;;  %v3797_v60 = vld [vmem:[%s4779_s3 + $0x18] sm:$0x3f] (!%p248_p2) }
   0xc   : > { %v4183_v34 = vrot.slane (!%p248_p2), %v4153_v17, %v536_v23  ;;  %v4200_v42 = vrot.slane (!%p248_p2), %v4148_v16, %v536_v23  ;;  %v4207_v45 = vrot.slane (!%p248_p2), %v4153_v17, %v637_v39  ;;  %v4219_v51 = vrot.slane (!%p248_p2), %v4148_v16, %v637_v39  ;;  %v3813_v39 = vld [vmem:[%s4779_s3 + $0x38] sm:$0x3f] (!%p248_p2) }
   0xd   : > { %s4785_s25 = smov (!%p284_p3, %s3774_s25), 1  ;;  %v822_v55 = vsub.s32 5, %v4139_v12  ;;  %vm817_vm7 = vcmp.lt.s32.totalorder %v4141_v13, 127  ;;  %v923_v62 = vsub.s32 6, %v4139_v12  ;;  %vm918_vm8 = vcmp.lt.s32.totalorder %v4141_v13, 113 }
   0xe   : > { %s3934_s26 = sshll.u32 %s4785_s25, 2  ;;  %s3935_s27 = sshll.u32 %s4785_s25, 3  ;;  %v1024_v11 = vsub.s32 7, %v4139_v12  ;;  %vm1019_vm9 = vcmp.lt.s32.totalorder %v4141_v13, 112  ;;  %vm1120_vm10 = vcmp.lt.s32.totalorder %v4141_v13, 111 }
   0xf   : > { %s288_s30 = scalar_lea.vmem %s4776_s0, %s3934_s26  ;;  %s293_s10 = scalar_lea.vmem %s4777_s1, %s3935_s27  ;;  %v4237_v58 = vrot.slane %v4153_v17, %v822_v55 }
  0x10   : > { %v3785_v0 = vld.sshfl [vmem:[%s288_s30] sm:$0x33 pattern:$0x76325410]  ;;  %v4279_v12 = vrot.slane %v4153_v17, %v1024_v11  ;;  %s3936_s21 = sshll.u32 %s4785_s25, 4 }
  0x11   : > { %v304_v1 = vld [vmem:[%s293_s10] sm:$0xff]  ;;  %v313_v4 = vcombine.high %v3785_v0, %v3785_v0 }
  0x12   : > { %v318_v3 = vrot.slane %v304_v1, 6  ;;  %v317_v5 = vcombine.high %v304_v1, %v304_v1  ;;  %v4251_v1 = vrot.slane %v4148_v16, %v822_v55 }
  0x14   : > { %v4100_v6 = vsel %vm322_vm0, %v3785_v0, %v318_v3  ;;  %v319_v7 = vrot.slane %v317_v5, 6 }
  0x15   : > { %326 = vrot.lane.b32.xlu1 %v4100_v6, %s4031_s11  ;;  %346 = vrot.lane.b32.xlu0 %v4100_v6, %s4032_s12 }
  0x16   : > { %v4106_v8 = vsel %vm322_vm0, %v313_v4, %v319_v7  ;;  %v4258_v4 = vrot.slane %v4153_v17, %v923_v62  ;;  %v4292_v17 = vrot.slane %v4148_v16, %v1024_v11 }
  0x19   : > { %328 = vrot.lane.b32.xlu1 %v4106_v8, %s4031_s11  ;;  %348 = vrot.lane.b32.xlu0 %v4106_v8, %s4032_s12 }
  0x1d   : > { %529 = vrot.lane.b32.xlu1 %v4106_v8, %s4033_s13  ;;  %527 = vrot.lane.b32.xlu0 %v4100_v6, %s4033_s13 }
  0x21   : > { %630 = vrot.lane.b32.xlu1 %v4106_v8, %s4034_s14  ;;  %628 = vrot.lane.b32.xlu0 %v4100_v6, %s4034_s14 }
  0x25   : > { %815 = vrot.lane.b32.xlu1 %v4106_v8, %s4035_s15  ;;  %813 = vrot.lane.b32.xlu0 %v4100_v6, %s4035_s15 }
  0x29   : > { %916 = vrot.lane.b32.xlu1 %v4106_v8, %s4036_s16  ;;  %914 = vrot.lane.b32.xlu0 %v4100_v6, %s4036_s16 }
  0x2d   : > { %1017 = vrot.lane.b32.xlu1 %v4106_v8, %s4037_s17  ;;  %1015 = vrot.lane.b32.xlu0 %v4100_v6, %s4037_s17 }
  0x31   : > { %1118 = vrot.lane.b32.xlu1 %v4106_v8, %s4038_s18  ;;  %1116 = vrot.lane.b32.xlu0 %v4100_v6, %s4038_s18 }
  0x35   : > { %1219 = vperm.xlu0 %4019, %v325_v9   ;;  %v3801_v9 = vld [vmem:[%s4779_s3 + $0x20] sm:$0x3f] }
  0x87   : > { %v327_v18 = vpop.permute.xlu1 %326  ;;  %v347_v19 = vpop.permute.xlu0 %346 }
  0x8b   : > { %v329_v25 = vpop.permute.xlu1 %328  ;;  %v349_v26 = vpop.permute.xlu0 %348 }
  0x8c   : > { %v333_v27 = vsel %vm332_vm1, %v327_v18, %v329_v25  ;;  %v334_v28 = vsel %vm332_vm1, %v329_v25, %v327_v18  ;;  %v351_v29 = vsel %vm350_vm2, %v347_v19, %v349_v26  ;;  %v352_v30 = vsel %vm350_vm2, %v349_v26, %v347_v19  ;;  %v3805_v26 = vld [vmem:[%s4779_s3 + $0x28] sm:$0x3f] }
  0x8d   : > { %v344_v31 = vmul.f32 %v4158_v20, %v333_v27  ;;  %v361_v32 = vmul.f32 %v4161_v21, %v352_v30  ;;  %v362_v33 = vmul.f32 %v4164_v22, %v351_v29  ;;  %v343_v35 = vmul.f32 %v4168_v24, %v334_v28 }
  0x8e   : > { %v4272_v18 = vrot.slane %v4148_v16, %v923_v62  ;;  %v3809_v16 = vld [vmem:[%s4779_s3 + $0x30] sm:$0x3f] }
  0x8f   : > { %3787 = vmatprep.subr.msk.mxu0 %vm369_vm3, %v362_v33  ;;  %v530_v37 = vpop.permute.xlu1 %529  ;;  %v528_v38 = vpop.permute.xlu0 %527 }
  0x90   : > { %3788 = vmatpush1.msk.msra.mxu0 %vm369_vm3, %v361_v32  ;;  %v532_v40 = vsel %vm531_vm4, %v528_v38, %v530_v37  ;;  %v533_v43 = vsel %vm531_vm4, %v530_v37, %v528_v38 }
  0x91   : > { %3789 = vmatmul.mubr.msk.f32.vlgmr.msra.gmra.mrb[0].mxu0 %vm365_vm5, %v3786_v36  ;;  %3790 = vmatprep.subr.msk.mxu0 %vm369_vm3, %v344_v31  ;;  %v543_v41 = vmul.f32 %v4183_v34, %v532_v40  ;;  %v542_v48 = vmul.f32 %v4200_v42, %v533_v43  ;;  %v4301_v31 = vld [vmem:[%s4778_s2 + $0x18] ss:$0 sm:$0xff]  ;;  %v4316_v36 = vld [vmem:[%s4778_s2 + $0x10] ss:$0 sm:$0xff]  ;;  %v3819_v40 = vld [vmem:[%s4779_s3 + $0x40] sm:$0x3f] }
  0x92   : > { %3791 = vmatpush1.msk.msra.mxu0 %vm369_vm3, %v343_v35  ;;  %520 = vmatprep.mubr.f32.mxu0 %v4030_v2 }
  0x93   : > { %3794 = vmatprep.subr.msk.mxu0 %vm369_vm3, %v543_v41  ;;  %v631_v44 = vpop.permute.xlu1 %630  ;;  %v629_v46 = vpop.permute.xlu0 %628 }
  0x94   : > { %v633_v47 = vsel %vm632_vm6, %v629_v46, %v631_v44  ;;  %v634_v52 = vsel %vm632_vm6, %v631_v44, %v629_v46 }
  0x95   : > { %v644_v50 = vmul.f32 %v4207_v45, %v633_v47  ;;  %v643_v53 = vmul.f32 %v4219_v51, %v634_v52 }
  0x97   : > { %v816_v56 = vpop.permute.xlu1 %815  ;;  %v814_v57 = vpop.permute.xlu0 %813 }
  0x98   : > { %v819_v59 = vsel %vm817_vm7, %v816_v56, %v814_v57  ;;  %v818_v3 = vsel %vm817_vm7, %v814_v57, %v816_v56 }
  0x99   : > { %3792 = vmatmul.mubr.msk.f32.vlgmr.msra.gmra.mrb[0].mxu0 %vm365_vm5, %v345_v49  ;;  %v829_v61 = vmul.f32 %v4237_v58, %v819_v59  ;;  %v828_v7 = vmul.f32 %v4251_v1, %v818_v3 }
  0x9a   : > { %3795 = vmatpush1.msk.msra.mxu0 %vm369_vm3, %v542_v48  ;;  %619 = vmatprep.mubr.f32.mxu0 %v4030_v2 }
  0x9b   : > { %3798 = vmatprep.subr.msk.mxu0 %vm369_vm3, %v644_v50  ;;  %v917_v63 = vpop.permute.xlu1 %916  ;;  %v915_v0 = vpop.permute.xlu0 %914  ;;  %v1226_v50 = vld [vmem:[%s4782_s6] sm:$0x3f] }
  0x9c   : > { %v920_v5 = vsel %vm918_vm8, %v917_v63, %v915_v0  ;;  %v919_v19 = vsel %vm918_vm8, %v915_v0, %v917_v63 }
  0x9d   : > { %v930_v10 = vmul.f32 %v4258_v4, %v920_v5  ;;  %v929_v25 = vmul.f32 %v4272_v18, %v919_v19 }
  0x9f   : > { %v1018_v14 = vpop.permute.xlu1 %1017  ;;  %v1016_v15 = vpop.permute.xlu0 %1015 }
  0xa0   : > { %v1021_v23 = vsel %vm1019_vm9, %v1018_v14, %v1016_v15  ;;  %v1020_v30 = vsel %vm1019_vm9, %v1016_v15, %v1018_v14  ;;  %v1235_v14 = vld [vmem:[%s4781_s5] sm:$0x3f] }
  0xa1   : > { %3796 = vmatmul.mubr.msk.f32.vlgmr.msra.gmra.mrb[0].mxu0 %vm365_vm5, %v3793_v54  ;;  %v1031_v27 = vmul.f32 %v4279_v12, %v1021_v23  ;;  %v1030_v33 = vmul.f32 %v4292_v17, %v1020_v30 }
  0xa2   : > { %3799 = vmatpush1.msk.msra.mxu0 %vm369_vm3, %v643_v53  ;;  %720 = vmatprep.mubr.f32.mxu0 %v4030_v2 }
  0xa3   : > { %3802 = vmatprep.subr.msk.mxu0 %vm369_vm3, %v4106_v8  ;;  %v1119_v28 = vpop.permute.xlu1 %1118  ;;  %v1117_v29 = vpop.permute.xlu0 %1116 }
  0xa4   : > { %v1122_v32 = vsel %vm1120_vm10, %v1119_v28, %v1117_v29  ;;  %v1121_v37 = vsel %vm1120_vm10, %v1117_v29, %v1119_v28  ;;  %v3830_v28 = vld [vmem:[%s4781_s5 + $0x10] sm:$0x3f] }
  0xa5   : > { %v1132_v35 = vmul.f32 %v4301_v31, %v1122_v32  ;;  %v1131_v38 = vmul.f32 %v4316_v36, %v1121_v37 }
  0xa9   : > { %3800 = vmatmul.mubr.msk.f32.vlgmr.msra.gmra.mrb[0].mxu0 %vm365_vm5, %v3797_v60  ;;  %v3823_v60 = vld [vmem:[%s4781_s5 + $0x8] sm:$0x3f] }
  0xaa   : > { %3803 = vmatpush1.msk.msra.mxu0 %vm369_vm3, %v4100_v6  ;;  %804 = vmatprep.mubr.f32.mxu0 %v4030_v2 }
  0xab   : > { %3806 = vmatprep.subr.msk.mxu0 %vm369_vm3, %v829_v61 }
  0xb1   : > { %3804 = vmatmul.mubr.msk.f32.vlgmr.msra.gmra.mrb[0].mxu0 %vm365_vm5, %v3801_v9 }
  0xb2   : > { %3807 = vmatpush1.msk.msra.mxu0 %vm369_vm3, %v828_v7  ;;  %905 = vmatprep.mubr.f32.mxu0 %v4030_v2 }
  0xb3   : > { %3810 = vmatprep.subr.msk.mxu0 %vm369_vm3, %v930_v10 }
  0xb4   : > { %v1220_v41 = vpop.permute.xlu0 %1219 }
  0xb9   : > { %3808 = vmatmul.mubr.msk.f32.vlgmr.msra.gmra.mrb[0].mxu0 %vm365_vm5, %v3805_v26 }
  0xba   : > { %3811 = vmatpush1.msk.msra.mxu0 %vm369_vm3, %v929_v25  ;;  %1006 = vmatprep.mubr.f32.mxu0 %v4030_v2 }
  0xbb   : > { %3814 = vmatprep.subr.msk.mxu0 %vm369_vm3, %v1031_v27 }
  0xc1   : > { %3812 = vmatmul.mubr.msk.f32.vlgmr.msra.gmra.mrb[0].mxu0 %vm365_vm5, %v3809_v16  ;;  %v3834_v16 = vld [vmem:[%s4781_s5 + $0x18] sm:$0x3f] }
  0xc2   : > { %3815 = vmatpush1.msk.msra.mxu0 %vm369_vm3, %v1030_v33  ;;  %1107 = vmatprep.mubr.f32.mxu0 %v4030_v2 }
  0xc3   : > { %3820 = vmatprep.subr.msk.mxu0 %vm369_vm3, %v1132_v35 }
  0xc9   : > { %3816 = vmatmul.mubr.msk.f32.vlgmr.msra.gmra.mrb[0].mxu0 %vm365_vm5, %v3813_v39 }
  0xca   : > { %3821 = vmatpush1.msk.msra.mxu0 %vm369_vm3, %v1131_v38  ;;  %1208 = vmatprep.mubr.f32.mxu0 %v4030_v2 }
  0xd1   : > { %3822 = vmatmul.mubr.msk.f32.vlgmr.msra.gmra.mrb[0].mxu0 %vm365_vm5, %v3819_v40 }
  0xd2   : > { %2146 = vmatprep.mubr.f32.mxu0 %v4030_v2 }
 0x1a4   : > { %v1210_v43 = vpop.f32.mrb[0].mxu0 }
 0x1a5   : > { %v1222_v44 = vadd.f32 %v1220_v41, %v1210_v43  ;;  %v1212_v46 = vpop.f32.mrb[1].mxu0 }
 0x1a6   : > { %v1223_v48 = vadd.f32 %v1220_v41, %v1212_v46  ;;  %v3838_v41 = vld [vmem:[%s4781_s5 + $0x20] sm:$0x3f] }
 0x1a7   : > { %v4333_v47 = vmax.f32 %v1222_v44, 0.0 }
 0x1a8   : > { %v1225_v49 = vmax.f32 %v1223_v48, 0.0 }
 0x1a9   : > { %1227 = vrot.lane.b32.xlu0 %v4333_v47, %s4031_s11  ;;  %1236 = vrot.lane.b32.xlu1 %v4333_v47, %s4032_s12 }
 0x1ad   : > { %1406 = vrot.lane.b32.xlu0 %v4333_v47, %s4033_s13  ;;  %1238 = vrot.lane.b32.xlu1 %v1225_v49, %s4032_s12 }
 0x1b1   : > { %1498 = vrot.lane.b32.xlu0 %v4333_v47, %s4034_s14  ;;  %1229 = vrot.lane.b32.xlu1 %v1225_v49, %s4031_s11 }
 0x1b5   : > { %1674 = vrot.lane.b32.xlu0 %v4333_v47, %s4035_s15  ;;  %1408 = vrot.lane.b32.xlu1 %v1225_v49, %s4033_s13 }
 0x1b9   : > { %1766 = vrot.lane.b32.xlu0 %v4333_v47, %s4036_s16  ;;  %1500 = vrot.lane.b32.xlu1 %v1225_v49, %s4034_s14 }
 0x1bd   : > { %1858 = vrot.lane.b32.xlu0 %v4333_v47, %s4037_s17  ;;  %1676 = vrot.lane.b32.xlu1 %v1225_v49, %s4035_s15 }
 0x1c1   : > { %1950 = vrot.lane.b32.xlu0 %v4333_v47, %s4038_s18  ;;  %1768 = vrot.lane.b32.xlu1 %v1225_v49, %s4036_s16 }
 0x1c5   : > { %2044 = vperm.xlu0 %4019, %v1226_v50   ;;  %1860 = vrot.lane.b32.xlu1 %v1225_v49, %s4037_s17  ;;  %v3842_v50 = vld [vmem:[%s4781_s5 + $0x28] sm:$0x3f] }
 0x1c9   : > { %1952 = vrot.lane.b32.xlu1 %v1225_v49, %s4038_s18 }
 0x21b   : > { %v1237_v52 = vpop.permute.xlu1 %1236  ;;  %v1228_v53 = vpop.permute.xlu0 %1227 }
 0x21f   : > { %v1239_v54 = vpop.permute.xlu1 %1238  ;;  %v1407_v0 = vpop.permute.xlu0 %1406 }
 0x220   : > { %v1240_v55 = vsel %vm350_vm2, %v1237_v52, %v1239_v54  ;;  %v1241_v56 = vsel %vm350_vm2, %v1239_v54, %v1237_v52 }
 0x221   : > { %v1242_v57 = vmul.f32 %v1241_v56, %v4161_v21  ;;  %v1243_v59 = vmul.f32 %v1240_v55, %v4164_v22 }
 0x223   : > { %3824 = vmatprep.subr.msk.mxu1 %vm369_vm3, %v1243_v59  ;;  %v1230_v61 = vpop.permute.xlu1 %1229  ;;  %v1499_v15 = vpop.permute.xlu0 %1498  ;;  %v3846_v59 = vld [vmem:[%s4781_s5 + $0x30] sm:$0x3f] }
 0x224   : > { %v1231_v62 = vsel %vm332_vm1, %v1228_v53, %v1230_v61  ;;  %v1232_v63 = vsel %vm332_vm1, %v1230_v61, %v1228_v53  ;;  %3825 = vmatpush1.msk.msra.mxu1 %vm369_vm3, %v1242_v57 }
 0x225   : > { %v1233_v3 = vmul.f32 %v1232_v63, %v4168_v24  ;;  %v1234_v5 = vmul.f32 %v1231_v62, %v4158_v20  ;;  %3826 = vmatmul.mubr.msk.f32.vlgmr.msra.gmra.mrb[0].mxu1 %vm365_vm5, %v3823_v60  ;;  %v3850_v63 = vld [vmem:[%s4781_s5 + $0x38] sm:$0x3f] }
 0x226   : > { %1399 = vmatprep.mubr.f32.mxu1 %v4030_v2 }
 0x227   : > { %3827 = vmatprep.subr.msk.mxu1 %vm369_vm3, %v1234_v5  ;;  %v1409_v7 = vpop.permute.xlu1 %1408  ;;  %v1675_v32 = vpop.permute.xlu0 %1674 }
 0x228   : > { %v1410_v9 = vsel %vm531_vm4, %v1407_v0, %v1409_v7  ;;  %3828 = vmatpush1.msk.msra.mxu1 %vm369_vm3, %v1233_v3  ;;  %v1411_v10 = vsel %vm531_vm4, %v1409_v7, %v1407_v0  ;;  %v3854_v3 = vld [vmem:[%s4781_s5 + $0x40] sm:$0x3f] }
 0x229   : > { %v1413_v11 = vmul.f32 %v1410_v9, %v4183_v34  ;;  %v1412_v23 = vmul.f32 %v1411_v10, %v4200_v42 }
 0x22b   : > { %3831 = vmatprep.subr.msk.mxu1 %vm369_vm3, %v1413_v11  ;;  %v1501_v19 = vpop.permute.xlu1 %1500  ;;  %v1767_v38 = vpop.permute.xlu0 %1766 }
 0x22c   : > { %v1502_v25 = vsel %vm632_vm6, %v1499_v15, %v1501_v19  ;;  %v1503_v27 = vsel %vm632_vm6, %v1501_v19, %v1499_v15 }
 0x22d   : > { %v1505_v26 = vmul.f32 %v1502_v25, %v4207_v45  ;;  %3829 = vmatmul.mubr.msk.f32.vlgmr.msra.gmra.mrb[0].mxu1 %vm365_vm5, %v1235_v14  ;;  %v1504_v29 = vmul.f32 %v1503_v27, %v4219_v51 }
 0x22e   : > { %3832 = vmatpush1.msk.msra.mxu1 %vm369_vm3, %v1412_v23  ;;  %1489 = vmatprep.mubr.f32.mxu1 %v4030_v2 }
 0x22f   : > { %3835 = vmatprep.subr.msk.mxu1 %vm369_vm3, %v1505_v26  ;;  %v1677_v30 = vpop.permute.xlu1 %1676 }
 0x230   : > { %v1679_v33 = vsel %vm817_vm7, %v1677_v30, %v1675_v32  ;;  %v1678_v39 = vsel %vm817_vm7, %v1675_v32, %v1677_v30 }
 0x231   : > { %v1681_v35 = vmul.f32 %v1679_v33, %v4237_v58  ;;  %v1680_v43 = vmul.f32 %v1678_v39, %v4251_v1 }
 0x233   : > { %v1769_v37 = vpop.permute.xlu1 %1768 }
 0x234   : > { %v1771_v40 = vsel %vm918_vm8, %v1769_v37, %v1767_v38  ;;  %v1770_v48 = vsel %vm918_vm8, %v1767_v38, %v1769_v37 }
 0x235   : > { %3833 = vmatmul.mubr.msk.f32.vlgmr.msra.gmra.mrb[0].mxu1 %vm365_vm5, %v3830_v28  ;;  %v1773_v44 = vmul.f32 %v1771_v40, %v4258_v4  ;;  %v1772_v52 = vmul.f32 %v1770_v48, %v4272_v18 }
 0x236   : > { %3836 = vmatpush1.msk.msra.mxu1 %vm369_vm3, %v1504_v29  ;;  %1581 = vmatprep.mubr.f32.mxu1 %v4030_v2  ;;  %v3860_v29 = vld [vmem:[%s4779_s3 + $0x50] sm:$0x3f] }
 0x237   : > { %3839 = vmatprep.subr.msk.mxu1 %vm369_vm3, %v1225_v49  ;;  %v1861_v46 = vpop.permute.xlu1 %1860 }
 0x23b   : > { %v1953_v54 = vpop.permute.xlu1 %1952 }
 0x23d   : > { %3837 = vmatmul.mubr.msk.f32.vlgmr.msra.gmra.mrb[0].mxu1 %vm365_vm5, %v3834_v16 }
 0x23e   : > { %3840 = vmatpush1.msk.msra.mxu1 %vm369_vm3, %v4333_v47  ;;  %1665 = vmatprep.mubr.f32.mxu1 %v4030_v2  ;;  %v1859_v47 = vpop.permute.xlu0 %1858 }
 0x23f   : > { %3843 = vmatprep.subr.msk.mxu1 %vm369_vm3, %v1681_v35  ;;  %v1863_v49 = vsel %vm1019_vm9, %v1861_v46, %v1859_v47  ;;  %v1862_v56 = vsel %vm1019_vm9, %v1859_v47, %v1861_v46 }
 0x240   : > { %v1865_v53 = vmul.f32 %v1863_v49, %v4279_v12  ;;  %v1864_v60 = vmul.f32 %v1862_v56, %v4292_v17 }
 0x242   : > { %v1951_v55 = vpop.permute.xlu0 %1950 }
 0x243   : > { %v1955_v57 = vsel %vm1120_vm10, %v1953_v54, %v1951_v55  ;;  %v1954_v62 = vsel %vm1120_vm10, %v1951_v55, %v1953_v54 }
 0x244   : > { %v1957_v61 = vmul.f32 %v4301_v31, %v1955_v57  ;;  %v1956_v0 = vmul.f32 %v4316_v36, %v1954_v62  ;;  %v3871_v57 = vld [vmem:[%s4779_s3 + $0x60] sm:$0x3f] }
 0x245   : > { %3841 = vmatmul.mubr.msk.f32.vlgmr.msra.gmra.mrb[0].mxu1 %vm365_vm5, %v3838_v41 }
 0x246   : > { %3844 = vmatpush1.msk.msra.mxu1 %vm369_vm3, %v1680_v43  ;;  %1757 = vmatprep.mubr.f32.mxu1 %v4030_v2  ;;  %v2045_v5 = vpop.permute.xlu0 %2044 }
 0x247   : > { %3847 = vmatprep.subr.msk.mxu1 %vm369_vm3, %v1773_v44  ;;  %v3859_v44 = vld [vmem:[%s4779_s3 + $0x48] sm:$0x3f] }
 0x24d   : > { %3845 = vmatmul.mubr.msk.f32.vlgmr.msra.gmra.mrb[0].mxu1 %vm365_vm5, %v3842_v50 }
 0x24e   : > { %3848 = vmatpush1.msk.msra.mxu1 %vm369_vm3, %v1772_v52  ;;  %1849 = vmatprep.mubr.f32.mxu1 %v4030_v2  ;;  %v3867_v52 = vld [vmem:[%s4779_s3 + $0x58] sm:$0x3f] }
 0x24f   : > { %3851 = vmatprep.subr.msk.mxu1 %vm369_vm3, %v1865_v53 }
 0x255   : > { %3849 = vmatmul.mubr.msk.f32.vlgmr.msra.gmra.mrb[0].mxu1 %vm365_vm5, %v3846_v59 }
 0x256   : > { %3852 = vmatpush1.msk.msra.mxu1 %vm369_vm3, %v1864_v60  ;;  %1941 = vmatprep.mubr.f32.mxu1 %v4030_v2 }
 0x257   : > { %3855 = vmatprep.subr.msk.mxu1 %vm369_vm3, %v1957_v61 }
 0x25d   : > { %3853 = vmatmul.mubr.msk.f32.vlgmr.msra.gmra.mrb[0].mxu1 %vm365_vm5, %v3850_v63 }
 0x25e   : > { %3856 = vmatpush1.msk.msra.mxu1 %vm369_vm3, %v1956_v0  ;;  %2033 = vmatprep.mubr.f32.mxu1 %v4030_v2  ;;  %v3875_v0 = vld [vmem:[%s4779_s3 + $0x68] sm:$0x3f] }
 0x265   : > { %3857 = vmatmul.mubr.msk.f32.vlgmr.msra.gmra.mrb[0].mxu1 %vm365_vm5, %v3854_v3 }
 0x266   : > { %2973 = vmatprep.mubr.f32.mxu1 %v4030_v2 }
 0x338   : > { %v2035_v7 = vpop.f32.mrb[0].mxu1 }
 0x339   : > { %v2047_v9 = vadd.f32 %v2045_v5, %v2035_v7  ;;  %v2037_v10 = vpop.f32.mrb[1].mxu1 }
 0x33a   : > { %v2048_v11 = vadd.f32 %v2045_v5, %v2037_v10 }
 0x33b   : > { %v4475_v14 = vadd.f32 %v2047_v9, %v4100_v6  ;;  %v3858_v6 = vld [vmem:[%s4780_s4 + $0x8] sm:$0x3f] }
 0x33c   : > { %v4478_v15 = vadd.f32 %v2048_v11, %v4106_v8 }
 0x33d   : > { %2063 = vrot.lane.b32.xlu1 %v4475_v14, %s4032_s12 }
 0x33e   : > { %2065 = vrot.lane.b32.xlu0 %v4478_v15, %s4032_s12 }
 0x341   : > { %2053 = vrot.lane.b32.xlu1 %v4475_v14, %s4031_s11 }
 0x342   : > { %2055 = vrot.lane.b32.xlu0 %v4478_v15, %s4031_s11 }
 0x345   : > { %2233 = vrot.lane.b32.xlu1 %v4475_v14, %s4033_s13 }
 0x346   : > { %2235 = vrot.lane.b32.xlu0 %v4478_v15, %s4033_s13 }
 0x349   : > { %2325 = vrot.lane.b32.xlu1 %v4475_v14, %s4034_s14 }
 0x34a   : > { %2327 = vrot.lane.b32.xlu0 %v4478_v15, %s4034_s14 }
 0x34d   : > { %2501 = vrot.lane.b32.xlu1 %v4475_v14, %s4035_s15 }
 0x34e   : > { %2503 = vrot.lane.b32.xlu0 %v4478_v15, %s4035_s15 }
 0x351   : > { %2593 = vrot.lane.b32.xlu1 %v4475_v14, %s4036_s16 }
 0x352   : > { %2595 = vrot.lane.b32.xlu0 %v4478_v15, %s4036_s16 }
 0x355   : > { %2685 = vrot.lane.b32.xlu1 %v4475_v14, %s4037_s17 }
 0x356   : > { %2687 = vrot.lane.b32.xlu0 %v4478_v15, %s4037_s17 }
 0x359   : > { %2777 = vrot.lane.b32.xlu1 %v4475_v14, %s4038_s18 }
 0x35a   : > { %2779 = vrot.lane.b32.xlu0 %v4478_v15, %s4038_s18 }
 0x35d   : > { %2871 = vperm.xlu1 %4020, %v3858_v6   ;;  %v3879_v6 = vld [vmem:[%s4779_s3 + $0x70] sm:$0x3f] }
 0x3af   : > { %v2064_v8 = vpop.permute.xlu1 %2063 }
 0x3b0   : > { %v2066_v19 = vpop.permute.xlu0 %2065 }
 0x3b1   : > { %v2067_v23 = vsel %vm350_vm2, %v2064_v8, %v2066_v19  ;;  %v2068_v25 = vsel %vm350_vm2, %v2066_v19, %v2064_v8 }
 0x3b2   : > { %v2069_v26 = vmul.f32 %v2068_v25, %v4161_v21  ;;  %v2070_v27 = vmul.f32 %v2067_v23, %v4164_v22 }
 0x3b3   : > { %v2054_v28 = vpop.permute.xlu1 %2053 }
 0x3b4   : > { %3861 = vmatprep.subr.msk.mxu0 %vm369_vm3, %v2070_v27  ;;  %v2056_v30 = vpop.permute.xlu0 %2055 }
 0x3b5   : > { %v2057_v32 = vsel %vm332_vm1, %v2054_v28, %v2056_v30  ;;  %v2058_v33 = vsel %vm332_vm1, %v2056_v30, %v2054_v28  ;;  %3862 = vmatpush1.msk.msra.mxu0 %vm369_vm3, %v2069_v26  ;;  %v3883_v28 = vld [vmem:[%s4779_s3 + $0x78] sm:$0x3f] }
 0x3b6   : > { %v2059_v16 = vmul.f32 %v2058_v33, %v4168_v24  ;;  %v2060_v35 = vmul.f32 %v2057_v32, %v4158_v20  ;;  %3863 = vmatmul.mubr.msk.f32.vlgmr.msra.gmra.mrb[2].mxu0 %vm365_vm5, %v3860_v29  ;;  %v3887_v33 = vld [vmem:[%s4779_s3 + $0x80] sm:$0x3f] }
 0x3b7   : > { %v2234_v37 = vpop.permute.xlu1 %2233  ;;  %2226 = vmatprep.mubr.f32.mxu0 %v4030_v2 }
 0x3b8   : > { %3864 = vmatprep.subr.msk.mxu0 %vm369_vm3, %v2060_v35  ;;  %v2236_v38 = vpop.permute.xlu0 %2235  ;;  %v3891_v35 = vld [vmem:[%s4779_s3 + $0x88] sm:$0x3f] }
 0x3b9   : > { %v2237_v39 = vsel %vm531_vm4, %v2234_v37, %v2236_v38  ;;  %3865 = vmatpush1.msk.msra.mxu0 %vm369_vm3, %v2059_v16  ;;  %v2238_v40 = vsel %vm531_vm4, %v2236_v38, %v2234_v37 }
 0x3ba   : > { %v2240_v41 = vmul.f32 %v2237_v39, %v4183_v34  ;;  %v2239_v47 = vmul.f32 %v2238_v40, %v4200_v42 }
 0x3bb   : > { %v2326_v43 = vpop.permute.xlu1 %2325 }
 0x3bc   : > { %3868 = vmatprep.subr.msk.mxu0 %vm369_vm3, %v2240_v41  ;;  %v2328_v46 = vpop.permute.xlu0 %2327 }
 0x3bd   : > { %v2329_v48 = vsel %vm632_vm6, %v2326_v43, %v2328_v46  ;;  %v2330_v50 = vsel %vm632_vm6, %v2328_v46, %v2326_v43  ;;  %v3895_v46 = vld [vmem:[%s4782_s6 + $0x8] sm:$0x3f] }
 0x3be   : > { %v2332_v49 = vmul.f32 %v2329_v48, %v4207_v45  ;;  %3866 = vmatmul.mubr.msk.f32.vlgmr.msra.gmra.mrb[2].mxu0 %vm365_vm5, %v3859_v44  ;;  %v2331_v53 = vmul.f32 %v2330_v50, %v4219_v51 }
 0x3bf   : > { %3869 = vmatpush1.msk.msra.mxu0 %vm369_vm3, %v2239_v47  ;;  %2316 = vmatprep.mubr.f32.mxu0 %v4030_v2  ;;  %v2502_v54 = vpop.permute.xlu1 %2501 }
 0x3c0   : > { %3872 = vmatprep.subr.msk.mxu0 %vm369_vm3, %v2332_v49  ;;  %v2504_v55 = vpop.permute.xlu0 %2503 }
 0x3c1   : > { %v2506_v56 = vsel %vm817_vm7, %v2504_v55, %v2502_v54  ;;  %v2505_v62 = vsel %vm817_vm7, %v2502_v54, %v2504_v55  ;;  %v3897_v55 = vld [vmem:[%s4781_s5 + $0x50] sm:$0x3f] }
 0x3c2   : > { %v2508_v59 = vmul.f32 %v2506_v56, %v4237_v58  ;;  %v2507_v3 = vmul.f32 %v2505_v62, %v4251_v1 }
 0x3c3   : > { %v2594_v60 = vpop.permute.xlu1 %2593 }
 0x3c4   : > { %v2596_v61 = vpop.permute.xlu0 %2595 }
 0x3c5   : > { %v2598_v63 = vsel %vm918_vm8, %v2596_v61, %v2594_v60  ;;  %v2597_v10 = vsel %vm918_vm8, %v2594_v60, %v2596_v61 }
 0x3c6   : > { %3870 = vmatmul.mubr.msk.f32.vlgmr.msra.gmra.mrb[2].mxu0 %vm365_vm5, %v3867_v52  ;;  %v2600_v5 = vmul.f32 %v2598_v63, %v4258_v4  ;;  %v2599_v8 = vmul.f32 %v2597_v10, %v4272_v18 }
 0x3c7   : > { %3873 = vmatpush1.msk.msra.mxu0 %vm369_vm3, %v2331_v53  ;;  %2408 = vmatprep.mubr.f32.mxu0 %v4030_v2  ;;  %v2686_v7 = vpop.permute.xlu1 %2685 }
 0x3c8   : > { %3876 = vmatprep.subr.msk.mxu0 %vm369_vm3, %v4478_v15  ;;  %v2688_v9 = vpop.permute.xlu0 %2687 }
 0x3c9   : > { %v2690_v11 = vsel %vm1019_vm9, %v2688_v9, %v2686_v7  ;;  %v2689_v26 = vsel %vm1019_vm9, %v2686_v7, %v2688_v9 }
 0x3ca   : > { %v2692_v19 = vmul.f32 %v2690_v11, %v4279_v12  ;;  %v2691_v29 = vmul.f32 %v2689_v26, %v4292_v17 }
 0x3cb   : > { %v2778_v23 = vpop.permute.xlu1 %2777 }
 0x3cc   : > { %v2780_v25 = vpop.permute.xlu0 %2779 }
 0x3cd   : > { %v2782_v27 = vsel %vm1120_vm10, %v2780_v25, %v2778_v23  ;;  %v2781_v32 = vsel %vm1120_vm10, %v2778_v23, %v2780_v25 }
 0x3ce   : > { %3874 = vmatmul.mubr.msk.f32.vlgmr.msra.gmra.mrb[2].mxu0 %vm365_vm5, %v3871_v57  ;;  %v2784_v30 = vmul.f32 %v4301_v31, %v2782_v27  ;;  %v2783_v16 = vmul.f32 %v4316_v36, %v2781_v32 }
 0x3cf   : > { %3877 = vmatpush1.msk.msra.mxu0 %vm369_vm3, %v4475_v14  ;;  %2492 = vmatprep.mubr.f32.mxu0 %v4030_v2 }
 0x3d0   : > { %3880 = vmatprep.subr.msk.mxu0 %vm369_vm3, %v2508_v59 }
 0x3d6   : > { %3878 = vmatmul.mubr.msk.f32.vlgmr.msra.gmra.mrb[2].mxu0 %vm365_vm5, %v3875_v0 }
 0x3d7   : > { %3881 = vmatpush1.msk.msra.mxu0 %vm369_vm3, %v2507_v3  ;;  %2584 = vmatprep.mubr.f32.mxu0 %v4030_v2 }
 0x3d8   : > { %3884 = vmatprep.subr.msk.mxu0 %vm369_vm3, %v2600_v5 }
 0x3dc   : > { %v2872_v37 = vpop.permute.xlu1 %2871 }
 0x3de   : > { %3882 = vmatmul.mubr.msk.f32.vlgmr.msra.gmra.mrb[2].mxu0 %vm365_vm5, %v3879_v6 }
 0x3df   : > { %3885 = vmatpush1.msk.msra.mxu0 %vm369_vm3, %v2599_v8  ;;  %2676 = vmatprep.mubr.f32.mxu0 %v4030_v2  ;;  %v3908_v8 = vld [vmem:[%s4781_s5 + $0x60] sm:$0x3f] }
 0x3e0   : > { %3888 = vmatprep.subr.msk.mxu0 %vm369_vm3, %v2692_v19 }
 0x3e6   : > { %3886 = vmatmul.mubr.msk.f32.vlgmr.msra.gmra.mrb[2].mxu0 %vm365_vm5, %v3883_v28 }
 0x3e7   : > { %3889 = vmatpush1.msk.msra.mxu0 %vm369_vm3, %v2691_v29  ;;  %2768 = vmatprep.mubr.f32.mxu0 %v4030_v2 }
 0x3e8   : > { %3892 = vmatprep.subr.msk.mxu0 %vm369_vm3, %v2784_v30 }
 0x3ee   : > { %3890 = vmatmul.mubr.msk.f32.vlgmr.msra.gmra.mrb[2].mxu0 %vm365_vm5, %v3887_v33 }
 0x3ef   : > { %3893 = vmatpush1.msk.msra.mxu0 %vm369_vm3, %v2783_v16  ;;  %2860 = vmatprep.mubr.f32.mxu0 %v4030_v2 }
 0x3f6   : > { %3894 = vmatmul.mubr.msk.f32.vlgmr.msra.gmra.mrb[2].mxu0 %vm365_vm5, %v3891_v35 }
 0x4c9   : > { %v2862_v38 = vpop.f32.mrb[2].mxu0 }
 0x4ca   : > { %v2874_v39 = vadd.f32 %v2872_v37, %v2862_v38  ;;  %v2864_v40 = vpop.f32.mrb[3].mxu0 }
 0x4cb   : > { %v2875_v41 = vadd.f32 %v2872_v37, %v2864_v40 }
 0x4cc   : > { %v4627_v43 = vmax.f32 %v2874_v39, 0.0 }
 0x4cd   : > { %v2877_v44 = vmax.f32 %v2875_v41, 0.0 }
 0x4ce   : > { %2890 = vrot.lane.b32.xlu0 %v4627_v43, %s4032_s12 }
 0x4cf   : > { %2892 = vrot.lane.b32.xlu1 %v2877_v44, %s4032_s12 }
 0x4d2   : > { %2880 = vrot.lane.b32.xlu0 %v4627_v43, %s4031_s11 }
 0x4d3   : > { %2882 = vrot.lane.b32.xlu1 %v2877_v44, %s4031_s11 }
 0x4d6   : > { %3060 = vrot.lane.b32.xlu0 %v4627_v43, %s4033_s13 }
 0x4d7   : > { %3062 = vrot.lane.b32.xlu1 %v2877_v44, %s4033_s13  ;;  %s298_s13 = scalar_lea.vmem %s4783_s7, %s3936_s21 }
 0x4da   : > { %3152 = vrot.lane.b32.xlu0 %v4627_v43, %s4034_s14 }
 0x4db   : > { %3154 = vrot.lane.b32.xlu1 %v2877_v44, %s4034_s14 }
 0x4de   : > { %3328 = vrot.lane.b32.xlu0 %v4627_v43, %s4035_s15 }
 0x4df   : > { %3330 = vrot.lane.b32.xlu1 %v2877_v44, %s4035_s15 }
 0x4e2   : > { %3420 = vrot.lane.b32.xlu0 %v4627_v43, %s4036_s16 }
 0x4e3   : > { %3422 = vrot.lane.b32.xlu1 %v2877_v44, %s4036_s16 }
 0x4e6   : > { %3512 = vrot.lane.b32.xlu0 %v4627_v43, %s4037_s17 }
 0x4e7   : > { %3514 = vrot.lane.b32.xlu1 %v2877_v44, %s4037_s17 }
 0x4ea   : > { %3604 = vrot.lane.b32.xlu0 %v4627_v43, %s4038_s18 }
 0x4eb   : > { %3606 = vrot.lane.b32.xlu1 %v2877_v44, %s4038_s18 }
 0x4ee   : > { %3698 = vperm.xlu0 %4019, %v3895_v46  }
 0x540   : > { %v2891_v47 = vpop.permute.xlu0 %2890 }
 0x541   : > { %v2893_v48 = vpop.permute.xlu1 %2892 }
 0x542   : > { %v2894_v49 = vsel %vm350_vm2, %v2891_v47, %v2893_v48  ;;  %v2895_v50 = vsel %vm350_vm2, %v2893_v48, %v2891_v47 }
 0x543   : > { %v2896_v52 = vmul.f32 %v2895_v50, %v4161_v21  ;;  %v2897_v53 = vmul.f32 %v2894_v49, %v4164_v22 }
 0x544   : > { %v2881_v54 = vpop.permute.xlu0 %2880 }
 0x545   : > { %3898 = vmatprep.subr.msk.mxu1 %vm369_vm3, %v2897_v53  ;;  %v2883_v56 = vpop.permute.xlu1 %2882 }
 0x546   : > { %v2884_v57 = vsel %vm332_vm1, %v2881_v54, %v2883_v56  ;;  %v2885_v59 = vsel %vm332_vm1, %v2883_v56, %v2881_v54  ;;  %3899 = vmatpush1.msk.msra.mxu1 %vm369_vm3, %v2896_v52 }
 0x547   : > { %v2886_v21 = vmul.f32 %v2885_v59, %v4168_v24  ;;  %v2887_v22 = vmul.f32 %v2884_v57, %v4158_v20  ;;  %3900 = vmatmul.mubr.msk.f32.vlgmr.msra.gmra.mrb[2].mxu1 %vm365_vm5, %v3897_v55  ;;  %v3896_v20 = vld [vmem:[%s4781_s5 + $0x48] sm:$0x3f] }
 0x548   : > { %v3061_v60 = vpop.permute.xlu0 %3060  ;;  %3053 = vmatprep.mubr.f32.mxu1 %v4030_v2 }
 0x549   : > { %3901 = vmatprep.subr.msk.mxu1 %vm369_vm3, %v2887_v22  ;;  %v3063_v61 = vpop.permute.xlu1 %3062 }
 0x54a   : > { %v3064_v62 = vsel %vm531_vm4, %v3061_v60, %v3063_v61  ;;  %3902 = vmatpush1.msk.msra.mxu1 %vm369_vm3, %v2886_v21  ;;  %v3065_v63 = vsel %vm531_vm4, %v3063_v61, %v3061_v60 }
 0x54b   : > { %v3067_v24 = vmul.f32 %v3064_v62, %v4183_v34  ;;  %v3066_v5 = vmul.f32 %v3065_v63, %v4200_v42  ;;  %v3904_v42 = vld [vmem:[%s4781_s5 + $0x58] sm:$0x3f] }
 0x54c   : > { %v3153_v0 = vpop.permute.xlu0 %3152 }
 0x54d   : > { %3905 = vmatprep.subr.msk.mxu1 %vm369_vm3, %v3067_v24  ;;  %v3155_v3 = vpop.permute.xlu1 %3154 }
 0x54e   : > { %v3156_v7 = vsel %vm632_vm6, %v3153_v0, %v3155_v3  ;;  %v3157_v34 = vsel %vm632_vm6, %v3155_v3, %v3153_v0 }
 0x54f   : > { %v3159_v9 = vmul.f32 %v3156_v7, %v4207_v45  ;;  %3903 = vmatmul.mubr.msk.f32.vlgmr.msra.gmra.mrb[2].mxu1 %vm365_vm5, %v3896_v20  ;;  %v3158_v10 = vmul.f32 %v3157_v34, %v4219_v51 }
 0x550   : > { %3906 = vmatpush1.msk.msra.mxu1 %vm369_vm3, %v3066_v5  ;;  %3143 = vmatprep.mubr.f32.mxu1 %v4030_v2  ;;  %v3329_v45 = vpop.permute.xlu0 %3328 }
 0x551   : > { %3909 = vmatprep.subr.msk.mxu1 %vm369_vm3, %v3159_v9  ;;  %v3331_v11 = vpop.permute.xlu1 %3330 }
 0x552   : > { %v3333_v6 = vsel %vm817_vm7, %v3331_v11, %v3329_v45  ;;  %v3332_v25 = vsel %vm817_vm7, %v3329_v45, %v3331_v11 }
 0x553   : > { %v3335_v19 = vmul.f32 %v3333_v6, %v4237_v58  ;;  %v3912_v58 = vld [vmem:[%s4781_s5 + $0x68] sm:$0x3f]  ;;  %v3334_v27 = vmul.f32 %v3332_v25, %v4251_v1  ;;  %v3916_v1 = vld [vmem:[%s4781_s5 + $0x70] sm:$0x3f] }
 0x554   : > { %v3421_v51 = vpop.permute.xlu0 %3420 }
 0x555   : > { %v3423_v23 = vpop.permute.xlu1 %3422 }
 0x556   : > { %v3425_v26 = vsel %vm918_vm8, %v3423_v23, %v3421_v51  ;;  %v3424_v32 = vsel %vm918_vm8, %v3421_v51, %v3423_v23 }
 0x557   : > { %3907 = vmatmul.mubr.msk.f32.vlgmr.msra.gmra.mrb[2].mxu1 %vm365_vm5, %v3904_v42  ;;  %v3427_v28 = vmul.f32 %v3425_v26, %v4258_v4  ;;  %v3426_v4 = vmul.f32 %v3424_v32, %v4272_v18  ;;  %v3920_v18 = vld [vmem:[%s4781_s5 + $0x78] sm:$0x3f] }
 0x558   : > { %3910 = vmatpush1.msk.msra.mxu1 %vm369_vm3, %v3158_v10  ;;  %3235 = vmatprep.mubr.f32.mxu1 %v4030_v2  ;;  %v3513_v29 = vpop.permute.xlu0 %3512 }
 0x559   : > { %3913 = vmatprep.subr.msk.mxu1 %vm369_vm3, %v2877_v44  ;;  %v3515_v30 = vpop.permute.xlu1 %3514 }
 0x55a   : > { %v3517_v33 = vsel %vm1019_vm9, %v3515_v30, %v3513_v29  ;;  %v3516_v38 = vsel %vm1019_vm9, %v3513_v29, %v3515_v30 }
 0x55b   : > { %v3519_v16 = vmul.f32 %v3517_v33, %v4279_v12  ;;  %v3518_v12 = vmul.f32 %v3516_v38, %v4292_v17  ;;  %v3928_v17 = vld [vmem:[%s4781_s5 + $0x88] sm:$0x3f] }
 0x55c   : > { %v3605_v35 = vpop.permute.xlu0 %3604 }
 0x55d   : > { %v3607_v37 = vpop.permute.xlu1 %3606 }
 0x55e   : > { %v3609_v39 = vsel %vm1120_vm10, %v3607_v37, %v3605_v35  ;;  %v3608_v41 = vsel %vm1120_vm10, %v3605_v35, %v3607_v37 }
 0x55f   : > { %3911 = vmatmul.mubr.msk.f32.vlgmr.msra.gmra.mrb[2].mxu1 %vm365_vm5, %v3908_v8  ;;  %v3611_v40 = vmul.f32 %v4301_v31, %v3609_v39  ;;  %v3610_v44 = vmul.f32 %v4316_v36, %v3608_v41 }
 0x560   : > { %3914 = vmatpush1.msk.msra.mxu1 %vm369_vm3, %v4627_v43  ;;  %3319 = vmatprep.mubr.f32.mxu1 %v4030_v2  ;;  %v3924_v43 = vld [vmem:[%s4781_s5 + $0x80] sm:$0x3f] }
 0x561   : > { %3917 = vmatprep.subr.msk.mxu1 %vm369_vm3, %v3335_v19 }
 0x567   : > { %3915 = vmatmul.mubr.msk.f32.vlgmr.msra.gmra.mrb[2].mxu1 %vm365_vm5, %v3912_v58 }
 0x568   : > { %3918 = vmatpush1.msk.msra.mxu1 %vm369_vm3, %v3334_v27  ;;  %3411 = vmatprep.mubr.f32.mxu1 %v4030_v2 }
 0x569   : > { %3921 = vmatprep.subr.msk.mxu1 %vm369_vm3, %v3427_v28 }
 0x56d   : > { %v3699_v13 = vpop.permute.xlu0 %3698 }
 0x56f   : > { %3919 = vmatmul.mubr.msk.f32.vlgmr.msra.gmra.mrb[2].mxu1 %vm365_vm5, %v3916_v1 }
 0x570   : > { %3922 = vmatpush1.msk.msra.mxu1 %vm369_vm3, %v3426_v4  ;;  %3503 = vmatprep.mubr.f32.mxu1 %v4030_v2 }
 0x571   : > { %3925 = vmatprep.subr.msk.mxu1 %vm369_vm3, %v3519_v16 }
 0x577   : > { %3923 = vmatmul.mubr.msk.f32.vlgmr.msra.gmra.mrb[2].mxu1 %vm365_vm5, %v3920_v18 }
 0x578   : > { %3926 = vmatpush1.msk.msra.mxu1 %vm369_vm3, %v3518_v12  ;;  %3595 = vmatprep.mubr.f32.mxu1 %v4030_v2 }
 0x579   : > { %3929 = vmatprep.subr.msk.mxu1 %vm369_vm3, %v3611_v40 }
 0x57f   : > { %3927 = vmatmul.mubr.msk.f32.vlgmr.msra.gmra.mrb[2].mxu1 %vm365_vm5, %v3924_v43 }
 0x580   : > { %3930 = vmatpush1.msk.msra.mxu1 %vm369_vm3, %v3610_v44  ;;  %3687 = vmatprep.mubr.f32.mxu1 %v4030_v2 }
 0x587   : > { %3931 = vmatmul.mubr.msk.f32.vlgmr.msra.gmra.mrb[2].mxu1 %vm365_vm5, %v3928_v17 }
 0x65a   : > { %v3689_v31 = vpop.f32.mrb[2].mxu1 }
 0x65b   : > { %v3701_v46 = vadd.f32 %v3699_v13, %v3689_v31  ;;  %v3691_v47 = vpop.f32.mrb[3].mxu1 }
 0x65c   : > { %v3702_v36 = vadd.f32 %v3699_v13, %v3691_v47 }
 0x65d   : > { %v3703_v48 = vadd.f32 %v3701_v46, %v4475_v14 }
 0x65e   : > { %v3704_v2 = vadd.f32 %v3702_v36, %v4478_v15 }
 0x65f   : > { %3705 = vst [vmem:[%s298_s13] sm:$0x3f] %v3703_v48 }
 0x660   : > { %3706 = vst [vmem:[%s298_s13 + $0x8] sm:$0x3f] %v3704_v2 }
 0x661 PF: > { %s17_s24 = sadd.s32 1, %s4028_s24  }
 0x662   : > { %p14_p4 = scmp.ge.s32.totalorder %s17_s24, 4  }
 0x664   :  { %16 = sbr.rel (!%p14_p4) target bundleno = 1 (0x1), region = 117 }

// kernel: mxnet_forward.8
= control target key start
LH: loop header
LB: loop body
LE: loop exit
PB: predicated region body
PF: predicated region fallthrough
CT: control target
= control target key end

     0   :  { %s4844_s17 = smov 0   ;;  %s5704_s0 = inlined_call_operand.<no memory space> [shape: f32[1], index: 0, kind: input, shape index: {}]   ;;  %s5705_s1 = inlined_call_operand.<no memory space> [shape: f32[1], index: 1, kind: input, shape index: {}]   ;;  %s5706_s2 = inlined_call_operand.vmem [shape: f32[2,1,256], index: 2, kind: input, shape index: {}]   ;;  %s5707_s3 = inlined_call_operand.vmem [shape: f32[2,1,256], index: 3, kind: input, shape index: {}]   ;;  %s5708_s4 = inlined_call_operand.vmem [shape: f32[2,1,256], index: 4, kind: input, shape index: {}]   ;;  %s5709_s5 = inlined_call_operand.vmem [shape: f32[2,1,256], index: 5, kind: input, shape index: {}]   ;;  %s5710_s6 = inlined_call_operand.vmem [shape: f32[9,256], index: 6, kind: input, shape index: {}]   ;;  %s5711_s7 = inlined_call_operand.vmem [shape: f32[9,3,1], index: 7, kind: input, shape index: {}]   ;;  %s5712_s8 = inlined_call_operand.vmem [shape: f32[18,4,4], index: 8, kind: input, shape index: {}]   ;;  %s5713_s9 = inlined_call_operand.vmem [shape: f32[2,4,1], index: 9, kind: input, shape index: {}]   ;;  %s5714_s10 = inlined_call_operand.vmem [shape: f32[18,4,4], index: 10, kind: input, shape index: {}]   ;;  %s5715_s11 = inlined_call_operand.vmem [shape: f32[2,4,1], index: 11, kind: input, shape index: {}]   ;;  %s5716_s12 = inlined_call_operand.vmem [shape: f32[2,1,256], index: 12, kind: output, shape index: {0}]   ;;  %s5717_s13 = inlined_call_operand.vmem [shape: f32[2,1,256], index: 13, kind: output, shape index: {1}]   ;;  %s5718_s14 = inlined_call_operand.vmem [shape: f32[2,1,256], index: 14, kind: output, shape index: {2}]  }
   0x1   :  { %20 = sst [smem:[#allocation2]] %s5704_s0 }
   0x2   :  { %21 = sst [smem:[#allocation3]] %s5705_s1 }
   0x3 LB: > { %s4479_s18 = sadd.s32 4294967295, %s4748_s17   ;;  %p4483_p0 = scmp.ge.s32.totalorder %s4748_s17, 1  ;;  %s4748_s17 = sphi %s4844_s17, %s27_s17  }
   0x4   : > { %p445_p1 = scmp.lt.s32.totalorder %s4748_s17, 3 }
   0x6   : > { %p446_p2 = pnand %p4483_p0, %p445_p1 }
   0x7   : > { %p509_p3 = scmp.lt.s32.totalorder (!%p446_p2), %s4479_s18, 1  ;;  %s541_s0 = sld [smem:[#allocation2]] (!%p446_p2)  ;;  %v562_v0 = vlaneseq (!%p446_p2)  ;;  %vm583_vm0 = vcmask (!%p446_p2), 1040384   ;;  %v4751_v29 = vmov (!%p446_p2), 0   ;;  %v4491_v32 = vld [vmem:[%s5711_s7 + $0x4] sm:$0x7] (!%p446_p2) }
   0x8   : > { %449 = sbr.rel (%p446_p2) target bundleno = 2188 (0x88c), region = 68  ;;  %s4750_s15 = smov (!%p446_p2), 64   ;;  %4730 = vset.pattern.permute.xlu1 (!%p446_p2), %v4751_v29  ;;  %4731 = vset.pattern.permute.xlu0 (!%p446_p2), %v4751_v29  ;;  %v4496_v33 = vld [vmem:[%s5711_s7 + $0x18] sm:$0x7] (!%p446_p2)  ;;  %v609_v36 = vld [vmem:[%s5711_s7] sm:$0x7] (!%p446_p2) }
   0x9   : > { %v4883_v8 = vshrl.u32 (!%p446_p2), %v562_v0, 7  ;;  %s4752_s16 = smov (!%p446_p2), 32   ;;  %s4753_s22 = smov (!%p446_p2), 16   ;;  %v4492_v37 = vld [vmem:[%s5711_s7 + $0x8] sm:$0x7] (!%p446_p2)  ;;  %v4950_v55 = vld [vmem:[%s5710_s6] sm:$0xff] (!%p446_p2) }
   0xa   : > { %v4493_v38 = vld [vmem:[%s5711_s7 + $0xc] sm:$0x7] (!%p446_p2)  ;;  %v4494_v39 = vld [vmem:[%s5711_s7 + $0x10] sm:$0x7] (!%p446_p2)  ;;  %v4495_v40 = vld [vmem:[%s5711_s7 + $0x14] sm:$0x7] (!%p446_p2) }
   0xb   : > { %v4886_v17 = vsub.s32 (!%p446_p2), 0, %v4883_v8  ;;  %v4889_v18 = vsub.s32 (!%p446_p2), 1, %v4883_v8  ;;  %s4754_s20 = smov (!%p446_p2), 17   ;;  %s4755_s23 = smov (!%p446_p2), 15   ;;  %v4497_v46 = vld [vmem:[%s5711_s7 + $0x1c] sm:$0x7] (!%p446_p2) }
   0xc   : > { %s4756_s25 = smov (!%p446_p2), 127   ;;  %s4757_s26 = smov (!%p446_p2), 1   ;;  %v4498_v47 = vld [vmem:[%s5711_s7 + $0x20] sm:$0x7] (!%p446_p2)  ;;  %v4955_v57 = vld [vmem:[%s5710_s6 + $0x8] sm:$0xff] (!%p446_p2)  ;;  %v629_v58 = vrot.slane (!%p446_p2), %v4950_v55, 1 }
   0xd   : > { %v550_v7 = vstv (!%p446_p2), %s541_s0  ;;  %s4758_s28 = smov (!%p446_p2), 113   ;;  %s4760_s19 = smov (!%p446_p2), 111   ;;  %v630_v60 = vrot.slane (!%p446_p2), %v4955_v57, 1  ;;  %v657_v62 = vrot.slane (!%p446_p2), %v4950_v55, 2  ;;  %v658_v63 = vrot.slane (!%p446_p2), %v4955_v57, 2 }
   0xe   : > { %vm880_vm2 = vcmask (!%p446_p2), 1043456   ;;  %vm876_vm4 = vcmask (!%p446_p2), 31744   ;;  %s542_s29 = sld [smem:[#allocation3]] (!%p446_p2)  ;;  %vm5681_vm11 = vcmp.lt.s32.totalorder (!%p446_p2), %v562_v0, 256 }
   0xf   : > { %s5722_s18 = smov (!%p509_p3, %s4479_s18), 1 }
  0x10   : > { %s4852_s1 = sshll.u32 %s5722_s18, 1 }
  0x11   : > { %s4858_s21 = scalar_lea.vmem %s5706_s2, %s4852_s1  ;;  %s4864_s24 = scalar_lea.vmem %s5707_s3, %s4852_s1 }
  0x12   : > { %s4870_s27 = scalar_lea.vmem %s5708_s4, %s4852_s1  ;;  %s4876_s30 = scalar_lea.vmem %s5709_s5, %s4852_s1  ;;  %v543_v1 = vld [vmem:[%s4858_s21] sm:$0x3] }
  0x13   : > { %v544_v2 = vld [vmem:[%s4864_s24] sm:$0x3]  ;;  %v547_v5 = vmul.f32 %v543_v1, %v543_v1 }
  0x14   : > { %v545_v3 = vld [vmem:[%s4870_s27] sm:$0x3]  ;;  %v548_v6 = vmul.f32 %v544_v2, %v544_v2 }
  0x15   : > { %v546_v4 = vld [vmem:[%s4876_s30] sm:$0x3]  ;;  %v552_v9 = vmul.f32 %v545_v3, %v543_v1  ;;  %v557_v11 = vmul.f32 %v545_v3, %v545_v3  ;;  %v685_v3 = vrot.slane %v4950_v55, 3 }
  0x16   : > { %v553_v10 = vmul.f32 %v546_v4, %v544_v2  ;;  %v558_v12 = vmul.f32 %v546_v4, %v546_v4  ;;  %v549_v13 = vadd.f32 %v548_v6, %v547_v5  ;;  %v686_v6 = vrot.slane %v4955_v57, 3 }
  0x18   : > { %v554_v14 = vadd.f32 %v553_v10, %v552_v9  ;;  %v559_v15 = vadd.f32 %v558_v12, %v557_v11  ;;  %v551_v16 = vmul.f32 %v550_v7, %v549_v13 }
  0x1a   : > { %v555_v19 = vmul.f32 2.0, %v554_v14  ;;  %v560_v20 = vadd.f32 %v559_v15, %v551_v16 }
  0x1c   : > { %v556_v21 = vadd.f32 %v555_v19, %v551_v16  ;;  %v576_v22 = vrot.slane %v560_v20, %v4886_v17  ;;  %v580_v23 = vrot.slane %v560_v20, %v4889_v18 }
  0x1e   : > { %v565_v24 = vrot.slane %v556_v21, %v4886_v17  ;;  %v569_v25 = vrot.slane %v556_v21, %v4889_v18 }
  0x20   : > { %v584_v26 = vsel %vm583_vm0, %v565_v24, %v576_v22  ;;  %v585_v27 = vsel %vm583_vm0, %v569_v25, %v580_v23 }
  0x21   : > { %v586_v28 = vadd.f32 %v585_v27, %v584_v26 }
  0x23   : > { %587 = vrot.lane.b32.xlu0 %v586_v28, %s4750_s15  ;;  %s528_s15 = scalar_lea.vmem %s5716_s12, %s4852_s1 }
  0x95   : > { %v588_v30 = vpop.permute.xlu0 %587 }
  0x96   : > { %v591_v31 = vadd.f32 %v588_v30, %v586_v28  ;;  %v727_v28 = vrot.slane %v4950_v55, 5  ;;  %v728_v30 = vrot.slane %v4955_v57, 5 }
  0x98   : > { %592 = vrot.lane.b32.xlu0 %v591_v31, %s4752_s16  ;;  %s4759_s16 = smov 112  }
  0x9c   : > { %639 = vperm.xlu0 %4731, %v4491_v32  }
  0xa0   : > { %765 = vperm.xlu0 %4731, %v4496_v33  }
 0x10a   : > { %v593_v34 = vpop.permute.xlu0 %592 }
 0x10b   : > { %v594_v35 = vadd.f32 %v593_v34, %v591_v31 }
 0x10d   : > { %595 = vrot.lane.b32.xlu1 %v594_v35, %s4753_s22 }
 0x111   : > { %612 = vperm.xlu1 %4730, %v609_v36  }
 0x115   : > { %667 = vperm.xlu1 %4730, %v4492_v37  }
 0x119   : > { %695 = vperm.xlu1 %4730, %v4493_v38  }
 0x11b   : > { %v640_v51 = vpop.permute.xlu0 %639 }
 0x11d   : > { %714 = vperm.xlu1 %4730, %v4494_v39   ;;  %v755_v39 = vrot.slane %v4950_v55, 6 }
 0x11f   : > { %v4943_v53 = vpop.permute.xlu0 %765 }
 0x121   : > { %737 = vperm.xlu1 %4730, %v4495_v40   ;;  %v756_v40 = vrot.slane %v4955_v57, 6 }
 0x17f   : > { %v596_v41 = vpop.permute.xlu1 %595 }
 0x180   : > { %v598_v42 = vadd.f32 %v596_v41, %v594_v35 }
 0x182   : > { %v600_v43 = vrot.slane %v598_v42, 1 }
 0x184   : > { %4732 = vrcp.f32 %v600_v43 }
 0x18e   : > { %v4733_v44 = vpop.eup %4732 }
 0x18f   : > { %v4919_v45 = vmul.f32 %v4733_v44, %v598_v42 }
 0x190   : > { %v613_v48 = vpop.permute.xlu1 %612 }
 0x191   : > { %625 = vrot.lane.b32.xlu0 %v4919_v45, %s4753_s22  ;;  %604 = vrot.lane.b32.xlu1 %v4919_v45, %s4754_s20  ;;  %v720_v43 = vrot.slane %v4919_v45, %v4886_v17 }
 0x194   : > { %v668_v49 = vpop.permute.xlu1 %667 }
 0x195   : > { %654 = vrot.lane.b32.xlu0 %v4919_v45, %s4755_s23  ;;  %724 = vrot.lane.b32.xlu1 %v4919_v45, %s4756_s25 }
 0x198   : > { %v696_v50 = vpop.permute.xlu1 %695 }
 0x199   : > { %682 = vrot.lane.b32.xlu0 %v4919_v45, %s4757_s26  ;;  %752 = vrot.lane.b32.xlu1 %v4919_v45, %s4758_s28 }
 0x19c   : > { %v715_v52 = vpop.permute.xlu1 %714 }
 0x19d   : > { %793 = vperm.xlu0 %4731, %v4497_v46   ;;  %780 = vrot.lane.b32.xlu1 %v4919_v45, %s4759_s16 }
 0x1a0   : > { %v4945_v54 = vpop.permute.xlu1 %737 }
 0x1a1   : > { %817 = vperm.xlu0 %4731, %v4498_v47   ;;  %v783_v47 = vrot.slane %v4950_v55, 7 }
 0x1a5   : > { %808 = vrot.lane.b32.xlu0 %v4919_v45, %s4760_s19 }
 0x203   : > { %v626_v56 = vpop.permute.xlu0 %625  ;;  %v605_v59 = vpop.permute.xlu1 %604 }
 0x204   : > { %v607_v1 = vmul.f32 %v605_v59, %v4950_v55  ;;  %v633_v2 = vmul.f32 %v629_v58, %v626_v56  ;;  %v608_v4 = vmul.f32 %v605_v59, %v4955_v57  ;;  %v634_v5 = vmul.f32 %v630_v60, %v626_v56 }
 0x206   : > { %v618_v11 = vrot.slane %v607_v1, %v4886_v17  ;;  %v645_v12 = vrot.slane %v633_v2, %v4886_v17  ;;  %v622_v14 = vrot.slane %v608_v4, %v4886_v17  ;;  %v649_v15 = vrot.slane %v634_v5, %v4886_v17 }
 0x207   : > { %v655_v61 = vpop.permute.xlu0 %654  ;;  %v725_v19 = vpop.permute.xlu1 %724 }
 0x208   : > { %v661_v9 = vmul.f32 %v657_v62, %v655_v61  ;;  %v662_v10 = vmul.f32 %v658_v63, %v655_v61  ;;  %v623_v22 = vmul.f32 %v618_v11, %v613_v48  ;;  %v650_v23 = vmul.f32 %v645_v12, %v640_v51 }
 0x209   : > { %v624_v25 = vmul.f32 %v622_v14, %v613_v48  ;;  %v651_v26 = vmul.f32 %v649_v15, %v640_v51  ;;  %v731_v37 = vmul.f32 %v727_v28, %v725_v19  ;;  %v732_v41 = vmul.f32 %v728_v30, %v725_v19 }
 0x20a   : > { %v673_v20 = vrot.slane %v661_v9, %v4886_v17  ;;  %v677_v21 = vrot.slane %v662_v10, %v4886_v17  ;;  %v652_v32 = vadd.f32 %v650_v23, %v623_v22  ;;  %v784_v48 = vrot.slane %v4955_v57, 7  ;;  %v4995_v9 = vld [vmem:[%s5710_s6 + $0x18] sm:$0x1] }
 0x20b   : > { %v683_v7 = vpop.permute.xlu0 %682  ;;  %v753_v33 = vpop.permute.xlu1 %752  ;;  %v653_v35 = vadd.f32 %v651_v26, %v624_v25  ;;  %v747_v60 = vrot.slane %v732_v41, %v4886_v17  ;;  %v4761_v25 = vmov 0.0  }
 0x20c   : > { %v689_v13 = vmul.f32 %v685_v3, %v683_v7  ;;  %v690_v16 = vmul.f32 %v686_v6, %v683_v7  ;;  %v678_v29 = vmul.f32 %v673_v20, %v668_v49  ;;  %v679_v31 = vmul.f32 %v677_v21, %v668_v49  ;;  %v4990_v7 = vld [vmem:[%s5710_s6 + $0x10] sm:$0x1]  ;;  %951 = vmatprep.mubr.f32.mxu0 %v4761_v25 }
 0x20d   : > { %v721_v49 = vmul.f32 %v720_v43, %v715_v52  ;;  %v759_v51 = vmul.f32 %v755_v39, %v753_v33  ;;  %v760_v56 = vmul.f32 %v756_v40, %v753_v33  ;;  %v749_v52 = vmul.f32 %v747_v60, %v4945_v54  ;;  %1824 = vmatprep.mubr.f32.mxu1 %v4761_v25 }
 0x20e   : > { %v701_v24 = vrot.slane %v689_v13, %v4886_v17  ;;  %v705_v27 = vrot.slane %v690_v16, %v4886_v17  ;;  %v680_v38 = vadd.f32 %v678_v29, %v652_v32  ;;  %v681_v42 = vadd.f32 %v679_v31, %v653_v35 }
 0x20f   : > { %v781_v58 = vpop.permute.xlu1 %780  ;;  %v771_v3 = vrot.slane %v759_v51, %v4886_v17  ;;  %v775_v4 = vrot.slane %v760_v56, %v4886_v17  ;;  %v5051_v35 = vand.u32 127, %v562_v0 }
 0x210   : > { %v706_v34 = vmul.f32 %v701_v24, %v696_v50  ;;  %v707_v36 = vmul.f32 %v705_v27, %v696_v50  ;;  %v743_v50 = vrot.slane %v731_v37, %v4886_v17  ;;  %v787_v62 = vmul.f32 %v783_v47, %v781_v58 }
 0x211   : > { %v788_v63 = vmul.f32 %v784_v48, %v781_v58  ;;  %v776_v13 = vmul.f32 %v771_v3, %v4943_v53  ;;  %vm597_vm1 = vcmp.lt.s32.totalorder %v5051_v35, 16  ;;  %v5060_v37 = vrot.slane %v4955_v57, %v4889_v18  ;;  %v4499_v48 = vld [vmem:[%s5712_s8 + $0x4] sm:$0xf] }
 0x212   : > { %v708_v44 = vadd.f32 %v706_v34, %v680_v38  ;;  %v709_v46 = vadd.f32 %v707_v36, %v681_v42  ;;  %v748_v2 = vmul.f32 %v743_v50, %v4945_v54  ;;  %v799_v11 = vrot.slane %v787_v62, %v4886_v17 }
 0x213   : > { %v803_v12 = vrot.slane %v788_v63, %v4886_v17  ;;  %v777_v54 = vmul.f32 %v775_v4, %v4943_v53  ;;  %v5056_v36 = vrot.slane %v4950_v55, %v4889_v18  ;;  %vm606_vm3 = vcmp.lt.s32.totalorder %v5051_v35, 17 }
 0x214   : > { %v722_v61 = vadd.f32 %v721_v49, %v708_v44  ;;  %v723_v1 = vadd.f32 %v721_v49, %v709_v46  ;;  %v5069_v42 = vrot.slane %v4950_v55, %v4886_v17  ;;  %v5075_v46 = vrot.slane %v4955_v57, %v4886_v17 }
 0x215   : > { %v1046_v47 = vsub.s32 2, %v4883_v8  ;;  %vm656_vm5 = vcmp.lt.s32.totalorder %v5051_v35, 15  ;;  %vm684_vm6 = vcmp.lt.s32.totalorder %v5051_v35, 1  ;;  %vm726_vm7 = vcmp.lt.s32.totalorder %v5051_v35, 127 }
 0x216   : > { %v750_v6 = vadd.f32 %v748_v2, %v722_v61  ;;  %v751_v10 = vadd.f32 %v749_v52, %v723_v1  ;;  %v1146_v61 = vsub.s32 3, %v4883_v8  ;;  %v857_v52 = vld [vmem:[%s5712_s8] sm:$0xf]  ;;  %vm754_vm8 = vcmp.lt.s32.totalorder %v5051_v35, 113 }
 0x217   : > { %v5092_v60 = vrot.slane %v4955_v57, %v1046_v47  ;;  %v5098_v1 = vrot.slane %v4950_v55, %v1046_v47  ;;  %vm782_vm9 = vcmp.lt.s32.totalorder %v5051_v35, 112  ;;  %vm810_vm10 = vcmp.lt.s32.totalorder %v5051_v35, 111 }
 0x218   : > { %v778_v21 = vadd.f32 %v776_v13, %v750_v6  ;;  %v779_v22 = vadd.f32 %v777_v54, %v751_v10  ;;  %v5123_v54 = vrot.slane %v4950_v55, %v1146_v61  ;;  %v4762_v35 = vmov 1966171168  }
 0x21c   : > { %v794_v59 = vpop.permute.xlu0 %793 }
 0x21d   : > { %v804_v15 = vmul.f32 %v799_v11, %v794_v59  ;;  %v805_v16 = vmul.f32 %v803_v12, %v794_v59 }
 0x21f   : > { %v806_v26 = vadd.f32 %v804_v15, %v778_v21  ;;  %v807_v53 = vadd.f32 %v805_v16, %v779_v22  ;;  %v4506_v15 = vld [vmem:[%s5712_s8 + $0x8] sm:$0xf] }
 0x220   : > { %v818_v5 = vpop.permute.xlu0 %817 }
 0x224   : > { %v809_v14 = vpop.permute.xlu0 %808 }
 0x225   : > { %v811_v19 = vmul.f32 %v809_v14, %v4990_v7  ;;  %v812_v20 = vmul.f32 %v809_v14, %v4995_v9 }
 0x227   : > { %v823_v23 = vrot.slane %v811_v19, %v4886_v17  ;;  %v827_v24 = vrot.slane %v812_v20, %v4886_v17  ;;  %v1330_v19 = vsub.s32 5, %v4883_v8 }
 0x229   : > { %v828_v27 = vmul.f32 %v823_v23, %v818_v5  ;;  %v829_v28 = vmul.f32 %v827_v24, %v818_v5  ;;  %v5108_v5 = vrot.slane %v4955_v57, %v1146_v61  ;;  %v5139_v22 = vrot.slane %v4955_v57, %v1330_v19  ;;  %v4510_v24 = vld [vmem:[%s5712_s8 + $0xc] sm:$0xf] }
 0x22a   : > { %v5200_v61 = vrot.slane %v4995_v9, %v4886_v17 }
 0x22b   : > { %v830_v29 = vadd.f32 %v828_v27, %v806_v26  ;;  %v831_v30 = vadd.f32 %v829_v28, %v807_v53  ;;  %v1430_v53 = vsub.s32 6, %v4883_v8 }
 0x22d   : > { %v834_v31 = vrot.slane %v830_v29, 7  ;;  %v835_v32 = vrot.slane %v831_v30, 7  ;;  %v5155_v29 = vrot.slane %v4950_v55, %v1330_v19  ;;  %v1731_v19 = vld [vmem:[%s5715_s11] sm:$0xf] }
 0x22f   : > { %v5009_v33 = vsel %vm583_vm0, %v4919_v45, %v834_v31  ;;  %v5013_v34 = vsel %vm583_vm0, %v4919_v45, %v835_v32  ;;  %v840_v45 = vld [vmem:[%s5713_s9] sm:$0xf]  ;;  %v5160_v31 = vrot.slane %v4955_v57, %v1430_v53 }
 0x230   : > { %860 = vrot.lane.b32.xlu0 %v5013_v34, %s4753_s22  ;;  %858 = vrot.lane.b32.xlu1 %v5009_v33, %s4753_s22 }
 0x234   : > { %843 = vrot.lane.b32.xlu0 %v5013_v34, %s4754_s20  ;;  %841 = vrot.lane.b32.xlu1 %v5009_v33, %s4754_s20 }
 0x238   : > { %1040 = vrot.lane.b32.xlu0 %v5013_v34, %s4755_s23  ;;  %1038 = vrot.lane.b32.xlu1 %v5009_v33, %s4755_s23 }
 0x23c   : > { %1140 = vrot.lane.b32.xlu0 %v5013_v34, %s4757_s26  ;;  %1138 = vrot.lane.b32.xlu1 %v5009_v33, %s4757_s26 }
 0x240   : > { %1324 = vrot.lane.b32.xlu0 %v5013_v34, %s4756_s25  ;;  %1322 = vrot.lane.b32.xlu1 %v5009_v33, %s4756_s25 }
 0x244   : > { %1424 = vrot.lane.b32.xlu0 %v5013_v34, %s4758_s28  ;;  %1422 = vrot.lane.b32.xlu1 %v5009_v33, %s4758_s28 }
 0x248   : > { %1524 = vrot.lane.b32.xlu0 %v5013_v34, %s4759_s16  ;;  %1522 = vrot.lane.b32.xlu1 %v5009_v33, %s4759_s16 }
 0x24c   : > { %1624 = vrot.lane.b32.xlu0 %v5013_v34, %s4760_s19  ;;  %1622 = vrot.lane.b32.xlu1 %v5009_v33, %s4760_s19 }
 0x250   : > { %1724 = vperm.xlu1 %4730, %v840_v45   ;;  %v4514_v45 = vld [vmem:[%s5712_s8 + $0x10] sm:$0xf] }
 0x2a2   : > { %v861_v38 = vpop.permute.xlu0 %860  ;;  %v859_v39 = vpop.permute.xlu1 %858 }
 0x2a3   : > { %v862_v40 = vsel %vm597_vm1, %v859_v39, %v861_v38  ;;  %v863_v41 = vsel %vm597_vm1, %v861_v38, %v859_v39 }
 0x2a4   : > { %v872_v43 = vmul.f32 %v5056_v36, %v863_v41  ;;  %v873_v44 = vmul.f32 %v5060_v37, %v862_v40  ;;  %v1530_v40 = vsub.s32 7, %v4883_v8 }
 0x2a6   : > { %v844_v49 = vpop.permute.xlu0 %843  ;;  %4500 = vmatprep.subr.msk.mxu0 %vm880_vm2, %v873_v44  ;;  %v842_v50 = vpop.permute.xlu1 %841  ;;  %v5176_v44 = vrot.slane %v4950_v55, %v1430_v53 }
 0x2a7   : > { %v845_v51 = vsel %vm606_vm3, %v842_v50, %v844_v49  ;;  %v846_v56 = vsel %vm606_vm3, %v844_v49, %v842_v50  ;;  %4501 = vmatpush1.msk.msra.mxu0 %vm880_vm2, %v872_v43  ;;  %v4518_v50 = vld [vmem:[%s5712_s8 + $0x14] sm:$0xf] }
 0x2a8   : > { %v855_v58 = vmul.f32 %v5069_v42, %v846_v56  ;;  %v856_v59 = vmul.f32 %v5075_v46, %v845_v51  ;;  %4502 = vmatmul.mubr.msk.f32.vlgmr.msra.gmra.mrb[0].mxu0 %vm876_vm4, %v4499_v48  ;;  %v5181_v48 = vrot.slane %v4955_v57, %v1530_v40 }
 0x2a9   : > { %1031 = vmatprep.mubr.f32.mxu0 %v4761_v25 }
 0x2aa   : > { %v1041_v62 = vpop.permute.xlu0 %1040  ;;  %4503 = vmatprep.subr.msk.mxu0 %vm880_vm2, %v856_v59  ;;  %v1039_v63 = vpop.permute.xlu1 %1038  ;;  %v5196_v59 = vrot.slane %v4950_v55, %v1530_v40  ;;  %v5217_v55 = vrot.slane %v4990_v7, %v4886_v17  ;;  %v4530_v7 = vld [vmem:[%s5712_s8 + $0x20] sm:$0xf] }
 0x2ab   : > { %v1042_v2 = vsel %vm656_vm5, %v1039_v63, %v1041_v62  ;;  %4504 = vmatpush1.msk.msra.mxu0 %vm880_vm2, %v855_v58  ;;  %v1043_v3 = vsel %vm656_vm5, %v1041_v62, %v1039_v63 }
 0x2ac   : > { %v1053_v4 = vmul.f32 %v5092_v60, %v1042_v2  ;;  %v1052_v11 = vmul.f32 %v5098_v1, %v1043_v3  ;;  %v4522_v2 = vld [vmem:[%s5712_s8 + $0x18] sm:$0xf] }
 0x2ae   : > { %v1141_v6 = vpop.permute.xlu0 %1140  ;;  %4507 = vmatprep.subr.msk.mxu0 %vm880_vm2, %v1053_v4  ;;  %v1139_v10 = vpop.permute.xlu1 %1138 }
 0x2af   : > { %v1142_v12 = vsel %vm684_vm6, %v1139_v10, %v1141_v6  ;;  %v1143_v14 = vsel %vm684_vm6, %v1141_v6, %v1139_v10 }
 0x2b0   : > { %v1153_v13 = vmul.f32 %v5108_v5, %v1142_v12  ;;  %4505 = vmatmul.mubr.msk.f32.vlgmr.msra.gmra.mrb[0].mxu0 %vm876_vm4, %v857_v52  ;;  %v1152_v16 = vmul.f32 %v5123_v54, %v1143_v14  ;;  %v4526_v52 = vld [vmem:[%s5712_s8 + $0x1c] sm:$0xf] }
 0x2b1   : > { %4508 = vmatpush1.msk.msra.mxu0 %vm880_vm2, %v1052_v11  ;;  %1129 = vmatprep.mubr.f32.mxu0 %v4761_v25 }
 0x2b2   : > { %4511 = vmatprep.subr.msk.mxu0 %vm880_vm2, %v1153_v13  ;;  %v1325_v20 = vpop.permute.xlu0 %1324  ;;  %v1323_v21 = vpop.permute.xlu1 %1322 }
 0x2b3   : > { %v1327_v23 = vsel %vm726_vm7, %v1325_v20, %v1323_v21  ;;  %v1326_v30 = vsel %vm726_vm7, %v1323_v21, %v1325_v20 }
 0x2b4   : > { %v1337_v26 = vmul.f32 %v5139_v22, %v1327_v23  ;;  %v1336_v38 = vmul.f32 %v5155_v29, %v1326_v30 }
 0x2b6   : > { %v1425_v27 = vpop.permute.xlu0 %1424  ;;  %v1423_v28 = vpop.permute.xlu1 %1422 }
 0x2b7   : > { %v1427_v32 = vsel %vm754_vm8, %v1425_v27, %v1423_v28  ;;  %v1426_v47 = vsel %vm754_vm8, %v1423_v28, %v1425_v27  ;;  %v4534_v28 = vld [vmem:[%s5714_s10 + $0x4] sm:$0xf] }
 0x2b8   : > { %4509 = vmatmul.mubr.msk.f32.vlgmr.msra.gmra.mrb[0].mxu0 %vm876_vm4, %v4506_v15  ;;  %v1437_v39 = vmul.f32 %v5160_v31, %v1427_v32  ;;  %v1436_v51 = vmul.f32 %v5176_v44, %v1426_v47 }
 0x2b9   : > { %4512 = vmatpush1.msk.msra.mxu0 %vm880_vm2, %v1152_v16  ;;  %1229 = vmatprep.mubr.f32.mxu0 %v4761_v25 }
 0x2ba   : > { %4515 = vmatprep.subr.msk.mxu0 %vm880_vm2, %v5013_v34  ;;  %v1525_v41 = vpop.permute.xlu0 %1524  ;;  %v1523_v43 = vpop.permute.xlu1 %1522 }
 0x2bb   : > { %v1527_v49 = vsel %vm782_vm9, %v1525_v41, %v1523_v43  ;;  %v1526_v62 = vsel %vm782_vm9, %v1523_v43, %v1525_v41 }
 0x2bc   : > { %v1537_v56 = vmul.f32 %v5181_v48, %v1527_v49  ;;  %v1536_v3 = vmul.f32 %v5196_v59, %v1526_v62 }
 0x2be   : > { %v1625_v58 = vpop.permute.xlu0 %1624  ;;  %v1623_v57 = vpop.permute.xlu1 %1622 }
 0x2bf   : > { %v1627_v63 = vsel %vm810_vm10, %v1625_v58, %v1623_v57  ;;  %v1626_v9 = vsel %vm810_vm10, %v1623_v57, %v1625_v58 }
 0x2c0   : > { %4513 = vmatmul.mubr.msk.f32.vlgmr.msra.gmra.mrb[0].mxu0 %vm876_vm4, %v4510_v24  ;;  %v1637_v4 = vmul.f32 %v5200_v61, %v1627_v63  ;;  %v1636_v6 = vmul.f32 %v5217_v55, %v1626_v9 }
 0x2c1   : > { %4516 = vmatpush1.msk.msra.mxu0 %vm880_vm2, %v5009_v33  ;;  %1313 = vmatprep.mubr.f32.mxu0 %v4761_v25 }
 0x2c2   : > { %4519 = vmatprep.subr.msk.mxu0 %vm880_vm2, %v1337_v26 }
 0x2c8   : > { %4517 = vmatmul.mubr.msk.f32.vlgmr.msra.gmra.mrb[0].mxu0 %vm876_vm4, %v4514_v45 }
 0x2c9   : > { %4520 = vmatpush1.msk.msra.mxu0 %vm880_vm2, %v1336_v38  ;;  %1413 = vmatprep.mubr.f32.mxu0 %v4761_v25 }
 0x2ca   : > { %4523 = vmatprep.subr.msk.mxu0 %vm880_vm2, %v1437_v39 }
 0x2cf   : > { %v1725_v10 = vpop.permute.xlu1 %1724 }
 0x2d0   : > { %4521 = vmatmul.mubr.msk.f32.vlgmr.msra.gmra.mrb[0].mxu0 %vm876_vm4, %v4518_v50 }
 0x2d1   : > { %4524 = vmatpush1.msk.msra.mxu0 %vm880_vm2, %v1436_v51  ;;  %1513 = vmatprep.mubr.f32.mxu0 %v4761_v25  ;;  %v1740_v51 = vld [vmem:[%s5714_s10] sm:$0xf] }
 0x2d2   : > { %4527 = vmatprep.subr.msk.mxu0 %vm880_vm2, %v1537_v56 }
 0x2d8   : > { %4525 = vmatmul.mubr.msk.f32.vlgmr.msra.gmra.mrb[0].mxu0 %vm876_vm4, %v4522_v2  ;;  %v4541_v2 = vld [vmem:[%s5714_s10 + $0x8] sm:$0xf] }
 0x2d9   : > { %4528 = vmatpush1.msk.msra.mxu0 %vm880_vm2, %v1536_v3  ;;  %1613 = vmatprep.mubr.f32.mxu0 %v4761_v25 }
 0x2da   : > { %4531 = vmatprep.subr.msk.mxu0 %vm880_vm2, %v1637_v4 }
 0x2e0   : > { %4529 = vmatmul.mubr.msk.f32.vlgmr.msra.gmra.mrb[0].mxu0 %vm876_vm4, %v4526_v52 }
 0x2e1   : > { %4532 = vmatpush1.msk.msra.mxu0 %vm880_vm2, %v1636_v6  ;;  %1713 = vmatprep.mubr.f32.mxu0 %v4761_v25  ;;  %v4545_v6 = vld [vmem:[%s5714_s10 + $0xc] sm:$0xf] }
 0x2e8   : > { %4533 = vmatmul.mubr.msk.f32.vlgmr.msra.gmra.mrb[0].mxu0 %vm876_vm4, %v4530_v7 }
 0x2e9   : > { %2651 = vmatprep.mubr.f32.mxu0 %v4761_v25 }
 0x3bb   : > { %v1715_v11 = vpop.f32.mrb[0].mxu0 }
 0x3bc   : > { %v1727_v12 = vadd.f32 %v1725_v10, %v1715_v11  ;;  %v1717_v13 = vpop.f32.mrb[1].mxu0 }
 0x3bd   : > { %v1728_v14 = vadd.f32 %v1725_v10, %v1717_v13 }
 0x3be   : > { %v5233_v15 = vmax.f32 %v1727_v12, 0.0 }
 0x3bf   : > { %v1730_v16 = vmax.f32 %v1728_v14, 0.0  ;;  %v4549_v14 = vld [vmem:[%s5714_s10 + $0x10] sm:$0xf] }
 0x3c0   : > { %1741 = vrot.lane.b32.xlu0 %v5233_v15, %s4753_s22 }
 0x3c1   : > { %1743 = vrot.lane.b32.xlu1 %v1730_v16, %s4753_s22 }
 0x3c4   : > { %1732 = vrot.lane.b32.xlu0 %v5233_v15, %s4754_s20 }
 0x3c5   : > { %1734 = vrot.lane.b32.xlu1 %v1730_v16, %s4754_s20 }
 0x3c8   : > { %1911 = vrot.lane.b32.xlu0 %v5233_v15, %s4755_s23 }
 0x3c9   : > { %1913 = vrot.lane.b32.xlu1 %v1730_v16, %s4755_s23 }
 0x3cc   : > { %2003 = vrot.lane.b32.xlu0 %v5233_v15, %s4757_s26 }
 0x3cd   : > { %2005 = vrot.lane.b32.xlu1 %v1730_v16, %s4757_s26 }
 0x3d0   : > { %2179 = vrot.lane.b32.xlu0 %v5233_v15, %s4756_s25 }
 0x3d1   : > { %2181 = vrot.lane.b32.xlu1 %v1730_v16, %s4756_s25 }
 0x3d4   : > { %2271 = vrot.lane.b32.xlu0 %v5233_v15, %s4758_s28 }
 0x3d5   : > { %2273 = vrot.lane.b32.xlu1 %v1730_v16, %s4758_s28 }
 0x3d8   : > { %2363 = vrot.lane.b32.xlu0 %v5233_v15, %s4759_s16 }
 0x3d9   : > { %2365 = vrot.lane.b32.xlu1 %v1730_v16, %s4759_s16 }
 0x3dc   : > { %2455 = vrot.lane.b32.xlu0 %v5233_v15, %s4760_s19 }
 0x3dd   : > { %2457 = vrot.lane.b32.xlu1 %v1730_v16, %s4760_s19 }
 0x3e0   : > { %2549 = vperm.xlu0 %4731, %v1731_v19  }
 0x432   : > { %v1742_v20 = vpop.permute.xlu0 %1741 }
 0x433   : > { %v1744_v21 = vpop.permute.xlu1 %1743 }
 0x434   : > { %v1745_v23 = vsel %vm597_vm1, %v1742_v20, %v1744_v21  ;;  %v1746_v24 = vsel %vm597_vm1, %v1744_v21, %v1742_v20 }
 0x435   : > { %v1747_v26 = vmul.f32 %v1746_v24, %v5056_v36  ;;  %v1748_v53 = vmul.f32 %v1745_v23, %v5060_v37  ;;  %v4553_v24 = vld [vmem:[%s5714_s10 + $0x14] sm:$0xf] }
 0x436   : > { %v1733_v27 = vpop.permute.xlu0 %1732 }
 0x437   : > { %v1735_v30 = vpop.permute.xlu1 %1734  ;;  %4535 = vmatprep.subr.msk.mxu1 %vm880_vm2, %v1748_v53 }
 0x438   : > { %v1736_v32 = vsel %vm606_vm3, %v1733_v27, %v1735_v30  ;;  %v1737_v45 = vsel %vm606_vm3, %v1735_v30, %v1733_v27  ;;  %4536 = vmatpush1.msk.msra.mxu1 %vm880_vm2, %v1747_v26 }
 0x439   : > { %v1738_v38 = vmul.f32 %v1737_v45, %v5069_v42  ;;  %v1739_v39 = vmul.f32 %v1736_v32, %v5075_v46  ;;  %4537 = vmatmul.mubr.msk.f32.vlgmr.msra.gmra.mrb[0].mxu1 %vm876_vm4, %v4534_v28  ;;  %v4557_v45 = vld [vmem:[%s5714_s10 + $0x18] sm:$0xf] }
 0x43a   : > { %v1912_v40 = vpop.permute.xlu0 %1911  ;;  %1904 = vmatprep.mubr.f32.mxu1 %v4761_v25 }
 0x43b   : > { %v1914_v41 = vpop.permute.xlu1 %1913  ;;  %4538 = vmatprep.subr.msk.mxu1 %vm880_vm2, %v1739_v39 }
 0x43c   : > { %v1915_v43 = vsel %vm656_vm5, %v1912_v40, %v1914_v41  ;;  %4539 = vmatpush1.msk.msra.mxu1 %vm880_vm2, %v1738_v38  ;;  %v1916_v47 = vsel %vm656_vm5, %v1914_v41, %v1912_v40  ;;  %v4561_v41 = vld [vmem:[%s5714_s10 + $0x1c] sm:$0xf] }
 0x43d   : > { %v1918_v49 = vmul.f32 %v1915_v43, %v5092_v60  ;;  %v1917_v58 = vmul.f32 %v1916_v47, %v5098_v1  ;;  %v4565_v47 = vld [vmem:[%s5714_s10 + $0x20] sm:$0xf] }
 0x43e   : > { %v2004_v50 = vpop.permute.xlu0 %2003 }
 0x43f   : > { %v2006_v56 = vpop.permute.xlu1 %2005  ;;  %4542 = vmatprep.subr.msk.mxu1 %vm880_vm2, %v1918_v49 }
 0x440   : > { %v2007_v57 = vsel %vm684_vm6, %v2004_v50, %v2006_v56  ;;  %v2008_v63 = vsel %vm684_vm6, %v2006_v56, %v2004_v50 }
 0x441   : > { %v2010_v62 = vmul.f32 %v2007_v57, %v5108_v5  ;;  %4540 = vmatmul.mubr.msk.f32.vlgmr.msra.gmra.mrb[0].mxu1 %vm876_vm4, %v1740_v51  ;;  %v2009_v3 = vmul.f32 %v2008_v63, %v5123_v54 }
 0x442   : > { %4543 = vmatpush1.msk.msra.mxu1 %vm880_vm2, %v1917_v58  ;;  %1994 = vmatprep.mubr.f32.mxu1 %v4761_v25  ;;  %v2180_v4 = vpop.permute.xlu0 %2179 }
 0x443   : > { %4546 = vmatprep.subr.msk.mxu1 %vm880_vm2, %v2010_v62  ;;  %v2182_v9 = vpop.permute.xlu1 %2181 }
 0x444   : > { %v2184_v52 = vsel %vm726_vm7, %v2182_v9, %v2180_v4  ;;  %v2183_v12 = vsel %vm726_vm7, %v2180_v4, %v2182_v9 }
 0x445   : > { %v2186_v7 = vmul.f32 %v2184_v52, %v5139_v22 }
 0x446   : > { %v2272_v10 = vpop.permute.xlu0 %2271 }
 0x447   : > { %v2274_v11 = vpop.permute.xlu1 %2273 }
 0x448   : > { %v2276_v13 = vsel %vm754_vm8, %v2274_v11, %v2272_v10  ;;  %v2275_v21 = vsel %vm754_vm8, %v2272_v10, %v2274_v11 }
 0x449   : > { %4544 = vmatmul.mubr.msk.f32.vlgmr.msra.gmra.mrb[0].mxu1 %vm876_vm4, %v4541_v2  ;;  %v2277_v26 = vmul.f32 %v2275_v21, %v5176_v44 }
 0x44a   : > { %4547 = vmatpush1.msk.msra.mxu1 %vm880_vm2, %v2009_v3  ;;  %2086 = vmatprep.mubr.f32.mxu1 %v4761_v25  ;;  %v2364_v19 = vpop.permute.xlu0 %2363 }
 0x44b   : > { %4550 = vmatprep.subr.msk.mxu1 %vm880_vm2, %v1730_v16  ;;  %v2185_v16 = vmul.f32 %v2183_v12, %v5155_v29  ;;  %v2366_v20 = vpop.permute.xlu1 %2365 }
 0x44c   : > { %v2368_v23 = vsel %vm782_vm9, %v2366_v20, %v2364_v19  ;;  %v2367_v30 = vsel %vm782_vm9, %v2364_v19, %v2366_v20 }
 0x44d   : > { %v2370_v53 = vmul.f32 %v2368_v23, %v5181_v48  ;;  %v2369_v38 = vmul.f32 %v2367_v30, %v5196_v59  ;;  %v4570_v23 = vld [vmem:[%s5712_s8 + $0x24] sm:$0xf]  ;;  %v4578_v30 = vld [vmem:[%s5712_s8 + $0x2c] sm:$0xf] }
 0x44e   : > { %v2456_v27 = vpop.permute.xlu0 %2455 }
 0x44f   : > { %v2458_v28 = vpop.permute.xlu1 %2457 }
 0x450   : > { %v2460_v32 = vsel %vm810_vm10, %v2458_v28, %v2456_v27  ;;  %v2459_v40 = vsel %vm810_vm10, %v2456_v27, %v2458_v28 }
 0x451   : > { %4548 = vmatmul.mubr.msk.f32.vlgmr.msra.gmra.mrb[0].mxu1 %vm876_vm4, %v4545_v6  ;;  %v2462_v39 = vmul.f32 %v2460_v32, %v5200_v61  ;;  %v2461_v43 = vmul.f32 %v2459_v40, %v5217_v55  ;;  %v4571_v6 = vld [vmem:[%s5712_s8 + $0x28] sm:$0xf]  ;;  %v4582_v40 = vld [vmem:[%s5712_s8 + $0x30] sm:$0xf] }
 0x452   : > { %4551 = vmatpush1.msk.msra.mxu1 %vm880_vm2, %v5233_v15  ;;  %2170 = vmatprep.mubr.f32.mxu1 %v4761_v25  ;;  %v2278_v15 = vmul.f32 %v2276_v13, %v5160_v31 }
 0x453   : > { %4554 = vmatprep.subr.msk.mxu1 %vm880_vm2, %v2186_v7 }
 0x459   : > { %4552 = vmatmul.mubr.msk.f32.vlgmr.msra.gmra.mrb[0].mxu1 %vm876_vm4, %v4549_v14 }
 0x45a   : > { %4555 = vmatpush1.msk.msra.mxu1 %vm880_vm2, %v2185_v16  ;;  %2262 = vmatprep.mubr.f32.mxu1 %v4761_v25 }
 0x45b   : > { %4558 = vmatprep.subr.msk.mxu1 %vm880_vm2, %v2278_v15 }
 0x45f   : > { %v2550_v49 = vpop.permute.xlu0 %2549 }
 0x461   : > { %4556 = vmatmul.mubr.msk.f32.vlgmr.msra.gmra.mrb[0].mxu1 %vm876_vm4, %v4553_v24 }
 0x462   : > { %4559 = vmatpush1.msk.msra.mxu1 %vm880_vm2, %v2277_v26  ;;  %2354 = vmatprep.mubr.f32.mxu1 %v4761_v25 }
 0x463   : > { %4562 = vmatprep.subr.msk.mxu1 %vm880_vm2, %v2370_v53 }
 0x469   : > { %4560 = vmatmul.mubr.msk.f32.vlgmr.msra.gmra.mrb[0].mxu1 %vm876_vm4, %v4557_v45 }
 0x46a   : > { %4563 = vmatpush1.msk.msra.mxu1 %vm880_vm2, %v2369_v38  ;;  %2446 = vmatprep.mubr.f32.mxu1 %v4761_v25 }
 0x46b   : > { %4566 = vmatprep.subr.msk.mxu1 %vm880_vm2, %v2462_v39 }
 0x471   : > { %4564 = vmatmul.mubr.msk.f32.vlgmr.msra.gmra.mrb[0].mxu1 %vm876_vm4, %v4561_v41 }
 0x472   : > { %4567 = vmatpush1.msk.msra.mxu1 %vm880_vm2, %v2461_v43  ;;  %2538 = vmatprep.mubr.f32.mxu1 %v4761_v25 }
 0x479   : > { %4568 = vmatmul.mubr.msk.f32.vlgmr.msra.gmra.mrb[0].mxu1 %vm876_vm4, %v4565_v47 }
 0x47a   : > { %3478 = vmatprep.mubr.f32.mxu1 %v4761_v25 }
 0x54c   : > { %v2540_v50 = vpop.f32.mrb[0].mxu1 }
 0x54d   : > { %v2552_v51 = vadd.f32 %v2550_v49, %v2540_v50  ;;  %v2542_v56 = vpop.f32.mrb[1].mxu1 }
 0x54e   : > { %v2553_v58 = vadd.f32 %v2550_v49, %v2542_v56 }
 0x54f   : > { %v5375_v57 = vadd.f32 %v2552_v51, %v5009_v33  ;;  %v4569_v33 = vld [vmem:[%s5713_s9 + $0x4] sm:$0xf]  ;;  %v4586_v51 = vld [vmem:[%s5712_s8 + $0x34] sm:$0xf] }
 0x550   : > { %v5378_v62 = vadd.f32 %v2553_v58, %v5013_v34 }
 0x551   : > { %2568 = vrot.lane.b32.xlu1 %v5375_v57, %s4753_s22 }
 0x552   : > { %2570 = vrot.lane.b32.xlu0 %v5378_v62, %s4753_s22 }
 0x555   : > { %2558 = vrot.lane.b32.xlu1 %v5375_v57, %s4754_s20 }
 0x556   : > { %2560 = vrot.lane.b32.xlu0 %v5378_v62, %s4754_s20 }
 0x559   : > { %2738 = vrot.lane.b32.xlu1 %v5375_v57, %s4755_s23 }
 0x55a   : > { %2740 = vrot.lane.b32.xlu0 %v5378_v62, %s4755_s23 }
 0x55d   : > { %2830 = vrot.lane.b32.xlu1 %v5375_v57, %s4757_s26 }
 0x55e   : > { %2832 = vrot.lane.b32.xlu0 %v5378_v62, %s4757_s26 }
 0x561   : > { %3006 = vrot.lane.b32.xlu1 %v5375_v57, %s4756_s25 }
 0x562   : > { %3008 = vrot.lane.b32.xlu0 %v5378_v62, %s4756_s25 }
 0x565   : > { %3098 = vrot.lane.b32.xlu1 %v5375_v57, %s4758_s28 }
 0x566   : > { %3100 = vrot.lane.b32.xlu0 %v5378_v62, %s4758_s28 }
 0x569   : > { %3190 = vrot.lane.b32.xlu1 %v5375_v57, %s4759_s16 }
 0x56a   : > { %3192 = vrot.lane.b32.xlu0 %v5378_v62, %s4759_s16 }
 0x56d   : > { %3282 = vrot.lane.b32.xlu1 %v5375_v57, %s4760_s19 }
 0x56e   : > { %3284 = vrot.lane.b32.xlu0 %v5378_v62, %s4760_s19 }
 0x571   : > { %3376 = vperm.xlu1 %4730, %v4569_v33  }
 0x5c3   : > { %v2569_v34 = vpop.permute.xlu1 %2568 }
 0x5c4   : > { %v2571_v63 = vpop.permute.xlu0 %2570 }
 0x5c5   : > { %v2572_v2 = vsel %vm597_vm1, %v2569_v34, %v2571_v63  ;;  %v2573_v3 = vsel %vm597_vm1, %v2571_v63, %v2569_v34 }
 0x5c6   : > { %v2574_v4 = vmul.f32 %v2573_v3, %v5056_v36  ;;  %v2575_v9 = vmul.f32 %v2572_v2, %v5060_v37  ;;  %v4590_v3 = vld [vmem:[%s5712_s8 + $0x38] sm:$0xf] }
 0x5c7   : > { %v2559_v52 = vpop.permute.xlu1 %2558 }
 0x5c8   : > { %v2561_v7 = vpop.permute.xlu0 %2560  ;;  %4572 = vmatprep.subr.msk.mxu0 %vm880_vm2, %v2575_v9 }
 0x5c9   : > { %v2562_v10 = vsel %vm606_vm3, %v2559_v52, %v2561_v7  ;;  %v2563_v11 = vsel %vm606_vm3, %v2561_v7, %v2559_v52  ;;  %4573 = vmatpush1.msk.msra.mxu0 %vm880_vm2, %v2574_v4 }
 0x5ca   : > { %v2564_v12 = vmul.f32 %v2563_v11, %v5069_v42  ;;  %v2565_v13 = vmul.f32 %v2562_v10, %v5075_v46  ;;  %4574 = vmatmul.mubr.msk.f32.vlgmr.msra.gmra.mrb[2].mxu0 %vm876_vm4, %v4571_v6  ;;  %v4594_v11 = vld [vmem:[%s5712_s8 + $0x3c] sm:$0xf] }
 0x5cb   : > { %v2739_v14 = vpop.permute.xlu1 %2738  ;;  %2731 = vmatprep.mubr.f32.mxu0 %v4761_v25 }
 0x5cc   : > { %v2741_v16 = vpop.permute.xlu0 %2740  ;;  %4575 = vmatprep.subr.msk.mxu0 %vm880_vm2, %v2565_v13 }
 0x5cd   : > { %v2742_v15 = vsel %vm656_vm5, %v2739_v14, %v2741_v16  ;;  %4576 = vmatpush1.msk.msra.mxu0 %vm880_vm2, %v2564_v12  ;;  %v2743_v19 = vsel %vm656_vm5, %v2741_v16, %v2739_v14  ;;  %v4598_v16 = vld [vmem:[%s5712_s8 + $0x40] sm:$0xf] }
 0x5ce   : > { %v2745_v20 = vmul.f32 %v2742_v15, %v5092_v60  ;;  %v2744_v26 = vmul.f32 %v2743_v19, %v5098_v1  ;;  %v4602_v19 = vld [vmem:[%s5712_s8 + $0x44] sm:$0xf] }
 0x5cf   : > { %v2831_v21 = vpop.permute.xlu1 %2830 }
 0x5d0   : > { %v2833_v24 = vpop.permute.xlu0 %2832  ;;  %4579 = vmatprep.subr.msk.mxu0 %vm880_vm2, %v2745_v20 }
 0x5d1   : > { %v2834_v53 = vsel %vm684_vm6, %v2831_v21, %v2833_v24  ;;  %v2835_v28 = vsel %vm684_vm6, %v2833_v24, %v2831_v21 }
 0x5d2   : > { %v2837_v27 = vmul.f32 %v2834_v53, %v5108_v5  ;;  %4577 = vmatmul.mubr.msk.f32.vlgmr.msra.gmra.mrb[2].mxu0 %vm876_vm4, %v4570_v23  ;;  %v2836_v32 = vmul.f32 %v2835_v28, %v5123_v54  ;;  %v4606_v28 = vld [vmem:[%s5715_s11 + $0x4] sm:$0xf] }
 0x5d3   : > { %4580 = vmatpush1.msk.msra.mxu0 %vm880_vm2, %v2744_v26  ;;  %2821 = vmatprep.mubr.f32.mxu0 %v4761_v25  ;;  %v3007_v45 = vpop.permute.xlu1 %3006 }
 0x5d4   : > { %4583 = vmatprep.subr.msk.mxu0 %vm880_vm2, %v2837_v27  ;;  %v3009_v38 = vpop.permute.xlu0 %3008 }
 0x5d5   : > { %v3011_v39 = vsel %vm726_vm7, %v3009_v38, %v3007_v45  ;;  %v3010_v49 = vsel %vm726_vm7, %v3007_v45, %v3009_v38 }
 0x5d6   : > { %v3013_v41 = vmul.f32 %v3011_v39, %v5139_v22  ;;  %v3012_v56 = vmul.f32 %v3010_v49, %v5155_v29 }
 0x5d7   : > { %v3099_v43 = vpop.permute.xlu1 %3098 }
 0x5d8   : > { %v3101_v47 = vpop.permute.xlu0 %3100 }
 0x5d9   : > { %v3103_v50 = vsel %vm754_vm8, %v3101_v47, %v3099_v43  ;;  %v3102_v63 = vsel %vm754_vm8, %v3099_v43, %v3101_v47  ;;  %v4608_v43 = vld [vmem:[%s5714_s10 + $0x28] sm:$0xf] }
 0x5da   : > { %4581 = vmatmul.mubr.msk.f32.vlgmr.msra.gmra.mrb[2].mxu0 %vm876_vm4, %v4578_v30  ;;  %v3105_v58 = vmul.f32 %v3103_v50, %v5160_v31  ;;  %v3104_v4 = vmul.f32 %v3102_v63, %v5176_v44 }
 0x5db   : > { %4584 = vmatpush1.msk.msra.mxu0 %vm880_vm2, %v2836_v32  ;;  %2913 = vmatprep.mubr.f32.mxu0 %v4761_v25  ;;  %v3191_v33 = vpop.permute.xlu1 %3190 }
 0x5dc   : > { %4587 = vmatprep.subr.msk.mxu0 %vm880_vm2, %v5378_v62  ;;  %v3193_v34 = vpop.permute.xlu0 %3192 }
 0x5dd   : > { %v3195_v2 = vsel %vm782_vm9, %v3193_v34, %v3191_v33  ;;  %v3194_v7 = vsel %vm782_vm9, %v3191_v33, %v3193_v34 }
 0x5de   : > { %v3197_v9 = vmul.f32 %v3195_v2, %v5181_v48  ;;  %v3196_v12 = vmul.f32 %v3194_v7, %v5196_v59  ;;  %v4619_v7 = vld [vmem:[%s5714_s10 + $0x30] sm:$0xf] }
 0x5df   : > { %v3283_v52 = vpop.permute.xlu1 %3282 }
 0x5e0   : > { %v3285_v6 = vpop.permute.xlu0 %3284 }
 0x5e1   : > { %v3287_v10 = vsel %vm810_vm10, %v3285_v6, %v3283_v52  ;;  %v3286_v14 = vsel %vm810_vm10, %v3283_v52, %v3285_v6 }
 0x5e2   : > { %4585 = vmatmul.mubr.msk.f32.vlgmr.msra.gmra.mrb[2].mxu0 %vm876_vm4, %v4582_v40  ;;  %v3289_v13 = vmul.f32 %v3287_v10, %v5200_v61  ;;  %v3288_v15 = vmul.f32 %v3286_v14, %v5217_v55 }
 0x5e3   : > { %4588 = vmatpush1.msk.msra.mxu0 %vm880_vm2, %v5375_v57  ;;  %2997 = vmatprep.mubr.f32.mxu0 %v4761_v25 }
 0x5e4   : > { %4591 = vmatprep.subr.msk.mxu0 %vm880_vm2, %v3013_v41 }
 0x5ea   : > { %4589 = vmatmul.mubr.msk.f32.vlgmr.msra.gmra.mrb[2].mxu0 %vm876_vm4, %v4586_v51 }
 0x5eb   : > { %4592 = vmatpush1.msk.msra.mxu0 %vm880_vm2, %v3012_v56  ;;  %3089 = vmatprep.mubr.f32.mxu0 %v4761_v25 }
 0x5ec   : > { %4595 = vmatprep.subr.msk.mxu0 %vm880_vm2, %v3105_v58 }
 0x5f0   : > { %v3377_v20 = vpop.permute.xlu1 %3376 }
 0x5f2   : > { %4593 = vmatmul.mubr.msk.f32.vlgmr.msra.gmra.mrb[2].mxu0 %vm876_vm4, %v4590_v3 }
 0x5f3   : > { %4596 = vmatpush1.msk.msra.mxu0 %vm880_vm2, %v3104_v4  ;;  %3181 = vmatprep.mubr.f32.mxu0 %v4761_v25 }
 0x5f4   : > { %4599 = vmatprep.subr.msk.mxu0 %vm880_vm2, %v3197_v9 }
 0x5fa   : > { %4597 = vmatmul.mubr.msk.f32.vlgmr.msra.gmra.mrb[2].mxu0 %vm876_vm4, %v4594_v11 }
 0x5fb   : > { %4600 = vmatpush1.msk.msra.mxu0 %vm880_vm2, %v3196_v12  ;;  %3273 = vmatprep.mubr.f32.mxu0 %v4761_v25 }
 0x5fc   : > { %4603 = vmatprep.subr.msk.mxu0 %vm880_vm2, %v3289_v13 }
 0x602   : > { %4601 = vmatmul.mubr.msk.f32.vlgmr.msra.gmra.mrb[2].mxu0 %vm876_vm4, %v4598_v16 }
 0x603   : > { %4604 = vmatpush1.msk.msra.mxu0 %vm880_vm2, %v3288_v15  ;;  %3365 = vmatprep.mubr.f32.mxu0 %v4761_v25 }
 0x60a   : > { %4605 = vmatmul.mubr.msk.f32.vlgmr.msra.gmra.mrb[2].mxu0 %vm876_vm4, %v4602_v19 }
 0x6dd   : > { %v3367_v21 = vpop.f32.mrb[2].mxu0 }
 0x6de   : > { %v3379_v23 = vadd.f32 %v3377_v20, %v3367_v21  ;;  %v3369_v24 = vpop.f32.mrb[3].mxu0 }
 0x6df   : > { %v3380_v26 = vadd.f32 %v3377_v20, %v3369_v24 }
 0x6e0   : > { %v5527_v53 = vmax.f32 %v3379_v23, 0.0 }
 0x6e1   : > { %v3382_v27 = vmax.f32 %v3380_v26, 0.0 }
 0x6e2   : > { %3395 = vrot.lane.b32.xlu0 %v5527_v53, %s4753_s22 }
 0x6e3   : > { %3397 = vrot.lane.b32.xlu1 %v3382_v27, %s4753_s22  ;;  %s532_s22 = scalar_lea.vmem %s5717_s13, %s4852_s1 }
 0x6e6   : > { %3385 = vrot.lane.b32.xlu0 %v5527_v53, %s4754_s20 }
 0x6e7   : > { %3387 = vrot.lane.b32.xlu1 %v3382_v27, %s4754_s20 }
 0x6ea   : > { %3565 = vrot.lane.b32.xlu0 %v5527_v53, %s4755_s23 }
 0x6eb   : > { %3567 = vrot.lane.b32.xlu1 %v3382_v27, %s4755_s23 }
 0x6ee   : > { %3657 = vrot.lane.b32.xlu0 %v5527_v53, %s4757_s26 }
 0x6ef   : > { %3659 = vrot.lane.b32.xlu1 %v3382_v27, %s4757_s26 }
 0x6f2   : > { %3833 = vrot.lane.b32.xlu0 %v5527_v53, %s4756_s25 }
 0x6f3   : > { %3835 = vrot.lane.b32.xlu1 %v3382_v27, %s4756_s25  ;;  %s536_s25 = scalar_lea.vmem %s5718_s14, %s4852_s1 }
 0x6f6   : > { %3925 = vrot.lane.b32.xlu0 %v5527_v53, %s4758_s28 }
 0x6f7   : > { %3927 = vrot.lane.b32.xlu1 %v3382_v27, %s4758_s28 }
 0x6fa   : > { %4017 = vrot.lane.b32.xlu0 %v5527_v53, %s4759_s16 }
 0x6fb   : > { %4019 = vrot.lane.b32.xlu1 %v3382_v27, %s4759_s16 }
 0x6fe   : > { %4109 = vrot.lane.b32.xlu0 %v5527_v53, %s4760_s19 }
 0x6ff   : > { %4111 = vrot.lane.b32.xlu1 %v3382_v27, %s4760_s19 }
 0x702   : > { %4203 = vperm.xlu0 %4731, %v4606_v28  }
 0x754   : > { %v3396_v30 = vpop.permute.xlu0 %3395 }
 0x755   : > { %v3398_v32 = vpop.permute.xlu1 %3397 }
 0x756   : > { %v3399_v45 = vsel %vm597_vm1, %v3396_v30, %v3398_v32  ;;  %v3400_v38 = vsel %vm597_vm1, %v3398_v32, %v3396_v30  ;;  %v4635_v32 = vld [vmem:[%s5714_s10 + $0x40] sm:$0xf] }
 0x757   : > { %v3401_v39 = vmul.f32 %v3400_v38, %v5056_v36  ;;  %v3402_v40 = vmul.f32 %v3399_v45, %v5060_v37 }
 0x758   : > { %v3386_v41 = vpop.permute.xlu0 %3385 }
 0x759   : > { %v3388_v47 = vpop.permute.xlu1 %3387  ;;  %4609 = vmatprep.subr.msk.mxu1 %vm880_vm2, %v3402_v40 }
 0x75a   : > { %v3389_v49 = vsel %vm606_vm3, %v3386_v41, %v3388_v47  ;;  %v3390_v50 = vsel %vm606_vm3, %v3388_v47, %v3386_v41  ;;  %4610 = vmatpush1.msk.msra.mxu1 %vm880_vm2, %v3401_v39 }
 0x75b   : > { %v3391_v36 = vmul.f32 %v3390_v50, %v5069_v42  ;;  %v3392_v37 = vmul.f32 %v3389_v49, %v5075_v46  ;;  %4611 = vmatmul.mubr.msk.f32.vlgmr.msra.gmra.mrb[2].mxu1 %vm876_vm4, %v4608_v43  ;;  %v4607_v46 = vld [vmem:[%s5714_s10 + $0x24] sm:$0xf]  ;;  %v4233_v43 = vstv %s542_s29 }
 0x75c   : > { %v3566_v51 = vpop.permute.xlu0 %3565  ;;  %3558 = vmatprep.mubr.f32.mxu1 %v4761_v25 }
 0x75d   : > { %v3568_v56 = vpop.permute.xlu1 %3567  ;;  %4612 = vmatprep.subr.msk.mxu1 %vm880_vm2, %v3392_v37 }
 0x75e   : > { %v3569_v58 = vsel %vm656_vm5, %v3566_v51, %v3568_v56  ;;  %4613 = vmatpush1.msk.msra.mxu1 %vm880_vm2, %v3391_v36  ;;  %v3570_v33 = vsel %vm656_vm5, %v3568_v56, %v3566_v51  ;;  %v4739_v36 = vld [vmem:[%s4864_s24] sm:$0x3] }
 0x75f   : > { %v3572_v42 = vmul.f32 %v3569_v58, %v5092_v60  ;;  %v3571_v2 = vmul.f32 %v3570_v33, %v5098_v1  ;;  %v4615_v1 = vld [vmem:[%s5714_s10 + $0x2c] sm:$0xf]  ;;  %v4298_v37 = vrot.slane %v4739_v36, %v4886_v17  ;;  %v4302_v33 = vrot.slane %v4739_v36, %v4889_v18 }
 0x760   : > { %v3658_v34 = vpop.permute.xlu0 %3657 }
 0x761   : > { %v3660_v63 = vpop.permute.xlu1 %3659  ;;  %4616 = vmatprep.subr.msk.mxu1 %vm880_vm2, %v3572_v42 }
 0x762   : > { %v3661_v3 = vsel %vm684_vm6, %v3658_v34, %v3660_v63  ;;  %v3662_v60 = vsel %vm684_vm6, %v3660_v63, %v3658_v34 }
 0x763   : > { %v3664_v4 = vmul.f32 %v3661_v3, %v5108_v5  ;;  %4614 = vmatmul.mubr.msk.f32.vlgmr.msra.gmra.mrb[2].mxu1 %vm876_vm4, %v4607_v46  ;;  %v3663_v9 = vmul.f32 %v3662_v60, %v5123_v54 }
 0x764   : > { %4617 = vmatpush1.msk.msra.mxu1 %vm880_vm2, %v3571_v2  ;;  %3648 = vmatprep.mubr.f32.mxu1 %v4761_v25  ;;  %v3834_v5 = vpop.permute.xlu0 %3833 }
 0x765   : > { %4620 = vmatprep.subr.msk.mxu1 %vm880_vm2, %v3664_v4  ;;  %v3836_v52 = vpop.permute.xlu1 %3835 }
 0x766   : > { %v3838_v6 = vsel %vm726_vm7, %v3836_v52, %v3834_v5  ;;  %v3837_v12 = vsel %vm726_vm7, %v3834_v5, %v3836_v52 }
 0x767   : > { %v3840_v10 = vmul.f32 %v3838_v6, %v5139_v22  ;;  %v4623_v22 = vld [vmem:[%s5714_s10 + $0x34] sm:$0xf]  ;;  %v3839_v14 = vmul.f32 %v3837_v12, %v5155_v29  ;;  %v4627_v29 = vld [vmem:[%s5714_s10 + $0x38] sm:$0xf] }
 0x768   : > { %v3926_v54 = vpop.permute.xlu0 %3925 }
 0x769   : > { %v3928_v11 = vpop.permute.xlu1 %3927 }
 0x76a   : > { %v3930_v13 = vsel %vm754_vm8, %v3928_v11, %v3926_v54  ;;  %v3929_v20 = vsel %vm754_vm8, %v3926_v54, %v3928_v11  ;;  %v4740_v11 = vld [vmem:[%s4870_s27] sm:$0x3] }
 0x76b   : > { %4618 = vmatmul.mubr.msk.f32.vlgmr.msra.gmra.mrb[2].mxu1 %vm876_vm4, %v4615_v1  ;;  %v3932_v16 = vmul.f32 %v3930_v13, %v5160_v31  ;;  %v3931_v31 = vmul.f32 %v3929_v20, %v5176_v44  ;;  %v4631_v44 = vld [vmem:[%s5714_s10 + $0x3c] sm:$0xf] }
 0x76c   : > { %4621 = vmatpush1.msk.msra.mxu1 %vm880_vm2, %v3663_v9  ;;  %3740 = vmatprep.mubr.f32.mxu1 %v4761_v25  ;;  %v4018_v15 = vpop.permute.xlu0 %4017 }
 0x76d   : > { %4624 = vmatprep.subr.msk.mxu1 %vm880_vm2, %v3382_v27  ;;  %v4020_v19 = vpop.permute.xlu1 %4019 }
 0x76e   : > { %v4022_v21 = vsel %vm782_vm9, %v4020_v19, %v4018_v15 }
 0x76f   : > { %v4024_v23 = vmul.f32 %v4022_v21, %v5181_v48 }
 0x770   : > { %v4110_v24 = vpop.permute.xlu0 %4109 }
 0x771   : > { %v4112_v26 = vpop.permute.xlu1 %4111 }
 0x772   : > { %v4114_v27 = vsel %vm810_vm10, %v4112_v26, %v4110_v24  ;;  %v4113_v30 = vsel %vm810_vm10, %v4110_v24, %v4112_v26 }
 0x773   : > { %4622 = vmatmul.mubr.msk.f32.vlgmr.msra.gmra.mrb[2].mxu1 %vm876_vm4, %v4619_v7  ;;  %v4116_v28 = vmul.f32 %v4114_v27, %v5200_v61  ;;  %v4115_v45 = vmul.f32 %v4113_v30, %v5217_v55  ;;  %v4214_v61 = vunpack.c.l.s4 %v4762_v35 }
 0x774   : > { %4625 = vmatpush1.msk.msra.mxu1 %vm880_vm2, %v5527_v53  ;;  %3824 = vmatprep.mubr.f32.mxu1 %v4761_v25  ;;  %v4021_v53 = vsel %vm782_vm9, %v4018_v15, %v4020_v19 }
 0x775   : > { %4628 = vmatprep.subr.msk.mxu1 %vm880_vm2, %v3840_v10  ;;  %v4023_v48 = vmul.f32 %v4021_v53, %v5196_v59  ;;  %v4639_v59 = vld [vmem:[%s5714_s10 + $0x44] sm:$0xf]  ;;  %v4215_v55 = vunpack.c.0.s8 %v4214_v61 }
 0x777   : > { %v4218_v56 = vsub.s32 %v4215_v55, %v4883_v8 }
 0x77b   : > { %4626 = vmatmul.mubr.msk.f32.vlgmr.msra.gmra.mrb[2].mxu1 %vm876_vm4, %v4623_v22  ;;  %v4741_v22 = vld [vmem:[%s4876_s30] sm:$0x3] }
 0x77c   : > { %4629 = vmatpush1.msk.msra.mxu1 %vm880_vm2, %v3839_v14  ;;  %3916 = vmatprep.mubr.f32.mxu1 %v4761_v25 }
 0x77d   : > { %4632 = vmatprep.subr.msk.mxu1 %vm880_vm2, %v3932_v16 }
 0x781   : > { %v4204_v38 = vpop.permute.xlu0 %4203 }
 0x783   : > { %4630 = vmatmul.mubr.msk.f32.vlgmr.msra.gmra.mrb[2].mxu1 %vm876_vm4, %v4627_v29 }
 0x784   : > { %4633 = vmatpush1.msk.msra.mxu1 %vm880_vm2, %v3931_v31  ;;  %4008 = vmatprep.mubr.f32.mxu1 %v4761_v25 }
 0x785   : > { %4636 = vmatprep.subr.msk.mxu1 %vm880_vm2, %v4024_v23 }
 0x78b   : > { %4634 = vmatmul.mubr.msk.f32.vlgmr.msra.gmra.mrb[2].mxu1 %vm876_vm4, %v4631_v44 }
 0x78c   : > { %4637 = vmatpush1.msk.msra.mxu1 %vm880_vm2, %v4023_v48  ;;  %4100 = vmatprep.mubr.f32.mxu1 %v4761_v25 }
 0x78d   : > { %4640 = vmatprep.subr.msk.mxu1 %vm880_vm2, %v4116_v28 }
 0x793   : > { %4638 = vmatmul.mubr.msk.f32.vlgmr.msra.gmra.mrb[2].mxu1 %vm876_vm4, %v4635_v32 }
 0x794   : > { %4641 = vmatpush1.msk.msra.mxu1 %vm880_vm2, %v4115_v45  ;;  %4192 = vmatprep.mubr.f32.mxu1 %v4761_v25  ;;  %v4738_v25 = vld [vmem:[%s4858_s21] sm:$0x3] }
 0x795   : > { %v4246_v50 = vrot.slane %v4738_v25, %v4886_v17  ;;  %v4250_v58 = vrot.slane %v4738_v25, %v4889_v18 }
 0x79b   : > { %4642 = vmatmul.mubr.msk.f32.vlgmr.msra.gmra.mrb[2].mxu1 %vm876_vm4, %v4639_v59 }
 0x86e   : > { %v4194_v39 = vpop.f32.mrb[2].mxu1 }
 0x86f   : > { %v4206_v40 = vadd.f32 %v4204_v38, %v4194_v39  ;;  %v4196_v41 = vpop.f32.mrb[3].mxu1 }
 0x870   : > { %v4207_v47 = vadd.f32 %v4204_v38, %v4196_v41 }
 0x871   : > { %v4208_v49 = vadd.f32 %v4206_v40, %v5375_v57 }
 0x872   : > { %v4209_v51 = vadd.f32 %v4207_v47, %v5378_v62 }
 0x873   : > { %v4234_v42 = vmul.f32 %v4233_v43, %v4208_v49 }
 0x874   : > { %v4212_v34 = vcombine.low %v4208_v49, %v4209_v51  ;;  %v4235_v46 = vmul.f32 %v4233_v43, %v4209_v51 }
 0x875   : > { %v4236_v63 = vadd.f32 1.0, %v4234_v42  ;;  %v4253_v57 = vmul.f32 %v4246_v50, %v4234_v42  ;;  %v4305_v2 = vmul.f32 %v4298_v37, %v4234_v42 }
 0x876   : > { %v4219_v3 = vrot.slane %v4212_v34, %v4218_v56  ;;  %v4237_v4 = vadd.f32 1.0, %v4235_v46  ;;  %v4254_v60 = vmul.f32 %v4250_v58, %v4235_v46  ;;  %v4306_v1 = vmul.f32 %v4302_v33, %v4235_v46 }
 0x877   : > { %4734 = vrcp.f32 %v4236_v63 }
 0x878   : > { %v4226_v17 = vrot.slane %v4219_v3, %v4218_v56  ;;  %4736 = vrcp.f32 %v4237_v4  ;;  %v4257_v18 = vcombine.low %v4253_v57, %v4254_v60  ;;  %v4309_v62 = vcombine.low %v4305_v2, %v4306_v1 }
 0x87a   : > { %4232 = vst.msk [vmem:[%s528_s15] sm:$0x3] %vm5681_vm11, %v4226_v17  ;;  %v4264_v9 = vrot.slane %v4257_v18, %v4218_v56  ;;  %v4316_v5 = vrot.slane %v4309_v62, %v4218_v56 }
 0x87c   : > { %v4271_v7 = vrot.slane %v4264_v9, %v4218_v56  ;;  %v4323_v0 = vrot.slane %v4316_v5, %v4218_v56 }
 0x87e   : > { %v4273_v12 = vadd.f32 %v4740_v11, %v4271_v7  ;;  %v4325_v14 = vadd.f32 %v4741_v22, %v4323_v0 }
 0x881   : > { %v4735_v52 = vpop.eup %4734 }
 0x882   : > { %v4737_v6 = vpop.eup %4736 }
 0x883   : > { %v4276_v10 = vcombine.low %v4735_v52, %v4737_v6 }
 0x885   : > { %v4283_v54 = vrot.slane %v4276_v10, %v4218_v56 }
 0x887   : > { %v4290_v13 = vrot.slane %v4283_v54, %v4218_v56 }
 0x889   : > { %v4292_v16 = vmul.f32 %v4290_v13, %v4273_v12  ;;  %v4326_v15 = vmul.f32 %v4325_v14, %v4290_v13 }
 0x88b   : > { %4293 = vst.msk [vmem:[%s532_s22] sm:$0x3] %vm5681_vm11, %v4292_v16  ;;  %4327 = vst.msk [vmem:[%s536_s25] sm:$0x3] %vm5681_vm11, %v4326_v15 }
 0x88c PF: > { %s27_s17 = sadd.s32 1, %s4748_s17  }
 0x88d   : > { %p24_p4 = scmp.ge.s32.totalorder %s27_s17, 4  }
 0x88f   :  { %26 = sbr.rel (!%p24_p4) target bundleno = 3 (0x3), region = 175 }

</bundles_post_ra>
